<compile_context>
chip_gen: v6e
topology: v6e:2x2x1
jax: 0.10.0
libtpu: 0.0.40
codegen_flags: <defaults>
</compile_context>

<pallas_src>
import functools
import math

import jax
import jax.numpy as jnp
from jax.experimental import pallas as pl
from jax.experimental.pallas import tpu as pltpu


# ------------------------------ tiling helpers ------------------------------

def _round_up(n, m):
    return ((n + m - 1) // m) * m


def _tile(dim, target, align):
    """Largest block <= target that is a multiple of `align` and divides `dim`,
    else the full dim (full-dim blocks are always legal)."""
    if dim <= target or dim % align != 0:
        return dim
    t = (target // align) * align
    while t >= align:
        if dim % t == 0:
            return t
        t -= align
    return dim


def _tile_m(M, target=256, align=16):
    """M (row) tile; align=16 for bf16 sublane packing.  Prefer >= 2 programs
    along the parallel M axis so v7x's two TensorCores both get work."""
    t = _tile(M, target, align)
    if M // t < 2 and M >= 2 * align and M % (2 * align) == 0:
        t2 = _tile(M, M // 2, align)
        if t2 < M:
            t = t2
    return t


_VMEM_LIMIT = 32 * 1024 * 1024


# ------------------------- tiled linear (matmul) kernels ---------------------

def _linear_kernel_acc(x_ref, w_ref, b_ref, o_ref, acc_ref, *, relu):
    @pl.when(pl.program_id(2) == 0)
    def _():
        acc_ref[...] = jnp.zeros_like(acc_ref)

    acc_ref[...] += jnp.dot(x_ref[...], w_ref[...],
                            preferred_element_type=jnp.float32)

    @pl.when(pl.program_id(2) == pl.num_programs(2) - 1)
    def _():
        y = acc_ref[...] + b_ref[...]
        if relu:
            y = jnp.maximum(y, 0.0)
        o_ref[...] = y.astype(o_ref.dtype)


def _linear_kernel_nok(x_ref, w_ref, b_ref, o_ref, *, relu):
    # Single-K-tile specialization: no scratch, no zero fill, one store.
    y = jnp.dot(x_ref[...], w_ref[...],
                preferred_element_type=jnp.float32) + b_ref[...]
    if relu:
        y = jnp.maximum(y, 0.0)
    o_ref[...] = y.astype(o_ref.dtype)


def pallas_linear(x, lin, relu=False, out_dtype=jnp.bfloat16):
    """x: (M, K) bf16.  lin = dict(w=(K, Np) bf16 (possibly lane-padded),
    b=(Np,) f32).  Returns (M, Np) in out_dtype (caller slices padding if it
    cares)."""
    w, b = lin["w"], lin["b"]
    M, K = x.shape
    Kw, Np = w.shape
    assert K == Kw, (K, Kw)

    tm = _tile_m(M)
    tn = _tile(Np, 512, 128)
    tk = _tile(K, 512, 128)
    mt, nt, kt = M // tm, Np // tn, K // tk

    xb = x.dtype.itemsize
    wb = w.dtype.itemsize
    ob = jnp.dtype(out_dtype).itemsize
    cost = pl.CostEstimate(
        flops=2 * M * Np * K,
        transcendentals=0,
        bytes_accessed=xb * M * K * nt + wb * K * Np * mt + ob * M * Np)

    if kt == 1:
        return pl.pallas_call(
            functools.partial(_linear_kernel_nok, relu=relu),
            out_shape=jax.ShapeDtypeStruct((M, Np), out_dtype),
            grid=(mt, nt),
            in_specs=[
                pl.BlockSpec((tm, K), lambda i, j: (i, 0)),
                pl.BlockSpec((K, tn), lambda i, j: (0, j)),
                pl.BlockSpec((1, tn), lambda i, j: (0, j)),
            ],
            out_specs=pl.BlockSpec((tm, tn), lambda i, j: (i, j)),
            compiler_params=pltpu.CompilerParams(
                dimension_semantics=("parallel", "parallel"),
                vmem_limit_bytes=_VMEM_LIMIT),
            cost_estimate=cost,
        )(x, w, b.reshape(1, Np))

    return pl.pallas_call(
        functools.partial(_linear_kernel_acc, relu=relu),
        out_shape=jax.ShapeDtypeStruct((M, Np), out_dtype),
        grid=(mt, nt, kt),
        in_specs=[
            pl.BlockSpec((tm, tk), lambda i, j, k: (i, k)),
            pl.BlockSpec((tk, tn), lambda i, j, k: (k, j)),
            pl.BlockSpec((1, tn), lambda i, j, k: (0, j)),
        ],
        out_specs=pl.BlockSpec((tm, tn), lambda i, j, k: (i, j)),
        scratch_shapes=[pltpu.VMEM((tm, tn), jnp.float32)],
        compiler_params=pltpu.CompilerParams(
            dimension_semantics=("parallel", "parallel", "arbitrary"),
            vmem_limit_bytes=_VMEM_LIMIT),
        cost_estimate=cost,
    )(x, w, b.reshape(1, Np))


# --------------- linear + residual-add + LayerNorm fused kernels -------------

def _linear_addln_kernel_nok(x_ref, w_ref, b_ref, r_ref, g_ref, be_ref, o_ref,
                             *, eps):
    h = jnp.dot(x_ref[...], w_ref[...], preferred_element_type=jnp.float32)
    h = h + b_ref[...] + r_ref[...].astype(jnp.float32)
    mu = jnp.mean(h, axis=-1, keepdims=True)
    var = jnp.mean((h - mu) ** 2, axis=-1, keepdims=True)
    inv = jax.lax.rsqrt(var + eps)
    o_ref[...] = ((h - mu) * inv * g_ref[...] + be_ref[...]).astype(o_ref.dtype)


def _linear_addln_kernel_acc(x_ref, w_ref, b_ref, r_ref, g_ref, be_ref, o_ref,
                             acc_ref, *, eps):
    @pl.when(pl.program_id(1) == 0)
    def _():
        acc_ref[...] = jnp.zeros_like(acc_ref)

    acc_ref[...] += jnp.dot(x_ref[...], w_ref[...],
                            preferred_element_type=jnp.float32)

    @pl.when(pl.program_id(1) == pl.num_programs(1) - 1)
    def _():
        h = acc_ref[...] + b_ref[...] + r_ref[...].astype(jnp.float32)
        mu = jnp.mean(h, axis=-1, keepdims=True)
        var = jnp.mean((h - mu) ** 2, axis=-1, keepdims=True)
        inv = jax.lax.rsqrt(var + eps)
        o_ref[...] = ((h - mu) * inv * g_ref[...] +
                      be_ref[...]).astype(o_ref.dtype)


def pallas_linear_add_ln(x, lin, residual, gamma, beta, eps=1e-5,
                         out_dtype=jnp.bfloat16):
    """LayerNorm(x @ w + b + residual) fused into the matmul finalize.
    x: (M, K) bf16, lin['w']: (K, D) bf16 (UNPADDED), residual: (M, D) bf16,
    gamma/beta: (D,) f32.  Returns (M, D) in out_dtype."""
    w, b = lin["w"], lin["b"]
    M, K = x.shape
    Kw, D = w.shape
    assert K == Kw and residual.shape == (M, D)

    tm = _tile_m(M)
    tk = _tile(K, 512, 128)
    mt, kt = M // tm, K // tk

    xb = x.dtype.itemsize
    wb = w.dtype.itemsize
    ob = jnp.dtype(out_dtype).itemsize
    cost = pl.CostEstimate(
        flops=2 * M * D * K + 8 * M * D,
        transcendentals=M,  # rsqrt per row
        bytes_accessed=xb * M * K + wb * K * D * mt + xb * M * D + ob * M * D)

    if kt == 1:
        return pl.pallas_call(
            functools.partial(_linear_addln_kernel_nok, eps=eps),
            out_shape=jax.ShapeDtypeStruct((M, D), out_dtype),
            grid=(mt,),
            in_specs=[
                pl.BlockSpec((tm, K), lambda i: (i, 0)),
                pl.BlockSpec((K, D), lambda i: (0, 0)),
                pl.BlockSpec((1, D), lambda i: (0, 0)),
                pl.BlockSpec((tm, D), lambda i: (i, 0)),
                pl.BlockSpec((1, D), lambda i: (0, 0)),
                pl.BlockSpec((1, D), lambda i: (0, 0)),
            ],
            out_specs=pl.BlockSpec((tm, D), lambda i: (i, 0)),
            compiler_params=pltpu.CompilerParams(
                dimension_semantics=("parallel",),
                vmem_limit_bytes=_VMEM_LIMIT),
            cost_estimate=cost,
        )(x, w, b.reshape(1, D), residual, gamma.reshape(1, D),
          beta.reshape(1, D))

    return pl.pallas_call(
        functools.partial(_linear_addln_kernel_acc, eps=eps),
        out_shape=jax.ShapeDtypeStruct((M, D), out_dtype),
        grid=(mt, kt),
        in_specs=[
            pl.BlockSpec((tm, tk), lambda i, k: (i, k)),
            pl.BlockSpec((tk, D), lambda i, k: (k, 0)),
            pl.BlockSpec((1, D), lambda i, k: (0, 0)),
            pl.BlockSpec((tm, D), lambda i, k: (i, 0)),
            pl.BlockSpec((1, D), lambda i, k: (0, 0)),
            pl.BlockSpec((1, D), lambda i, k: (0, 0)),
        ],
        out_specs=pl.BlockSpec((tm, D), lambda i, k: (i, 0)),
        scratch_shapes=[pltpu.VMEM((tm, D), jnp.float32)],
        compiler_params=pltpu.CompilerParams(
            dimension_semantics=("parallel", "arbitrary"),
            vmem_limit_bytes=_VMEM_LIMIT),
        cost_estimate=cost,
    )(x, w, b.reshape(1, D), residual, gamma.reshape(1, D), beta.reshape(1, D))


# --------------------------- multi-head attention ----------------------------

def _attention_all_heads(q, k, v, heads, causal):
    """q: (Sq, D) f32, k/v: (Sk, D) f32 -> (Sq, D) f32.  All heads of one
    batch element; per-head split via static slices; single concatenated
    result so the caller can do ONE lane-contiguous store."""
    Sq, D = q.shape
    Sk = k.shape[0]
    dh = D // heads
    scale = 1.0 / math.sqrt(dh)
    use_mxu = dh >= 64  # tiny head dims would leave the MXU ~empty -> VPU

    if causal:
        row = jax.lax.broadcasted_iota(jnp.int32, (Sq, Sk), 0)
        col = jax.lax.broadcasted_iota(jnp.int32, (Sq, Sk), 1)
        allow = row >= col

    outs = []
    for h in range(heads):
        sl = slice(h * dh, (h + 1) * dh)
        qh, kh, vh = q[:, sl], k[:, sl], v[:, sl]
        if use_mxu:
            s = jax.lax.dot_general(qh, kh, (((1,), (1,)), ((), ())),
                                    preferred_element_type=jnp.float32)
        else:
            s = jnp.sum(qh[:, None, :] * kh[None, :, :], axis=-1)
        s = s * scale
        if causal:
            s = jnp.where(allow, s, jnp.float32(-1e9))
        s = s - jnp.max(s, axis=-1, keepdims=True)
        p = jnp.exp(s)
        p = p * pl.reciprocal(jnp.sum(p, axis=-1, keepdims=True), approx=True)
        if use_mxu:
            oh = jnp.dot(p, vh, preferred_element_type=jnp.float32)
        else:
            oh = jnp.sum(p[:, :, None] * vh[None, :, :], axis=1)
        outs.append(oh)
    return jnp.concatenate(outs, axis=-1)


def _self_attn_kernel(qkv_ref, o_ref, *, d_model, heads, causal):
    # qkv_ref block: (1, S, Np) with q|k|v packed in the first 3*d_model lanes.
    q = qkv_ref[0, :, 0:d_model].astype(jnp.float32)
    k = qkv_ref[0, :, d_model:2 * d_model].astype(jnp.float32)
    v = qkv_ref[0, :, 2 * d_model:3 * d_model].astype(jnp.float32)
    o_ref[0] = _attention_all_heads(q, k, v, heads, causal).astype(o_ref.dtype)


def _cross_attn_kernel(q_ref, kv_ref, o_ref, *, d_model, heads):
    q = q_ref[0, :, 0:d_model].astype(jnp.float32)
    k = kv_ref[0, :, 0:d_model].astype(jnp.float32)
    v = kv_ref[0, :, d_model:2 * d_model].astype(jnp.float32)
    o_ref[0] = _attention_all_heads(q, k, v, heads, False).astype(o_ref.dtype)


# TODO(synk): for long sequences / large D this attention should move to a
# flash-style kv grid axis with online softmax (VMEM-bounded working set,
# needed earliest on v7x's 64 MiB VMEM).  At these shapes full-sequence tiles
# are tiny.
def pallas_self_attention(qkv, d_model, heads, causal):
    """qkv: (B, S, Np) bf16 (padded fused projection) -> (B, S, d_model) bf16."""
    B, S, Np = qkv.shape
    kernel = functools.partial(_self_attn_kernel, d_model=d_model,
                               heads=heads, causal=causal)
    return pl.pallas_call(
        kernel,
        out_shape=jax.ShapeDtypeStruct((B, S, d_model), jnp.bfloat16),
        grid=(B,),
        in_specs=[pl.BlockSpec((1, S, Np), lambda b: (b, 0, 0))],
        out_specs=pl.BlockSpec((1, S, d_model), lambda b: (b, 0, 0)),
        compiler_params=pltpu.CompilerParams(
            dimension_semantics=("parallel",)),
    )(qkv)


def pallas_cross_attention(q_pad, kv_pad, d_model, heads):
    """q_pad: (B, Sq, Nq) bf16, kv_pad: (B, Sk, Nkv) bf16 -> (B, Sq, d_model)."""
    B, Sq, Nq = q_pad.shape
    _, Sk, Nkv = kv_pad.shape
    kernel = functools.partial(_cross_attn_kernel, d_model=d_model, heads=heads)
    return pl.pallas_call(
        kernel,
        out_shape=jax.ShapeDtypeStruct((B, Sq, d_model), jnp.bfloat16),
        grid=(B,),
        in_specs=[
            pl.BlockSpec((1, Sq, Nq), lambda b: (b, 0, 0)),
            pl.BlockSpec((1, Sk, Nkv), lambda b: (b, 0, 0)),
        ],
        out_specs=pl.BlockSpec((1, Sq, d_model), lambda b: (b, 0, 0)),
        compiler_params=pltpu.CompilerParams(
            dimension_semantics=("parallel",)),
    )(q_pad, kv_pad)


# --------------------------- model glue (plain JAX) -------------------------

def encoder_block(blk, x, heads):
    B, S, D = x.shape
    x2d = x.reshape(B * S, D)
    # fused QKV projection, padded output fed straight to attention
    qkv = pallas_linear(x2d, blk["attn"]["qkv"]).reshape(B, S, -1)
    a = pallas_self_attention(qkv, D, heads, causal=False)
    # out-proj + residual + LayerNorm fused
    h = pallas_linear_add_ln(a.reshape(B * S, D), blk["attn"]["out"], x2d,
                             blk["ln1"]["g"], blk["ln1"]["b"])
    # FFN: w1+ReLU, then w2 + residual + LayerNorm fused
    f = pallas_linear(h, blk["ffn"]["w1"], relu=True)
    y = pallas_linear_add_ln(f, blk["ffn"]["w2"], h,
                             blk["ln2"]["g"], blk["ln2"]["b"])
    return y.reshape(B, S, D)


def decoder_block(blk, y, enc_out, heads):
    B, St, D = y.shape
    _, Ss, _ = enc_out.shape
    y2d = y.reshape(B * St, D)
    # masked self-attention
    qkv = pallas_linear(y2d, blk["self_attn"]["qkv"]).reshape(B, St, -1)
    sa = pallas_self_attention(qkv, D, heads, causal=True)
    q = pallas_linear_add_ln(sa.reshape(B * St, D), blk["self_attn"]["out"],
                             y2d, blk["ln_self"]["g"], blk["ln_self"]["b"])
    # cross-attention with encoder output
    qp = pallas_linear(q, blk["cross_attn"]["q"]).reshape(B, St, -1)
    kv = pallas_linear(enc_out.reshape(B * Ss, D),
                       blk["cross_attn"]["kv"]).reshape(B, Ss, -1)
    ca = pallas_cross_attention(qp, kv, D, heads)
    z = pallas_linear_add_ln(ca.reshape(B * St, D), blk["cross_attn"]["out"],
                             q, blk["ln1"]["g"], blk["ln1"]["b"])
    # FFN
    f = pallas_linear(z, blk["ffn"]["w1"], relu=True)
    out = pallas_linear_add_ln(f, blk["ffn"]["w2"], z,
                               blk["ln2"]["g"], blk["ln2"]["b"])
    return out.reshape(B, St, D)


def sinusoidal_pos_encoding(seq_len, d_model):
    pos = jnp.arange(seq_len, dtype=jnp.float32)[:, None]
    i = jnp.arange(d_model, dtype=jnp.float32)[None, :]
    angle = pos / jnp.power(10000.0, (2.0 * jnp.floor(i / 2.0)) / d_model)
    return jnp.where(jnp.arange(d_model)[None, :] % 2 == 0,
                     jnp.sin(angle), jnp.cos(angle)).astype(jnp.float32)


def crossformers_forward(params, sumber, target, *, heads, tgt_vocab):
    B, Ss = sumber.shape
    _, St = target.shape
    D = params["src_emb"].shape[1]

    # ---- encoder ----
    x = (params["src_emb"][sumber] +
         params["pos_enc"][:Ss][None, :, :]).astype(jnp.bfloat16)
    for blk in params["encoder_blocks"]:
        x = encoder_block(blk, x, heads)
    enc_out = x

    # ---- decoder (buat_mask_target == causal look-ahead mask, in-kernel) ----
    y = (params["tgt_emb"][target] +
         params["pos_enc"][:St][None, :, :]).astype(jnp.bfloat16)
    for blk in params["decoder_blocks"]:
        y = decoder_block(blk, y, enc_out, heads)

    # ---- fc_output (lane-padded vocab, sliced back to true vocab) ----
    logits = pallas_linear(y.reshape(B * St, D), params["fc"],
                           out_dtype=jnp.float32)
    logits = logits[:, :tgt_vocab]
    return logits.reshape(B, St, tgt_vocab)


# ---------------------------- parameter init --------------------------------

def _dense_init(key, din, dout, pad=True):
    """PyTorch nn.Linear-style init.  Weights stored bf16 (MXU-native on
    v5e/v6e/v7x), bias f32 (added to the f32 accumulator).  Output columns
    padded to a multiple of 128 unless pad=False (LN-fused layers need the
    true width for the row reduction)."""
    kw, kb = jax.random.split(key)
    bound = 1.0 / math.sqrt(din)
    w = jax.random.uniform(kw, (din, dout), jnp.float32, -bound, bound)
    b = jax.random.uniform(kb, (dout,), jnp.float32, -bound, bound)
    if pad:
        dp = _round_up(dout, 128)
        if dp != dout:
            w = jnp.pad(w, ((0, 0), (0, dp - dout)))
            b = jnp.pad(b, (0, dp - dout))
    return dict(w=w.astype(jnp.bfloat16), b=b.astype(jnp.float32))


def _self_attn_init(key, d):
    k1, k2 = jax.random.split(key)
    return dict(qkv=_dense_init(k1, d, 3 * d),            # padded, fed to attn
                out=_dense_init(k2, d, d, pad=False))      # LN-fused


def _cross_attn_init(key, d):
    k1, k2, k3 = jax.random.split(key, 3)
    return dict(q=_dense_init(k1, d, d),                   # padded, fed to attn
                kv=_dense_init(k2, d, 2 * d),              # padded, fed to attn
                out=_dense_init(k3, d, d, pad=False))      # LN-fused


def _ffn_init(key, d, exp):
    k1, k2 = jax.random.split(key)
    return dict(w1=_dense_init(k1, d, d * exp),
                w2=_dense_init(k2, d * exp, d, pad=False))  # LN-fused


def _ln_init(d):
    return dict(g=jnp.ones((d,), jnp.float32), b=jnp.zeros((d,), jnp.float32))


def init_crossformers(key, d_model, src_vocab, tgt_vocab, seq_len,
                      num_blocks, expansion, heads):
    keys = iter(jax.random.split(key, 8 + 8 * num_blocks))
    params = {
        "src_emb": 0.02 * jax.random.normal(next(keys), (src_vocab, d_model),
                                            jnp.float32),
        "tgt_emb": 0.02 * jax.random.normal(next(keys), (tgt_vocab, d_model),
                                            jnp.float32),
        "pos_enc": sinusoidal_pos_encoding(seq_len, d_model),
        "encoder_blocks": [],
        "decoder_blocks": [],
    }
    for _ in range(num_blocks):
        params["encoder_blocks"].append(dict(
            attn=_self_attn_init(next(keys), d_model),
            ln1=_ln_init(d_model),
            ffn=_ffn_init(next(keys), d_model, expansion),
            ln2=_ln_init(d_model),
        ))
    for _ in range(num_blocks):
        params["decoder_blocks"].append(dict(
            self_attn=_self_attn_init(next(keys), d_model),
            ln_self=_ln_init(d_model),
            cross_attn=_cross_attn_init(next(keys), d_model),
            ln1=_ln_init(d_model),
            ffn=_ffn_init(next(keys), d_model, expansion),
            ln2=_ln_init(d_model),
        ))
    params["fc"] = _dense_init(next(keys), d_model, tgt_vocab)
    return params


# ---------------------------------- main -------------------------------------

if __name__ == "__main__":
    # Small, module-consistent shapes.
    batch = 2
    seq_len = 8
    d_model = 32
    heads = 8
    num_blocks = 2
    expansion = 4
    src_vocab = 50
    tgt_vocab = 60

    root = jax.random.PRNGKey(0)
    k_params, k_src, k_tgt = jax.random.split(root, 3)

    params = init_crossformers(k_params, d_model, src_vocab, tgt_vocab,
                               seq_len, num_blocks, expansion, heads)

    sumber = jax.random.randint(k_src, (batch, seq_len), 0, src_vocab,
                                dtype=jnp.int32)
    target = jax.random.randint(k_tgt, (batch, seq_len), 0, tgt_vocab,
                                dtype=jnp.int32)

    fwd = jax.jit(functools.partial(crossformers_forward, heads=heads,
                                    tgt_vocab=tgt_vocab))
    logits = fwd(params, sumber, target)
    logits = jax.block_until_ready(logits)

    assert logits.shape == (batch, seq_len, tgt_vocab), logits.shape
    assert bool(jnp.all(jnp.isfinite(logits)))
    print("KERNEL_OK")
</pallas_src>

<mosaic_0001>
module attributes {stable_mosaic.version = 11 : i64} {
  func.func @_self_attn_kernel(%arg0: i32, %arg1: memref<1x8x128xbf16, #tpu.memory_space<vmem>>, %arg2: memref<1x8x32xbf16, #tpu.memory_space<vmem>>) attributes {dimension_semantics = [#tpu.dimension_semantics<parallel>], iteration_bounds = array<i64: 2>, scalar_prefetch = 0 : i64, scratch_operands = 0 : i64, tpu.core_type = #tpu.core_type<tc>, window_params = [{transform_indices = @transform_0, window_bounds = array<i64: 1, 8, 128>}, {transform_indices = @transform_1, window_bounds = array<i64: 1, 8, 32>}]} {
    %c0 = arith.constant 0 : index
    %c0_0 = arith.constant 0 : index
    %c0_1 = arith.constant 0 : index
    %0 = vector.load %arg1[%c0, %c0_0, %c0_1] : memref<1x8x128xbf16, #tpu.memory_space<vmem>>, vector<1x8x32xbf16>
    %1 = vector.shape_cast %0 : vector<1x8x32xbf16> to vector<8x32xbf16>
    %2 = arith.extf %1 : vector<8x32xbf16> to vector<8x32xf32>
    %c0_2 = arith.constant 0 : index
    %c0_3 = arith.constant 0 : index
    %c32 = arith.constant 32 : index
    %3 = vector.load %arg1[%c0_2, %c0_3, %c32] : memref<1x8x128xbf16, #tpu.memory_space<vmem>>, vector<1x8x32xbf16>
    %4 = vector.shape_cast %3 : vector<1x8x32xbf16> to vector<8x32xbf16>
    %5 = arith.extf %4 : vector<8x32xbf16> to vector<8x32xf32>
    %c0_4 = arith.constant 0 : index
    %c0_5 = arith.constant 0 : index
    %c64 = arith.constant 64 : index
    %6 = vector.load %arg1[%c0_4, %c0_5, %c64] : memref<1x8x128xbf16, #tpu.memory_space<vmem>>, vector<1x8x32xbf16>
    %7 = vector.shape_cast %6 : vector<1x8x32xbf16> to vector<8x32xbf16>
    %8 = arith.extf %7 : vector<8x32xbf16> to vector<8x32xf32>
    %9 = vector.extract_strided_slice %2 {offsets = [0, 0], sizes = [8, 4], strides = [1, 1]} : vector<8x32xf32> to vector<8x4xf32>
    %10 = vector.extract_strided_slice %5 {offsets = [0, 0], sizes = [8, 4], strides = [1, 1]} : vector<8x32xf32> to vector<8x4xf32>
    %11 = vector.extract_strided_slice %8 {offsets = [0, 0], sizes = [8, 4], strides = [1, 1]} : vector<8x32xf32> to vector<8x4xf32>
    %12 = vector.shape_cast %9 : vector<8x4xf32> to vector<8x1x4xf32>
    %13 = vector.shape_cast %10 : vector<8x4xf32> to vector<1x8x4xf32>
    %14 = vector.broadcast %12 : vector<8x1x4xf32> to vector<8x8x4xf32>
    %15 = vector.broadcast %13 : vector<1x8x4xf32> to vector<8x8x4xf32>
    %16 = arith.mulf %14, %15 : vector<8x8x4xf32>
    %cst = arith.constant dense<0.000000e+00> : vector<8x8xf32>
    %17 = vector.multi_reduction <add>, %16, %cst [2] : vector<8x8x4xf32> to vector<8x8xf32>
    %cst_6 = arith.constant 5.000000e-01 : f32
    %18 = vector.broadcast %cst_6 : f32 to vector<8x8xf32>
    %19 = arith.mulf %17, %18 : vector<8x8xf32>
    %cst_7 = arith.constant dense<0xFF800000> : vector<8xf32>
    %20 = vector.multi_reduction <maximumf>, %19, %cst_7 [1] : vector<8x8xf32> to vector<8xf32>
    %21 = vector.shape_cast %20 : vector<8xf32> to vector<8x1xf32>
    %22 = vector.broadcast %21 : vector<8x1xf32> to vector<8x8xf32>
    %23 = arith.subf %19, %22 : vector<8x8xf32>
    %24 = math.exp %23 : vector<8x8xf32>
    %cst_8 = arith.constant dense<0.000000e+00> : vector<8xf32>
    %25 = vector.multi_reduction <add>, %24, %cst_8 [1] : vector<8x8xf32> to vector<8xf32>
    %26 = vector.shape_cast %25 : vector<8xf32> to vector<8x1xf32>
    %27 = tpu.reciprocal %26 {approx = true} : vector<8x1xf32> -> vector<8x1xf32>
    %28 = vector.broadcast %27 : vector<8x1xf32> to vector<8x8xf32>
    %29 = arith.mulf %24, %28 : vector<8x8xf32>
    %30 = vector.shape_cast %29 : vector<8x8xf32> to vector<8x8x1xf32>
    %31 = vector.shape_cast %11 : vector<8x4xf32> to vector<1x8x4xf32>
    %32 = vector.broadcast %30 : vector<8x8x1xf32> to vector<8x8x4xf32>
    %33 = vector.broadcast %31 : vector<1x8x4xf32> to vector<8x8x4xf32>
    %34 = arith.mulf %32, %33 : vector<8x8x4xf32>
    %cst_9 = arith.constant dense<0.000000e+00> : vector<8x4xf32>
    %35 = vector.multi_reduction <add>, %34, %cst_9 [1] : vector<8x8x4xf32> to vector<8x4xf32>
    %36 = vector.extract_strided_slice %2 {offsets = [0, 4], sizes = [8, 4], strides = [1, 1]} : vector<8x32xf32> to vector<8x4xf32>
    %37 = vector.extract_strided_slice %5 {offsets = [0, 4], sizes = [8, 4], strides = [1, 1]} : vector<8x32xf32> to vector<8x4xf32>
    %38 = vector.extract_strided_slice %8 {offsets = [0, 4], sizes = [8, 4], strides = [1, 1]} : vector<8x32xf32> to vector<8x4xf32>
    %39 = vector.shape_cast %36 : vector<8x4xf32> to vector<8x1x4xf32>
    %40 = vector.shape_cast %37 : vector<8x4xf32> to vector<1x8x4xf32>
    %41 = vector.broadcast %39 : vector<8x1x4xf32> to vector<8x8x4xf32>
    %42 = vector.broadcast %40 : vector<1x8x4xf32> to vector<8x8x4xf32>
    %43 = arith.mulf %41, %42 : vector<8x8x4xf32>
    %cst_10 = arith.constant dense<0.000000e+00> : vector<8x8xf32>
    %44 = vector.multi_reduction <add>, %43, %cst_10 [2] : vector<8x8x4xf32> to vector<8x8xf32>
    %cst_11 = arith.constant 5.000000e-01 : f32
    %45 = vector.broadcast %cst_11 : f32 to vector<8x8xf32>
    %46 = arith.mulf %44, %45 : vector<8x8xf32>
    %cst_12 = arith.constant dense<0xFF800000> : vector<8xf32>
    %47 = vector.multi_reduction <maximumf>, %46, %cst_12 [1] : vector<8x8xf32> to vector<8xf32>
    %48 = vector.shape_cast %47 : vector<8xf32> to vector<8x1xf32>
    %49 = vector.broadcast %48 : vector<8x1xf32> to vector<8x8xf32>
    %50 = arith.subf %46, %49 : vector<8x8xf32>
    %51 = math.exp %50 : vector<8x8xf32>
    %cst_13 = arith.constant dense<0.000000e+00> : vector<8xf32>
    %52 = vector.multi_reduction <add>, %51, %cst_13 [1] : vector<8x8xf32> to vector<8xf32>
    %53 = vector.shape_cast %52 : vector<8xf32> to vector<8x1xf32>
    %54 = tpu.reciprocal %53 {approx = true} : vector<8x1xf32> -> vector<8x1xf32>
    %55 = vector.broadcast %54 : vector<8x1xf32> to vector<8x8xf32>
    %56 = arith.mulf %51, %55 : vector<8x8xf32>
    %57 = vector.shape_cast %56 : vector<8x8xf32> to vector<8x8x1xf32>
    %58 = vector.shape_cast %38 : vector<8x4xf32> to vector<1x8x4xf32>
    %59 = vector.broadcast %57 : vector<8x8x1xf32> to vector<8x8x4xf32>
    %60 = vector.broadcast %58 : vector<1x8x4xf32> to vector<8x8x4xf32>
    %61 = arith.mulf %59, %60 : vector<8x8x4xf32>
    %cst_14 = arith.constant dense<0.000000e+00> : vector<8x4xf32>
    %62 = vector.multi_reduction <add>, %61, %cst_14 [1] : vector<8x8x4xf32> to vector<8x4xf32>
    %63 = vector.extract_strided_slice %2 {offsets = [0, 8], sizes = [8, 4], strides = [1, 1]} : vector<8x32xf32> to vector<8x4xf32>
    %64 = vector.extract_strided_slice %5 {offsets = [0, 8], sizes = [8, 4], strides = [1, 1]} : vector<8x32xf32> to vector<8x4xf32>
    %65 = vector.extract_strided_slice %8 {offsets = [0, 8], sizes = [8, 4], strides = [1, 1]} : vector<8x32xf32> to vector<8x4xf32>
    %66 = vector.shape_cast %63 : vector<8x4xf32> to vector<8x1x4xf32>
    %67 = vector.shape_cast %64 : vector<8x4xf32> to vector<1x8x4xf32>
    %68 = vector.broadcast %66 : vector<8x1x4xf32> to vector<8x8x4xf32>
    %69 = vector.broadcast %67 : vector<1x8x4xf32> to vector<8x8x4xf32>
    %70 = arith.mulf %68, %69 : vector<8x8x4xf32>
    %cst_15 = arith.constant dense<0.000000e+00> : vector<8x8xf32>
    %71 = vector.multi_reduction <add>, %70, %cst_15 [2] : vector<8x8x4xf32> to vector<8x8xf32>
    %cst_16 = arith.constant 5.000000e-01 : f32
    %72 = vector.broadcast %cst_16 : f32 to vector<8x8xf32>
    %73 = arith.mulf %71, %72 : vector<8x8xf32>
    %cst_17 = arith.constant dense<0xFF800000> : vector<8xf32>
    %74 = vector.multi_reduction <maximumf>, %73, %cst_17 [1] : vector<8x8xf32> to vector<8xf32>
    %75 = vector.shape_cast %74 : vector<8xf32> to vector<8x1xf32>
    %76 = vector.broadcast %75 : vector<8x1xf32> to vector<8x8xf32>
    %77 = arith.subf %73, %76 : vector<8x8xf32>
    %78 = math.exp %77 : vector<8x8xf32>
    %cst_18 = arith.constant dense<0.000000e+00> : vector<8xf32>
    %79 = vector.multi_reduction <add>, %78, %cst_18 [1] : vector<8x8xf32> to vector<8xf32>
    %80 = vector.shape_cast %79 : vector<8xf32> to vector<8x1xf32>
    %81 = tpu.reciprocal %80 {approx = true} : vector<8x1xf32> -> vector<8x1xf32>
    %82 = vector.broadcast %81 : vector<8x1xf32> to vector<8x8xf32>
    %83 = arith.mulf %78, %82 : vector<8x8xf32>
    %84 = vector.shape_cast %83 : vector<8x8xf32> to vector<8x8x1xf32>
    %85 = vector.shape_cast %65 : vector<8x4xf32> to vector<1x8x4xf32>
    %86 = vector.broadcast %84 : vector<8x8x1xf32> to vector<8x8x4xf32>
    %87 = vector.broadcast %85 : vector<1x8x4xf32> to vector<8x8x4xf32>
    %88 = arith.mulf %86, %87 : vector<8x8x4xf32>
    %cst_19 = arith.constant dense<0.000000e+00> : vector<8x4xf32>
    %89 = vector.multi_reduction <add>, %88, %cst_19 [1] : vector<8x8x4xf32> to vector<8x4xf32>
    %90 = vector.extract_strided_slice %2 {offsets = [0, 12], sizes = [8, 4], strides = [1, 1]} : vector<8x32xf32> to vector<8x4xf32>
    %91 = vector.extract_strided_slice %5 {offsets = [0, 12], sizes = [8, 4], strides = [1, 1]} : vector<8x32xf32> to vector<8x4xf32>
    %92 = vector.extract_strided_slice %8 {offsets = [0, 12], sizes = [8, 4], strides = [1, 1]} : vector<8x32xf32> to vector<8x4xf32>
    %93 = vector.shape_cast %90 : vector<8x4xf32> to vector<8x1x4xf32>
    %94 = vector.shape_cast %91 : vector<8x4xf32> to vector<1x8x4xf32>
    %95 = vector.broadcast %93 : vector<8x1x4xf32> to vector<8x8x4xf32>
    %96 = vector.broadcast %94 : vector<1x8x4xf32> to vector<8x8x4xf32>
    %97 = arith.mulf %95, %96 : vector<8x8x4xf32>
    %cst_20 = arith.constant dense<0.000000e+00> : vector<8x8xf32>
    %98 = vector.multi_reduction <add>, %97, %cst_20 [2] : vector<8x8x4xf32> to vector<8x8xf32>
    %cst_21 = arith.constant 5.000000e-01 : f32
    %99 = vector.broadcast %cst_21 : f32 to vector<8x8xf32>
    %100 = arith.mulf %98, %99 : vector<8x8xf32>
    %cst_22 = arith.constant dense<0xFF800000> : vector<8xf32>
    %101 = vector.multi_reduction <maximumf>, %100, %cst_22 [1] : vector<8x8xf32> to vector<8xf32>
    %102 = vector.shape_cast %101 : vector<8xf32> to vector<8x1xf32>
    %103 = vector.broadcast %102 : vector<8x1xf32> to vector<8x8xf32>
    %104 = arith.subf %100, %103 : vector<8x8xf32>
    %105 = math.exp %104 : vector<8x8xf32>
    %cst_23 = arith.constant dense<0.000000e+00> : vector<8xf32>
    %106 = vector.multi_reduction <add>, %105, %cst_23 [1] : vector<8x8xf32> to vector<8xf32>
    %107 = vector.shape_cast %106 : vector<8xf32> to vector<8x1xf32>
    %108 = tpu.reciprocal %107 {approx = true} : vector<8x1xf32> -> vector<8x1xf32>
    %109 = vector.broadcast %108 : vector<8x1xf32> to vector<8x8xf32>
    %110 = arith.mulf %105, %109 : vector<8x8xf32>
    %111 = vector.shape_cast %110 : vector<8x8xf32> to vector<8x8x1xf32>
    %112 = vector.shape_cast %92 : vector<8x4xf32> to vector<1x8x4xf32>
    %113 = vector.broadcast %111 : vector<8x8x1xf32> to vector<8x8x4xf32>
    %114 = vector.broadcast %112 : vector<1x8x4xf32> to vector<8x8x4xf32>
    %115 = arith.mulf %113, %114 : vector<8x8x4xf32>
    %cst_24 = arith.constant dense<0.000000e+00> : vector<8x4xf32>
    %116 = vector.multi_reduction <add>, %115, %cst_24 [1] : vector<8x8x4xf32> to vector<8x4xf32>
    %117 = vector.extract_strided_slice %2 {offsets = [0, 16], sizes = [8, 4], strides = [1, 1]} : vector<8x32xf32> to vector<8x4xf32>
    %118 = vector.extract_strided_slice %5 {offsets = [0, 16], sizes = [8, 4], strides = [1, 1]} : vector<8x32xf32> to vector<8x4xf32>
    %119 = vector.extract_strided_slice %8 {offsets = [0, 16], sizes = [8, 4], strides = [1, 1]} : vector<8x32xf32> to vector<8x4xf32>
    %120 = vector.shape_cast %117 : vector<8x4xf32> to vector<8x1x4xf32>
    %121 = vector.shape_cast %118 : vector<8x4xf32> to vector<1x8x4xf32>
    %122 = vector.broadcast %120 : vector<8x1x4xf32> to vector<8x8x4xf32>
    %123 = vector.broadcast %121 : vector<1x8x4xf32> to vector<8x8x4xf32>
    %124 = arith.mulf %122, %123 : vector<8x8x4xf32>
    %cst_25 = arith.constant dense<0.000000e+00> : vector<8x8xf32>
    %125 = vector.multi_reduction <add>, %124, %cst_25 [2] : vector<8x8x4xf32> to vector<8x8xf32>
    %cst_26 = arith.constant 5.000000e-01 : f32
    %126 = vector.broadcast %cst_26 : f32 to vector<8x8xf32>
    %127 = arith.mulf %125, %126 : vector<8x8xf32>
    %cst_27 = arith.constant dense<0xFF800000> : vector<8xf32>
    %128 = vector.multi_reduction <maximumf>, %127, %cst_27 [1] : vector<8x8xf32> to vector<8xf32>
    %129 = vector.shape_cast %128 : vector<8xf32> to vector<8x1xf32>
    %130 = vector.broadcast %129 : vector<8x1xf32> to vector<8x8xf32>
    %131 = arith.subf %127, %130 : vector<8x8xf32>
    %132 = math.exp %131 : vector<8x8xf32>
    %cst_28 = arith.constant dense<0.000000e+00> : vector<8xf32>
    %133 = vector.multi_reduction <add>, %132, %cst_28 [1] : vector<8x8xf32> to vector<8xf32>
    %134 = vector.shape_cast %133 : vector<8xf32> to vector<8x1xf32>
    %135 = tpu.reciprocal %134 {approx = true} : vector<8x1xf32> -> vector<8x1xf32>
    %136 = vector.broadcast %135 : vector<8x1xf32> to vector<8x8xf32>
    %137 = arith.mulf %132, %136 : vector<8x8xf32>
    %138 = vector.shape_cast %137 : vector<8x8xf32> to vector<8x8x1xf32>
    %139 = vector.shape_cast %119 : vector<8x4xf32> to vector<1x8x4xf32>
    %140 = vector.broadcast %138 : vector<8x8x1xf32> to vector<8x8x4xf32>
    %141 = vector.broadcast %139 : vector<1x8x4xf32> to vector<8x8x4xf32>
    %142 = arith.mulf %140, %141 : vector<8x8x4xf32>
    %cst_29 = arith.constant dense<0.000000e+00> : vector<8x4xf32>
    %143 = vector.multi_reduction <add>, %142, %cst_29 [1] : vector<8x8x4xf32> to vector<8x4xf32>
    %144 = vector.extract_strided_slice %2 {offsets = [0, 20], sizes = [8, 4], strides = [1, 1]} : vector<8x32xf32> to vector<8x4xf32>
    %145 = vector.extract_strided_slice %5 {offsets = [0, 20], sizes = [8, 4], strides = [1, 1]} : vector<8x32xf32> to vector<8x4xf32>
    %146 = vector.extract_strided_slice %8 {offsets = [0, 20], sizes = [8, 4], strides = [1, 1]} : vector<8x32xf32> to vector<8x4xf32>
    %147 = vector.shape_cast %144 : vector<8x4xf32> to vector<8x1x4xf32>
    %148 = vector.shape_cast %145 : vector<8x4xf32> to vector<1x8x4xf32>
    %149 = vector.broadcast %147 : vector<8x1x4xf32> to vector<8x8x4xf32>
    %150 = vector.broadcast %148 : vector<1x8x4xf32> to vector<8x8x4xf32>
    %151 = arith.mulf %149, %150 : vector<8x8x4xf32>
    %cst_30 = arith.constant dense<0.000000e+00> : vector<8x8xf32>
    %152 = vector.multi_reduction <add>, %151, %cst_30 [2] : vector<8x8x4xf32> to vector<8x8xf32>
    %cst_31 = arith.constant 5.000000e-01 : f32
    %153 = vector.broadcast %cst_31 : f32 to vector<8x8xf32>
    %154 = arith.mulf %152, %153 : vector<8x8xf32>
    %cst_32 = arith.constant dense<0xFF800000> : vector<8xf32>
    %155 = vector.multi_reduction <maximumf>, %154, %cst_32 [1] : vector<8x8xf32> to vector<8xf32>
    %156 = vector.shape_cast %155 : vector<8xf32> to vector<8x1xf32>
    %157 = vector.broadcast %156 : vector<8x1xf32> to vector<8x8xf32>
    %158 = arith.subf %154, %157 : vector<8x8xf32>
    %159 = math.exp %158 : vector<8x8xf32>
    %cst_33 = arith.constant dense<0.000000e+00> : vector<8xf32>
    %160 = vector.multi_reduction <add>, %159, %cst_33 [1] : vector<8x8xf32> to vector<8xf32>
    %161 = vector.shape_cast %160 : vector<8xf32> to vector<8x1xf32>
    %162 = tpu.reciprocal %161 {approx = true} : vector<8x1xf32> -> vector<8x1xf32>
    %163 = vector.broadcast %162 : vector<8x1xf32> to vector<8x8xf32>
    %164 = arith.mulf %159, %163 : vector<8x8xf32>
    %165 = vector.shape_cast %164 : vector<8x8xf32> to vector<8x8x1xf32>
    %166 = vector.shape_cast %146 : vector<8x4xf32> to vector<1x8x4xf32>
    %167 = vector.broadcast %165 : vector<8x8x1xf32> to vector<8x8x4xf32>
    %168 = vector.broadcast %166 : vector<1x8x4xf32> to vector<8x8x4xf32>
    %169 = arith.mulf %167, %168 : vector<8x8x4xf32>
    %cst_34 = arith.constant dense<0.000000e+00> : vector<8x4xf32>
    %170 = vector.multi_reduction <add>, %169, %cst_34 [1] : vector<8x8x4xf32> to vector<8x4xf32>
    %171 = vector.extract_strided_slice %2 {offsets = [0, 24], sizes = [8, 4], strides = [1, 1]} : vector<8x32xf32> to vector<8x4xf32>
    %172 = vector.extract_strided_slice %5 {offsets = [0, 24], sizes = [8, 4], strides = [1, 1]} : vector<8x32xf32> to vector<8x4xf32>
    %173 = vector.extract_strided_slice %8 {offsets = [0, 24], sizes = [8, 4], strides = [1, 1]} : vector<8x32xf32> to vector<8x4xf32>
    %174 = vector.shape_cast %171 : vector<8x4xf32> to vector<8x1x4xf32>
    %175 = vector.shape_cast %172 : vector<8x4xf32> to vector<1x8x4xf32>
    %176 = vector.broadcast %174 : vector<8x1x4xf32> to vector<8x8x4xf32>
    %177 = vector.broadcast %175 : vector<1x8x4xf32> to vector<8x8x4xf32>
    %178 = arith.mulf %176, %177 : vector<8x8x4xf32>
    %cst_35 = arith.constant dense<0.000000e+00> : vector<8x8xf32>
    %179 = vector.multi_reduction <add>, %178, %cst_35 [2] : vector<8x8x4xf32> to vector<8x8xf32>
    %cst_36 = arith.constant 5.000000e-01 : f32
    %180 = vector.broadcast %cst_36 : f32 to vector<8x8xf32>
    %181 = arith.mulf %179, %180 : vector<8x8xf32>
    %cst_37 = arith.constant dense<0xFF800000> : vector<8xf32>
    %182 = vector.multi_reduction <maximumf>, %181, %cst_37 [1] : vector<8x8xf32> to vector<8xf32>
    %183 = vector.shape_cast %182 : vector<8xf32> to vector<8x1xf32>
    %184 = vector.broadcast %183 : vector<8x1xf32> to vector<8x8xf32>
    %185 = arith.subf %181, %184 : vector<8x8xf32>
    %186 = math.exp %185 : vector<8x8xf32>
    %cst_38 = arith.constant dense<0.000000e+00> : vector<8xf32>
    %187 = vector.multi_reduction <add>, %186, %cst_38 [1] : vector<8x8xf32> to vector<8xf32>
    %188 = vector.shape_cast %187 : vector<8xf32> to vector<8x1xf32>
    %189 = tpu.reciprocal %188 {approx = true} : vector<8x1xf32> -> vector<8x1xf32>
    %190 = vector.broadcast %189 : vector<8x1xf32> to vector<8x8xf32>
    %191 = arith.mulf %186, %190 : vector<8x8xf32>
    %192 = vector.shape_cast %191 : vector<8x8xf32> to vector<8x8x1xf32>
    %193 = vector.shape_cast %173 : vector<8x4xf32> to vector<1x8x4xf32>
    %194 = vector.broadcast %192 : vector<8x8x1xf32> to vector<8x8x4xf32>
    %195 = vector.broadcast %193 : vector<1x8x4xf32> to vector<8x8x4xf32>
    %196 = arith.mulf %194, %195 : vector<8x8x4xf32>
    %cst_39 = arith.constant dense<0.000000e+00> : vector<8x4xf32>
    %197 = vector.multi_reduction <add>, %196, %cst_39 [1] : vector<8x8x4xf32> to vector<8x4xf32>
    %198 = vector.extract_strided_slice %2 {offsets = [0, 28], sizes = [8, 4], strides = [1, 1]} : vector<8x32xf32> to vector<8x4xf32>
    %199 = vector.extract_strided_slice %5 {offsets = [0, 28], sizes = [8, 4], strides = [1, 1]} : vector<8x32xf32> to vector<8x4xf32>
    %200 = vector.extract_strided_slice %8 {offsets = [0, 28], sizes = [8, 4], strides = [1, 1]} : vector<8x32xf32> to vector<8x4xf32>
    %201 = vector.shape_cast %198 : vector<8x4xf32> to vector<8x1x4xf32>
    %202 = vector.shape_cast %199 : vector<8x4xf32> to vector<1x8x4xf32>
    %203 = vector.broadcast %201 : vector<8x1x4xf32> to vector<8x8x4xf32>
    %204 = vector.broadcast %202 : vector<1x8x4xf32> to vector<8x8x4xf32>
    %205 = arith.mulf %203, %204 : vector<8x8x4xf32>
    %cst_40 = arith.constant dense<0.000000e+00> : vector<8x8xf32>
    %206 = vector.multi_reduction <add>, %205, %cst_40 [2] : vector<8x8x4xf32> to vector<8x8xf32>
    %cst_41 = arith.constant 5.000000e-01 : f32
    %207 = vector.broadcast %cst_41 : f32 to vector<8x8xf32>
    %208 = arith.mulf %206, %207 : vector<8x8xf32>
    %cst_42 = arith.constant dense<0xFF800000> : vector<8xf32>
    %209 = vector.multi_reduction <maximumf>, %208, %cst_42 [1] : vector<8x8xf32> to vector<8xf32>
    %210 = vector.shape_cast %209 : vector<8xf32> to vector<8x1xf32>
    %211 = vector.broadcast %210 : vector<8x1xf32> to vector<8x8xf32>
    %212 = arith.subf %208, %211 : vector<8x8xf32>
    %213 = math.exp %212 : vector<8x8xf32>
    %cst_43 = arith.constant dense<0.000000e+00> : vector<8xf32>
    %214 = vector.multi_reduction <add>, %213, %cst_43 [1] : vector<8x8xf32> to vector<8xf32>
    %215 = vector.shape_cast %214 : vector<8xf32> to vector<8x1xf32>
    %216 = tpu.reciprocal %215 {approx = true} : vector<8x1xf32> -> vector<8x1xf32>
    %217 = vector.broadcast %216 : vector<8x1xf32> to vector<8x8xf32>
    %218 = arith.mulf %213, %217 : vector<8x8xf32>
    %219 = vector.shape_cast %218 : vector<8x8xf32> to vector<8x8x1xf32>
    %220 = vector.shape_cast %200 : vector<8x4xf32> to vector<1x8x4xf32>
    %221 = vector.broadcast %219 : vector<8x8x1xf32> to vector<8x8x4xf32>
    %222 = vector.broadcast %220 : vector<1x8x4xf32> to vector<8x8x4xf32>
    %223 = arith.mulf %221, %222 : vector<8x8x4xf32>
    %cst_44 = arith.constant dense<0.000000e+00> : vector<8x4xf32>
    %224 = vector.multi_reduction <add>, %223, %cst_44 [1] : vector<8x8x4xf32> to vector<8x4xf32>
    %225 = tpu.concatenate %35, %62, %89, %116, %143, %170, %197, %224 in 1 : vector<8x4xf32>, vector<8x4xf32>, vector<8x4xf32>, vector<8x4xf32>, vector<8x4xf32>, vector<8x4xf32>, vector<8x4xf32>, vector<8x4xf32> -> vector<8x32xf32>
    %226 = arith.truncf %225 : vector<8x32xf32> to vector<8x32xbf16>
    %c0_45 = arith.constant 0 : index
    %c0_46 = arith.constant 0 : index
    %c0_47 = arith.constant 0 : index
    %227 = vector.load %arg2[%c0_45, %c0_46, %c0_47] : memref<1x8x32xbf16, #tpu.memory_space<vmem>>, vector<1x8x32xbf16>
    %228 = vector.shape_cast %227 : vector<1x8x32xbf16> to vector<8x32xbf16>
    %229 = vector.shape_cast %226 : vector<8x32xbf16> to vector<1x8x32xbf16>
    tpu.vector_store %arg2[%c0_45, %c0_46, %c0_47], %229 {strides = array<i32>} : memref<1x8x32xbf16, #tpu.memory_space<vmem>>, vector<1x8x32xbf16>,
    return
  }
  func.func @transform_0(%arg0: i32) -> (i32, i32, i32) {
    %c0_i32 = arith.constant 0 : i32
    %c0_i32_0 = arith.constant 0 : i32
    %c0_i32_1 = arith.constant 0 : i32
    return %arg0, %c0_i32, %c0_i32_0 : i32, i32, i32
  }
  func.func @transform_1(%arg0: i32) -> (i32, i32, i32) {
    %c0_i32 = arith.constant 0 : i32
    %c0_i32_0 = arith.constant 0 : i32
    %c0_i32_1 = arith.constant 0 : i32
    return %arg0, %c0_i32, %c0_i32_0 : i32, i32, i32
  }
}

module attributes {stable_mosaic.version = 11 : i64} {
  func.func @_linear_kernel_nok(%arg0: i32, %arg1: i32, %arg2: memref<16x32xbf16, #tpu.memory_space<vmem>>, %arg3: memref<32x128xbf16, #tpu.memory_space<vmem>>, %arg4: memref<1x128xf32, #tpu.memory_space<vmem>>, %arg5: memref<16x128xbf16, #tpu.memory_space<vmem>>) attributes {dimension_semantics = [#tpu.dimension_semantics<parallel>, #tpu.dimension_semantics<parallel>], iteration_bounds = array<i64: 1, 1>, scalar_prefetch = 0 : i64, scratch_operands = 0 : i64, tpu.core_type = #tpu.core_type<tc>, window_params = [{transform_indices = @transform_0, window_bounds = array<i64: 16, 32>}, {transform_indices = @transform_1, window_bounds = array<i64: 32, 128>}, {transform_indices = @transform_2, window_bounds = array<i64: 1, 128>}, {transform_indices = @transform_3, window_bounds = array<i64: 16, 128>}]} {
    %c0 = arith.constant 0 : index
    %c0_0 = arith.constant 0 : index
    %0 = vector.load %arg2[%c0, %c0_0] : memref<16x32xbf16, #tpu.memory_space<vmem>>, vector<16x32xbf16>
    %c0_1 = arith.constant 0 : index
    %c0_2 = arith.constant 0 : index
    %1 = vector.load %arg3[%c0_1, %c0_2] : memref<32x128xbf16, #tpu.memory_space<vmem>>, vector<32x128xbf16>
    %cst = arith.constant dense<0.000000e+00> : vector<16x128xf32>
    %2 = tpu.matmul %0, %1, %cst {dimension_numbers = #tpu.dot_dimension_numbers<[1], [0], [0], [1], [0, 0, 1, 1], [], []>} : vector<16x32xbf16>, vector<32x128xbf16>, vector<16x128xf32> -> vector<16x128xf32>
    %c0_3 = arith.constant 0 : index
    %c0_4 = arith.constant 0 : index
    %3 = vector.load %arg4[%c0_3, %c0_4] : memref<1x128xf32, #tpu.memory_space<vmem>>, vector<1x128xf32>
    %4 = vector.broadcast %3 : vector<1x128xf32> to vector<16x128xf32>
    %5 = arith.addf %2, %4 : vector<16x128xf32>
    %6 = arith.truncf %5 : vector<16x128xf32> to vector<16x128xbf16>
    %c0_5 = arith.constant 0 : index
    %c0_6 = arith.constant 0 : index
    %7 = vector.load %arg5[%c0_5, %c0_6] : memref<16x128xbf16, #tpu.memory_space<vmem>>, vector<16x128xbf16>
    tpu.vector_store %arg5[%c0_5, %c0_6], %6 {strides = array<i32>} : memref<16x128xbf16, #tpu.memory_space<vmem>>, vector<16x128xbf16>,
    return
  }
  func.func @transform_0(%arg0: i32, %arg1: i32) -> (i32, i32) {
    %c0_i32 = arith.constant 0 : i32
    %c0_i32_0 = arith.constant 0 : i32
    return %arg0, %c0_i32 : i32, i32
  }
  func.func @transform_1(%arg0: i32, %arg1: i32) -> (i32, i32) {
    %c0_i32 = arith.constant 0 : i32
    %c0_i32_0 = arith.constant 0 : i32
    return %c0_i32, %arg1 : i32, i32
  }
  func.func @transform_2(%arg0: i32, %arg1: i32) -> (i32, i32) {
    %c0_i32 = arith.constant 0 : i32
    %c0_i32_0 = arith.constant 0 : i32
    return %c0_i32, %arg1 : i32, i32
  }
  func.func @transform_3(%arg0: i32, %arg1: i32) -> (i32, i32) {
    %c0_i32 = arith.constant 0 : i32
    return %arg0, %arg1 : i32, i32
  }
}

module attributes {stable_mosaic.version = 11 : i64} {
  func.func @_linear_addln_kernel_nok(%arg0: i32, %arg1: memref<16x32xbf16, #tpu.memory_space<vmem>>, %arg2: memref<32x32xbf16, #tpu.memory_space<vmem>>, %arg3: memref<1x32xf32, #tpu.memory_space<vmem>>, %arg4: memref<16x32xbf16, #tpu.memory_space<vmem>>, %arg5: memref<1x32xf32, #tpu.memory_space<vmem>>, %arg6: memref<1x32xf32, #tpu.memory_space<vmem>>, %arg7: memref<16x32xbf16, #tpu.memory_space<vmem>>) attributes {dimension_semantics = [#tpu.dimension_semantics<parallel>], iteration_bounds = array<i64: 1>, scalar_prefetch = 0 : i64, scratch_operands = 0 : i64, tpu.core_type = #tpu.core_type<tc>, window_params = [{transform_indices = @transform_0, window_bounds = array<i64: 16, 32>}, {pipeline_mode = #tpu.pipeline_mode<synchronous>, transform_indices = @transform_1, window_bounds = array<i64: 32, 32>}, {pipeline_mode = #tpu.pipeline_mode<synchronous>, transform_indices = @transform_2, window_bounds = array<i64: 1, 32>}, {transform_indices = @transform_3, window_bounds = array<i64: 16, 32>}, {pipeline_mode = #tpu.pipeline_mode<synchronous>, transform_indices = @transform_4, window_bounds = array<i64: 1, 32>}, {pipeline_mode = #tpu.pipeline_mode<synchronous>, transform_indices = @transform_5, window_bounds = array<i64: 1, 32>}, {transform_indices = @transform_6, window_bounds = array<i64: 16, 32>}]} {
    %c0 = arith.constant 0 : index
    %c0_0 = arith.constant 0 : index
    %0 = vector.load %arg1[%c0, %c0_0] : memref<16x32xbf16, #tpu.memory_space<vmem>>, vector<16x32xbf16>
    %c0_1 = arith.constant 0 : index
    %c0_2 = arith.constant 0 : index
    %1 = vector.load %arg2[%c0_1, %c0_2] : memref<32x32xbf16, #tpu.memory_space<vmem>>, vector<32x32xbf16>
    %cst = arith.constant dense<0.000000e+00> : vector<16x32xf32>
    %2 = tpu.matmul %0, %1, %cst {dimension_numbers = #tpu.dot_dimension_numbers<[1], [0], [0], [1], [0, 0, 1, 1], [], []>} : vector<16x32xbf16>, vector<32x32xbf16>, vector<16x32xf32> -> vector<16x32xf32>
    %c0_3 = arith.constant 0 : index
    %c0_4 = arith.constant 0 : index
    %3 = vector.load %arg3[%c0_3, %c0_4] : memref<1x32xf32, #tpu.memory_space<vmem>>, vector<1x32xf32>
    %4 = vector.broadcast %3 : vector<1x32xf32> to vector<16x32xf32>
    %5 = arith.addf %2, %4 : vector<16x32xf32>
    %c0_5 = arith.constant 0 : index
    %c0_6 = arith.constant 0 : index
    %6 = vector.load %arg4[%c0_5, %c0_6] : memref<16x32xbf16, #tpu.memory_space<vmem>>, vector<16x32xbf16>
    %7 = arith.extf %6 : vector<16x32xbf16> to vector<16x32xf32>
    %8 = arith.addf %5, %7 : vector<16x32xf32>
    %cst_7 = arith.constant dense<0.000000e+00> : vector<16xf32>
    %9 = vector.multi_reduction <add>, %8, %cst_7 [1] : vector<16x32xf32> to vector<16xf32>
    %10 = vector.shape_cast %9 : vector<16xf32> to vector<16x1xf32>
    %cst_8 = arith.constant 3.200000e+01 : f32
    %11 = vector.broadcast %cst_8 : f32 to vector<16x1xf32>
    %12 = arith.divf %10, %11 : vector<16x1xf32>
    %13 = vector.broadcast %12 : vector<16x1xf32> to vector<16x32xf32>
    %14 = arith.subf %8, %13 : vector<16x32xf32>
    %15 = arith.mulf %14, %14 : vector<16x32xf32>
    %cst_9 = arith.constant dense<0.000000e+00> : vector<16xf32>
    %16 = vector.multi_reduction <add>, %15, %cst_9 [1] : vector<16x32xf32> to vector<16xf32>
    %17 = vector.shape_cast %16 : vector<16xf32> to vector<16x1xf32>
    %cst_10 = arith.constant 3.200000e+01 : f32
    %18 = vector.broadcast %cst_10 : f32 to vector<16x1xf32>
    %19 = arith.divf %17, %18 : vector<16x1xf32>
    %cst_11 = arith.constant 9.99999974E-6 : f32
    %20 = vector.broadcast %cst_11 : f32 to vector<16x1xf32>
    %21 = arith.addf %19, %20 : vector<16x1xf32>
    %22 = math.rsqrt %21 : vector<16x1xf32>
    %23 = vector.broadcast %12 : vector<16x1xf32> to vector<16x32xf32>
    %24 = arith.subf %8, %23 : vector<16x32xf32>
    %25 = vector.broadcast %22 : vector<16x1xf32> to vector<16x32xf32>
    %26 = arith.mulf %24, %25 : vector<16x32xf32>
    %c0_12 = arith.constant 0 : index
    %c0_13 = arith.constant 0 : index
    %27 = vector.load %arg5[%c0_12, %c0_13] : memref<1x32xf32, #tpu.memory_space<vmem>>, vector<1x32xf32>
    %28 = vector.broadcast %27 : vector<1x32xf32> to vector<16x32xf32>
    %29 = arith.mulf %26, %28 : vector<16x32xf32>
    %c0_14 = arith.constant 0 : index
    %c0_15 = arith.constant 0 : index
    %30 = vector.load %arg6[%c0_14, %c0_15] : memref<1x32xf32, #tpu.memory_space<vmem>>, vector<1x32xf32>
    %31 = vector.broadcast %30 : vector<1x32xf32> to vector<16x32xf32>
    %32 = arith.addf %29, %31 : vector<16x32xf32>
    %33 = arith.truncf %32 : vector<16x32xf32> to vector<16x32xbf16>
    %c0_16 = arith.constant 0 : index
    %c0_17 = arith.constant 0 : index
    %34 = vector.load %arg7[%c0_16, %c0_17] : memref<16x32xbf16, #tpu.memory_space<vmem>>, vector<16x32xbf16>
    tpu.vector_store %arg7[%c0_16, %c0_17], %33 {strides = array<i32>} : memref<16x32xbf16, #tpu.memory_space<vmem>>, vector<16x32xbf16>,
    return
  }
  func.func @transform_0(%arg0: i32) -> (i32, i32) {
    %c0_i32 = arith.constant 0 : i32
    %c0_i32_0 = arith.constant 0 : i32
    return %arg0, %c0_i32 : i32, i32
  }
  func.func @transform_1(%arg0: i32) -> (i32, i32) {
    %c0_i32 = arith.constant 0 : i32
    %c0_i32_0 = arith.constant 0 : i32
    %c0_i32_1 = arith.constant 0 : i32
    return %c0_i32, %c0_i32_0 : i32, i32
  }
  func.func @transform_2(%arg0: i32) -> (i32, i32) {
    %c0_i32 = arith.constant 0 : i32
    %c0_i32_0 = arith.constant 0 : i32
    %c0_i32_1 = arith.constant 0 : i32
    return %c0_i32, %c0_i32_0 : i32, i32
  }
  func.func @transform_3(%arg0: i32) -> (i32, i32) {
    %c0_i32 = arith.constant 0 : i32
    %c0_i32_0 = arith.constant 0 : i32
    return %arg0, %c0_i32 : i32, i32
  }
  func.func @transform_4(%arg0: i32) -> (i32, i32) {
    %c0_i32 = arith.constant 0 : i32
    %c0_i32_0 = arith.constant 0 : i32
    %c0_i32_1 = arith.constant 0 : i32
    return %c0_i32, %c0_i32_0 : i32, i32
  }
  func.func @transform_5(%arg0: i32) -> (i32, i32) {
    %c0_i32 = arith.constant 0 : i32
    %c0_i32_0 = arith.constant 0 : i32
    %c0_i32_1 = arith.constant 0 : i32
    return %c0_i32, %c0_i32_0 : i32, i32
  }
  func.func @transform_6(%arg0: i32) -> (i32, i32) {
    %c0_i32 = arith.constant 0 : i32
    %c0_i32_0 = arith.constant 0 : i32
    return %arg0, %c0_i32 : i32, i32
  }
}

module attributes {stable_mosaic.version = 11 : i64} {
  func.func @_linear_kernel_nok(%arg0: i32, %arg1: i32, %arg2: memref<16x32xbf16, #tpu.memory_space<vmem>>, %arg3: memref<32x128xbf16, #tpu.memory_space<vmem>>, %arg4: memref<1x128xf32, #tpu.memory_space<vmem>>, %arg5: memref<16x128xbf16, #tpu.memory_space<vmem>>) attributes {dimension_semantics = [#tpu.dimension_semantics<parallel>, #tpu.dimension_semantics<parallel>], iteration_bounds = array<i64: 1, 1>, scalar_prefetch = 0 : i64, scratch_operands = 0 : i64, tpu.core_type = #tpu.core_type<tc>, window_params = [{transform_indices = @transform_0, window_bounds = array<i64: 16, 32>}, {transform_indices = @transform_1, window_bounds = array<i64: 32, 128>}, {transform_indices = @transform_2, window_bounds = array<i64: 1, 128>}, {transform_indices = @transform_3, window_bounds = array<i64: 16, 128>}]} {
    %c0 = arith.constant 0 : index
    %c0_0 = arith.constant 0 : index
    %0 = vector.load %arg2[%c0, %c0_0] : memref<16x32xbf16, #tpu.memory_space<vmem>>, vector<16x32xbf16>
    %c0_1 = arith.constant 0 : index
    %c0_2 = arith.constant 0 : index
    %1 = vector.load %arg3[%c0_1, %c0_2] : memref<32x128xbf16, #tpu.memory_space<vmem>>, vector<32x128xbf16>
    %cst = arith.constant dense<0.000000e+00> : vector<16x128xf32>
    %2 = tpu.matmul %0, %1, %cst {dimension_numbers = #tpu.dot_dimension_numbers<[1], [0], [0], [1], [0, 0, 1, 1], [], []>} : vector<16x32xbf16>, vector<32x128xbf16>, vector<16x128xf32> -> vector<16x128xf32>
    %c0_3 = arith.constant 0 : index
    %c0_4 = arith.constant 0 : index
    %3 = vector.load %arg4[%c0_3, %c0_4] : memref<1x128xf32, #tpu.memory_space<vmem>>, vector<1x128xf32>
    %4 = vector.broadcast %3 : vector<1x128xf32> to vector<16x128xf32>
    %5 = arith.addf %2, %4 : vector<16x128xf32>
    %cst_5 = arith.constant 0.000000e+00 : f32
    %6 = vector.broadcast %cst_5 : f32 to vector<16x128xf32>
    %7 = arith.maximumf %5, %6 : vector<16x128xf32>
    %8 = arith.truncf %7 : vector<16x128xf32> to vector<16x128xbf16>
    %c0_6 = arith.constant 0 : index
    %c0_7 = arith.constant 0 : index
    %9 = vector.load %arg5[%c0_6, %c0_7] : memref<16x128xbf16, #tpu.memory_space<vmem>>, vector<16x128xbf16>
    tpu.vector_store %arg5[%c0_6, %c0_7], %8 {strides = array<i32>} : memref<16x128xbf16, #tpu.memory_space<vmem>>, vector<16x128xbf16>,
    return
  }
  func.func @transform_0(%arg0: i32, %arg1: i32) -> (i32, i32) {
    %c0_i32 = arith.constant 0 : i32
    %c0_i32_0 = arith.constant 0 : i32
    return %arg0, %c0_i32 : i32, i32
  }
  func.func @transform_1(%arg0: i32, %arg1: i32) -> (i32, i32) {
    %c0_i32 = arith.constant 0 : i32
    %c0_i32_0 = arith.constant 0 : i32
    return %c0_i32, %arg1 : i32, i32
  }
  func.func @transform_2(%arg0: i32, %arg1: i32) -> (i32, i32) {
    %c0_i32 = arith.constant 0 : i32
    %c0_i32_0 = arith.constant 0 : i32
    return %c0_i32, %arg1 : i32, i32
  }
  func.func @transform_3(%arg0: i32, %arg1: i32) -> (i32, i32) {
    %c0_i32 = arith.constant 0 : i32
    return %arg0, %arg1 : i32, i32
  }
}

module attributes {stable_mosaic.version = 11 : i64} {
  func.func @_linear_addln_kernel_nok(%arg0: i32, %arg1: memref<16x128xbf16, #tpu.memory_space<vmem>>, %arg2: memref<128x32xbf16, #tpu.memory_space<vmem>>, %arg3: memref<1x32xf32, #tpu.memory_space<vmem>>, %arg4: memref<16x32xbf16, #tpu.memory_space<vmem>>, %arg5: memref<1x32xf32, #tpu.memory_space<vmem>>, %arg6: memref<1x32xf32, #tpu.memory_space<vmem>>, %arg7: memref<16x32xbf16, #tpu.memory_space<vmem>>) attributes {dimension_semantics = [#tpu.dimension_semantics<parallel>], iteration_bounds = array<i64: 1>, scalar_prefetch = 0 : i64, scratch_operands = 0 : i64, tpu.core_type = #tpu.core_type<tc>, window_params = [{transform_indices = @transform_0, window_bounds = array<i64: 16, 128>}, {pipeline_mode = #tpu.pipeline_mode<synchronous>, transform_indices = @transform_1, window_bounds = array<i64: 128, 32>}, {pipeline_mode = #tpu.pipeline_mode<synchronous>, transform_indices = @transform_2, window_bounds = array<i64: 1, 32>}, {transform_indices = @transform_3, window_bounds = array<i64: 16, 32>}, {pipeline_mode = #tpu.pipeline_mode<synchronous>, transform_indices = @transform_4, window_bounds = array<i64: 1, 32>}, {pipeline_mode = #tpu.pipeline_mode<synchronous>, transform_indices = @transform_5, window_bounds = array<i64: 1, 32>}, {transform_indices = @transform_6, window_bounds = array<i64: 16, 32>}]} {
    %c0 = arith.constant 0 : index
    %c0_0 = arith.constant 0 : index
    %0 = vector.load %arg1[%c0, %c0_0] : memref<16x128xbf16, #tpu.memory_space<vmem>>, vector<16x128xbf16>
    %c0_1 = arith.constant 0 : index
    %c0_2 = arith.constant 0 : index
    %1 = vector.load %arg2[%c0_1, %c0_2] : memref<128x32xbf16, #tpu.memory_space<vmem>>, vector<128x32xbf16>
    %cst = arith.constant dense<0.000000e+00> : vector<16x32xf32>
    %2 = tpu.matmul %0, %1, %cst {dimension_numbers = #tpu.dot_dimension_numbers<[1], [0], [0], [1], [0, 0, 1, 1], [], []>} : vector<16x128xbf16>, vector<128x32xbf16>, vector<16x32xf32> -> vector<16x32xf32>
    %c0_3 = arith.constant 0 : index
    %c0_4 = arith.constant 0 : index
    %3 = vector.load %arg3[%c0_3, %c0_4] : memref<1x32xf32, #tpu.memory_space<vmem>>, vector<1x32xf32>
    %4 = vector.broadcast %3 : vector<1x32xf32> to vector<16x32xf32>
    %5 = arith.addf %2, %4 : vector<16x32xf32>
    %c0_5 = arith.constant 0 : index
    %c0_6 = arith.constant 0 : index
    %6 = vector.load %arg4[%c0_5, %c0_6] : memref<16x32xbf16, #tpu.memory_space<vmem>>, vector<16x32xbf16>
    %7 = arith.extf %6 : vector<16x32xbf16> to vector<16x32xf32>
    %8 = arith.addf %5, %7 : vector<16x32xf32>
    %cst_7 = arith.constant dense<0.000000e+00> : vector<16xf32>
    %9 = vector.multi_reduction <add>, %8, %cst_7 [1] : vector<16x32xf32> to vector<16xf32>
    %10 = vector.shape_cast %9 : vector<16xf32> to vector<16x1xf32>
    %cst_8 = arith.constant 3.200000e+01 : f32
    %11 = vector.broadcast %cst_8 : f32 to vector<16x1xf32>
    %12 = arith.divf %10, %11 : vector<16x1xf32>
    %13 = vector.broadcast %12 : vector<16x1xf32> to vector<16x32xf32>
    %14 = arith.subf %8, %13 : vector<16x32xf32>
    %15 = arith.mulf %14, %14 : vector<16x32xf32>
    %cst_9 = arith.constant dense<0.000000e+00> : vector<16xf32>
    %16 = vector.multi_reduction <add>, %15, %cst_9 [1] : vector<16x32xf32> to vector<16xf32>
    %17 = vector.shape_cast %16 : vector<16xf32> to vector<16x1xf32>
    %cst_10 = arith.constant 3.200000e+01 : f32
    %18 = vector.broadcast %cst_10 : f32 to vector<16x1xf32>
    %19 = arith.divf %17, %18 : vector<16x1xf32>
    %cst_11 = arith.constant 9.99999974E-6 : f32
    %20 = vector.broadcast %cst_11 : f32 to vector<16x1xf32>
    %21 = arith.addf %19, %20 : vector<16x1xf32>
    %22 = math.rsqrt %21 : vector<16x1xf32>
    %23 = vector.broadcast %12 : vector<16x1xf32> to vector<16x32xf32>
    %24 = arith.subf %8, %23 : vector<16x32xf32>
    %25 = vector.broadcast %22 : vector<16x1xf32> to vector<16x32xf32>
    %26 = arith.mulf %24, %25 : vector<16x32xf32>
    %c0_12 = arith.constant 0 : index
    %c0_13 = arith.constant 0 : index
    %27 = vector.load %arg5[%c0_12, %c0_13] : memref<1x32xf32, #tpu.memory_space<vmem>>, vector<1x32xf32>
    %28 = vector.broadcast %27 : vector<1x32xf32> to vector<16x32xf32>
    %29 = arith.mulf %26, %28 : vector<16x32xf32>
    %c0_14 = arith.constant 0 : index
    %c0_15 = arith.constant 0 : index
    %30 = vector.load %arg6[%c0_14, %c0_15] : memref<1x32xf32, #tpu.memory_space<vmem>>, vector<1x32xf32>
    %31 = vector.broadcast %30 : vector<1x32xf32> to vector<16x32xf32>
    %32 = arith.addf %29, %31 : vector<16x32xf32>
    %33 = arith.truncf %32 : vector<16x32xf32> to vector<16x32xbf16>
    %c0_16 = arith.constant 0 : index
    %c0_17 = arith.constant 0 : index
    %34 = vector.load %arg7[%c0_16, %c0_17] : memref<16x32xbf16, #tpu.memory_space<vmem>>, vector<16x32xbf16>
    tpu.vector_store %arg7[%c0_16, %c0_17], %33 {strides = array<i32>} : memref<16x32xbf16, #tpu.memory_space<vmem>>, vector<16x32xbf16>,
    return
  }
  func.func @transform_0(%arg0: i32) -> (i32, i32) {
    %c0_i32 = arith.constant 0 : i32
    %c0_i32_0 = arith.constant 0 : i32
    return %arg0, %c0_i32 : i32, i32
  }
  func.func @transform_1(%arg0: i32) -> (i32, i32) {
    %c0_i32 = arith.constant 0 : i32
    %c0_i32_0 = arith.constant 0 : i32
    %c0_i32_1 = arith.constant 0 : i32
    return %c0_i32, %c0_i32_0 : i32, i32
  }
  func.func @transform_2(%arg0: i32) -> (i32, i32) {
    %c0_i32 = arith.constant 0 : i32
    %c0_i32_0 = arith.constant 0 : i32
    %c0_i32_1 = arith.constant 0 : i32
    return %c0_i32, %c0_i32_0 : i32, i32
  }
  func.func @transform_3(%arg0: i32) -> (i32, i32) {
    %c0_i32 = arith.constant 0 : i32
    %c0_i32_0 = arith.constant 0 : i32
    return %arg0, %c0_i32 : i32, i32
  }
  func.func @transform_4(%arg0: i32) -> (i32, i32) {
    %c0_i32 = arith.constant 0 : i32
    %c0_i32_0 = arith.constant 0 : i32
    %c0_i32_1 = arith.constant 0 : i32
    return %c0_i32, %c0_i32_0 : i32, i32
  }
  func.func @transform_5(%arg0: i32) -> (i32, i32) {
    %c0_i32 = arith.constant 0 : i32
    %c0_i32_0 = arith.constant 0 : i32
    %c0_i32_1 = arith.constant 0 : i32
    return %c0_i32, %c0_i32_0 : i32, i32
  }
  func.func @transform_6(%arg0: i32) -> (i32, i32) {
    %c0_i32 = arith.constant 0 : i32
    %c0_i32_0 = arith.constant 0 : i32
    return %arg0, %c0_i32 : i32, i32
  }
}

module attributes {stable_mosaic.version = 11 : i64} {
  func.func @_self_attn_kernel(%arg0: i32, %arg1: memref<1x8x128xbf16, #tpu.memory_space<vmem>>, %arg2: memref<1x8x32xbf16, #tpu.memory_space<vmem>>) attributes {dimension_semantics = [#tpu.dimension_semantics<parallel>], iteration_bounds = array<i64: 2>, scalar_prefetch = 0 : i64, scratch_operands = 0 : i64, tpu.core_type = #tpu.core_type<tc>, window_params = [{transform_indices = @transform_0, window_bounds = array<i64: 1, 8, 128>}, {transform_indices = @transform_1, window_bounds = array<i64: 1, 8, 32>}]} {
    %c0 = arith.constant 0 : index
    %c0_0 = arith.constant 0 : index
    %c0_1 = arith.constant 0 : index
    %0 = vector.load %arg1[%c0, %c0_0, %c0_1] : memref<1x8x128xbf16, #tpu.memory_space<vmem>>, vector<1x8x32xbf16>
    %1 = vector.shape_cast %0 : vector<1x8x32xbf16> to vector<8x32xbf16>
    %2 = arith.extf %1 : vector<8x32xbf16> to vector<8x32xf32>
    %c0_2 = arith.constant 0 : index
    %c0_3 = arith.constant 0 : index
    %c32 = arith.constant 32 : index
    %3 = vector.load %arg1[%c0_2, %c0_3, %c32] : memref<1x8x128xbf16, #tpu.memory_space<vmem>>, vector<1x8x32xbf16>
    %4 = vector.shape_cast %3 : vector<1x8x32xbf16> to vector<8x32xbf16>
    %5 = arith.extf %4 : vector<8x32xbf16> to vector<8x32xf32>
    %c0_4 = arith.constant 0 : index
    %c0_5 = arith.constant 0 : index
    %c64 = arith.constant 64 : index
    %6 = vector.load %arg1[%c0_4, %c0_5, %c64] : memref<1x8x128xbf16, #tpu.memory_space<vmem>>, vector<1x8x32xbf16>
    %7 = vector.shape_cast %6 : vector<1x8x32xbf16> to vector<8x32xbf16>
    %8 = arith.extf %7 : vector<8x32xbf16> to vector<8x32xf32>
    %9 = tpu.iota {dimensions = array<i32: 0>} : vector<8x8xi32>
    %10 = tpu.iota {dimensions = array<i32: 1>} : vector<8x8xi32>
    %11 = arith.cmpi sge, %9, %10 : vector<8x8xi32>
    %12 = vector.extract_strided_slice %2 {offsets = [0, 0], sizes = [8, 4], strides = [1, 1]} : vector<8x32xf32> to vector<8x4xf32>
    %13 = vector.extract_strided_slice %5 {offsets = [0, 0], sizes = [8, 4], strides = [1, 1]} : vector<8x32xf32> to vector<8x4xf32>
    %14 = vector.extract_strided_slice %8 {offsets = [0, 0], sizes = [8, 4], strides = [1, 1]} : vector<8x32xf32> to vector<8x4xf32>
    %15 = vector.shape_cast %12 : vector<8x4xf32> to vector<8x1x4xf32>
    %16 = vector.shape_cast %13 : vector<8x4xf32> to vector<1x8x4xf32>
    %17 = vector.broadcast %15 : vector<8x1x4xf32> to vector<8x8x4xf32>
    %18 = vector.broadcast %16 : vector<1x8x4xf32> to vector<8x8x4xf32>
    %19 = arith.mulf %17, %18 : vector<8x8x4xf32>
    %cst = arith.constant dense<0.000000e+00> : vector<8x8xf32>
    %20 = vector.multi_reduction <add>, %19, %cst [2] : vector<8x8x4xf32> to vector<8x8xf32>
    %cst_6 = arith.constant 5.000000e-01 : f32
    %21 = vector.broadcast %cst_6 : f32 to vector<8x8xf32>
    %22 = arith.mulf %20, %21 : vector<8x8xf32>
    %cst_7 = arith.constant -1.000000e+09 : f32
    %23 = vector.broadcast %cst_7 : f32 to vector<8x8xf32>
    %24 = arith.select %11, %22, %23 : vector<8x8xi1>, vector<8x8xf32>
    %cst_8 = arith.constant dense<0xFF800000> : vector<8xf32>
    %25 = vector.multi_reduction <maximumf>, %24, %cst_8 [1] : vector<8x8xf32> to vector<8xf32>
    %26 = vector.shape_cast %25 : vector<8xf32> to vector<8x1xf32>
    %27 = vector.broadcast %26 : vector<8x1xf32> to vector<8x8xf32>
    %28 = arith.subf %24, %27 : vector<8x8xf32>
    %29 = math.exp %28 : vector<8x8xf32>
    %cst_9 = arith.constant dense<0.000000e+00> : vector<8xf32>
    %30 = vector.multi_reduction <add>, %29, %cst_9 [1] : vector<8x8xf32> to vector<8xf32>
    %31 = vector.shape_cast %30 : vector<8xf32> to vector<8x1xf32>
    %32 = tpu.reciprocal %31 {approx = true} : vector<8x1xf32> -> vector<8x1xf32>
    %33 = vector.broadcast %32 : vector<8x1xf32> to vector<8x8xf32>
    %34 = arith.mulf %29, %33 : vector<8x8xf32>
    %35 = vector.shape_cast %34 : vector<8x8xf32> to vector<8x8x1xf32>
    %36 = vector.shape_cast %14 : vector<8x4xf32> to vector<1x8x4xf32>
    %37 = vector.broadcast %35 : vector<8x8x1xf32> to vector<8x8x4xf32>
    %38 = vector.broadcast %36 : vector<1x8x4xf32> to vector<8x8x4xf32>
    %39 = arith.mulf %37, %38 : vector<8x8x4xf32>
    %cst_10 = arith.constant dense<0.000000e+00> : vector<8x4xf32>
    %40 = vector.multi_reduction <add>, %39, %cst_10 [1] : vector<8x8x4xf32> to vector<8x4xf32>
    %41 = vector.extract_strided_slice %2 {offsets = [0, 4], sizes = [8, 4], strides = [1, 1]} : vector<8x32xf32> to vector<8x4xf32>
    %42 = vector.extract_strided_slice %5 {offsets = [0, 4], sizes = [8, 4], strides = [1, 1]} : vector<8x32xf32> to vector<8x4xf32>
    %43 = vector.extract_strided_slice %8 {offsets = [0, 4], sizes = [8, 4], strides = [1, 1]} : vector<8x32xf32> to vector<8x4xf32>
    %44 = vector.shape_cast %41 : vector<8x4xf32> to vector<8x1x4xf32>
    %45 = vector.shape_cast %42 : vector<8x4xf32> to vector<1x8x4xf32>
    %46 = vector.broadcast %44 : vector<8x1x4xf32> to vector<8x8x4xf32>
    %47 = vector.broadcast %45 : vector<1x8x4xf32> to vector<8x8x4xf32>
    %48 = arith.mulf %46, %47 : vector<8x8x4xf32>
    %cst_11 = arith.constant dense<0.000000e+00> : vector<8x8xf32>
    %49 = vector.multi_reduction <add>, %48, %cst_11 [2] : vector<8x8x4xf32> to vector<8x8xf32>
    %cst_12 = arith.constant 5.000000e-01 : f32
    %50 = vector.broadcast %cst_12 : f32 to vector<8x8xf32>
    %51 = arith.mulf %49, %50 : vector<8x8xf32>
    %cst_13 = arith.constant -1.000000e+09 : f32
    %52 = vector.broadcast %cst_13 : f32 to vector<8x8xf32>
    %53 = arith.select %11, %51, %52 : vector<8x8xi1>, vector<8x8xf32>
    %cst_14 = arith.constant dense<0xFF800000> : vector<8xf32>
    %54 = vector.multi_reduction <maximumf>, %53, %cst_14 [1] : vector<8x8xf32> to vector<8xf32>
    %55 = vector.shape_cast %54 : vector<8xf32> to vector<8x1xf32>
    %56 = vector.broadcast %55 : vector<8x1xf32> to vector<8x8xf32>
    %57 = arith.subf %53, %56 : vector<8x8xf32>
    %58 = math.exp %57 : vector<8x8xf32>
    %cst_15 = arith.constant dense<0.000000e+00> : vector<8xf32>
    %59 = vector.multi_reduction <add>, %58, %cst_15 [1] : vector<8x8xf32> to vector<8xf32>
    %60 = vector.shape_cast %59 : vector<8xf32> to vector<8x1xf32>
    %61 = tpu.reciprocal %60 {approx = true} : vector<8x1xf32> -> vector<8x1xf32>
    %62 = vector.broadcast %61 : vector<8x1xf32> to vector<8x8xf32>
    %63 = arith.mulf %58, %62 : vector<8x8xf32>
    %64 = vector.shape_cast %63 : vector<8x8xf32> to vector<8x8x1xf32>
    %65 = vector.shape_cast %43 : vector<8x4xf32> to vector<1x8x4xf32>
    %66 = vector.broadcast %64 : vector<8x8x1xf32> to vector<8x8x4xf32>
    %67 = vector.broadcast %65 : vector<1x8x4xf32> to vector<8x8x4xf32>
    %68 = arith.mulf %66, %67 : vector<8x8x4xf32>
    %cst_16 = arith.constant dense<0.000000e+00> : vector<8x4xf32>
    %69 = vector.multi_reduction <add>, %68, %cst_16 [1] : vector<8x8x4xf32> to vector<8x4xf32>
    %70 = vector.extract_strided_slice %2 {offsets = [0, 8], sizes = [8, 4], strides = [1, 1]} : vector<8x32xf32> to vector<8x4xf32>
    %71 = vector.extract_strided_slice %5 {offsets = [0, 8], sizes = [8, 4], strides = [1, 1]} : vector<8x32xf32> to vector<8x4xf32>
    %72 = vector.extract_strided_slice %8 {offsets = [0, 8], sizes = [8, 4], strides = [1, 1]} : vector<8x32xf32> to vector<8x4xf32>
    %73 = vector.shape_cast %70 : vector<8x4xf32> to vector<8x1x4xf32>
    %74 = vector.shape_cast %71 : vector<8x4xf32> to vector<1x8x4xf32>
    %75 = vector.broadcast %73 : vector<8x1x4xf32> to vector<8x8x4xf32>
    %76 = vector.broadcast %74 : vector<1x8x4xf32> to vector<8x8x4xf32>
    %77 = arith.mulf %75, %76 : vector<8x8x4xf32>
    %cst_17 = arith.constant dense<0.000000e+00> : vector<8x8xf32>
    %78 = vector.multi_reduction <add>, %77, %cst_17 [2] : vector<8x8x4xf32> to vector<8x8xf32>
    %cst_18 = arith.constant 5.000000e-01 : f32
    %79 = vector.broadcast %cst_18 : f32 to vector<8x8xf32>
    %80 = arith.mulf %78, %79 : vector<8x8xf32>
    %cst_19 = arith.constant -1.000000e+09 : f32
    %81 = vector.broadcast %cst_19 : f32 to vector<8x8xf32>
    %82 = arith.select %11, %80, %81 : vector<8x8xi1>, vector<8x8xf32>
    %cst_20 = arith.constant dense<0xFF800000> : vector<8xf32>
    %83 = vector.multi_reduction <maximumf>, %82, %cst_20 [1] : vector<8x8xf32> to vector<8xf32>
    %84 = vector.shape_cast %83 : vector<8xf32> to vector<8x1xf32>
    %85 = vector.broadcast %84 : vector<8x1xf32> to vector<8x8xf32>
    %86 = arith.subf %82, %85 : vector<8x8xf32>
    %87 = math.exp %86 : vector<8x8xf32>
    %cst_21 = arith.constant dense<0.000000e+00> : vector<8xf32>
    %88 = vector.multi_reduction <add>, %87, %cst_21 [1] : vector<8x8xf32> to vector<8xf32>
    %89 = vector.shape_cast %88 : vector<8xf32> to vector<8x1xf32>
    %90 = tpu.reciprocal %89 {approx = true} : vector<8x1xf32> -> vector<8x1xf32>
    %91 = vector.broadcast %90 : vector<8x1xf32> to vector<8x8xf32>
    %92 = arith.mulf %87, %91 : vector<8x8xf32>
    %93 = vector.shape_cast %92 : vector<8x8xf32> to vector<8x8x1xf32>
    %94 = vector.shape_cast %72 : vector<8x4xf32> to vector<1x8x4xf32>
    %95 = vector.broadcast %93 : vector<8x8x1xf32> to vector<8x8x4xf32>
    %96 = vector.broadcast %94 : vector<1x8x4xf32> to vector<8x8x4xf32>
    %97 = arith.mulf %95, %96 : vector<8x8x4xf32>
    %cst_22 = arith.constant dense<0.000000e+00> : vector<8x4xf32>
    %98 = vector.multi_reduction <add>, %97, %cst_22 [1] : vector<8x8x4xf32> to vector<8x4xf32>
    %99 = vector.extract_strided_slice %2 {offsets = [0, 12], sizes = [8, 4], strides = [1, 1]} : vector<8x32xf32> to vector<8x4xf32>
    %100 = vector.extract_strided_slice %5 {offsets = [0, 12], sizes = [8, 4], strides = [1, 1]} : vector<8x32xf32> to vector<8x4xf32>
    %101 = vector.extract_strided_slice %8 {offsets = [0, 12], sizes = [8, 4], strides = [1, 1]} : vector<8x32xf32> to vector<8x4xf32>
    %102 = vector.shape_cast %99 : vector<8x4xf32> to vector<8x1x4xf32>
    %103 = vector.shape_cast %100 : vector<8x4xf32> to vector<1x8x4xf32>
    %104 = vector.broadcast %102 : vector<8x1x4xf32> to vector<8x8x4xf32>
    %105 = vector.broadcast %103 : vector<1x8x4xf32> to vector<8x8x4xf32>
    %106 = arith.mulf %104, %105 : vector<8x8x4xf32>
    %cst_23 = arith.constant dense<0.000000e+00> : vector<8x8xf32>
    %107 = vector.multi_reduction <add>, %106, %cst_23 [2] : vector<8x8x4xf32> to vector<8x8xf32>
    %cst_24 = arith.constant 5.000000e-01 : f32
    %108 = vector.broadcast %cst_24 : f32 to vector<8x8xf32>
    %109 = arith.mulf %107, %108 : vector<8x8xf32>
    %cst_25 = arith.constant -1.000000e+09 : f32
    %110 = vector.broadcast %cst_25 : f32 to vector<8x8xf32>
    %111 = arith.select %11, %109, %110 : vector<8x8xi1>, vector<8x8xf32>
    %cst_26 = arith.constant dense<0xFF800000> : vector<8xf32>
    %112 = vector.multi_reduction <maximumf>, %111, %cst_26 [1] : vector<8x8xf32> to vector<8xf32>
    %113 = vector.shape_cast %112 : vector<8xf32> to vector<8x1xf32>
    %114 = vector.broadcast %113 : vector<8x1xf32> to vector<8x8xf32>
    %115 = arith.subf %111, %114 : vector<8x8xf32>
    %116 = math.exp %115 : vector<8x8xf32>
    %cst_27 = arith.constant dense<0.000000e+00> : vector<8xf32>
    %117 = vector.multi_reduction <add>, %116, %cst_27 [1] : vector<8x8xf32> to vector<8xf32>
    %118 = vector.shape_cast %117 : vector<8xf32> to vector<8x1xf32>
    %119 = tpu.reciprocal %118 {approx = true} : vector<8x1xf32> -> vector<8x1xf32>
    %120 = vector.broadcast %119 : vector<8x1xf32> to vector<8x8xf32>
    %121 = arith.mulf %116, %120 : vector<8x8xf32>
    %122 = vector.shape_cast %121 : vector<8x8xf32> to vector<8x8x1xf32>
    %123 = vector.shape_cast %101 : vector<8x4xf32> to vector<1x8x4xf32>
    %124 = vector.broadcast %122 : vector<8x8x1xf32> to vector<8x8x4xf32>
    %125 = vector.broadcast %123 : vector<1x8x4xf32> to vector<8x8x4xf32>
    %126 = arith.mulf %124, %125 : vector<8x8x4xf32>
    %cst_28 = arith.constant dense<0.000000e+00> : vector<8x4xf32>
    %127 = vector.multi_reduction <add>, %126, %cst_28 [1] : vector<8x8x4xf32> to vector<8x4xf32>
    %128 = vector.extract_strided_slice %2 {offsets = [0, 16], sizes = [8, 4], strides = [1, 1]} : vector<8x32xf32> to vector<8x4xf32>
    %129 = vector.extract_strided_slice %5 {offsets = [0, 16], sizes = [8, 4], strides = [1, 1]} : vector<8x32xf32> to vector<8x4xf32>
    %130 = vector.extract_strided_slice %8 {offsets = [0, 16], sizes = [8, 4], strides = [1, 1]} : vector<8x32xf32> to vector<8x4xf32>
    %131 = vector.shape_cast %128 : vector<8x4xf32> to vector<8x1x4xf32>
    %132 = vector.shape_cast %129 : vector<8x4xf32> to vector<1x8x4xf32>
    %133 = vector.broadcast %131 : vector<8x1x4xf32> to vector<8x8x4xf32>
    %134 = vector.broadcast %132 : vector<1x8x4xf32> to vector<8x8x4xf32>
    %135 = arith.mulf %133, %134 : vector<8x8x4xf32>
    %cst_29 = arith.constant dense<0.000000e+00> : vector<8x8xf32>
    %136 = vector.multi_reduction <add>, %135, %cst_29 [2] : vector<8x8x4xf32> to vector<8x8xf32>
    %cst_30 = arith.constant 5.000000e-01 : f32
    %137 = vector.broadcast %cst_30 : f32 to vector<8x8xf32>
    %138 = arith.mulf %136, %137 : vector<8x8xf32>
    %cst_31 = arith.constant -1.000000e+09 : f32
    %139 = vector.broadcast %cst_31 : f32 to vector<8x8xf32>
    %140 = arith.select %11, %138, %139 : vector<8x8xi1>, vector<8x8xf32>
    %cst_32 = arith.constant dense<0xFF800000> : vector<8xf32>
    %141 = vector.multi_reduction <maximumf>, %140, %cst_32 [1] : vector<8x8xf32> to vector<8xf32>
    %142 = vector.shape_cast %141 : vector<8xf32> to vector<8x1xf32>
    %143 = vector.broadcast %142 : vector<8x1xf32> to vector<8x8xf32>
    %144 = arith.subf %140, %143 : vector<8x8xf32>
    %145 = math.exp %144 : vector<8x8xf32>
    %cst_33 = arith.constant dense<0.000000e+00> : vector<8xf32>
    %146 = vector.multi_reduction <add>, %145, %cst_33 [1] : vector<8x8xf32> to vector<8xf32>
    %147 = vector.shape_cast %146 : vector<8xf32> to vector<8x1xf32>
    %148 = tpu.reciprocal %147 {approx = true} : vector<8x1xf32> -> vector<8x1xf32>
    %149 = vector.broadcast %148 : vector<8x1xf32> to vector<8x8xf32>
    %150 = arith.mulf %145, %149 : vector<8x8xf32>
    %151 = vector.shape_cast %150 : vector<8x8xf32> to vector<8x8x1xf32>
    %152 = vector.shape_cast %130 : vector<8x4xf32> to vector<1x8x4xf32>
    %153 = vector.broadcast %151 : vector<8x8x1xf32> to vector<8x8x4xf32>
    %154 = vector.broadcast %152 : vector<1x8x4xf32> to vector<8x8x4xf32>
    %155 = arith.mulf %153, %154 : vector<8x8x4xf32>
    %cst_34 = arith.constant dense<0.000000e+00> : vector<8x4xf32>
    %156 = vector.multi_reduction <add>, %155, %cst_34 [1] : vector<8x8x4xf32> to vector<8x4xf32>
    %157 = vector.extract_strided_slice %2 {offsets = [0, 20], sizes = [8, 4], strides = [1, 1]} : vector<8x32xf32> to vector<8x4xf32>
    %158 = vector.extract_strided_slice %5 {offsets = [0, 20], sizes = [8, 4], strides = [1, 1]} : vector<8x32xf32> to vector<8x4xf32>
    %159 = vector.extract_strided_slice %8 {offsets = [0, 20], sizes = [8, 4], strides = [1, 1]} : vector<8x32xf32> to vector<8x4xf32>
    %160 = vector.shape_cast %157 : vector<8x4xf32> to vector<8x1x4xf32>
    %161 = vector.shape_cast %158 : vector<8x4xf32> to vector<1x8x4xf32>
    %162 = vector.broadcast %160 : vector<8x1x4xf32> to vector<8x8x4xf32>
    %163 = vector.broadcast %161 : vector<1x8x4xf32> to vector<8x8x4xf32>
    %164 = arith.mulf %162, %163 : vector<8x8x4xf32>
    %cst_35 = arith.constant dense<0.000000e+00> : vector<8x8xf32>
    %165 = vector.multi_reduction <add>, %164, %cst_35 [2] : vector<8x8x4xf32> to vector<8x8xf32>
    %cst_36 = arith.constant 5.000000e-01 : f32
    %166 = vector.broadcast %cst_36 : f32 to vector<8x8xf32>
    %167 = arith.mulf %165, %166 : vector<8x8xf32>
    %cst_37 = arith.constant -1.000000e+09 : f32
    %168 = vector.broadcast %cst_37 : f32 to vector<8x8xf32>
    %169 = arith.select %11, %167, %168 : vector<8x8xi1>, vector<8x8xf32>
    %cst_38 = arith.constant dense<0xFF800000> : vector<8xf32>
    %170 = vector.multi_reduction <maximumf>, %169, %cst_38 [1] : vector<8x8xf32> to vector<8xf32>
    %171 = vector.shape_cast %170 : vector<8xf32> to vector<8x1xf32>
    %172 = vector.broadcast %171 : vector<8x1xf32> to vector<8x8xf32>
    %173 = arith.subf %169, %172 : vector<8x8xf32>
    %174 = math.exp %173 : vector<8x8xf32>
    %cst_39 = arith.constant dense<0.000000e+00> : vector<8xf32>
    %175 = vector.multi_reduction <add>, %174, %cst_39 [1] : vector<8x8xf32> to vector<8xf32>
    %176 = vector.shape_cast %175 : vector<8xf32> to vector<8x1xf32>
    %177 = tpu.reciprocal %176 {approx = true} : vector<8x1xf32> -> vector<8x1xf32>
    %178 = vector.broadcast %177 : vector<8x1xf32> to vector<8x8xf32>
    %179 = arith.mulf %174, %178 : vector<8x8xf32>
    %180 = vector.shape_cast %179 : vector<8x8xf32> to vector<8x8x1xf32>
    %181 = vector.shape_cast %159 : vector<8x4xf32> to vector<1x8x4xf32>
    %182 = vector.broadcast %180 : vector<8x8x1xf32> to vector<8x8x4xf32>
    %183 = vector.broadcast %181 : vector<1x8x4xf32> to vector<8x8x4xf32>
    %184 = arith.mulf %182, %183 : vector<8x8x4xf32>
    %cst_40 = arith.constant dense<0.000000e+00> : vector<8x4xf32>
    %185 = vector.multi_reduction <add>, %184, %cst_40 [1] : vector<8x8x4xf32> to vector<8x4xf32>
    %186 = vector.extract_strided_slice %2 {offsets = [0, 24], sizes = [8, 4], strides = [1, 1]} : vector<8x32xf32> to vector<8x4xf32>
    %187 = vector.extract_strided_slice %5 {offsets = [0, 24], sizes = [8, 4], strides = [1, 1]} : vector<8x32xf32> to vector<8x4xf32>
    %188 = vector.extract_strided_slice %8 {offsets = [0, 24], sizes = [8, 4], strides = [1, 1]} : vector<8x32xf32> to vector<8x4xf32>
    %189 = vector.shape_cast %186 : vector<8x4xf32> to vector<8x1x4xf32>
    %190 = vector.shape_cast %187 : vector<8x4xf32> to vector<1x8x4xf32>
    %191 = vector.broadcast %189 : vector<8x1x4xf32> to vector<8x8x4xf32>
    %192 = vector.broadcast %190 : vector<1x8x4xf32> to vector<8x8x4xf32>
    %193 = arith.mulf %191, %192 : vector<8x8x4xf32>
    %cst_41 = arith.constant dense<0.000000e+00> : vector<8x8xf32>
    %194 = vector.multi_reduction <add>, %193, %cst_41 [2] : vector<8x8x4xf32> to vector<8x8xf32>
    %cst_42 = arith.constant 5.000000e-01 : f32
    %195 = vector.broadcast %cst_42 : f32 to vector<8x8xf32>
    %196 = arith.mulf %194, %195 : vector<8x8xf32>
    %cst_43 = arith.constant -1.000000e+09 : f32
    %197 = vector.broadcast %cst_43 : f32 to vector<8x8xf32>
    %198 = arith.select %11, %196, %197 : vector<8x8xi1>, vector<8x8xf32>
    %cst_44 = arith.constant dense<0xFF800000> : vector<8xf32>
    %199 = vector.multi_reduction <maximumf>, %198, %cst_44 [1] : vector<8x8xf32> to vector<8xf32>
    %200 = vector.shape_cast %199 : vector<8xf32> to vector<8x1xf32>
    %201 = vector.broadcast %200 : vector<8x1xf32> to vector<8x8xf32>
    %202 = arith.subf %198, %201 : vector<8x8xf32>
    %203 = math.exp %202 : vector<8x8xf32>
    %cst_45 = arith.constant dense<0.000000e+00> : vector<8xf32>
    %204 = vector.multi_reduction <add>, %203, %cst_45 [1] : vector<8x8xf32> to vector<8xf32>
    %205 = vector.shape_cast %204 : vector<8xf32> to vector<8x1xf32>
    %206 = tpu.reciprocal %205 {approx = true} : vector<8x1xf32> -> vector<8x1xf32>
    %207 = vector.broadcast %206 : vector<8x1xf32> to vector<8x8xf32>
    %208 = arith.mulf %203, %207 : vector<8x8xf32>
    %209 = vector.shape_cast %208 : vector<8x8xf32> to vector<8x8x1xf32>
    %210 = vector.shape_cast %188 : vector<8x4xf32> to vector<1x8x4xf32>
    %211 = vector.broadcast %209 : vector<8x8x1xf32> to vector<8x8x4xf32>
    %212 = vector.broadcast %210 : vector<1x8x4xf32> to vector<8x8x4xf32>
    %213 = arith.mulf %211, %212 : vector<8x8x4xf32>
    %cst_46 = arith.constant dense<0.000000e+00> : vector<8x4xf32>
    %214 = vector.multi_reduction <add>, %213, %cst_46 [1] : vector<8x8x4xf32> to vector<8x4xf32>
    %215 = vector.extract_strided_slice %2 {offsets = [0, 28], sizes = [8, 4], strides = [1, 1]} : vector<8x32xf32> to vector<8x4xf32>
    %216 = vector.extract_strided_slice %5 {offsets = [0, 28], sizes = [8, 4], strides = [1, 1]} : vector<8x32xf32> to vector<8x4xf32>
    %217 = vector.extract_strided_slice %8 {offsets = [0, 28], sizes = [8, 4], strides = [1, 1]} : vector<8x32xf32> to vector<8x4xf32>
    %218 = vector.shape_cast %215 : vector<8x4xf32> to vector<8x1x4xf32>
    %219 = vector.shape_cast %216 : vector<8x4xf32> to vector<1x8x4xf32>
    %220 = vector.broadcast %218 : vector<8x1x4xf32> to vector<8x8x4xf32>
    %221 = vector.broadcast %219 : vector<1x8x4xf32> to vector<8x8x4xf32>
    %222 = arith.mulf %220, %221 : vector<8x8x4xf32>
    %cst_47 = arith.constant dense<0.000000e+00> : vector<8x8xf32>
    %223 = vector.multi_reduction <add>, %222, %cst_47 [2] : vector<8x8x4xf32> to vector<8x8xf32>
    %cst_48 = arith.constant 5.000000e-01 : f32
    %224 = vector.broadcast %cst_48 : f32 to vector<8x8xf32>
    %225 = arith.mulf %223, %224 : vector<8x8xf32>
    %cst_49 = arith.constant -1.000000e+09 : f32
    %226 = vector.broadcast %cst_49 : f32 to vector<8x8xf32>
    %227 = arith.select %11, %225, %226 : vector<8x8xi1>, vector<8x8xf32>
    %cst_50 = arith.constant dense<0xFF800000> : vector<8xf32>
    %228 = vector.multi_reduction <maximumf>, %227, %cst_50 [1] : vector<8x8xf32> to vector<8xf32>
    %229 = vector.shape_cast %228 : vector<8xf32> to vector<8x1xf32>
    %230 = vector.broadcast %229 : vector<8x1xf32> to vector<8x8xf32>
    %231 = arith.subf %227, %230 : vector<8x8xf32>
    %232 = math.exp %231 : vector<8x8xf32>
    %cst_51 = arith.constant dense<0.000000e+00> : vector<8xf32>
    %233 = vector.multi_reduction <add>, %232, %cst_51 [1] : vector<8x8xf32> to vector<8xf32>
    %234 = vector.shape_cast %233 : vector<8xf32> to vector<8x1xf32>
    %235 = tpu.reciprocal %234 {approx = true} : vector<8x1xf32> -> vector<8x1xf32>
    %236 = vector.broadcast %235 : vector<8x1xf32> to vector<8x8xf32>
    %237 = arith.mulf %232, %236 : vector<8x8xf32>
    %238 = vector.shape_cast %237 : vector<8x8xf32> to vector<8x8x1xf32>
    %239 = vector.shape_cast %217 : vector<8x4xf32> to vector<1x8x4xf32>
    %240 = vector.broadcast %238 : vector<8x8x1xf32> to vector<8x8x4xf32>
    %241 = vector.broadcast %239 : vector<1x8x4xf32> to vector<8x8x4xf32>
    %242 = arith.mulf %240, %241 : vector<8x8x4xf32>
    %cst_52 = arith.constant dense<0.000000e+00> : vector<8x4xf32>
    %243 = vector.multi_reduction <add>, %242, %cst_52 [1] : vector<8x8x4xf32> to vector<8x4xf32>
    %244 = tpu.concatenate %40, %69, %98, %127, %156, %185, %214, %243 in 1 : vector<8x4xf32>, vector<8x4xf32>, vector<8x4xf32>, vector<8x4xf32>, vector<8x4xf32>, vector<8x4xf32>, vector<8x4xf32>, vector<8x4xf32> -> vector<8x32xf32>
    %245 = arith.truncf %244 : vector<8x32xf32> to vector<8x32xbf16>
    %c0_53 = arith.constant 0 : index
    %c0_54 = arith.constant 0 : index
    %c0_55 = arith.constant 0 : index
    %246 = vector.load %arg2[%c0_53, %c0_54, %c0_55] : memref<1x8x32xbf16, #tpu.memory_space<vmem>>, vector<1x8x32xbf16>
    %247 = vector.shape_cast %246 : vector<1x8x32xbf16> to vector<8x32xbf16>
    %248 = vector.shape_cast %245 : vector<8x32xbf16> to vector<1x8x32xbf16>
    tpu.vector_store %arg2[%c0_53, %c0_54, %c0_55], %248 {strides = array<i32>} : memref<1x8x32xbf16, #tpu.memory_space<vmem>>, vector<1x8x32xbf16>,
    return
  }
  func.func @transform_0(%arg0: i32) -> (i32, i32, i32) {
    %c0_i32 = arith.constant 0 : i32
    %c0_i32_0 = arith.constant 0 : i32
    %c0_i32_1 = arith.constant 0 : i32
    return %arg0, %c0_i32, %c0_i32_0 : i32, i32, i32
  }
  func.func @transform_1(%arg0: i32) -> (i32, i32, i32) {
    %c0_i32 = arith.constant 0 : i32
    %c0_i32_0 = arith.constant 0 : i32
    %c0_i32_1 = arith.constant 0 : i32
    return %arg0, %c0_i32, %c0_i32_0 : i32, i32, i32
  }
}

module attributes {stable_mosaic.version = 11 : i64} {
  func.func @_cross_attn_kernel(%arg0: i32, %arg1: memref<1x8x128xbf16, #tpu.memory_space<vmem>>, %arg2: memref<1x8x128xbf16, #tpu.memory_space<vmem>>, %arg3: memref<1x8x32xbf16, #tpu.memory_space<vmem>>) attributes {dimension_semantics = [#tpu.dimension_semantics<parallel>], iteration_bounds = array<i64: 2>, scalar_prefetch = 0 : i64, scratch_operands = 0 : i64, tpu.core_type = #tpu.core_type<tc>, window_params = [{transform_indices = @transform_0, window_bounds = array<i64: 1, 8, 128>}, {transform_indices = @transform_1, window_bounds = array<i64: 1, 8, 128>}, {transform_indices = @transform_2, window_bounds = array<i64: 1, 8, 32>}]} {
    %c0 = arith.constant 0 : index
    %c0_0 = arith.constant 0 : index
    %c0_1 = arith.constant 0 : index
    %0 = vector.load %arg1[%c0, %c0_0, %c0_1] : memref<1x8x128xbf16, #tpu.memory_space<vmem>>, vector<1x8x32xbf16>
    %1 = vector.shape_cast %0 : vector<1x8x32xbf16> to vector<8x32xbf16>
    %2 = arith.extf %1 : vector<8x32xbf16> to vector<8x32xf32>
    %c0_2 = arith.constant 0 : index
    %c0_3 = arith.constant 0 : index
    %c0_4 = arith.constant 0 : index
    %3 = vector.load %arg2[%c0_2, %c0_3, %c0_4] : memref<1x8x128xbf16, #tpu.memory_space<vmem>>, vector<1x8x32xbf16>
    %4 = vector.shape_cast %3 : vector<1x8x32xbf16> to vector<8x32xbf16>
    %5 = arith.extf %4 : vector<8x32xbf16> to vector<8x32xf32>
    %c0_5 = arith.constant 0 : index
    %c0_6 = arith.constant 0 : index
    %c32 = arith.constant 32 : index
    %6 = vector.load %arg2[%c0_5, %c0_6, %c32] : memref<1x8x128xbf16, #tpu.memory_space<vmem>>, vector<1x8x32xbf16>
    %7 = vector.shape_cast %6 : vector<1x8x32xbf16> to vector<8x32xbf16>
    %8 = arith.extf %7 : vector<8x32xbf16> to vector<8x32xf32>
    %9 = vector.extract_strided_slice %2 {offsets = [0, 0], sizes = [8, 4], strides = [1, 1]} : vector<8x32xf32> to vector<8x4xf32>
    %10 = vector.extract_strided_slice %5 {offsets = [0, 0], sizes = [8, 4], strides = [1, 1]} : vector<8x32xf32> to vector<8x4xf32>
    %11 = vector.extract_strided_slice %8 {offsets = [0, 0], sizes = [8, 4], strides = [1, 1]} : vector<8x32xf32> to vector<8x4xf32>
    %12 = vector.shape_cast %9 : vector<8x4xf32> to vector<8x1x4xf32>
    %13 = vector.shape_cast %10 : vector<8x4xf32> to vector<1x8x4xf32>
    %14 = vector.broadcast %12 : vector<8x1x4xf32> to vector<8x8x4xf32>
    %15 = vector.broadcast %13 : vector<1x8x4xf32> to vector<8x8x4xf32>
    %16 = arith.mulf %14, %15 : vector<8x8x4xf32>
    %cst = arith.constant dense<0.000000e+00> : vector<8x8xf32>
    %17 = vector.multi_reduction <add>, %16, %cst [2] : vector<8x8x4xf32> to vector<8x8xf32>
    %cst_7 = arith.constant 5.000000e-01 : f32
    %18 = vector.broadcast %cst_7 : f32 to vector<8x8xf32>
    %19 = arith.mulf %17, %18 : vector<8x8xf32>
    %cst_8 = arith.constant dense<0xFF800000> : vector<8xf32>
    %20 = vector.multi_reduction <maximumf>, %19, %cst_8 [1] : vector<8x8xf32> to vector<8xf32>
    %21 = vector.shape_cast %20 : vector<8xf32> to vector<8x1xf32>
    %22 = vector.broadcast %21 : vector<8x1xf32> to vector<8x8xf32>
    %23 = arith.subf %19, %22 : vector<8x8xf32>
    %24 = math.exp %23 : vector<8x8xf32>
    %cst_9 = arith.constant dense<0.000000e+00> : vector<8xf32>
    %25 = vector.multi_reduction <add>, %24, %cst_9 [1] : vector<8x8xf32> to vector<8xf32>
    %26 = vector.shape_cast %25 : vector<8xf32> to vector<8x1xf32>
    %27 = tpu.reciprocal %26 {approx = true} : vector<8x1xf32> -> vector<8x1xf32>
    %28 = vector.broadcast %27 : vector<8x1xf32> to vector<8x8xf32>
    %29 = arith.mulf %24, %28 : vector<8x8xf32>
    %30 = vector.shape_cast %29 : vector<8x8xf32> to vector<8x8x1xf32>
    %31 = vector.shape_cast %11 : vector<8x4xf32> to vector<1x8x4xf32>
    %32 = vector.broadcast %30 : vector<8x8x1xf32> to vector<8x8x4xf32>
    %33 = vector.broadcast %31 : vector<1x8x4xf32> to vector<8x8x4xf32>
    %34 = arith.mulf %32, %33 : vector<8x8x4xf32>
    %cst_10 = arith.constant dense<0.000000e+00> : vector<8x4xf32>
    %35 = vector.multi_reduction <add>, %34, %cst_10 [1] : vector<8x8x4xf32> to vector<8x4xf32>
    %36 = vector.extract_strided_slice %2 {offsets = [0, 4], sizes = [8, 4], strides = [1, 1]} : vector<8x32xf32> to vector<8x4xf32>
    %37 = vector.extract_strided_slice %5 {offsets = [0, 4], sizes = [8, 4], strides = [1, 1]} : vector<8x32xf32> to vector<8x4xf32>
    %38 = vector.extract_strided_slice %8 {offsets = [0, 4], sizes = [8, 4], strides = [1, 1]} : vector<8x32xf32> to vector<8x4xf32>
    %39 = vector.shape_cast %36 : vector<8x4xf32> to vector<8x1x4xf32>
    %40 = vector.shape_cast %37 : vector<8x4xf32> to vector<1x8x4xf32>
    %41 = vector.broadcast %39 : vector<8x1x4xf32> to vector<8x8x4xf32>
    %42 = vector.broadcast %40 : vector<1x8x4xf32> to vector<8x8x4xf32>
    %43 = arith.mulf %41, %42 : vector<8x8x4xf32>
    %cst_11 = arith.constant dense<0.000000e+00> : vector<8x8xf32>
    %44 = vector.multi_reduction <add>, %43, %cst_11 [2] : vector<8x8x4xf32> to vector<8x8xf32>
    %cst_12 = arith.constant 5.000000e-01 : f32
    %45 = vector.broadcast %cst_12 : f32 to vector<8x8xf32>
    %46 = arith.mulf %44, %45 : vector<8x8xf32>
    %cst_13 = arith.constant dense<0xFF800000> : vector<8xf32>
    %47 = vector.multi_reduction <maximumf>, %46, %cst_13 [1] : vector<8x8xf32> to vector<8xf32>
    %48 = vector.shape_cast %47 : vector<8xf32> to vector<8x1xf32>
    %49 = vector.broadcast %48 : vector<8x1xf32> to vector<8x8xf32>
    %50 = arith.subf %46, %49 : vector<8x8xf32>
    %51 = math.exp %50 : vector<8x8xf32>
    %cst_14 = arith.constant dense<0.000000e+00> : vector<8xf32>
    %52 = vector.multi_reduction <add>, %51, %cst_14 [1] : vector<8x8xf32> to vector<8xf32>
    %53 = vector.shape_cast %52 : vector<8xf32> to vector<8x1xf32>
    %54 = tpu.reciprocal %53 {approx = true} : vector<8x1xf32> -> vector<8x1xf32>
    %55 = vector.broadcast %54 : vector<8x1xf32> to vector<8x8xf32>
    %56 = arith.mulf %51, %55 : vector<8x8xf32>
    %57 = vector.shape_cast %56 : vector<8x8xf32> to vector<8x8x1xf32>
    %58 = vector.shape_cast %38 : vector<8x4xf32> to vector<1x8x4xf32>
    %59 = vector.broadcast %57 : vector<8x8x1xf32> to vector<8x8x4xf32>
    %60 = vector.broadcast %58 : vector<1x8x4xf32> to vector<8x8x4xf32>
    %61 = arith.mulf %59, %60 : vector<8x8x4xf32>
    %cst_15 = arith.constant dense<0.000000e+00> : vector<8x4xf32>
    %62 = vector.multi_reduction <add>, %61, %cst_15 [1] : vector<8x8x4xf32> to vector<8x4xf32>
    %63 = vector.extract_strided_slice %2 {offsets = [0, 8], sizes = [8, 4], strides = [1, 1]} : vector<8x32xf32> to vector<8x4xf32>
    %64 = vector.extract_strided_slice %5 {offsets = [0, 8], sizes = [8, 4], strides = [1, 1]} : vector<8x32xf32> to vector<8x4xf32>
    %65 = vector.extract_strided_slice %8 {offsets = [0, 8], sizes = [8, 4], strides = [1, 1]} : vector<8x32xf32> to vector<8x4xf32>
    %66 = vector.shape_cast %63 : vector<8x4xf32> to vector<8x1x4xf32>
    %67 = vector.shape_cast %64 : vector<8x4xf32> to vector<1x8x4xf32>
    %68 = vector.broadcast %66 : vector<8x1x4xf32> to vector<8x8x4xf32>
    %69 = vector.broadcast %67 : vector<1x8x4xf32> to vector<8x8x4xf32>
    %70 = arith.mulf %68, %69 : vector<8x8x4xf32>
    %cst_16 = arith.constant dense<0.000000e+00> : vector<8x8xf32>
    %71 = vector.multi_reduction <add>, %70, %cst_16 [2] : vector<8x8x4xf32> to vector<8x8xf32>
    %cst_17 = arith.constant 5.000000e-01 : f32
    %72 = vector.broadcast %cst_17 : f32 to vector<8x8xf32>
    %73 = arith.mulf %71, %72 : vector<8x8xf32>
    %cst_18 = arith.constant dense<0xFF800000> : vector<8xf32>
    %74 = vector.multi_reduction <maximumf>, %73, %cst_18 [1] : vector<8x8xf32> to vector<8xf32>
    %75 = vector.shape_cast %74 : vector<8xf32> to vector<8x1xf32>
    %76 = vector.broadcast %75 : vector<8x1xf32> to vector<8x8xf32>
    %77 = arith.subf %73, %76 : vector<8x8xf32>
    %78 = math.exp %77 : vector<8x8xf32>
    %cst_19 = arith.constant dense<0.000000e+00> : vector<8xf32>
    %79 = vector.multi_reduction <add>, %78, %cst_19 [1] : vector<8x8xf32> to vector<8xf32>
    %80 = vector.shape_cast %79 : vector<8xf32> to vector<8x1xf32>
    %81 = tpu.reciprocal %80 {approx = true} : vector<8x1xf32> -> vector<8x1xf32>
    %82 = vector.broadcast %81 : vector<8x1xf32> to vector<8x8xf32>
    %83 = arith.mulf %78, %82 : vector<8x8xf32>
    %84 = vector.shape_cast %83 : vector<8x8xf32> to vector<8x8x1xf32>
    %85 = vector.shape_cast %65 : vector<8x4xf32> to vector<1x8x4xf32>
    %86 = vector.broadcast %84 : vector<8x8x1xf32> to vector<8x8x4xf32>
    %87 = vector.broadcast %85 : vector<1x8x4xf32> to vector<8x8x4xf32>
    %88 = arith.mulf %86, %87 : vector<8x8x4xf32>
    %cst_20 = arith.constant dense<0.000000e+00> : vector<8x4xf32>
    %89 = vector.multi_reduction <add>, %88, %cst_20 [1] : vector<8x8x4xf32> to vector<8x4xf32>
    %90 = vector.extract_strided_slice %2 {offsets = [0, 12], sizes = [8, 4], strides = [1, 1]} : vector<8x32xf32> to vector<8x4xf32>
    %91 = vector.extract_strided_slice %5 {offsets = [0, 12], sizes = [8, 4], strides = [1, 1]} : vector<8x32xf32> to vector<8x4xf32>
    %92 = vector.extract_strided_slice %8 {offsets = [0, 12], sizes = [8, 4], strides = [1, 1]} : vector<8x32xf32> to vector<8x4xf32>
    %93 = vector.shape_cast %90 : vector<8x4xf32> to vector<8x1x4xf32>
    %94 = vector.shape_cast %91 : vector<8x4xf32> to vector<1x8x4xf32>
    %95 = vector.broadcast %93 : vector<8x1x4xf32> to vector<8x8x4xf32>
    %96 = vector.broadcast %94 : vector<1x8x4xf32> to vector<8x8x4xf32>
    %97 = arith.mulf %95, %96 : vector<8x8x4xf32>
    %cst_21 = arith.constant dense<0.000000e+00> : vector<8x8xf32>
    %98 = vector.multi_reduction <add>, %97, %cst_21 [2] : vector<8x8x4xf32> to vector<8x8xf32>
    %cst_22 = arith.constant 5.000000e-01 : f32
    %99 = vector.broadcast %cst_22 : f32 to vector<8x8xf32>
    %100 = arith.mulf %98, %99 : vector<8x8xf32>
    %cst_23 = arith.constant dense<0xFF800000> : vector<8xf32>
    %101 = vector.multi_reduction <maximumf>, %100, %cst_23 [1] : vector<8x8xf32> to vector<8xf32>
    %102 = vector.shape_cast %101 : vector<8xf32> to vector<8x1xf32>
    %103 = vector.broadcast %102 : vector<8x1xf32> to vector<8x8xf32>
    %104 = arith.subf %100, %103 : vector<8x8xf32>
    %105 = math.exp %104 : vector<8x8xf32>
    %cst_24 = arith.constant dense<0.000000e+00> : vector<8xf32>
    %106 = vector.multi_reduction <add>, %105, %cst_24 [1] : vector<8x8xf32> to vector<8xf32>
    %107 = vector.shape_cast %106 : vector<8xf32> to vector<8x1xf32>
    %108 = tpu.reciprocal %107 {approx = true} : vector<8x1xf32> -> vector<8x1xf32>
    %109 = vector.broadcast %108 : vector<8x1xf32> to vector<8x8xf32>
    %110 = arith.mulf %105, %109 : vector<8x8xf32>
    %111 = vector.shape_cast %110 : vector<8x8xf32> to vector<8x8x1xf32>
    %112 = vector.shape_cast %92 : vector<8x4xf32> to vector<1x8x4xf32>
    %113 = vector.broadcast %111 : vector<8x8x1xf32> to vector<8x8x4xf32>
    %114 = vector.broadcast %112 : vector<1x8x4xf32> to vector<8x8x4xf32>
    %115 = arith.mulf %113, %114 : vector<8x8x4xf32>
    %cst_25 = arith.constant dense<0.000000e+00> : vector<8x4xf32>
    %116 = vector.multi_reduction <add>, %115, %cst_25 [1] : vector<8x8x4xf32> to vector<8x4xf32>
    %117 = vector.extract_strided_slice %2 {offsets = [0, 16], sizes = [8, 4], strides = [1, 1]} : vector<8x32xf32> to vector<8x4xf32>
    %118 = vector.extract_strided_slice %5 {offsets = [0, 16], sizes = [8, 4], strides = [1, 1]} : vector<8x32xf32> to vector<8x4xf32>
    %119 = vector.extract_strided_slice %8 {offsets = [0, 16], sizes = [8, 4], strides = [1, 1]} : vector<8x32xf32> to vector<8x4xf32>
    %120 = vector.shape_cast %117 : vector<8x4xf32> to vector<8x1x4xf32>
    %121 = vector.shape_cast %118 : vector<8x4xf32> to vector<1x8x4xf32>
    %122 = vector.broadcast %120 : vector<8x1x4xf32> to vector<8x8x4xf32>
    %123 = vector.broadcast %121 : vector<1x8x4xf32> to vector<8x8x4xf32>
    %124 = arith.mulf %122, %123 : vector<8x8x4xf32>
    %cst_26 = arith.constant dense<0.000000e+00> : vector<8x8xf32>
    %125 = vector.multi_reduction <add>, %124, %cst_26 [2] : vector<8x8x4xf32> to vector<8x8xf32>
    %cst_27 = arith.constant 5.000000e-01 : f32
    %126 = vector.broadcast %cst_27 : f32 to vector<8x8xf32>
    %127 = arith.mulf %125, %126 : vector<8x8xf32>
    %cst_28 = arith.constant dense<0xFF800000> : vector<8xf32>
    %128 = vector.multi_reduction <maximumf>, %127, %cst_28 [1] : vector<8x8xf32> to vector<8xf32>
    %129 = vector.shape_cast %128 : vector<8xf32> to vector<8x1xf32>
    %130 = vector.broadcast %129 : vector<8x1xf32> to vector<8x8xf32>
    %131 = arith.subf %127, %130 : vector<8x8xf32>
    %132 = math.exp %131 : vector<8x8xf32>
    %cst_29 = arith.constant dense<0.000000e+00> : vector<8xf32>
    %133 = vector.multi_reduction <add>, %132, %cst_29 [1] : vector<8x8xf32> to vector<8xf32>
    %134 = vector.shape_cast %133 : vector<8xf32> to vector<8x1xf32>
    %135 = tpu.reciprocal %134 {approx = true} : vector<8x1xf32> -> vector<8x1xf32>
    %136 = vector.broadcast %135 : vector<8x1xf32> to vector<8x8xf32>
    %137 = arith.mulf %132, %136 : vector<8x8xf32>
    %138 = vector.shape_cast %137 : vector<8x8xf32> to vector<8x8x1xf32>
    %139 = vector.shape_cast %119 : vector<8x4xf32> to vector<1x8x4xf32>
    %140 = vector.broadcast %138 : vector<8x8x1xf32> to vector<8x8x4xf32>
    %141 = vector.broadcast %139 : vector<1x8x4xf32> to vector<8x8x4xf32>
    %142 = arith.mulf %140, %141 : vector<8x8x4xf32>
    %cst_30 = arith.constant dense<0.000000e+00> : vector<8x4xf32>
    %143 = vector.multi_reduction <add>, %142, %cst_30 [1] : vector<8x8x4xf32> to vector<8x4xf32>
    %144 = vector.extract_strided_slice %2 {offsets = [0, 20], sizes = [8, 4], strides = [1, 1]} : vector<8x32xf32> to vector<8x4xf32>
    %145 = vector.extract_strided_slice %5 {offsets = [0, 20], sizes = [8, 4], strides = [1, 1]} : vector<8x32xf32> to vector<8x4xf32>
    %146 = vector.extract_strided_slice %8 {offsets = [0, 20], sizes = [8, 4], strides = [1, 1]} : vector<8x32xf32> to vector<8x4xf32>
    %147 = vector.shape_cast %144 : vector<8x4xf32> to vector<8x1x4xf32>
    %148 = vector.shape_cast %145 : vector<8x4xf32> to vector<1x8x4xf32>
    %149 = vector.broadcast %147 : vector<8x1x4xf32> to vector<8x8x4xf32>
    %150 = vector.broadcast %148 : vector<1x8x4xf32> to vector<8x8x4xf32>
    %151 = arith.mulf %149, %150 : vector<8x8x4xf32>
    %cst_31 = arith.constant dense<0.000000e+00> : vector<8x8xf32>
    %152 = vector.multi_reduction <add>, %151, %cst_31 [2] : vector<8x8x4xf32> to vector<8x8xf32>
    %cst_32 = arith.constant 5.000000e-01 : f32
    %153 = vector.broadcast %cst_32 : f32 to vector<8x8xf32>
    %154 = arith.mulf %152, %153 : vector<8x8xf32>
    %cst_33 = arith.constant dense<0xFF800000> : vector<8xf32>
    %155 = vector.multi_reduction <maximumf>, %154, %cst_33 [1] : vector<8x8xf32> to vector<8xf32>
    %156 = vector.shape_cast %155 : vector<8xf32> to vector<8x1xf32>
    %157 = vector.broadcast %156 : vector<8x1xf32> to vector<8x8xf32>
    %158 = arith.subf %154, %157 : vector<8x8xf32>
    %159 = math.exp %158 : vector<8x8xf32>
    %cst_34 = arith.constant dense<0.000000e+00> : vector<8xf32>
    %160 = vector.multi_reduction <add>, %159, %cst_34 [1] : vector<8x8xf32> to vector<8xf32>
    %161 = vector.shape_cast %160 : vector<8xf32> to vector<8x1xf32>
    %162 = tpu.reciprocal %161 {approx = true} : vector<8x1xf32> -> vector<8x1xf32>
    %163 = vector.broadcast %162 : vector<8x1xf32> to vector<8x8xf32>
    %164 = arith.mulf %159, %163 : vector<8x8xf32>
    %165 = vector.shape_cast %164 : vector<8x8xf32> to vector<8x8x1xf32>
    %166 = vector.shape_cast %146 : vector<8x4xf32> to vector<1x8x4xf32>
    %167 = vector.broadcast %165 : vector<8x8x1xf32> to vector<8x8x4xf32>
    %168 = vector.broadcast %166 : vector<1x8x4xf32> to vector<8x8x4xf32>
    %169 = arith.mulf %167, %168 : vector<8x8x4xf32>
    %cst_35 = arith.constant dense<0.000000e+00> : vector<8x4xf32>
    %170 = vector.multi_reduction <add>, %169, %cst_35 [1] : vector<8x8x4xf32> to vector<8x4xf32>
    %171 = vector.extract_strided_slice %2 {offsets = [0, 24], sizes = [8, 4], strides = [1, 1]} : vector<8x32xf32> to vector<8x4xf32>
    %172 = vector.extract_strided_slice %5 {offsets = [0, 24], sizes = [8, 4], strides = [1, 1]} : vector<8x32xf32> to vector<8x4xf32>
    %173 = vector.extract_strided_slice %8 {offsets = [0, 24], sizes = [8, 4], strides = [1, 1]} : vector<8x32xf32> to vector<8x4xf32>
    %174 = vector.shape_cast %171 : vector<8x4xf32> to vector<8x1x4xf32>
    %175 = vector.shape_cast %172 : vector<8x4xf32> to vector<1x8x4xf32>
    %176 = vector.broadcast %174 : vector<8x1x4xf32> to vector<8x8x4xf32>
    %177 = vector.broadcast %175 : vector<1x8x4xf32> to vector<8x8x4xf32>
    %178 = arith.mulf %176, %177 : vector<8x8x4xf32>
    %cst_36 = arith.constant dense<0.000000e+00> : vector<8x8xf32>
    %179 = vector.multi_reduction <add>, %178, %cst_36 [2] : vector<8x8x4xf32> to vector<8x8xf32>
    %cst_37 = arith.constant 5.000000e-01 : f32
    %180 = vector.broadcast %cst_37 : f32 to vector<8x8xf32>
    %181 = arith.mulf %179, %180 : vector<8x8xf32>
    %cst_38 = arith.constant dense<0xFF800000> : vector<8xf32>
    %182 = vector.multi_reduction <maximumf>, %181, %cst_38 [1] : vector<8x8xf32> to vector<8xf32>
    %183 = vector.shape_cast %182 : vector<8xf32> to vector<8x1xf32>
    %184 = vector.broadcast %183 : vector<8x1xf32> to vector<8x8xf32>
    %185 = arith.subf %181, %184 : vector<8x8xf32>
    %186 = math.exp %185 : vector<8x8xf32>
    %cst_39 = arith.constant dense<0.000000e+00> : vector<8xf32>
    %187 = vector.multi_reduction <add>, %186, %cst_39 [1] : vector<8x8xf32> to vector<8xf32>
    %188 = vector.shape_cast %187 : vector<8xf32> to vector<8x1xf32>
    %189 = tpu.reciprocal %188 {approx = true} : vector<8x1xf32> -> vector<8x1xf32>
    %190 = vector.broadcast %189 : vector<8x1xf32> to vector<8x8xf32>
    %191 = arith.mulf %186, %190 : vector<8x8xf32>
    %192 = vector.shape_cast %191 : vector<8x8xf32> to vector<8x8x1xf32>
    %193 = vector.shape_cast %173 : vector<8x4xf32> to vector<1x8x4xf32>
    %194 = vector.broadcast %192 : vector<8x8x1xf32> to vector<8x8x4xf32>
    %195 = vector.broadcast %193 : vector<1x8x4xf32> to vector<8x8x4xf32>
    %196 = arith.mulf %194, %195 : vector<8x8x4xf32>
    %cst_40 = arith.constant dense<0.000000e+00> : vector<8x4xf32>
    %197 = vector.multi_reduction <add>, %196, %cst_40 [1] : vector<8x8x4xf32> to vector<8x4xf32>
    %198 = vector.extract_strided_slice %2 {offsets = [0, 28], sizes = [8, 4], strides = [1, 1]} : vector<8x32xf32> to vector<8x4xf32>
    %199 = vector.extract_strided_slice %5 {offsets = [0, 28], sizes = [8, 4], strides = [1, 1]} : vector<8x32xf32> to vector<8x4xf32>
    %200 = vector.extract_strided_slice %8 {offsets = [0, 28], sizes = [8, 4], strides = [1, 1]} : vector<8x32xf32> to vector<8x4xf32>
    %201 = vector.shape_cast %198 : vector<8x4xf32> to vector<8x1x4xf32>
    %202 = vector.shape_cast %199 : vector<8x4xf32> to vector<1x8x4xf32>
    %203 = vector.broadcast %201 : vector<8x1x4xf32> to vector<8x8x4xf32>
    %204 = vector.broadcast %202 : vector<1x8x4xf32> to vector<8x8x4xf32>
    %205 = arith.mulf %203, %204 : vector<8x8x4xf32>
    %cst_41 = arith.constant dense<0.000000e+00> : vector<8x8xf32>
    %206 = vector.multi_reduction <add>, %205, %cst_41 [2] : vector<8x8x4xf32> to vector<8x8xf32>
    %cst_42 = arith.constant 5.000000e-01 : f32
    %207 = vector.broadcast %cst_42 : f32 to vector<8x8xf32>
    %208 = arith.mulf %206, %207 : vector<8x8xf32>
    %cst_43 = arith.constant dense<0xFF800000> : vector<8xf32>
    %209 = vector.multi_reduction <maximumf>, %208, %cst_43 [1] : vector<8x8xf32> to vector<8xf32>
    %210 = vector.shape_cast %209 : vector<8xf32> to vector<8x1xf32>
    %211 = vector.broadcast %210 : vector<8x1xf32> to vector<8x8xf32>
    %212 = arith.subf %208, %211 : vector<8x8xf32>
    %213 = math.exp %212 : vector<8x8xf32>
    %cst_44 = arith.constant dense<0.000000e+00> : vector<8xf32>
    %214 = vector.multi_reduction <add>, %213, %cst_44 [1] : vector<8x8xf32> to vector<8xf32>
    %215 = vector.shape_cast %214 : vector<8xf32> to vector<8x1xf32>
    %216 = tpu.reciprocal %215 {approx = true} : vector<8x1xf32> -> vector<8x1xf32>
    %217 = vector.broadcast %216 : vector<8x1xf32> to vector<8x8xf32>
    %218 = arith.mulf %213, %217 : vector<8x8xf32>
    %219 = vector.shape_cast %218 : vector<8x8xf32> to vector<8x8x1xf32>
    %220 = vector.shape_cast %200 : vector<8x4xf32> to vector<1x8x4xf32>
    %221 = vector.broadcast %219 : vector<8x8x1xf32> to vector<8x8x4xf32>
    %222 = vector.broadcast %220 : vector<1x8x4xf32> to vector<8x8x4xf32>
    %223 = arith.mulf %221, %222 : vector<8x8x4xf32>
    %cst_45 = arith.constant dense<0.000000e+00> : vector<8x4xf32>
    %224 = vector.multi_reduction <add>, %223, %cst_45 [1] : vector<8x8x4xf32> to vector<8x4xf32>
    %225 = tpu.concatenate %35, %62, %89, %116, %143, %170, %197, %224 in 1 : vector<8x4xf32>, vector<8x4xf32>, vector<8x4xf32>, vector<8x4xf32>, vector<8x4xf32>, vector<8x4xf32>, vector<8x4xf32>, vector<8x4xf32> -> vector<8x32xf32>
    %226 = arith.truncf %225 : vector<8x32xf32> to vector<8x32xbf16>
    %c0_46 = arith.constant 0 : index
    %c0_47 = arith.constant 0 : index
    %c0_48 = arith.constant 0 : index
    %227 = vector.load %arg3[%c0_46, %c0_47, %c0_48] : memref<1x8x32xbf16, #tpu.memory_space<vmem>>, vector<1x8x32xbf16>
    %228 = vector.shape_cast %227 : vector<1x8x32xbf16> to vector<8x32xbf16>
    %229 = vector.shape_cast %226 : vector<8x32xbf16> to vector<1x8x32xbf16>
    tpu.vector_store %arg3[%c0_46, %c0_47, %c0_48], %229 {strides = array<i32>} : memref<1x8x32xbf16, #tpu.memory_space<vmem>>, vector<1x8x32xbf16>,
    return
  }
  func.func @transform_0(%arg0: i32) -> (i32, i32, i32) {
    %c0_i32 = arith.constant 0 : i32
    %c0_i32_0 = arith.constant 0 : i32
    %c0_i32_1 = arith.constant 0 : i32
    return %arg0, %c0_i32, %c0_i32_0 : i32, i32, i32
  }
  func.func @transform_1(%arg0: i32) -> (i32, i32, i32) {
    %c0_i32 = arith.constant 0 : i32
    %c0_i32_0 = arith.constant 0 : i32
    %c0_i32_1 = arith.constant 0 : i32
    return %arg0, %c0_i32, %c0_i32_0 : i32, i32, i32
  }
  func.func @transform_2(%arg0: i32) -> (i32, i32, i32) {
    %c0_i32 = arith.constant 0 : i32
    %c0_i32_0 = arith.constant 0 : i32
    %c0_i32_1 = arith.constant 0 : i32
    return %arg0, %c0_i32, %c0_i32_0 : i32, i32, i32
  }
}

module attributes {stable_mosaic.version = 11 : i64} {
  func.func @_linear_kernel_nok(%arg0: i32, %arg1: i32, %arg2: memref<16x32xbf16, #tpu.memory_space<vmem>>, %arg3: memref<32x128xbf16, #tpu.memory_space<vmem>>, %arg4: memref<1x128xf32, #tpu.memory_space<vmem>>, %arg5: memref<16x128xf32, #tpu.memory_space<vmem>>) attributes {dimension_semantics = [#tpu.dimension_semantics<parallel>, #tpu.dimension_semantics<parallel>], iteration_bounds = array<i64: 1, 1>, scalar_prefetch = 0 : i64, scratch_operands = 0 : i64, tpu.core_type = #tpu.core_type<tc>, window_params = [{transform_indices = @transform_0, window_bounds = array<i64: 16, 32>}, {transform_indices = @transform_1, window_bounds = array<i64: 32, 128>}, {transform_indices = @transform_2, window_bounds = array<i64: 1, 128>}, {transform_indices = @transform_3, window_bounds = array<i64: 16, 128>}]} {
    %c0 = arith.constant 0 : index
    %c0_0 = arith.constant 0 : index
    %0 = vector.load %arg2[%c0, %c0_0] : memref<16x32xbf16, #tpu.memory_space<vmem>>, vector<16x32xbf16>
    %c0_1 = arith.constant 0 : index
    %c0_2 = arith.constant 0 : index
    %1 = vector.load %arg3[%c0_1, %c0_2] : memref<32x128xbf16, #tpu.memory_space<vmem>>, vector<32x128xbf16>
    %cst = arith.constant dense<0.000000e+00> : vector<16x128xf32>
    %2 = tpu.matmul %0, %1, %cst {dimension_numbers = #tpu.dot_dimension_numbers<[1], [0], [0], [1], [0, 0, 1, 1], [], []>} : vector<16x32xbf16>, vector<32x128xbf16>, vector<16x128xf32> -> vector<16x128xf32>
    %c0_3 = arith.constant 0 : index
    %c0_4 = arith.constant 0 : index
    %3 = vector.load %arg4[%c0_3, %c0_4] : memref<1x128xf32, #tpu.memory_space<vmem>>, vector<1x128xf32>
    %4 = vector.broadcast %3 : vector<1x128xf32> to vector<16x128xf32>
    %5 = arith.addf %2, %4 : vector<16x128xf32>
    %c0_5 = arith.constant 0 : index
    %c0_6 = arith.constant 0 : index
    %6 = vector.load %arg5[%c0_5, %c0_6] : memref<16x128xf32, #tpu.memory_space<vmem>>, vector<16x128xf32>
    tpu.vector_store %arg5[%c0_5, %c0_6], %5 {strides = array<i32>} : memref<16x128xf32, #tpu.memory_space<vmem>>, vector<16x128xf32>,
    return
  }
  func.func @transform_0(%arg0: i32, %arg1: i32) -> (i32, i32) {
    %c0_i32 = arith.constant 0 : i32
    %c0_i32_0 = arith.constant 0 : i32
    return %arg0, %c0_i32 : i32, i32
  }
  func.func @transform_1(%arg0: i32, %arg1: i32) -> (i32, i32) {
    %c0_i32 = arith.constant 0 : i32
    %c0_i32_0 = arith.constant 0 : i32
    return %c0_i32, %arg1 : i32, i32
  }
  func.func @transform_2(%arg0: i32, %arg1: i32) -> (i32, i32) {
    %c0_i32 = arith.constant 0 : i32
    %c0_i32_0 = arith.constant 0 : i32
    return %c0_i32, %arg1 : i32, i32
  }
  func.func @transform_3(%arg0: i32, %arg1: i32) -> (i32, i32) {
    %c0_i32 = arith.constant 0 : i32
    return %arg0, %arg1 : i32, i32
  }
}

</mosaic_0001>

<bundles_post_ra>
// kernel: crossformers_forward.29
= control target key start
LH: loop header
LB: loop body
LE: loop exit
PB: predicated region body
PF: predicated region fallthrough
CT: control target
= control target key end

     0   :  { %v134_v0 = vmov 0.0   ;;  %vm135_vm0 = vmmov 0   ;;  %vm45_vm1 = vcmask 261120   ;;  %s171_s1 = inlined_call_operand.vmem [shape: bf16[32,128], index: 1, kind: input, shape index: {}]   ;;  %s172_s0 = inlined_call_operand.vmem [shape: bf16[16,32], index: 0, kind: input, shape index: {}]   ;;  %s173_s2 = inlined_call_operand.vmem [shape: f32[1,128], index: 2, kind: input, shape index: {}]   ;;  %s174_s3 = inlined_call_operand.vmem [shape: bf16[16,128], index: 3, kind: output, shape index: {}]  }
   0x1   :  { %121 = vmatprep.subr.bf16.mxu0 %v134_v0  ;;  %v131_v1 = vld [vmem:[%s171_s1 + $0x8] sm:$0xff]   ;;  %125 = vmatprep.mubr.msk.bf16.mxu0 %vm135_vm0, %v134_v0  ;;  %v132_v2 = vld [vmem:[%s171_s1] sm:$0xff]  }
   0x2   :  { %122 = vmatpush3.bf16.msra.mxu0 %v131_v1  ;;  %v133_v3 = vld [vmem:[%s172_s0] sm:$0xff]  }
   0x3   :  { %123 = vmatprep.subr.bf16.mxu0 %v134_v0  ;;  %v104_v5 = vld [vmem:[%s173_s2] ss:$0 sm:$0xff] }
   0x6   :  { %124 = vmatpush3.bf16.msra.mxu0 %v132_v2 }
   0x9   :  { %126 = vmatmul.mubr.msk.bf16.vlgmr.msra.gmra.mxu0 %vm45_vm1, %v133_v3 }
  0xc9   :  { %v83_v4 = vpop.f32.mrf.mxu0 }
  0xca   :  { %v84_v8 = vadd.f32 %v104_v5, %v83_v4 }
  0xcb   :  { %v127_v6 = vpop.f32.mrf.mxu0 }
  0xcd   :  { %v86_v7 = vpop.f32.mrf.mxu0 }
  0xce   :  { %v87_v9 = vadd.f32 %v104_v5, %v86_v7 }
  0xcf   :  { %v128_v10 = vpop.f32.mrf.mxu0 }
  0xd0   :  { %v116_v11 = vpack.c.bf16 %v87_v9, %v84_v8 }
  0xd2   :  { %117 = vst [vmem:[%s174_s3] sm:$0xff] %v116_v11  }

// kernel: crossformers_forward.32
= control target key start
LH: loop header
LB: loop body
LE: loop exit
PB: predicated region body
PF: predicated region fallthrough
CT: control target
= control target key end

     0   :  { %v136_v0 = vmov 0.0   ;;  %vm137_vm0 = vmmov 0   ;;  %vm45_vm1 = vcmask 261120   ;;  %s173_s1 = inlined_call_operand.vmem [shape: bf16[32,128], index: 1, kind: input, shape index: {}]   ;;  %s174_s0 = inlined_call_operand.vmem [shape: bf16[16,32], index: 0, kind: input, shape index: {}]   ;;  %s175_s2 = inlined_call_operand.vmem [shape: f32[1,128], index: 2, kind: input, shape index: {}]   ;;  %s176_s3 = inlined_call_operand.vmem [shape: bf16[16,128], index: 3, kind: output, shape index: {}]  }
   0x1   :  { %123 = vmatprep.subr.bf16.mxu0 %v136_v0  ;;  %v133_v1 = vld [vmem:[%s173_s1 + $0x8] sm:$0xff]   ;;  %127 = vmatprep.mubr.msk.bf16.mxu0 %vm137_vm0, %v136_v0  ;;  %v134_v2 = vld [vmem:[%s173_s1] sm:$0xff]  }
   0x2   :  { %124 = vmatpush3.bf16.msra.mxu0 %v133_v1  ;;  %v135_v3 = vld [vmem:[%s174_s0] sm:$0xff]  }
   0x3   :  { %125 = vmatprep.subr.bf16.mxu0 %v136_v0  ;;  %v106_v4 = vld [vmem:[%s175_s2] ss:$0 sm:$0xff] }
   0x6   :  { %126 = vmatpush3.bf16.msra.mxu0 %v134_v2 }
   0x9   :  { %128 = vmatmul.mubr.msk.bf16.vlgmr.msra.gmra.mxu0 %vm45_vm1, %v135_v3 }
  0xc9   :  { %v83_v5 = vpop.f32.mrf.mxu0 }
  0xca   :  { %v84_v7 = vadd.f32 %v106_v4, %v83_v5 }
  0xcb   :  { %v129_v6 = vpop.f32.mrf.mxu0 }
  0xcc   :  { %v90_v11 = vmax.f32 %v84_v7, 0.0 }
  0xcd   :  { %v86_v8 = vpop.f32.mrf.mxu0 }
  0xce   :  { %v87_v9 = vadd.f32 %v106_v4, %v86_v8 }
  0xcf   :  { %v130_v10 = vpop.f32.mrf.mxu0 }
  0xd0   :  { %v91_v12 = vmax.f32 %v87_v9, 0.0 }
  0xd2   :  { %v118_v13 = vpack.c.bf16 %v91_v12, %v90_v11 }
  0xd4   :  { %119 = vst [vmem:[%s176_s3] sm:$0xff] %v118_v13  }

// kernel: crossformers_forward.31
= control target key start
LH: loop header
LB: loop body
LE: loop exit
PB: predicated region body
PF: predicated region fallthrough
CT: control target
= control target key end

     0   :  { %v200_v0 = vmov 0.0   ;;  %vm201_vm0 = vmmov 0   ;;  %vm54_vm1 = vcmask 261120   ;;  %vm158_vm2 = vcmask 257024   ;;  %s269_s1 = inlined_call_operand.vmem [shape: bf16[32,32], index: 1, kind: input, shape index: {}]   ;;  %s270_s0 = inlined_call_operand.vmem [shape: bf16[16,32], index: 0, kind: input, shape index: {}]   ;;  %s271_s3 = inlined_call_operand.vmem [shape: bf16[16,32], index: 3, kind: input, shape index: {}]   ;;  %s272_s2 = inlined_call_operand.vmem [shape: f32[1,32], index: 2, kind: input, shape index: {}]   ;;  %s273_s4 = inlined_call_operand.vmem [shape: f32[1,32], index: 4, kind: input, shape index: {}]   ;;  %s274_s5 = inlined_call_operand.vmem [shape: f32[1,32], index: 5, kind: input, shape index: {}]   ;;  %s275_s6 = inlined_call_operand.vmem [shape: bf16[16,32], index: 6, kind: output, shape index: {}]  }
   0x1   :  { %183 = vmatprep.subr.bf16.mxu0 %v200_v0  ;;  %v193_v1 = vld [vmem:[%s269_s1 + $0x8] sm:$0xff]   ;;  %187 = vmatprep.mubr.msk.bf16.mxu0 %vm201_vm0, %v200_v0  ;;  %v194_v2 = vld [vmem:[%s269_s1] sm:$0xff]  }
   0x2   :  { %184 = vmatpush3.bf16.msra.mxu0 %v193_v1  ;;  %v195_v3 = vld [vmem:[%s270_s0] sm:$0xff]  }
   0x3   :  { %185 = vmatprep.subr.bf16.mxu0 %v200_v0  ;;  %v177_v4 = vld [vmem:[%s271_s3] sm:$0xff]  }
   0x4   :  { %v165_v5 = vld [vmem:[%s272_s2] ss:$0 sm:$0xff]  ;;  %v178_v6 = vunpack.c.l.bf16 %v177_v4  ;;  %v179_v11 = vunpack.c.h.bf16 %v177_v4 }
   0x5   :  { %v170_v35 = vld [vmem:[%s273_s4] ss:$0 sm:$0xff] }
   0x6   :  { %186 = vmatpush3.bf16.msra.mxu0 %v194_v2  ;;  %v171_v37 = vld [vmem:[%s274_s5] ss:$0 sm:$0xff] }
   0x9   :  { %188 = vmatmul.mubr.msk.bf16.vlgmr.msra.gmra.mxu0 %vm54_vm1, %v195_v3 }
  0xc9   :  { %v92_v7 = vpop.f32.mrf.mxu0 }
  0xca   :  { %v93_v8 = vadd.f32 %v165_v5, %v92_v7 }
  0xcb   :  { %v189_v9 = vpop.f32.mrf.mxu0 }
  0xcc   :  { %v103_v10 = vadd.f32 %v178_v6, %v93_v8 }
  0xcd   :  { %v95_v12 = vpop.f32.mrf.mxu0 }
  0xce   :  { %v96_v13 = vadd.f32 %v165_v5, %v95_v12  ;;  %v105_v14 = vsel %vm54_vm1, %v103_v10, 0.0 }
  0xcf   :  { %106 = vadd.xlane.f32.xlu0 %v105_v14  ;;  %v190_v15 = vpop.f32.mrf.mxu0 }
  0xd0   :  { %v104_v16 = vadd.f32 %v179_v11, %v96_v13 }
  0xd2   :  { %v108_v17 = vsel %vm54_vm1, %v104_v16, 0.0 }
  0xd3   :  { %109 = vadd.xlane.f32.xlu0 %v108_v17 }
 0x158   :  { %v107_v18 = vpop.xlane.xlu0 %106 }
 0x159   :  { %v112_v19 = vmul.f32 0.03125, %v107_v18 }
 0x15b   :  { %v114_v20 = vsub.f32 %v103_v10, %v112_v19 }
 0x15c   :  { %v110_v21 = vpop.xlane.xlu0 %109 }
 0x15d   :  { %v113_v22 = vmul.f32 0.03125, %v110_v21  ;;  %v116_v23 = vmul.f32 %v114_v20, %v114_v20 }
 0x15f   :  { %v115_v24 = vsub.f32 %v104_v16, %v113_v22  ;;  %v118_v25 = vsel %vm54_vm1, %v116_v23, 0.0 }
 0x160   :  { %119 = vadd.xlane.f32.xlu1 %v118_v25 }
 0x161   :  { %v117_v26 = vmul.f32 %v115_v24, %v115_v24 }
 0x163   :  { %v121_v27 = vsel %vm54_vm1, %v117_v26, 0.0 }
 0x164   :  { %122 = vadd.xlane.f32.xlu1 %v121_v27 }
 0x1e9   :  { %v120_v28 = vpop.xlane.xlu1 %119 }
 0x1ea   :  { %v124_v29 = vmul.f32 0.03125, %v120_v28 }
 0x1ec   :  { %v126_v30 = vadd.f32 1e-05, %v124_v29 }
 0x1ed   :  { %v123_v31 = vpop.xlane.xlu1 %122 }
 0x1ee   :  { %196 = vrsqrt.f32 %v126_v30  ;;  %v125_v32 = vmul.f32 0.03125, %v123_v31 }
 0x1f0   :  { %v127_v33 = vadd.f32 1e-05, %v125_v32 }
 0x1f2   :  { %198 = vrsqrt.f32 %v127_v33 }
 0x1fb   :  { %v197_v34 = vpop.eup %196 }
 0x1fc   :  { %v130_v36 = vmul.f32 %v197_v34, %v114_v20 }
 0x1fe   :  { %v139_v38 = vmul.f32 %v170_v35, %v130_v36 }
 0x1ff   :  { %v199_v39 = vpop.eup %198 }
 0x200   :  { %v148_v40 = vadd.f32 %v171_v37, %v139_v38  ;;  %v131_v41 = vmul.f32 %v199_v39, %v115_v24 }
 0x202   :  { %v174_v42 = vpack.c.bf16 %v148_v40, %v148_v40  ;;  %v140_v43 = vmul.f32 %v170_v35, %v131_v41 }
 0x204   :  { %159 = vst.msk [vmem:[%s275_s6] sm:$0xf] %vm158_vm2, %v174_v42  ;;  %v149_v44 = vadd.f32 %v171_v37, %v140_v43 }
 0x206   :  { %v175_v45 = vpack.c.bf16 %v149_v44, %v149_v44 }
 0x208   :  { %160 = vst.msk [vmem:[%s275_s6 + $0x4] sm:$0xf] %vm158_vm2, %v175_v45 }

// kernel: crossformers_forward.33
= control target key start
LH: loop header
LB: loop body
LE: loop exit
PB: predicated region body
PF: predicated region fallthrough
CT: control target
= control target key end

     0   :  { %v275_v0 = vmov 0.0   ;;  %vm276_vm0 = vmmov 0   ;;  %vm150_vm1 = vcmask 261120   ;;  %vm204_vm2 = vcmask 257024   ;;  %s361_s1 = inlined_call_operand.vmem [shape: bf16[128,32], index: 1, kind: input, shape index: {}]   ;;  %s362_s0 = inlined_call_operand.vmem [shape: bf16[16,128], index: 0, kind: input, shape index: {}]   ;;  %s363_s3 = inlined_call_operand.vmem [shape: bf16[16,32], index: 3, kind: input, shape index: {}]   ;;  %s364_s2 = inlined_call_operand.vmem [shape: f32[1,32], index: 2, kind: input, shape index: {}]   ;;  %s365_s4 = inlined_call_operand.vmem [shape: f32[1,32], index: 4, kind: input, shape index: {}]   ;;  %s366_s5 = inlined_call_operand.vmem [shape: f32[1,32], index: 5, kind: input, shape index: {}]   ;;  %s367_s6 = inlined_call_operand.vmem [shape: bf16[16,32], index: 6, kind: output, shape index: {}]  }
   0x1   :  { %240 = vmatprep.subr.bf16.mxu0 %v275_v0  ;;  %v262_v1 = vld [vmem:[%s361_s1 + $0x38] sm:$0xff]   ;;  %256 = vmatprep.mubr.msk.bf16.mxu0 %vm276_vm0, %v275_v0  ;;  %v263_v2 = vld [vmem:[%s361_s1 + $0x30] sm:$0xff]   ;;  %v264_v3 = vld [vmem:[%s361_s1 + $0x28] sm:$0xff]  }
   0x2   :  { %241 = vmatpush3.bf16.msra.mxu0 %v262_v1  ;;  %v265_v4 = vld [vmem:[%s361_s1 + $0x20] sm:$0xff]   ;;  %v266_v5 = vld [vmem:[%s361_s1 + $0x18] sm:$0xff]   ;;  %v267_v6 = vld [vmem:[%s361_s1 + $0x10] sm:$0xff]  }
   0x3   :  { %242 = vmatprep.subr.bf16.mxu0 %v275_v0  ;;  %v268_v7 = vld [vmem:[%s361_s1 + $0x8] sm:$0xff]   ;;  %v269_v8 = vld [vmem:[%s361_s1] sm:$0xff]  }
   0x4   :  { %v270_v9 = vld [vmem:[%s362_s0] sm:$0xff]  }
   0x5   :  { %v228_v10 = vld [vmem:[%s363_s3] sm:$0xff]  }
   0x6   :  { %243 = vmatpush3.bf16.msra.mxu0 %v263_v2  ;;  %v211_v11 = vld [vmem:[%s364_s2] ss:$0 sm:$0xff]  ;;  %v229_v12 = vunpack.c.l.bf16 %v228_v10  ;;  %v230_v17 = vunpack.c.h.bf16 %v228_v10 }
   0x7   :  { %244 = vmatprep.subr.bf16.mxu0 %v275_v0  ;;  %v221_v41 = vld [vmem:[%s365_s4] ss:$0 sm:$0xff] }
   0x8   :  { %v222_v43 = vld [vmem:[%s366_s5] ss:$0 sm:$0xff] }
   0xa   :  { %245 = vmatpush3.bf16.msra.mxu0 %v264_v3 }
   0xb   :  { %246 = vmatprep.subr.bf16.mxu0 %v275_v0 }
   0xe   :  { %247 = vmatpush3.bf16.msra.mxu0 %v265_v4 }
   0xf   :  { %248 = vmatprep.subr.bf16.mxu0 %v275_v0 }
  0x12   :  { %249 = vmatpush3.bf16.msra.mxu0 %v266_v5 }
  0x13   :  { %250 = vmatprep.subr.bf16.mxu0 %v275_v0 }
  0x16   :  { %251 = vmatpush3.bf16.msra.mxu0 %v267_v6 }
  0x17   :  { %252 = vmatprep.subr.bf16.mxu0 %v275_v0 }
  0x1a   :  { %253 = vmatpush3.bf16.msra.mxu0 %v268_v7 }
  0x1b   :  { %254 = vmatprep.subr.bf16.mxu0 %v275_v0 }
  0x1e   :  { %255 = vmatpush3.bf16.msra.mxu0 %v269_v8 }
  0x21   :  { %257 = vmatmul.mubr.bf16.vlgmr.msra.gmra.mxu0 %v270_v9 }
  0xe1   :  { %v137_v13 = vpop.f32.mrf.mxu0 }
  0xe2   :  { %v138_v14 = vadd.f32 %v211_v11, %v137_v13 }
  0xe3   :  { %v258_v15 = vpop.f32.mrf.mxu0 }
  0xe4   :  { %v148_v16 = vadd.f32 %v229_v12, %v138_v14 }
  0xe5   :  { %v140_v18 = vpop.f32.mrf.mxu0 }
  0xe6   :  { %v141_v19 = vadd.f32 %v211_v11, %v140_v18  ;;  %v151_v20 = vsel %vm150_vm1, %v148_v16, 0.0 }
  0xe7   :  { %152 = vadd.xlane.f32.xlu0 %v151_v20  ;;  %v259_v21 = vpop.f32.mrf.mxu0 }
  0xe8   :  { %v149_v22 = vadd.f32 %v230_v17, %v141_v19 }
  0xea   :  { %v154_v23 = vsel %vm150_vm1, %v149_v22, 0.0 }
  0xeb   :  { %155 = vadd.xlane.f32.xlu0 %v154_v23 }
 0x170   :  { %v153_v24 = vpop.xlane.xlu0 %152 }
 0x171   :  { %v158_v25 = vmul.f32 0.03125, %v153_v24 }
 0x173   :  { %v160_v26 = vsub.f32 %v148_v16, %v158_v25 }
 0x174   :  { %v156_v27 = vpop.xlane.xlu0 %155 }
 0x175   :  { %v159_v28 = vmul.f32 0.03125, %v156_v27  ;;  %v162_v29 = vmul.f32 %v160_v26, %v160_v26 }
 0x177   :  { %v161_v30 = vsub.f32 %v149_v22, %v159_v28  ;;  %v164_v31 = vsel %vm150_vm1, %v162_v29, 0.0 }
 0x178   :  { %165 = vadd.xlane.f32.xlu1 %v164_v31 }
 0x179   :  { %v163_v32 = vmul.f32 %v161_v30, %v161_v30 }
 0x17b   :  { %v167_v33 = vsel %vm150_vm1, %v163_v32, 0.0 }
 0x17c   :  { %168 = vadd.xlane.f32.xlu1 %v167_v33 }
 0x201   :  { %v166_v34 = vpop.xlane.xlu1 %165 }
 0x202   :  { %v170_v35 = vmul.f32 0.03125, %v166_v34 }
 0x204   :  { %v172_v36 = vadd.f32 1e-05, %v170_v35 }
 0x205   :  { %v169_v37 = vpop.xlane.xlu1 %168 }
 0x206   :  { %271 = vrsqrt.f32 %v172_v36  ;;  %v171_v38 = vmul.f32 0.03125, %v169_v37 }
 0x208   :  { %v173_v39 = vadd.f32 1e-05, %v171_v38 }
 0x20a   :  { %273 = vrsqrt.f32 %v173_v39 }
 0x213   :  { %v272_v40 = vpop.eup %271 }
 0x214   :  { %v176_v42 = vmul.f32 %v272_v40, %v160_v26 }
 0x216   :  { %v185_v44 = vmul.f32 %v221_v41, %v176_v42 }
 0x217   :  { %v274_v45 = vpop.eup %273 }
 0x218   :  { %v194_v46 = vadd.f32 %v222_v43, %v185_v44  ;;  %v177_v47 = vmul.f32 %v274_v45, %v161_v30 }
 0x21a   :  { %v225_v48 = vpack.c.bf16 %v194_v46, %v194_v46  ;;  %v186_v49 = vmul.f32 %v221_v41, %v177_v47 }
 0x21c   :  { %205 = vst.msk [vmem:[%s367_s6] sm:$0xf] %vm204_vm2, %v225_v48  ;;  %v195_v50 = vadd.f32 %v222_v43, %v186_v49 }
 0x21e   :  { %v226_v51 = vpack.c.bf16 %v195_v50, %v195_v50 }
 0x220   :  { %206 = vst.msk [vmem:[%s367_s6 + $0x4] sm:$0xf] %vm204_vm2, %v226_v51 }

// kernel: crossformers_forward.30
= control target key start
LH: loop header
LB: loop body
LE: loop exit
PB: predicated region body
PF: predicated region fallthrough
CT: control target
= control target key end

     0   :  { %s3861_s6 = smov 0   ;;  %s5518_s0 = inlined_call_operand.vmem [shape: bf16[2,8,128], index: 0, kind: input, shape index: {}]   ;;  %s5519_s1 = inlined_call_operand.vmem [shape: bf16[2,8,32], index: 1, kind: output, shape index: {}]  }
   0x1 LB: > { %s3638_s7 = sadd.s32 4294967295, %s3838_s6   ;;  %p3642_p0 = scmp.ge.s32.totalorder %s3838_s6, 1  ;;  %s3838_s6 = sphi %s3861_s6, %s11_s6  }
   0x2   : > { %p86_p1 = scmp.lt.s32.totalorder %s3838_s6, 3 }
   0x4   : > { %p87_p2 = pnand %p3642_p0, %p86_p1 }
   0x6   : > { %90 = sbr.rel (%p87_p2) target bundleno = 2073 (0x819), region = 24 }
   0xb   : > { %p104_p3 = scmp.lt.s32.totalorder %s3638_s7, 1  ;;  %v119_v0 = vlaneseq  ;;  %s3840_s12 = smov 96   ;;  %v3841_v6 = vmov 1966171168   ;;  %vm215_vm0 = vcmask 31744   ;;  %vm290_vm1 = vcmask 1041409  }
   0xc   : > { %v117_v7 = vunpack.c.l.s4 %v3841_v6  ;;  %s3842_s13 = smov 124   ;;  %s3843_s14 = smov 120   ;;  %vm292_vm2 = vcmask 1042434   ;;  %vm294_vm3 = vcmask 1043459   ;;  %vm296_vm4 = vcmask 1044484  }
   0xd   : > { %s5686_s7 = smov (!%p104_p3, %s3638_s7), 1  ;;  %v3871_v1 = vshrl.u32 %v119_v0, 7  ;;  %v257_v2 = vand.u32 127, %v119_v0  ;;  %s3844_s15 = smov 116   ;;  %vm298_vm5 = vcmask 1045509   ;;  %vm300_vm6 = vcmask 1046534  }
   0xe   : > { %s3643_s8 = sshll.u32 %s5686_s7, 2  ;;  %v118_v8 = vunpack.c.0.s8 %v117_v7  ;;  %s3845_s16 = smov 112   ;;  %vm302_vm7 = vcmask 1047559   ;;  %vm305_vm8 = vcmask 64512   ;;  %vm547_vm9 = vcmask 556544  }
   0xf   : > { %v3875_v3 = vsub.s32 %v257_v2, %v3871_v1  ;;  %s107_s11 = scalar_lea.vmem %s5518_s0, %s3643_s8  ;;  %v3890_v15 = vsub.s32 0, %v3871_v1  ;;  %s3847_s17 = smov 100   ;;  %vm1761_vm10 = vcmask 654944   ;;  %vm957_vm11 = vcmask 589344  }
  0x10   : > { %v112_v4 = vld [vmem:[%s107_s11] sm:$0xf]  ;;  %v121_v9 = vsub.s32 %v118_v8, %v3871_v1  ;;  %s3848_s18 = smov 104   ;;  %s3849_s19 = smov 108   ;;  %vm1359_vm12 = vcmask 622144   ;;  %vm2163_vm13 = vcmask 687744  }
  0x11   : > { %v3882_v5 = vunpack.c.l.bf16 %v112_v4  ;;  %vm2565_vm14 = vcmask 720544   ;;  %s3850_s20 = smov 64   ;;  %vm2967_vm15 = vcmask 753344   ;;  %s111_s23 = scalar_lea.vmem %s5519_s1, %s3643_s8 }
  0x13   : > { %5564 = vst [vmem:[#allocation2_spill] sm:$0xff] %v3882_v5  ;;  %204 = vrot.lane.b32.xlu0 %v3882_v5, %s3840_s12  ;;  %v115_v10 = vcombine.high %v3882_v5, %v3882_v5  ;;  %v122_v11 = vrot.slane %v3882_v5, %v121_v9 }
  0x15   : > { %v129_v12 = vrot.slane %v115_v10, %v121_v9  ;;  %v130_v13 = vcombine.high %v122_v11, %v122_v11  ;;  %v138_v14 = vrot.slane %v122_v11, %v121_v9 }
  0x17   : > { %v131_v16 = vcombine.high %v129_v12, %v129_v12  ;;  %v152_v17 = vrot.slane %v130_v13, %v121_v9  ;;  %v160_v18 = vcombine.high %v138_v14, %v138_v14  ;;  %v167_v20 = vrot.slane %v138_v14, %v3890_v15 }
  0x18   : > { %v145_v29 = vrot.slane %v129_v12, %v121_v9 }
  0x19   : > { %v159_v19 = vrot.slane %v131_v16, %v121_v9  ;;  %v171_v21 = vrot.slane %v152_v17, %v3890_v15  ;;  %v162_v23 = vcombine.high %v152_v17, %v152_v17  ;;  %v175_v24 = vrot.slane %v160_v18, %v3890_v15 }
  0x1a   : > { %v161_v34 = vcombine.high %v145_v29, %v145_v29  ;;  %v183_v35 = vrot.slane %v145_v29, %v3890_v15 }
  0x1b   : > { %v163_v25 = vcombine.high %v159_v19, %v159_v19  ;;  %v187_v26 = vrot.slane %v159_v19, %v3890_v15  ;;  %v179_v30 = vrot.slane %v162_v23, %v3890_v15 }
  0x1c   : > { %v191_v38 = vrot.slane %v161_v34, %v3890_v15 }
  0x1d   : > { %v195_v31 = vrot.slane %v163_v25, %v3890_v15 }
  0x85   : > { %v205_v22 = vpop.permute.xlu0 %204 }
  0x86   : > { %v3896_v27 = vmul.f32 %v205_v22, %v167_v20  ;;  %v3898_v28 = vmul.f32 %v205_v22, %v171_v21  ;;  %v3904_v32 = vmul.f32 %v205_v22, %v175_v24  ;;  %v3906_v33 = vmul.f32 %v205_v22, %v187_v26 }
  0x87   : > { %v3911_v36 = vmul.f32 %v205_v22, %v179_v30  ;;  %v3913_v37 = vmul.f32 %v205_v22, %v195_v31  ;;  %v3918_v39 = vmul.f32 %v205_v22, %v183_v35  ;;  %v3922_v40 = vmul.f32 %v205_v22, %v191_v38 }
  0x88   : > { %612 = vrot.lane.b32.xlu1 %v3896_v27, %s3842_s13  ;;  %614 = vrot.lane.b32.xlu0 %v3898_v28, %s3842_s13  ;;  %v219_v41 = vsel %vm215_vm0, %v3898_v28, 0.0  ;;  %v222_v42 = vsel %vm215_vm0, %v3904_v32, 0.0  ;;  %v231_v45 = vsel %vm215_vm0, %v3906_v33, 0.0  ;;  %v216_v48 = vsel %vm215_vm0, %v3896_v27, 0.0 }
  0x89   : > { %v225_v43 = vsel %vm215_vm0, %v3911_v36, 0.0  ;;  %v228_v44 = vsel %vm215_vm0, %v3918_v39, 0.0  ;;  %v234_v46 = vsel %vm215_vm0, %v3922_v40, 0.0  ;;  %v237_v47 = vsel %vm215_vm0, %v3913_v37, 0.0 }
  0x8c   : > { %616 = vrot.lane.b32.xlu0 %v3904_v32, %s3842_s13  ;;  %622 = vrot.lane.b32.xlu1 %v3906_v33, %s3842_s13 }
  0x90   : > { %618 = vrot.lane.b32.xlu0 %v3911_v36, %s3842_s13  ;;  %626 = vrot.lane.b32.xlu1 %v3913_v37, %s3842_s13 }
  0x94   : > { %620 = vrot.lane.b32.xlu0 %v3918_v39, %s3842_s13  ;;  %1016 = vrot.lane.b32.xlu1 %v3898_v28, %s3843_s14 }
  0x98   : > { %624 = vrot.lane.b32.xlu0 %v3922_v40, %s3842_s13  ;;  %1028 = vrot.lane.b32.xlu1 %v3913_v37, %s3843_s14 }
  0x9c   : > { %1014 = vrot.lane.b32.xlu0 %v3896_v27, %s3843_s14  ;;  %1418 = vrot.lane.b32.xlu1 %v3898_v28, %s3844_s15 }
  0xa0   : > { %1018 = vrot.lane.b32.xlu0 %v3904_v32, %s3843_s14  ;;  %1428 = vrot.lane.b32.xlu1 %v3922_v40, %s3844_s15 }
  0xa4   : > { %1020 = vrot.lane.b32.xlu0 %v3911_v36, %s3843_s14 }
  0xa8   : > { %1022 = vrot.lane.b32.xlu0 %v3918_v39, %s3843_s14 }
  0xac   : > { %1024 = vrot.lane.b32.xlu0 %v3906_v33, %s3843_s14 }
  0xb0   : > { %1026 = vrot.lane.b32.xlu0 %v3922_v40, %s3843_s14 }
  0xb4   : > { %1416 = vrot.lane.b32.xlu0 %v3896_v27, %s3844_s15 }
  0xb8   : > { %1420 = vrot.lane.b32.xlu0 %v3904_v32, %s3844_s15 }
  0xbc   : > { %1422 = vrot.lane.b32.xlu0 %v3911_v36, %s3844_s15 }
  0xc0   : > { %1424 = vrot.lane.b32.xlu0 %v3918_v39, %s3844_s15 }
  0xc4   : > { %1426 = vrot.lane.b32.xlu0 %v3906_v33, %s3844_s15  ;;  %220 = vadd.xlane.f32.xlu1 %v219_v41 }
  0xc8   : > { %1430 = vrot.lane.b32.xlu0 %v3913_v37, %s3844_s15  ;;  %223 = vadd.xlane.f32.xlu1 %v222_v42 }
  0xcc   : > { %226 = vadd.xlane.f32.xlu1 %v225_v43 }
  0xd0   : > { %229 = vadd.xlane.f32.xlu1 %v228_v44 }
  0xd4   : > { %232 = vadd.xlane.f32.xlu1 %v231_v45 }
  0xd8   : > { %235 = vadd.xlane.f32.xlu1 %v234_v46 }
  0xdc   : > { %238 = vadd.xlane.f32.xlu1 %v237_v47 }
  0xe7   : > { %217 = vadd.xlane.f32.xlu0 %v216_v48 }
  0xfa   : > { %v613_v49 = vpop.permute.xlu1 %612  ;;  %v615_v50 = vpop.permute.xlu0 %614 }
  0xfb   : > { %v636_v51 = vsel %vm215_vm0, %v613_v49, 0.0  ;;  %v639_v52 = vsel %vm215_vm0, %v615_v50, 0.0 }
  0xfc   : > { %637 = vadd.xlane.f32.xlu0 %v636_v51  ;;  %640 = vadd.xlane.f32.xlu1 %v639_v52 }
  0xfe   : > { %v617_v53 = vpop.permute.xlu0 %616  ;;  %v623_v54 = vpop.permute.xlu1 %622 }
  0xff   : > { %v642_v55 = vsel %vm215_vm0, %v617_v53, 0.0  ;;  %v651_v56 = vsel %vm215_vm0, %v623_v54, 0.0 }
 0x100   : > { %643 = vadd.xlane.f32.xlu0 %v642_v55  ;;  %652 = vadd.xlane.f32.xlu1 %v651_v56 }
 0x102   : > { %v619_v57 = vpop.permute.xlu0 %618  ;;  %v627_v58 = vpop.permute.xlu1 %626 }
 0x103   : > { %v645_v59 = vsel %vm215_vm0, %v619_v57, 0.0  ;;  %v657_v60 = vsel %vm215_vm0, %v627_v58, 0.0 }
 0x104   : > { %646 = vadd.xlane.f32.xlu0 %v645_v59  ;;  %658 = vadd.xlane.f32.xlu1 %v657_v60 }
 0x106   : > { %v621_v61 = vpop.permute.xlu0 %620  ;;  %v1017_v62 = vpop.permute.xlu1 %1016 }
 0x107   : > { %v648_v63 = vsel %vm215_vm0, %v621_v61, 0.0  ;;  %v1041_v0 = vsel %vm215_vm0, %v1017_v62, 0.0 }
 0x108   : > { %649 = vadd.xlane.f32.xlu0 %v648_v63  ;;  %1042 = vadd.xlane.f32.xlu1 %v1041_v0 }
 0x10a   : > { %v625_v2 = vpop.permute.xlu0 %624  ;;  %v1029_v14 = vpop.permute.xlu1 %1028 }
 0x10b   : > { %v654_v4 = vsel %vm215_vm0, %v625_v2, 0.0  ;;  %v1059_v19 = vsel %vm215_vm0, %v1029_v14, 0.0 }
 0x10c   : > { %655 = vadd.xlane.f32.xlu0 %v654_v4 }
 0x10e   : > { %v1015_v6 = vpop.permute.xlu0 %1014  ;;  %v1419_v21 = vpop.permute.xlu1 %1418 }
 0x10f   : > { %v1038_v7 = vsel %vm215_vm0, %v1015_v6, 0.0  ;;  %v1443_v23 = vsel %vm215_vm0, %v1419_v21, 0.0 }
 0x110   : > { %1039 = vadd.xlane.f32.xlu0 %v1038_v7 }
 0x112   : > { %v1019_v8 = vpop.permute.xlu0 %1018  ;;  %v1429_v35 = vpop.permute.xlu1 %1428 }
 0x113   : > { %v1044_v9 = vsel %vm215_vm0, %v1019_v8, 0.0  ;;  %v1458_v41 = vsel %vm215_vm0, %v1429_v35, 0.0 }
 0x114   : > { %1045 = vadd.xlane.f32.xlu0 %v1044_v9 }
 0x116   : > { %v1021_v10 = vpop.permute.xlu0 %1020 }
 0x117   : > { %v1047_v11 = vsel %vm215_vm0, %v1021_v10, 0.0 }
 0x118   : > { %1048 = vadd.xlane.f32.xlu0 %v1047_v11 }
 0x11a   : > { %v1023_v12 = vpop.permute.xlu0 %1022 }
 0x11b   : > { %v1050_v13 = vsel %vm215_vm0, %v1023_v12, 0.0 }
 0x11c   : > { %1051 = vadd.xlane.f32.xlu1 %v1050_v13 }
 0x11e   : > { %v1025_v16 = vpop.permute.xlu0 %1024 }
 0x11f   : > { %v1053_v17 = vsel %vm215_vm0, %v1025_v16, 0.0 }
 0x120   : > { %1054 = vadd.xlane.f32.xlu0 %v1053_v17 }
 0x122   : > { %v1027_v18 = vpop.permute.xlu0 %1026 }
 0x123   : > { %v1056_v20 = vsel %vm215_vm0, %v1027_v18, 0.0 }
 0x124   : > { %1060 = vadd.xlane.f32.xlu0 %v1059_v19  ;;  %1057 = vadd.xlane.f32.xlu1 %v1056_v20 }
 0x126   : > { %v1417_v22 = vpop.permute.xlu0 %1416 }
 0x127   : > { %v1440_v24 = vsel %vm215_vm0, %v1417_v22, 0.0 }
 0x128   : > { %1444 = vadd.xlane.f32.xlu0 %v1443_v23  ;;  %1441 = vadd.xlane.f32.xlu1 %v1440_v24 }
 0x12a   : > { %v1421_v25 = vpop.permute.xlu0 %1420 }
 0x12b   : > { %v1446_v26 = vsel %vm215_vm0, %v1421_v25, 0.0 }
 0x12c   : > { %1447 = vadd.xlane.f32.xlu0 %v1446_v26 }
 0x12e   : > { %v1423_v29 = vpop.permute.xlu0 %1422 }
 0x12f   : > { %v1449_v30 = vsel %vm215_vm0, %v1423_v29, 0.0 }
 0x130   : > { %1450 = vadd.xlane.f32.xlu1 %v1449_v30 }
 0x132   : > { %v1425_v31 = vpop.permute.xlu0 %1424 }
 0x133   : > { %v1452_v34 = vsel %vm215_vm0, %v1425_v31, 0.0 }
 0x134   : > { %1453 = vadd.xlane.f32.xlu0 %v1452_v34 }
 0x136   : > { %v1427_v38 = vpop.permute.xlu0 %1426 }
 0x137   : > { %v1455_v42 = vsel %vm215_vm0, %v1427_v38, 0.0 }
 0x138   : > { %1459 = vadd.xlane.f32.xlu0 %v1458_v41  ;;  %1456 = vadd.xlane.f32.xlu1 %v1455_v42 }
 0x13a   : > { %v1431_v43 = vpop.permute.xlu0 %1430 }
 0x13b   : > { %v1461_v45 = vsel %vm215_vm0, %v1431_v43, 0.0 }
 0x149   : > { %1820 = vrot.lane.b32.xlu1 %v3898_v28, %s3845_s16 }
 0x14d   : > { %1822 = vrot.lane.b32.xlu1 %v3904_v32, %s3845_s16  ;;  %v221_v44 = vpop.xlane.xlu1 %220 }
 0x14e   : > { %1818 = vrot.lane.b32.xlu0 %v3896_v27, %s3845_s16  ;;  %v4000_v59 = vmul.f32 0.5, %v221_v44 }
 0x150   : > { %v265_v0 = vrot.slane %v4000_v59, %v3875_v3 }
 0x151   : > { %1824 = vrot.lane.b32.xlu1 %v3911_v36, %s3845_s16  ;;  %v224_v46 = vpop.xlane.xlu1 %223 }
 0x152   : > { %1830 = vrot.lane.b32.xlu0 %v3922_v40, %s3845_s16  ;;  %v4004_v61 = vmul.f32 0.5, %v224_v46 }
 0x154   : > { %v269_v6 = vrot.slane %v4004_v61, %v3875_v3 }
 0x155   : > { %v227_v47 = vpop.xlane.xlu1 %226 }
 0x156   : > { %v4012_v2 = vmul.f32 0.5, %v227_v47 }
 0x158   : > { %v273_v11 = vrot.slane %v4012_v2, %v3875_v3 }
 0x159   : > { %v230_v49 = vpop.xlane.xlu1 %229 }
 0x15a   : > { %v4017_v7 = vmul.f32 0.5, %v230_v49 }
 0x15c   : > { %v277_v14 = vrot.slane %v4017_v7, %v3875_v3 }
 0x15d   : > { %v233_v51 = vpop.xlane.xlu1 %232 }
 0x15e   : > { %v4026_v12 = vmul.f32 0.5, %v233_v51 }
 0x160   : > { %v281_v20 = vrot.slane %v4026_v12, %v3875_v3 }
 0x161   : > { %v236_v54 = vpop.xlane.xlu1 %235 }
 0x162   : > { %v4031_v16 = vmul.f32 0.5, %v236_v54 }
 0x164   : > { %v285_v23 = vrot.slane %v4031_v16, %v3875_v3 }
 0x165   : > { %v239_v57 = vpop.xlane.xlu1 %238 }
 0x166   : > { %v4040_v21 = vmul.f32 0.5, %v239_v57 }
 0x168   : > { %v289_v29 = vrot.slane %v4040_v21, %v3875_v3 }
 0x170   : > { %v218_v48 = vpop.xlane.xlu0 %217 }
 0x171   : > { %v3996_v56 = vmul.f32 0.5, %v218_v48 }
 0x173   : > { %v261_v60 = vrot.slane %v3996_v56, %v3875_v3 }
 0x175   : > { %1462 = vadd.xlane.f32.xlu1 %v1461_v45  ;;  %v291_v4 = vsel %vm290_vm1, %v265_v0, %v261_v60 }
 0x176   : > { %v293_v8 = vsel %vm292_vm2, %v269_v6, %v291_v4 }
 0x177   : > { %v295_v13 = vsel %vm294_vm3, %v273_v11, %v293_v8 }
 0x178   : > { %v297_v19 = vsel %vm296_vm4, %v277_v14, %v295_v13 }
 0x179   : > { %v299_v22 = vsel %vm298_vm5, %v281_v20, %v297_v19 }
 0x17a   : > { %v301_v26 = vsel %vm300_vm6, %v285_v23, %v299_v22 }
 0x17b   : > { %v303_v31 = vsel %vm302_vm7, %v289_v29, %v301_v26  ;;  %v3846_v26 = vmov 0  }
 0x17c   : > { %v306_v35 = vsel %vm305_vm8, %v303_v31, -inf  ;;  %3667 = vset.pattern.permute.xlu0 %v3846_v26  ;;  %3666 = vset.pattern.permute.xlu1 %v3846_v26 }
 0x185   : > { %v3985_v50 = vpop.xlane.xlu0 %637  ;;  %v4006_v62 = vpop.xlane.xlu1 %640 }
 0x186   : > { %1826 = vrot.lane.b32.xlu1 %v3918_v39, %s3845_s16 }
 0x189   : > { %v3988_v52 = vpop.xlane.xlu0 %643  ;;  %v4020_v9 = vpop.xlane.xlu1 %652 }
 0x18a   : > { %1828 = vrot.lane.b32.xlu1 %v3906_v33, %s3845_s16 }
 0x18d   : > { %v3991_v53 = vpop.xlane.xlu0 %646  ;;  %v4033_v17 = vpop.xlane.xlu1 %658 }
 0x18e   : > { %1832 = vrot.lane.b32.xlu1 %v3913_v37, %s3845_s16 }
 0x191   : > { %v3994_v55 = vpop.xlane.xlu0 %649  ;;  %v1043_v25 = vpop.xlane.xlu1 %1042 }
 0x195   : > { %v3998_v58 = vpop.xlane.xlu0 %655 }
 0x199   : > { %v4008_v63 = vpop.xlane.xlu0 %1039 }
 0x19a   : > { %v4101_v29 = vmul.f32 0.5, %v4008_v63 }
 0x19d   : > { %v4022_v10 = vpop.xlane.xlu0 %1045 }
 0x19e   : > { %v4104_v31 = vmul.f32 0.5, %v4022_v10 }
 0x1a0   : > { %v1089_v63 = vrot.slane %v4104_v31, %v3875_v3 }
 0x1a1   : > { %v4035_v18 = vpop.xlane.xlu0 %1048 }
 0x1a5   : > { %v1052_v34 = vpop.xlane.xlu1 %1051 }
 0x1a9   : > { %v4045_v24 = vpop.xlane.xlu0 %1054 }
 0x1ad   : > { %v4050_v30 = vpop.xlane.xlu0 %1060  ;;  %v1058_v38 = vpop.xlane.xlu1 %1057 }
 0x1ae   : > { %v4122_v10 = vmul.f32 0.5, %v1058_v38  ;;  %v4136_v38 = vmul.f32 0.5, %v4050_v30 }
 0x1b1   : > { %v4054_v41 = vpop.xlane.xlu0 %1444  ;;  %v4056_v42 = vpop.xlane.xlu1 %1441 }
 0x1b2   : > { %307 = vmax.xlane.f32.xlu1 %v306_v35  ;;  %v4108_v35 = vmul.f32 0.5, %v1043_v25 }
 0x1b5   : > { %v4058_v43 = vpop.xlane.xlu0 %1447 }
 0x1b6   : > { %v4198_v26 = vmul.f32 0.5, %v4058_v43 }
 0x1b9   : > { %v4060_v44 = vpop.xlane.xlu1 %1450 }
 0x1bd   : > { %v4062_v45 = vpop.xlane.xlu0 %1453 }
 0x1c1   : > { %v4064_v46 = vpop.xlane.xlu0 %1459  ;;  %v4066_v47 = vpop.xlane.xlu1 %1456 }
 0x1c5   : > { %v1819_v48 = vpop.permute.xlu0 %1818  ;;  %v1821_v49 = vpop.permute.xlu1 %1820 }
 0x1c6   : > { %v1842_v51 = vsel %vm215_vm0, %v1819_v48, 0.0  ;;  %v1845_v54 = vsel %vm215_vm0, %v1821_v49, 0.0  ;;  %v4111_v48 = vmul.f32 0.5, %v4035_v18  ;;  %v4113_v49 = vmul.f32 0.5, %v1052_v34 }
 0x1c7   : > { %1843 = vadd.xlane.f32.xlu0 %v1842_v51  ;;  %1846 = vadd.xlane.f32.xlu1 %v1845_v54  ;;  %v4118_v51 = vmul.f32 0.5, %v4045_v24  ;;  %v1085_v18 = vrot.slane %v4108_v35, %v3875_v3 }
 0x1c8   : > { %v1093_v25 = vrot.slane %v4111_v48, %v3875_v3  ;;  %v1097_v34 = vrot.slane %v4113_v49, %v3875_v3 }
 0x1c9   : > { %v1823_v57 = vpop.permute.xlu1 %1822  ;;  %v1831_v13 = vpop.permute.xlu0 %1830  ;;  %v1101_v54 = vrot.slane %v4118_v51, %v3875_v3 }
 0x1ca   : > { %v1848_v60 = vsel %vm215_vm0, %v1823_v57, 0.0  ;;  %v1860_v19 = vsel %vm215_vm0, %v1831_v13, 0.0  ;;  %v4164_v13 = vmul.f32 0.5, %v3985_v50 }
 0x1cb   : > { %1849 = vadd.xlane.f32.xlu0 %v1848_v60 }
 0x1cd   : > { %v1825_v0 = vpop.permute.xlu1 %1824 }
 0x1ce   : > { %v1851_v4 = vsel %vm215_vm0, %v1825_v0, 0.0 }
 0x1cf   : > { %1852 = vadd.xlane.f32.xlu0 %v1851_v4  ;;  %v1109_v4 = vrot.slane %v4136_v38, %v3875_v3 }
 0x1fe   : > { %v4072_v6 = vpop.xlane.xlu1 %1462 }
 0x202   : > { %v1827_v8 = vpop.permute.xlu1 %1826 }
 0x203   : > { %v1854_v11 = vsel %vm215_vm0, %v1827_v8, 0.0 }
 0x204   : > { %1855 = vadd.xlane.f32.xlu1 %v1854_v11 }
 0x206   : > { %v1829_v14 = vpop.permute.xlu1 %1828 }
 0x207   : > { %v1857_v20 = vsel %vm215_vm0, %v1829_v14, 0.0  ;;  %v4170_v14 = vmul.f32 0.5, %v3988_v52  ;;  %v4187_v52 = vmul.f32 0.5, %v4054_v41  ;;  %v4205_v41 = vmul.f32 0.5, %v4060_v44 }
 0x208   : > { %1861 = vadd.xlane.f32.xlu1 %v1860_v19  ;;  %1858 = vadd.xlane.f32.xlu0 %v1857_v20  ;;  %v4173_v19 = vmul.f32 0.5, %v3991_v53  ;;  %v679_v20 = vrot.slane %v4164_v13, %v3875_v3  ;;  %v4190_v53 = vmul.f32 0.5, %v4056_v42 }
 0x209   : > { %v687_v50 = vrot.slane %v4170_v14, %v3875_v3 }
 0x20a   : > { %v1833_v22 = vpop.permute.xlu1 %1832  ;;  %v1483_v43 = vrot.slane %v4190_v53, %v3875_v3 }
 0x20b   : > { %v1863_v23 = vsel %vm215_vm0, %v1833_v22, 0.0 }
 0x20c   : > { %1864 = vadd.xlane.f32.xlu0 %v1863_v23  ;;  %v4195_v23 = vmul.f32 0.5, %v3998_v58  ;;  %v1487_v58 = vrot.slane %v4187_v52, %v3875_v3 }
 0x20e   : > { %v703_v44 = vrot.slane %v4195_v23, %v3875_v3 }
 0x219   : > { %3026 = vrot.lane.b32.xlu1 %v3898_v28, %s3847_s17 }
 0x21d   : > { %2630 = vrot.lane.b32.xlu1 %v3918_v39, %s3848_s18 }
 0x221   : > { %2232 = vrot.lane.b32.xlu1 %v3922_v40, %s3849_s19 }
 0x222   : > { %2220 = vrot.lane.b32.xlu0 %v3896_v27, %s3849_s19 }
 0x225   : > { %3032 = vrot.lane.b32.xlu1 %v3918_v39, %s3847_s17 }
 0x226   : > { %2222 = vrot.lane.b32.xlu0 %v3898_v28, %s3849_s19 }
 0x229   : > { %2634 = vrot.lane.b32.xlu1 %v3922_v40, %s3848_s18 }
 0x22a   : > { %2224 = vrot.lane.b32.xlu0 %v3904_v32, %s3849_s19 }
 0x22e   : > { %2622 = vrot.lane.b32.xlu0 %v3896_v27, %s3848_s18 }
 0x232   : > { %2624 = vrot.lane.b32.xlu0 %v3898_v28, %s3848_s18  ;;  %v1081_v28 = vrot.slane %v4101_v29, %v3875_v3 }
 0x234   : > { %v1110_v24 = vsel %vm290_vm1, %v1085_v18, %v1081_v28  ;;  %v4209_v18 = vmul.f32 0.5, %v4062_v45  ;;  %v1491_v45 = vrot.slane %v4198_v26, %v3875_v3 }
 0x235   : > { %v1111_v57 = vsel %vm292_vm2, %v1089_v63, %v1110_v24  ;;  %v4202_v63 = vmul.f32 0.5, %v4020_v9 }
 0x236   : > { %2226 = vrot.lane.b32.xlu0 %v3911_v36, %s3849_s19  ;;  %v1112_v60 = vsel %vm294_vm3, %v1093_v25, %v1111_v57  ;;  %v1495_v57 = vrot.slane %v4205_v41, %v3875_v3 }
 0x237   : > { %v1113_v0 = vsel %vm296_vm4, %v1097_v34, %v1112_v60  ;;  %v4217_v34 = vmul.f32 0.5, %v4066_v47  ;;  %v699_v24 = vrot.slane %v4202_v63, %v3875_v3  ;;  %v1499_v47 = vrot.slane %v4209_v18, %v3875_v3 }
 0x238   : > { %v1114_v8 = vsel %vm298_vm5, %v1101_v54, %v1113_v0  ;;  %v4227_v54 = vmul.f32 0.5, %v4033_v17  ;;  %v1512_v60 = vsel %vm290_vm1, %v1487_v58, %v1483_v43 }
 0x239   : > { %v1503_v0 = vrot.slane %v4217_v34, %v3875_v3 }
 0x23a   : > { %2626 = vrot.lane.b32.xlu0 %v3904_v32, %s3848_s18 }
 0x23e   : > { %3024 = vrot.lane.b32.xlu0 %v3896_v27, %s3847_s17  ;;  %v1105_v27 = vrot.slane %v4122_v10, %v3875_v3 }
 0x240   : > { %v1115_v30 = vsel %vm300_vm6, %v1105_v27, %v1114_v8  ;;  %v4234_v27 = vmul.f32 0.5, %v4064_v46  ;;  %v1513_v8 = vsel %vm292_vm2, %v1491_v45, %v1512_v60 }
 0x241   : > { %v1116_v11 = vsel %vm302_vm7, %v1109_v4, %v1115_v30  ;;  %v4240_v4 = vmul.f32 0.5, %v4072_v6  ;;  %v1514_v46 = vsel %vm294_vm3, %v1495_v57, %v1513_v8 }
 0x242   : > { %2228 = vrot.lane.b32.xlu0 %v3918_v39, %s3849_s19  ;;  %v1118_v39 = vsel %vm305_vm8, %v1116_v11, -inf  ;;  %v707_v11 = vrot.slane %v4227_v54, %v3875_v3 }
 0x243   : > { %v1511_v6 = vrot.slane %v4240_v4, %v3875_v3 }
 0x246   : > { %2628 = vrot.lane.b32.xlu0 %v3911_v36, %s3848_s18 }
 0x24a   : > { %3028 = vrot.lane.b32.xlu0 %v3904_v32, %s3847_s17  ;;  %v4167_v32 = vmul.f32 0.5, %v4006_v62  ;;  %v691_v62 = vrot.slane %v4173_v19, %v3875_v3 }
 0x24c   : > { %v683_v22 = vrot.slane %v4167_v32, %v3875_v3 }
 0x24d   : > { %1119 = vmax.xlane.f32.xlu1 %v1118_v39  ;;  %v1515_v39 = vsel %vm296_vm4, %v1499_v47, %v1514_v46 }
 0x24e   : > { %2230 = vrot.lane.b32.xlu0 %v3906_v33, %s3849_s19  ;;  %v708_v28 = vsel %vm290_vm1, %v683_v22, %v679_v20  ;;  %v1507_v20 = vrot.slane %v4234_v27, %v3875_v3  ;;  %v4252_v22 = vsub.s32 1, %v3871_v1 }
 0x24f   : > { %v709_v42 = vsel %vm292_vm2, %v687_v50, %v708_v28 }
 0x250   : > { %v710_v25 = vsel %vm294_vm3, %v691_v62, %v709_v42  ;;  %v1516_v62 = vsel %vm298_vm5, %v1503_v0, %v1515_v39 }
 0x251   : > { %v1517_v42 = vsel %vm300_vm6, %v1507_v20, %v1516_v62 }
 0x252   : > { %3030 = vrot.lane.b32.xlu0 %v3911_v36, %s3847_s17  ;;  %v4176_v36 = vmul.f32 0.5, %v3994_v55  ;;  %v1518_v58 = vsel %vm302_vm7, %v1511_v6, %v1517_v42 }
 0x253   : > { %v1520_v43 = vsel %vm305_vm8, %v1518_v58, -inf }
 0x254   : > { %v695_v55 = vrot.slane %v4176_v36, %v3875_v3 }
 0x256   : > { %2632 = vrot.lane.b32.xlu0 %v3906_v33, %s3848_s18  ;;  %v711_v9 = vsel %vm296_vm4, %v695_v55, %v710_v25  ;;  %v4258_v55 = vpop.xlane.xlu1 %307 }
 0x257   : > { %v712_v17 = vsel %vm298_vm5, %v699_v24, %v711_v9  ;;  %v317_v25 = vrot.slane %v4258_v55, %v4252_v22 }
 0x258   : > { %v713_v30 = vsel %vm300_vm6, %v703_v44, %v712_v17  ;;  %v1844_v44 = vpop.xlane.xlu0 %1843 }
 0x259   : > { %v714_v50 = vsel %vm302_vm7, %v707_v11, %v713_v30  ;;  %v351_v9 = vsub.f32 %v4000_v59, %v317_v25  ;;  %v4267_v60 = vmul.f32 0.5, %v1844_v44 }
 0x25a   : > { %2234 = vrot.lane.b32.xlu0 %v3913_v37, %s3849_s19  ;;  %v716_v28 = vsel %vm305_vm8, %v714_v50, -inf  ;;  %v1847_v57 = vpop.xlane.xlu1 %1846 }
 0x25b   : > { %v360_v45 = vmul.f32 1.442695, %v351_v9  ;;  %v4269_v0 = vmul.f32 0.5, %v1847_v57  ;;  %v1885_v11 = vrot.slane %v4267_v60, %v3875_v3  ;;  %v313_v9 = vrot.slane %v4258_v55, %v3890_v15 }
 0x25c   : > { %v1850_v24 = vpop.xlane.xlu0 %1849 }
 0x25d   : > { %3688 = vpow2.f32 %v360_v45  ;;  %v4271_v17 = vmul.f32 0.5, %v1850_v24  ;;  %v1889_v59 = vrot.slane %v4269_v0, %v3875_v3 }
 0x25f   : > { %v1893_v39 = vrot.slane %v4271_v17, %v3875_v3  ;;  %v1914_v42 = vsel %vm290_vm1, %v1889_v59, %v1885_v11 }
 0x260   : > { %v1853_v47 = vpop.xlane.xlu0 %1852 }
 0x261   : > { %v4273_v8 = vmul.f32 0.5, %v1853_v47  ;;  %v1915_v44 = vsel %vm292_vm2, %v1893_v39, %v1914_v42 }
 0x263   : > { %v1897_v20 = vrot.slane %v4273_v8, %v3875_v3 }
 0x265   : > { %v1916_v45 = vsel %vm294_vm3, %v1897_v20, %v1915_v44  ;;  %v350_v20 = vsub.f32 %v3996_v56, %v313_v9  ;;  %v4320_v44 = vsub.s32 4, %v3871_v1  ;;  %v4328_v56 = vsub.s32 5, %v3871_v1 }
 0x267   : > { %v329_v9 = vrot.slane %v4258_v55, %v4320_v44 }
 0x279   : > { %717 = vmax.xlane.f32.xlu0 %v716_v28  ;;  %v4287_v28 = vpop.eup %3688 }
 0x27a   : > { %5565 = vst [vmem:[#allocation3_spill] sm:$0xff] %v4287_v28 }
 0x27d   : > { %1521 = vmax.xlane.f32.xlu0 %v1520_v43  ;;  %v4295_v43 = vsub.s32 2, %v3871_v1 }
 0x27f   : > { %v321_v39 = vrot.slane %v4258_v55, %v4295_v43 }
 0x28d   : > { %v1856_v30 = vpop.xlane.xlu1 %1855 }
 0x28e   : > { %v4279_v46 = vmul.f32 0.5, %v1856_v30 }
 0x290   : > { %v1901_v6 = vrot.slane %v4279_v46, %v3875_v3 }
 0x291   : > { %v1859_v50 = vpop.xlane.xlu0 %1858  ;;  %v1862_v62 = vpop.xlane.xlu1 %1861 }
 0x292   : > { %v4290_v25 = vmul.f32 0.5, %v1859_v50  ;;  %v4292_v58 = vmul.f32 0.5, %v1862_v62  ;;  %v1917_v30 = vsel %vm296_vm4, %v1901_v6, %v1916_v45  ;;  %v4311_v50 = vsub.s32 3, %v3871_v1 }
 0x293   : > { %386 = vperm.xlu0 %3667, %v4287_v28  }
 0x294   : > { %v1905_v24 = vrot.slane %v4290_v25, %v3875_v3  ;;  %v1909_v57 = vrot.slane %v4292_v58, %v3875_v3  ;;  %v325_v45 = vrot.slane %v4258_v55, %v4311_v50 }
 0x295   : > { %v1865_v47 = vpop.xlane.xlu0 %1864  ;;  %v4392_v5 = vpop.permute.xlu1 %3026 }
 0x296   : > { %v4307_v11 = vmul.f32 0.5, %v1865_v47  ;;  %v1918_v59 = vsel %vm298_vm5, %v1905_v24, %v1917_v30  ;;  %v352_v24 = vsub.f32 %v4004_v61, %v321_v39  ;;  %v358_v47 = vmul.f32 1.442695, %v350_v20  ;;  %5581 = vst [vmem:[#allocation19_spill] sm:$0xff] %v4392_v5 }
 0x297   : > { %v1919_v42 = vsel %vm300_vm6, %v1909_v57, %v1918_v59  ;;  %v353_v57 = vsub.f32 %v4012_v2, %v325_v45  ;;  %v333_v61 = vrot.slane %v4258_v55, %v4328_v56  ;;  %v354_v39 = vsub.f32 %v4017_v7, %v329_v9 }
 0x298   : > { %v1913_v62 = vrot.slane %v4307_v11, %v3875_v3  ;;  %3690 = vpow2.f32 %v358_v47  ;;  %v362_v59 = vmul.f32 1.442695, %v352_v24 }
 0x299   : > { %v364_v20 = vmul.f32 1.442695, %v353_v57  ;;  %v355_v2 = vsub.f32 %v4026_v12, %v333_v61  ;;  %v366_v45 = vmul.f32 1.442695, %v354_v39  ;;  %v4345_v24 = vpop.permute.xlu0 %2220 }
 0x29a   : > { %v1920_v6 = vsel %vm302_vm7, %v1913_v62, %v1919_v42  ;;  %v4334_v62 = vsub.s32 6, %v3871_v1  ;;  %3692 = vpow2.f32 %v362_v59  ;;  %v4340_v42 = vsub.s32 7, %v3871_v1 }
 0x29b   : > { %v1922_v30 = vsel %vm305_vm8, %v1920_v6, -inf  ;;  %3694 = vpow2.f32 %v364_v20  ;;  %v368_v7 = vmul.f32 1.442695, %v355_v2 }
 0x29c   : > { %1923 = vmax.xlane.f32.xlu1 %v1922_v30  ;;  %v337_v6 = vrot.slane %v4258_v55, %v4334_v62  ;;  %v341_v47 = vrot.slane %v4258_v55, %v4340_v42  ;;  %3696 = vpow2.f32 %v366_v45 }
 0x29d   : > { %3698 = vpow2.f32 %v368_v7  ;;  %v4356_v59 = vpop.permute.xlu0 %2222 }
 0x29e   : > { %v356_v30 = vsub.f32 %v4031_v16, %v337_v6  ;;  %v357_v1 = vsub.f32 %v4040_v21, %v341_v47  ;;  %5568 = vst [vmem:[#allocation6_spill] sm:$0xff] %v4356_v59 }
 0x2a0   : > { %v370_v57 = vmul.f32 1.442695, %v356_v30  ;;  %v372_v55 = vmul.f32 1.442695, %v357_v1 }
 0x2a1   : > { %v4362_v16 = vpop.permute.xlu0 %2224 }
 0x2a2   : > { %3700 = vpow2.f32 %v370_v57 }
 0x2a3   : > { %3702 = vpow2.f32 %v372_v55 }
 0x2a5   : > { %v4350_v9 = vpop.eup %3690  ;;  %v4369_v20 = vpop.permute.xlu0 %2622 }
 0x2a6   : > { %5566 = vst [vmem:[#allocation4_spill] sm:$0xff] %v4350_v9 }
 0x2a7   : > { %v4354_v12 = vpop.eup %3692 }
 0x2a8   : > { %5567 = vst [vmem:[#allocation5_spill] sm:$0xff] %v4354_v12  ;;  %v4359_v61 = vpop.eup %3694 }
 0x2a9   : > { %5569 = vst [vmem:[#allocation7_spill] sm:$0xff] %v4359_v61  ;;  %v4364_v39 = vpop.eup %3696  ;;  %v4375_v2 = vpop.permute.xlu0 %2624 }
 0x2aa   : > { %5570 = vst [vmem:[#allocation8_spill] sm:$0xff] %v4364_v39  ;;  %v4367_v21 = vpop.eup %3698  ;;  %5573 = vst [vmem:[#allocation11_spill] sm:$0xff] %v4375_v2 }
 0x2ab   : > { %5571 = vst [vmem:[#allocation9_spill] sm:$0xff] %v4367_v21 }
 0x2ad   : > { %383 = vperm.xlu1 %3666, %v4350_v9   ;;  %v4380_v47 = vpop.permute.xlu0 %2226 }
 0x2ae   : > { %5575 = vst [vmem:[#allocation13_spill] sm:$0xff] %v4380_v47 }
 0x2af   : > { %v4372_v6 = vpop.eup %3700 }
 0x2b0   : > { %5572 = vst [vmem:[#allocation10_spill] sm:$0xff] %v4372_v6  ;;  %v4377_v45 = vpop.eup %3702 }
 0x2b1   : > { %389 = vperm.xlu1 %3666, %v4354_v12   ;;  %5574 = vst [vmem:[#allocation12_spill] sm:$0xff] %v4377_v45  ;;  %v4382_v30 = vpop.permute.xlu0 %2626 }
 0x2b2   : > { %5576 = vst [vmem:[#allocation14_spill] sm:$0xff] %v4382_v30 }
 0x2b5   : > { %392 = vperm.xlu1 %3666, %v4359_v61   ;;  %v4384_v7 = vpop.permute.xlu0 %3024 }
 0x2b6   : > { %5577 = vst [vmem:[#allocation15_spill] sm:$0xff] %v4384_v7 }
 0x2b9   : > { %395 = vperm.xlu1 %3666, %v4364_v39   ;;  %v4386_v1 = vpop.permute.xlu0 %2228 }
 0x2ba   : > { %5578 = vst [vmem:[#allocation16_spill] sm:$0xff] %v4386_v1 }
 0x2bd   : > { %398 = vperm.xlu1 %3666, %v4367_v21   ;;  %v4388_v57 = vpop.permute.xlu0 %2628  ;;  %v4396_v21 = vpop.permute.xlu1 %2630 }
 0x2be   : > { %5579 = vst [vmem:[#allocation17_spill] sm:$0xff] %v4388_v57  ;;  %5583 = vst [vmem:[#allocation21_spill] sm:$0xff] %v4396_v21 }
 0x2c1   : > { %401 = vperm.xlu1 %3666, %v4372_v6   ;;  %v4390_v55 = vpop.permute.xlu0 %3028 }
 0x2c2   : > { %5580 = vst [vmem:[#allocation18_spill] sm:$0xff] %v4390_v55 }
 0x2c5   : > { %404 = vperm.xlu1 %3666, %v4377_v45   ;;  %v4394_v6 = vpop.permute.xlu0 %2230  ;;  %v4400_v45 = vpop.permute.xlu1 %2232 }
 0x2c6   : > { %5582 = vst [vmem:[#allocation20_spill] sm:$0xff] %v4394_v6  ;;  %5585 = vst [vmem:[#allocation23_spill] sm:$0xff] %v4400_v45 }
 0x2c9   : > { %v4398_v39 = vpop.permute.xlu0 %3030  ;;  %v4404_v12 = vpop.permute.xlu1 %3032 }
 0x2ca   : > { %5584 = vst [vmem:[#allocation22_spill] sm:$0xff] %v4398_v39  ;;  %5587 = vst [vmem:[#allocation25_spill] sm:$0xff] %v4404_v12 }
 0x2cd   : > { %v4402_v61 = vpop.permute.xlu0 %2632  ;;  %v4408_v57 = vpop.permute.xlu1 %2634 }
 0x2ce   : > { %5586 = vst [vmem:[#allocation24_spill] sm:$0xff] %v4402_v61  ;;  %5589 = vst [vmem:[#allocation27_spill] sm:$0xff] %v4408_v57 }
 0x2d1   : > { %v4406_v28 = vpop.permute.xlu0 %2234 }
 0x2d2   : > { %5588 = vst [vmem:[#allocation26_spill] sm:$0xff] %v4406_v28 }
 0x2d6   : > { %v4420_v2 = vpop.xlane.xlu1 %1119 }
 0x302   : > { %v718_v9 = vpop.xlane.xlu0 %717 }
 0x303   : > { %v723_v30 = vrot.slane %v718_v9, %v3890_v15  ;;  %v727_v5 = vrot.slane %v718_v9, %v4252_v22  ;;  %v731_v6 = vrot.slane %v718_v9, %v4295_v43  ;;  %v743_v21 = vrot.slane %v718_v9, %v4328_v56 }
 0x304   : > { %v735_v39 = vrot.slane %v718_v9, %v4311_v50  ;;  %v751_v28 = vrot.slane %v718_v9, %v4340_v42  ;;  %v739_v1 = vrot.slane %v718_v9, %v4320_v44 }
 0x305   : > { %v760_v45 = vsub.f32 %v4164_v13, %v723_v30  ;;  %v761_v61 = vsub.f32 %v4167_v32, %v727_v5  ;;  %v762_v12 = vsub.f32 %v4170_v14, %v731_v6  ;;  %v765_v57 = vsub.f32 %v4202_v63, %v743_v21 }
 0x306   : > { %v763_v7 = vsub.f32 %v4173_v19, %v735_v39  ;;  %v1125_v13 = vrot.slane %v4420_v2, %v3890_v15  ;;  %v767_v5 = vsub.f32 %v4227_v54, %v751_v28  ;;  %v747_v14 = vrot.slane %v718_v9, %v4334_v62 }
 0x307   : > { %v768_v55 = vmul.f32 1.442695, %v760_v45  ;;  %v770_v59 = vmul.f32 1.442695, %v761_v61  ;;  %v772_v47 = vmul.f32 1.442695, %v762_v12  ;;  %v764_v63 = vsub.f32 %v4176_v36, %v739_v1 }
 0x308   : > { %v778_v32 = vmul.f32 1.442695, %v765_v57  ;;  %v774_v21 = vmul.f32 1.442695, %v763_v7  ;;  %v1137_v61 = vrot.slane %v4420_v2, %v4311_v50  ;;  %v1162_v19 = vsub.f32 %v4101_v29, %v1125_v13 }
 0x309   : > { %3704 = vpow2.f32 %v768_v55  ;;  %v782_v12 = vmul.f32 1.442695, %v767_v5  ;;  %v1129_v39 = vrot.slane %v4420_v2, %v4252_v22  ;;  %v766_v54 = vsub.f32 %v4195_v23, %v747_v14 }
 0x30a   : > { %3706 = vpow2.f32 %v770_v59  ;;  %v776_v28 = vmul.f32 1.442695, %v764_v63  ;;  %v1145_v9 = vrot.slane %v4420_v2, %v4328_v56  ;;  %v1165_v36 = vsub.f32 %v4111_v48, %v1137_v61  ;;  %v4448_v48 = vpop.xlane.xlu0 %1521 }
 0x30b   : > { %3708 = vpow2.f32 %v772_v47  ;;  %v1170_v59 = vmul.f32 1.442695, %v1162_v19  ;;  %v1133_v6 = vrot.slane %v4420_v2, %v4295_v43  ;;  %v1163_v29 = vsub.f32 %v4108_v35, %v1129_v39 }
 0x30c   : > { %3710 = vpow2.f32 %v778_v32  ;;  %v780_v45 = vmul.f32 1.442695, %v766_v54  ;;  %v1153_v23 = vrot.slane %v4420_v2, %v4340_v42  ;;  %v1167_v30 = vsub.f32 %v4118_v51, %v1145_v9 }
 0x30d   : > { %3712 = vpow2.f32 %v774_v21  ;;  %v1176_v7 = vmul.f32 1.442695, %v1165_v36  ;;  %v1141_v35 = vrot.slane %v4420_v2, %v4320_v44  ;;  %v1164_v57 = vsub.f32 %v4104_v31, %v1133_v6 }
 0x30e   : > { %3714 = vpow2.f32 %v782_v12  ;;  %v1172_v55 = vmul.f32 1.442695, %v1163_v29  ;;  %v1169_v51 = vsub.f32 %v4136_v38, %v1153_v23  ;;  %v1180_v5 = vmul.f32 1.442695, %v1167_v30 }
 0x30f   : > { %3716 = vpow2.f32 %v776_v28  ;;  %v1531_v32 = vrot.slane %v4448_v48, %v4252_v22  ;;  %v1149_v31 = vrot.slane %v4420_v2, %v4334_v62  ;;  %v1166_v63 = vsub.f32 %v4113_v49, %v1141_v35 }
 0x310   : > { %3718 = vpow2.f32 %v1170_v59  ;;  %v1174_v21 = vmul.f32 1.442695, %v1164_v57  ;;  %v1184_v38 = vmul.f32 1.442695, %v1169_v51  ;;  %v1543_v19 = vrot.slane %v4448_v48, %v4320_v44 }
 0x311   : > { %3720 = vpow2.f32 %v780_v45  ;;  %v1565_v12 = vsub.f32 %v4187_v52, %v1531_v32  ;;  %v1168_v2 = vsub.f32 %v4122_v10, %v1149_v31  ;;  %v1178_v49 = vmul.f32 1.442695, %v1166_v63 }
 0x312   : > { %3722 = vpow2.f32 %v1176_v7  ;;  %v1527_v54 = vrot.slane %v4448_v48, %v3890_v15  ;;  %v1551_v9 = vrot.slane %v4448_v48, %v4334_v62  ;;  %v1568_v52 = vsub.f32 %v4209_v18, %v1543_v19 }
 0x313   : > { %3724 = vpow2.f32 %v1172_v55  ;;  %v1574_v36 = vmul.f32 1.442695, %v1565_v12  ;;  %v1182_v10 = vmul.f32 1.442695, %v1168_v2  ;;  %v1535_v6 = vrot.slane %v4448_v48, %v4295_v43 }
 0x314   : > { %3726 = vpow2.f32 %v1180_v5  ;;  %v1564_v29 = vsub.f32 %v4190_v53, %v1527_v54  ;;  %v1570_v18 = vsub.f32 %v4234_v27, %v1551_v9  ;;  %v1580_v30 = vmul.f32 1.442695, %v1568_v52 }
 0x315   : > { %3728 = vpow2.f32 %v1174_v21  ;;  %v1539_v53 = vrot.slane %v4448_v48, %v4311_v50  ;;  %v1566_v57 = vsub.f32 %v4198_v26, %v1535_v6  ;;  %v1547_v63 = vrot.slane %v4448_v48, %v4328_v56 }
 0x316   : > { %v4441_v47 = vpop.eup %3704  ;;  %3730 = vpow2.f32 %v1184_v38  ;;  %v1572_v55 = vmul.f32 1.442695, %v1564_v29  ;;  %v1584_v27 = vmul.f32 1.442695, %v1570_v18 }
 0x317   : > { %v4446_v1 = vpop.eup %3706  ;;  %793 = vperm.xlu1 %3666, %v4441_v47   ;;  %3732 = vpow2.f32 %v1178_v49  ;;  %v1567_v26 = vsub.f32 %v4205_v41, %v1539_v53  ;;  %v1576_v21 = vmul.f32 1.442695, %v1566_v57  ;;  %v1555_v41 = vrot.slane %v4448_v48, %v4340_v42 }
 0x318   : > { %796 = vperm.xlu0 %3667, %v4446_v1   ;;  %v4455_v13 = vpop.eup %3708  ;;  %3734 = vpow2.f32 %v1574_v36  ;;  %v1569_v49 = vsub.f32 %v4217_v34, %v1547_v63 }
 0x319   : > { %v4460_v14 = vpop.eup %3710  ;;  %3736 = vpow2.f32 %v1182_v10  ;;  %v1578_v54 = vmul.f32 1.442695, %v1567_v26  ;;  %v1571_v48 = vsub.f32 %v4240_v4, %v1555_v41 }
 0x31a   : > { %v4467_v61 = vpop.eup %3712  ;;  %3738 = vpow2.f32 %v1580_v30  ;;  %v1582_v34 = vmul.f32 1.442695, %v1569_v49 }
 0x31b   : > { %799 = vperm.xlu1 %3666, %v4455_v13   ;;  %v4472_v39 = vpop.eup %3714  ;;  %3740 = vpow2.f32 %v1572_v55 }
 0x31c   : > { %808 = vperm.xlu0 %3667, %v4460_v14   ;;  %5590 = vst [vmem:[#allocation28_spill] sm:$0xff] %v4472_v39  ;;  %v4479_v28 = vpop.eup %3716  ;;  %3742 = vpow2.f32 %v1584_v27 }
 0x31d   : > { %v4484_v59 = vpop.eup %3718  ;;  %3744 = vpow2.f32 %v1576_v21 }
 0x31e   : > { %5591 = vst [vmem:[#allocation29_spill] sm:$0xff] %v4484_v59  ;;  %v4493_v23 = vpop.eup %3720 }
 0x31f   : > { %802 = vperm.xlu1 %3666, %v4467_v61   ;;  %5592 = vst [vmem:[#allocation30_spill] sm:$0xff] %v4493_v23  ;;  %v4498_v35 = vpop.eup %3722 }
 0x320   : > { %814 = vperm.xlu0 %3667, %v4472_v39   ;;  %5593 = vst [vmem:[#allocation31_spill] sm:$0xff] %v4498_v35  ;;  %v4505_v51 = vpop.eup %3724 }
 0x321   : > { %5594 = vst [vmem:[#allocation32_spill] sm:$0xff] %v4505_v51  ;;  %v4510_v31 = vpop.eup %3726 }
 0x322   : > { %5595 = vst [vmem:[#allocation33_spill] sm:$0xff] %v4510_v31  ;;  %v4517_v38 = vpop.eup %3728 }
 0x323   : > { %805 = vperm.xlu1 %3666, %v4479_v28   ;;  %5596 = vst [vmem:[#allocation34_spill] sm:$0xff] %v4517_v38  ;;  %v4522_v2 = vpop.eup %3730 }
 0x324   : > { %1195 = vperm.xlu0 %3667, %v4484_v59   ;;  %5597 = vst [vmem:[#allocation35_spill] sm:$0xff] %v4522_v2  ;;  %v4529_v9 = vpop.eup %3732 }
 0x325   : > { %v4491_v45 = vpop.xlane.xlu1 %1923  ;;  %5598 = vst [vmem:[#allocation36_spill] sm:$0xff] %v4529_v9  ;;  %v4534_v10 = vpop.eup %3734 }
 0x326   : > { %v1929_v7 = vrot.slane %v4491_v45, %v3890_v15  ;;  %v1941_v5 = vrot.slane %v4491_v45, %v4311_v50  ;;  %v1949_v19 = vrot.slane %v4491_v45, %v4328_v56  ;;  %v1957_v52 = vrot.slane %v4491_v45, %v4340_v42  ;;  %v4541_v29 = vpop.eup %3736 }
 0x327   : > { %811 = vperm.xlu1 %3666, %v4493_v23   ;;  %v1933_v6 = vrot.slane %v4491_v45, %v4252_v22  ;;  %5599 = vst [vmem:[#allocation37_spill] sm:$0xff] %v4541_v29  ;;  %v4544_v30 = vpop.eup %3738  ;;  %v1937_v4 = vrot.slane %v4491_v45, %v4295_v43  ;;  %v1945_v27 = vrot.slane %v4491_v45, %v4320_v44 }
 0x328   : > { %1204 = vperm.xlu0 %3667, %v4498_v35   ;;  %v1966_v32 = vsub.f32 %v4267_v60, %v1929_v7  ;;  %v1969_v60 = vsub.f32 %v4273_v8, %v1941_v5  ;;  %v1971_v8 = vsub.f32 %v4290_v25, %v1949_v19  ;;  %v1973_v18 = vsub.f32 %v4307_v11, %v1957_v52  ;;  %v4551_v57 = vpop.eup %3740 }
 0x329   : > { %v1586_v7 = vmul.f32 1.442695, %v1571_v48  ;;  %v1967_v53 = vsub.f32 %v4269_v0, %v1933_v6  ;;  %v4553_v11 = vpop.eup %3742  ;;  %v1968_v5 = vsub.f32 %v4271_v17, %v1937_v4  ;;  %v1953_v26 = vrot.slane %v4491_v45, %v4334_v62  ;;  %v384_v48 = vpop.permute.xlu1 %383 }
 0x32a   : > { %v1974_v12 = vmul.f32 1.442695, %v1966_v32  ;;  %v1980_v36 = vmul.f32 1.442695, %v1969_v60  ;;  %v1984_v25 = vmul.f32 1.442695, %v1971_v8  ;;  %v4560_v63 = vpop.eup %3744  ;;  %v1970_v21 = vsub.f32 %v4279_v46, %v1945_v27  ;;  %v387_v4 = vpop.permute.xlu0 %386 }
 0x32b   : > { %1198 = vperm.xlu1 %3666, %v4505_v51   ;;  %v1988_v55 = vmul.f32 1.442695, %v1973_v18  ;;  %v1976_v32 = vmul.f32 1.442695, %v1967_v53  ;;  %v1978_v19 = vmul.f32 1.442695, %v1968_v5  ;;  %v409_v53 = vrot.slane %v384_v48, %v3875_v3 }
 0x32c   : > { %1210 = vperm.xlu0 %3667, %v4510_v31   ;;  %3746 = vpow2.f32 %v1974_v12  ;;  %v1972_v12 = vsub.f32 %v4292_v58, %v1953_v26  ;;  %v1982_v41 = vmul.f32 1.442695, %v1970_v21  ;;  %v413_v27 = vrot.slane %v387_v4, %v3875_v3 }
 0x32d   : > { %3748 = vpow2.f32 %v1578_v54  ;;  %v390_v6 = vpop.permute.xlu1 %389 }
 0x32e   : > { %3750 = vpow2.f32 %v1980_v36  ;;  %v1986_v46 = vmul.f32 1.442695, %v1972_v12  ;;  %v438_v26 = vsel %vm290_vm1, %v413_v27, %v409_v53 }
 0x32f   : > { %1201 = vperm.xlu1 %3666, %v4517_v38   ;;  %3752 = vpow2.f32 %v1582_v34 }
 0x330   : > { %1216 = vperm.xlu0 %3667, %v4522_v2   ;;  %3754 = vpow2.f32 %v1984_v25 }
 0x331   : > { %3756 = vpow2.f32 %v1586_v7 }
 0x332   : > { %3758 = vpow2.f32 %v1988_v55  ;;  %v417_v55 = vrot.slane %v390_v6, %v3875_v3 }
 0x333   : > { %1207 = vperm.xlu1 %3666, %v4529_v9   ;;  %3760 = vpow2.f32 %v1976_v32 }
 0x334   : > { %1600 = vperm.xlu0 %3667, %v4534_v10   ;;  %3762 = vpow2.f32 %v1978_v19 }
 0x335   : > { %3764 = vpow2.f32 %v1982_v41 }
 0x336   : > { %3766 = vpow2.f32 %v1986_v46 }
 0x337   : > { %1213 = vperm.xlu1 %3666, %v4541_v29  }
 0x338   : > { %1609 = vperm.xlu0 %3667, %v4544_v30  }
 0x339   : > { %v4562_v0 = vpop.eup %3746 }
 0x33a   : > { %5600 = vst [vmem:[#allocation38_spill] sm:$0xff] %v4562_v0  ;;  %v4569_v60 = vpop.eup %3748 }
 0x33b   : > { %1597 = vperm.xlu1 %3666, %v4551_v57   ;;  %v4571_v17 = vpop.eup %3750 }
 0x33c   : > { %1615 = vperm.xlu0 %3667, %v4553_v11   ;;  %v4576_v49 = vpop.eup %3752 }
 0x33d   : > { %v4578_v54 = vpop.eup %3754 }
 0x33e   : > { %5601 = vst [vmem:[#allocation39_spill] sm:$0xff] %v4578_v54  ;;  %v4582_v45 = vpop.eup %3756 }
 0x33f   : > { %1603 = vperm.xlu1 %3666, %v4560_v63   ;;  %v4584_v52 = vpop.eup %3758 }
 0x340   : > { %1999 = vperm.xlu0 %3667, %v4562_v0   ;;  %5602 = vst [vmem:[#allocation40_spill] sm:$0xff] %v4584_v52  ;;  %v4588_v58 = vpop.eup %3760 }
 0x341   : > { %5603 = vst [vmem:[#allocation41_spill] sm:$0xff] %v4588_v58  ;;  %v4593_v8 = vpop.eup %3762 }
 0x342   : > { %v4598_v36 = vpop.eup %3764 }
 0x343   : > { %1606 = vperm.xlu1 %3666, %v4569_v60   ;;  %5604 = vst [vmem:[#allocation42_spill] sm:$0xff] %v4598_v36  ;;  %v4601_v34 = vpop.eup %3766 }
 0x344   : > { %2008 = vperm.xlu0 %3667, %v4571_v17   ;;  %5605 = vst [vmem:[#allocation43_spill] sm:$0xff] %v4601_v34 }
 0x347   : > { %1612 = vperm.xlu1 %3666, %v4576_v49  }
 0x348   : > { %2014 = vperm.xlu0 %3667, %v4578_v54  }
 0x34b   : > { %1618 = vperm.xlu1 %3666, %v4582_v45  }
 0x34c   : > { %2020 = vperm.xlu0 %3667, %v4584_v52  }
 0x34f   : > { %2002 = vperm.xlu1 %3666, %v4588_v58  }
 0x350   : > { %3034 = vrot.lane.b32.xlu0 %v3906_v33, %s3847_s17  ;;  %v393_v33 = vpop.permute.xlu1 %392 }
 0x351   : > { %v421_v5 = vrot.slane %v393_v33, %v3875_v3 }
 0x353   : > { %2005 = vperm.xlu1 %3666, %v4593_v8  }
 0x354   : > { %3036 = vrot.lane.b32.xlu0 %v3922_v40, %s3847_s17  ;;  %v396_v18 = vpop.permute.xlu1 %395  ;;  %v2244_v40 = vsel %vm215_vm0, %v4345_v24, 0.0  ;;  %v439_v24 = vsel %vm292_vm2, %v417_v55, %v438_v26 }
 0x355   : > { %v425_v32 = vrot.slane %v396_v18, %v3875_v3  ;;  %v440_v12 = vsel %vm294_vm3, %v421_v5, %v439_v24 }
 0x357   : > { %2011 = vperm.xlu1 %3666, %v4598_v36   ;;  %v441_v46 = vsel %vm296_vm4, %v425_v32, %v440_v12 }
 0x358   : > { %v399_v25 = vpop.permute.xlu1 %398 }
 0x359   : > { %v429_v21 = vrot.slane %v399_v25, %v3875_v3 }
 0x35b   : > { %2017 = vperm.xlu1 %3666, %v4601_v34   ;;  %v442_v48 = vsel %vm298_vm5, %v429_v21, %v441_v46 }
 0x35c   : > { %v402_v7 = vpop.permute.xlu1 %401 }
 0x35d   : > { %v433_v19 = vrot.slane %v402_v7, %v3875_v3 }
 0x35f   : > { %2636 = vrot.lane.b32.xlu1 %v3913_v37, %s3848_s18  ;;  %v443_v6 = vsel %vm300_vm6, %v433_v19, %v442_v48 }
 0x363   : > { %3038 = vrot.lane.b32.xlu1 %v3913_v37, %s3847_s17  ;;  %v405_v37 = vpop.permute.xlu1 %404 }
 0x364   : > { %v437_v41 = vrot.slane %v405_v37, %v3875_v3 }
 0x366   : > { %v444_v33 = vsel %vm302_vm7, %v437_v41, %v443_v6 }
 0x367   : > { %v446_v18 = vsel %vm305_vm8, %v444_v33, 0.0 }
 0x373   : > { %2245 = vadd.xlane.f32.xlu0 %v2244_v40 }
 0x387   : > { %447 = vadd.xlane.f32.xlu1 %v446_v18 }
 0x392   : > { %v794_v25 = vpop.permute.xlu1 %793 }
 0x393   : > { %v797_v40 = vpop.permute.xlu0 %796  ;;  %v819_v55 = vrot.slane %v794_v25, %v3875_v3 }
 0x394   : > { %v823_v7 = vrot.slane %v797_v40, %v3875_v3 }
 0x396   : > { %v800_v4 = vpop.permute.xlu1 %799  ;;  %v848_v26 = vsel %vm290_vm1, %v823_v7, %v819_v55 }
 0x397   : > { %v809_v53 = vpop.permute.xlu0 %808  ;;  %v827_v5 = vrot.slane %v800_v4, %v3875_v3 }
 0x398   : > { %v839_v48 = vrot.slane %v809_v53, %v3875_v3 }
 0x399   : > { %v849_v24 = vsel %vm292_vm2, %v827_v5, %v848_v26 }
 0x39a   : > { %v803_v27 = vpop.permute.xlu1 %802 }
 0x39b   : > { %v815_v32 = vpop.permute.xlu0 %814  ;;  %v831_v37 = vrot.slane %v803_v27, %v3875_v3 }
 0x39c   : > { %v847_v25 = vrot.slane %v815_v32, %v3875_v3 }
 0x39d   : > { %v850_v41 = vsel %vm294_vm3, %v831_v37, %v849_v24 }
 0x39e   : > { %v806_v21 = vpop.permute.xlu1 %805 }
 0x39f   : > { %v1196_v19 = vpop.permute.xlu0 %1195  ;;  %v835_v12 = vrot.slane %v806_v21, %v3875_v3 }
 0x3a0   : > { %v1221_v53 = vrot.slane %v1196_v19, %v3875_v3 }
 0x3a1   : > { %v851_v46 = vsel %vm296_vm4, %v835_v12, %v850_v41 }
 0x3a2   : > { %v812_v6 = vpop.permute.xlu1 %811  ;;  %v852_v40 = vsel %vm298_vm5, %v839_v48, %v851_v46 }
 0x3a3   : > { %v1205_v33 = vpop.permute.xlu0 %1204  ;;  %v843_v18 = vrot.slane %v812_v6, %v3875_v3 }
 0x3a4   : > { %v1233_v41 = vrot.slane %v1205_v33, %v3875_v3 }
 0x3a5   : > { %v853_v4 = vsel %vm300_vm6, %v843_v18, %v852_v40 }
 0x3a6   : > { %v1199_v7 = vpop.permute.xlu1 %1198  ;;  %v854_v55 = vsel %vm302_vm7, %v847_v25, %v853_v4 }
 0x3a7   : > { %v1211_v27 = vpop.permute.xlu0 %1210  ;;  %v856_v5 = vsel %vm305_vm8, %v854_v55, 0.0  ;;  %v1225_v37 = vrot.slane %v1199_v7, %v3875_v3 }
 0x3a8   : > { %857 = vadd.xlane.f32.xlu1 %v856_v5  ;;  %v1241_v19 = vrot.slane %v1211_v27, %v3875_v3 }
 0x3a9   : > { %v1250_v32 = vsel %vm290_vm1, %v1225_v37, %v1221_v53 }
 0x3aa   : > { %v1202_v26 = vpop.permute.xlu1 %1201 }
 0x3ab   : > { %v1217_v21 = vpop.permute.xlu0 %1216  ;;  %v1229_v24 = vrot.slane %v1202_v26, %v3875_v3 }
 0x3ac   : > { %v1249_v7 = vrot.slane %v1217_v21, %v3875_v3 }
 0x3ad   : > { %v1251_v12 = vsel %vm292_vm2, %v1229_v24, %v1250_v32 }
 0x3ae   : > { %v1208_v46 = vpop.permute.xlu1 %1207  ;;  %v1252_v6 = vsel %vm294_vm3, %v1233_v41, %v1251_v12 }
 0x3af   : > { %v1237_v48 = vrot.slane %v1208_v46, %v3875_v3  ;;  %v1601_v18 = vpop.permute.xlu0 %1600 }
 0x3b0   : > { %v1627_v12 = vrot.slane %v1601_v18, %v3875_v3 }
 0x3b1   : > { %v1253_v25 = vsel %vm296_vm4, %v1237_v48, %v1252_v6 }
 0x3b2   : > { %v1214_v40 = vpop.permute.xlu1 %1213  ;;  %v1254_v55 = vsel %vm298_vm5, %v1241_v19, %v1253_v25 }
 0x3b3   : > { %v1245_v4 = vrot.slane %v1214_v40, %v3875_v3  ;;  %v1610_v53 = vpop.permute.xlu0 %1609 }
 0x3b4   : > { %v1639_v19 = vrot.slane %v1610_v53, %v3875_v3 }
 0x3b5   : > { %v1255_v5 = vsel %vm300_vm6, %v1245_v4, %v1254_v55 }
 0x3b6   : > { %v1598_v33 = vpop.permute.xlu1 %1597  ;;  %v1256_v37 = vsel %vm302_vm7, %v1249_v7, %v1255_v5 }
 0x3b7   : > { %v1258_v26 = vsel %vm305_vm8, %v1256_v37, 0.0  ;;  %v1623_v32 = vrot.slane %v1598_v33, %v3875_v3  ;;  %v1616_v41 = vpop.permute.xlu0 %1615 }
 0x3b8   : > { %1259 = vadd.xlane.f32.xlu1 %v1258_v26  ;;  %v1647_v5 = vrot.slane %v1616_v41, %v3875_v3  ;;  %v2250_v41 = vsel %vm215_vm0, %v4362_v16, 0.0 }
 0x3b9   : > { %v1652_v46 = vsel %vm290_vm1, %v1627_v12, %v1623_v32 }
 0x3ba   : > { %v1604_v24 = vpop.permute.xlu1 %1603 }
 0x3bb   : > { %v1631_v27 = vrot.slane %v1604_v24, %v3875_v3  ;;  %v2000_v4 = vpop.permute.xlu0 %1999 }
 0x3bd   : > { %v1653_v6 = vsel %vm292_vm2, %v1631_v27, %v1652_v46 }
 0x3be   : > { %v1607_v21 = vpop.permute.xlu1 %1606 }
 0x3bf   : > { %v1635_v48 = vrot.slane %v1607_v21, %v3875_v3  ;;  %v2009_v24 = vpop.permute.xlu0 %2008  ;;  %v2025_v21 = vrot.slane %v2000_v4, %v3875_v3 }
 0x3c1   : > { %v1654_v25 = vsel %vm294_vm3, %v1635_v48, %v1653_v6 }
 0x3c2   : > { %v1613_v40 = vpop.permute.xlu1 %1612  ;;  %v1655_v55 = vsel %vm296_vm4, %v1639_v19, %v1654_v25 }
 0x3c3   : > { %v1643_v7 = vrot.slane %v1613_v40, %v3875_v3  ;;  %v2015_v48 = vpop.permute.xlu0 %2014  ;;  %v2037_v40 = vrot.slane %v2009_v24, %v3875_v3 }
 0x3c5   : > { %v1656_v18 = vsel %vm298_vm5, %v1643_v7, %v1655_v55  ;;  %v2646_v55 = vsel %vm215_vm0, %v4369_v20, 0.0 }
 0x3c6   : > { %v1619_v33 = vpop.permute.xlu1 %1618  ;;  %v1657_v26 = vsel %vm300_vm6, %v1647_v5, %v1656_v18 }
 0x3c7   : > { %v1651_v37 = vrot.slane %v1619_v33, %v3875_v3  ;;  %v2021_v16 = vpop.permute.xlu0 %2020  ;;  %v2045_v33 = vrot.slane %v2015_v48, %v3875_v3  ;;  %v5608_v48 = vld [vmem:[#allocation16_spill] sm:$0xff] }
 0x3c9   : > { %v1658_v32 = vsel %vm302_vm7, %v1651_v37, %v1657_v26  ;;  %v5606_v26 = vld [vmem:[#allocation13_spill] sm:$0xff] }
 0x3ca   : > { %v2003_v27 = vpop.permute.xlu1 %2002  ;;  %v1660_v53 = vsel %vm305_vm8, %v1658_v32, 0.0  ;;  %v2253_v32 = vsel %vm215_vm0, %v5606_v26, 0.0 }
 0x3cb   : > { %1661 = vadd.xlane.f32.xlu0 %v1660_v53  ;;  %v2029_v12 = vrot.slane %v2003_v27, %v3875_v3  ;;  %v2053_v27 = vrot.slane %v2021_v16, %v3875_v3 }
 0x3cd   : > { %v2054_v25 = vsel %vm290_vm1, %v2029_v12, %v2025_v21  ;;  %v5607_v12 = vld [vmem:[#allocation15_spill] sm:$0xff] }
 0x3ce   : > { %v2006_v46 = vpop.permute.xlu1 %2005  ;;  %v3048_v21 = vsel %vm215_vm0, %v5607_v12, 0.0 }
 0x3cf   : > { %v2033_v6 = vrot.slane %v2006_v46, %v3875_v3  ;;  %2251 = vadd.xlane.f32.xlu0 %v2250_v41 }
 0x3d1   : > { %v2055_v19 = vsel %vm292_vm2, %v2033_v6, %v2054_v25  ;;  %v2256_v6 = vsel %vm215_vm0, %v5608_v48, 0.0  ;;  %v5609_v25 = vld [vmem:[#allocation6_spill] sm:$0xff]  ;;  %v5619_v48 = vld [vmem:[#allocation20_spill] sm:$0xff] }
 0x3d2   : > { %v2012_v7 = vpop.permute.xlu1 %2011  ;;  %v2056_v18 = vsel %vm294_vm3, %v2037_v40, %v2055_v19  ;;  %v2247_v19 = vsel %vm215_vm0, %v5609_v25, 0.0  ;;  %v5610_v40 = vld [vmem:[#allocation18_spill] sm:$0xff] }
 0x3d3   : > { %v2041_v4 = vrot.slane %v2012_v7, %v3875_v3  ;;  %2647 = vadd.xlane.f32.xlu0 %v2646_v55  ;;  %v3054_v7 = vsel %vm215_vm0, %v5610_v40, 0.0  ;;  %v5611_v55 = vld [vmem:[#allocation11_spill] sm:$0xff]  ;;  %v5620_v40 = vld [vmem:[#allocation22_spill] sm:$0xff] }
 0x3d5   : > { %v2057_v5 = vsel %vm296_vm4, %v2041_v4, %v2056_v18  ;;  %v2649_v4 = vsel %vm215_vm0, %v5611_v55, 0.0  ;;  %v5612_v18 = vld [vmem:[#allocation21_spill] sm:$0xff] }
 0x3d6   : > { %v2018_v37 = vpop.permute.xlu1 %2017  ;;  %v2058_v20 = vsel %vm298_vm5, %v2045_v33, %v2057_v5  ;;  %v2658_v16 = vsel %vm215_vm0, %v5612_v18, 0.0  ;;  %v5613_v5 = vld [vmem:[#allocation14_spill] sm:$0xff] }
 0x3d7   : > { %v2049_v24 = vrot.slane %v2018_v37, %v3875_v3  ;;  %2254 = vadd.xlane.f32.xlu0 %v2253_v32  ;;  %v2652_v33 = vsel %vm215_vm0, %v5613_v5, 0.0  ;;  %v5614_v37 = vld [vmem:[#allocation23_spill] sm:$0xff]  ;;  %v5622_v5 = vld [vmem:[#allocation26_spill] sm:$0xff] }
 0x3d8   : > { %v2262_v26 = vsel %vm215_vm0, %v5614_v37, 0.0  ;;  %v5615_v32 = vld [vmem:[#allocation19_spill] sm:$0xff] }
 0x3d9   : > { %v2059_v53 = vsel %vm300_vm6, %v2049_v24, %v2058_v20  ;;  %v3051_v24 = vsel %vm215_vm0, %v5615_v32, 0.0 }
 0x3da   : > { %v2060_v46 = vsel %vm302_vm7, %v2053_v27, %v2059_v53  ;;  %v5616_v27 = vld [vmem:[#allocation25_spill] sm:$0xff] }
 0x3db   : > { %3049 = vadd.xlane.f32.xlu0 %v3048_v21  ;;  %v2062_v41 = vsel %vm305_vm8, %v2060_v46, 0.0  ;;  %v3060_v20 = vsel %vm215_vm0, %v5616_v27, 0.0  ;;  %v5617_v53 = vld [vmem:[#allocation17_spill] sm:$0xff]  ;;  %v2637_v21 = vpop.permute.xlu1 %2636  ;;  %v5618_v46 = vld [vmem:[#allocation27_spill] sm:$0xff] }
 0x3dc   : > { %2063 = vadd.xlane.f32.xlu1 %v2062_v41  ;;  %v2655_v12 = vsel %vm215_vm0, %v5617_v53, 0.0  ;;  %v2664_v41 = vsel %vm215_vm0, %v5618_v46, 0.0  ;;  %v2667_v25 = vsel %vm215_vm0, %v2637_v21, 0.0 }
 0x3df   : > { %2257 = vadd.xlane.f32.xlu0 %v2256_v6  ;;  %v2259_v6 = vsel %vm215_vm0, %v5619_v48, 0.0 }
 0x3e0   : > { %2248 = vadd.xlane.f32.xlu1 %v2247_v19  ;;  %v3039_v19 = vpop.permute.xlu1 %3038 }
 0x3e1   : > { %v3069_v55 = vsel %vm215_vm0, %v3039_v19, 0.0 }
 0x3e3   : > { %3055 = vadd.xlane.f32.xlu0 %v3054_v7  ;;  %v3057_v7 = vsel %vm215_vm0, %v5620_v40, 0.0 }
 0x3e4   : > { %2650 = vadd.xlane.f32.xlu1 %v2649_v4  ;;  %v5621_v4 = vld [vmem:[#allocation24_spill] sm:$0xff] }
 0x3e5   : > { %v2661_v18 = vsel %vm215_vm0, %v5621_v4, 0.0 }
 0x3e7   : > { %2659 = vadd.xlane.f32.xlu0 %v2658_v16  ;;  %v3035_v16 = vpop.permute.xlu0 %3034 }
 0x3e8   : > { %2653 = vadd.xlane.f32.xlu1 %v2652_v33  ;;  %v2265_v33 = vsel %vm215_vm0, %v5622_v5, 0.0  ;;  %v3063_v37 = vsel %vm215_vm0, %v3035_v16, 0.0 }
 0x3eb   : > { %2263 = vadd.xlane.f32.xlu0 %v2262_v26  ;;  %v3037_v26 = vpop.permute.xlu0 %3036 }
 0x3ec   : > { %3052 = vadd.xlane.f32.xlu1 %v3051_v24  ;;  %v3066_v32 = vsel %vm215_vm0, %v3037_v26, 0.0 }
 0x3ef   : > { %3061 = vadd.xlane.f32.xlu0 %v3060_v20 }
 0x3f0   : > { %2656 = vadd.xlane.f32.xlu1 %v2655_v12 }
 0x3f3   : > { %2665 = vadd.xlane.f32.xlu0 %v2664_v41 }
 0x3f4   : > { %2260 = vadd.xlane.f32.xlu1 %v2259_v6 }
 0x3f7   : > { %2668 = vadd.xlane.f32.xlu0 %v2667_v25 }
 0x3f8   : > { %3058 = vadd.xlane.f32.xlu1 %v3057_v7 }
 0x3fb   : > { %3070 = vadd.xlane.f32.xlu0 %v3069_v55 }
 0x3fc   : > { %2662 = vadd.xlane.f32.xlu1 %v2661_v18  ;;  %v2246_v24 = vpop.xlane.xlu0 %2245 }
 0x400   : > { %2266 = vadd.xlane.f32.xlu1 %v2265_v33 }
 0x404   : > { %3064 = vadd.xlane.f32.xlu1 %v3063_v37  ;;  %v4744_v37 = vmul.f32 0.5, %v2246_v24 }
 0x406   : > { %v2287_v29 = vrot.slane %v4744_v37, %v3875_v3 }
 0x408   : > { %3067 = vadd.xlane.f32.xlu1 %v3066_v32 }
 0x410   : > { %v4734_v53 = vpop.xlane.xlu1 %447 }
 0x431   : > { %v4736_v21 = vpop.xlane.xlu1 %857 }
 0x441   : > { %v4738_v41 = vpop.xlane.xlu1 %1259 }
 0x454   : > { %v4732_v27 = vpop.xlane.xlu0 %1661 }
 0x458   : > { %v2252_v20 = vpop.xlane.xlu0 %2251 }
 0x459   : > { %v4750_v58 = vmul.f32 0.5, %v2252_v20 }
 0x45b   : > { %v2295_v20 = vrot.slane %v4750_v58, %v3875_v3 }
 0x45c   : > { %v2648_v12 = vpop.xlane.xlu0 %2647 }
 0x45d   : > { %v4756_v31 = vmul.f32 0.5, %v2648_v12 }
 0x45f   : > { %v2689_v12 = vrot.slane %v4756_v31, %v3875_v3 }
 0x460   : > { %v2255_v46 = vpop.xlane.xlu0 %2254 }
 0x461   : > { %v4760_v24 = vmul.f32 0.5, %v2255_v46 }
 0x463   : > { %v2299_v34 = vrot.slane %v4760_v24, %v3875_v3 }
 0x464   : > { %v3050_v48 = vpop.xlane.xlu0 %3049 }
 0x465   : > { %v4740_v6 = vpop.xlane.xlu1 %2063  ;;  %v4783_v54 = vmul.f32 0.5, %v3050_v48 }
 0x468   : > { %v2258_v25 = vpop.xlane.xlu0 %2257 }
 0x469   : > { %v2249_v19 = vpop.xlane.xlu1 %2248 }
 0x46a   : > { %v4742_v5 = vmul.f32 0.5, %v2249_v19 }
 0x46c   : > { %v3056_v40 = vpop.xlane.xlu0 %3055  ;;  %v2291_v32 = vrot.slane %v4742_v5, %v3875_v3 }
 0x46d   : > { %v2651_v7 = vpop.xlane.xlu1 %2650 }
 0x46e   : > { %v4748_v36 = vmul.f32 0.5, %v2651_v7  ;;  %v2316_v9 = vsel %vm290_vm1, %v2291_v32, %v2287_v29  ;;  %v4775_v29 = vmul.f32 0.5, %v2258_v25 }
 0x46f   : > { %v2317_v32 = vsel %vm292_vm2, %v2295_v20, %v2316_v9 }
 0x470   : > { %v2660_v55 = vpop.xlane.xlu0 %2659  ;;  %v2693_v7 = vrot.slane %v4748_v36, %v3875_v3  ;;  %v2303_v20 = vrot.slane %v4775_v29, %v3875_v3 }
 0x471   : > { %v2654_v4 = vpop.xlane.xlu1 %2653  ;;  %v4778_v38 = vmul.f32 0.5, %v2660_v55  ;;  %v2318_v55 = vsel %vm294_vm3, %v2299_v34, %v2317_v32 }
 0x472   : > { %v4752_v0 = vmul.f32 0.5, %v2654_v4  ;;  %v2718_v51 = vsel %vm290_vm1, %v2693_v7, %v2689_v12 }
 0x473   : > { %5624 = vst [vmem:[#allocation15_spill] sm:$0xff] %v4778_v38  ;;  %v2705_v48 = vrot.slane %v4778_v38, %v3875_v3 }
 0x474   : > { %v2264_v18 = vpop.xlane.xlu0 %2263  ;;  %v2697_v4 = vrot.slane %v4752_v0, %v3875_v3 }
 0x475   : > { %v3053_v16 = vpop.xlane.xlu1 %3052  ;;  %v4798_v7 = vmul.f32 0.5, %v2264_v18 }
 0x476   : > { %v2719_v59 = vsel %vm292_vm2, %v2697_v4, %v2718_v51  ;;  %v4786_v39 = vmul.f32 0.5, %v3053_v16  ;;  %v4802_v4 = vmul.f32 0.5, %v3056_v40 }
 0x478   : > { %v3062_v26 = vpop.xlane.xlu0 %3061  ;;  %5627 = vst [vmem:[#allocation18_spill] sm:$0xff] %v4802_v4 }
 0x479   : > { %v2657_v33 = vpop.xlane.xlu1 %2656 }
 0x47a   : > { %v4758_v19 = vmul.f32 0.5, %v2657_v33 }
 0x47c   : > { %5623 = vst [vmem:[#allocation13_spill] sm:$0xff] %v4758_v19  ;;  %v2666_v35 = vpop.xlane.xlu0 %2665  ;;  %v2701_v46 = vrot.slane %v4758_v19, %v3875_v3 }
 0x47d   : > { %v2261_v2 = vpop.xlane.xlu1 %2260  ;;  %v4800_v51 = vmul.f32 0.5, %v2666_v35 }
 0x47e   : > { %v4773_v33 = vmul.f32 0.5, %v2261_v2  ;;  %v2720_v2 = vsel %vm294_vm3, %v2701_v46, %v2719_v59  ;;  %v2319_v46 = vsel %vm296_vm4, %v2303_v20, %v2318_v55 }
 0x47f   : > { %5626 = vst [vmem:[#allocation6_spill] sm:$0xff] %v4800_v51  ;;  %v2721_v32 = vsel %vm296_vm4, %v2705_v48, %v2720_v2  ;;  %v2713_v23 = vrot.slane %v4800_v51, %v3875_v3  ;;  %v3099_v2 = vrot.slane %v4802_v4, %v3875_v3 }
 0x480   : > { %v2307_v25 = vrot.slane %v4773_v33, %v3875_v3  ;;  %v2669_v16 = vpop.xlane.xlu0 %2668 }
 0x481   : > { %v3059_v52 = vpop.xlane.xlu1 %3058  ;;  %v4812_v18 = vmul.f32 0.5, %v2669_v16 }
 0x482   : > { %v4808_v34 = vmul.f32 0.5, %v3059_v52  ;;  %v2320_v40 = vsel %vm298_vm5, %v2307_v25, %v2319_v46  ;;  %v2311_v52 = vrot.slane %v4798_v7, %v3875_v3 }
 0x483   : > { %v2717_v46 = vrot.slane %v4812_v18, %v3875_v3 }
 0x484   : > { %5628 = vst [vmem:[#allocation11_spill] sm:$0xff] %v4808_v34  ;;  %v3103_v25 = vrot.slane %v4808_v34, %v3875_v3  ;;  %v2321_v16 = vsel %vm300_vm6, %v2311_v52, %v2320_v40 }
 0x485   : > { %v2663_v19 = vpop.xlane.xlu1 %2662 }
 0x486   : > { %v4791_v9 = vmul.f32 0.5, %v2663_v19  ;;  %v3095_v19 = vrot.slane %v4786_v39, %v3875_v3 }
 0x488   : > { %5625 = vst [vmem:[#allocation16_spill] sm:$0xff] %v4791_v9  ;;  %v2709_v59 = vrot.slane %v4791_v9, %v3875_v3  ;;  %v3091_v9 = vrot.slane %v4783_v54, %v3875_v3 }
 0x489   : > { %v2267_v12 = vpop.xlane.xlu1 %2266 }
 0x48a   : > { %v4814_v35 = vmul.f32 0.5, %v2267_v12  ;;  %v2722_v38 = vsel %vm298_vm5, %v2709_v59, %v2721_v32  ;;  %v3120_v20 = vsel %vm290_vm1, %v3095_v19, %v3091_v9  ;;  %v4833_v12 = vmul.f32 0.5, %v3062_v26  ;;  %v3071_v32 = vpop.xlane.xlu0 %3070 }
 0x48b   : > { %v2723_v59 = vsel %vm300_vm6, %v2713_v23, %v2722_v38  ;;  %v3121_v19 = vsel %vm292_vm2, %v3099_v2, %v3120_v20  ;;  %v4844_v23 = vmul.f32 0.5, %v3071_v32 }
 0x48c   : > { %v2315_v55 = vrot.slane %v4814_v35, %v3875_v3  ;;  %v2724_v34 = vsel %vm302_vm7, %v2717_v46, %v2723_v59  ;;  %v3122_v40 = vsel %vm294_vm3, %v3103_v25, %v3121_v19  ;;  %v3107_v52 = vrot.slane %v4833_v12, %v3875_v3 }
 0x48d   : > { %v3065_v48 = vpop.xlane.xlu1 %3064  ;;  %v3119_v20 = vrot.slane %v4844_v23, %v3875_v3 }
 0x48e   : > { %v4837_v51 = vmul.f32 0.5, %v3065_v48  ;;  %v2322_v4 = vsel %vm302_vm7, %v2315_v55, %v2321_v16  ;;  %v3123_v2 = vsel %vm296_vm4, %v3107_v52, %v3122_v40 }
 0x48f   : > { %v2324_v9 = vsel %vm305_vm8, %v2322_v4, -inf  ;;  %v2726_v4 = vsel %vm305_vm8, %v2724_v34, -inf }
 0x490   : > { %2325 = vmax.xlane.f32.xlu0 %v2324_v9  ;;  %v3111_v38 = vrot.slane %v4837_v51, %v3875_v3 }
 0x491   : > { %v3068_v26 = vpop.xlane.xlu1 %3067 }
 0x492   : > { %v4850_v48 = vmul.f32 0.5, %v3068_v26  ;;  %v3124_v25 = vsel %vm298_vm5, %v3111_v38, %v3123_v2 }
 0x494   : > { %5629 = vst [vmem:[#allocation21_spill] sm:$0xff] %v4850_v48  ;;  %v3115_v55 = vrot.slane %v4850_v48, %v3875_v3  ;;  %2727 = vmax.xlane.f32.xlu0 %v2726_v4 }
 0x496   : > { %v3125_v16 = vsel %vm300_vm6, %v3115_v55, %v3124_v25 }
 0x497   : > { %v3126_v59 = vsel %vm302_vm7, %v3119_v20, %v3125_v16 }
 0x498   : > { %v3128_v46 = vsel %vm305_vm8, %v3126_v59, -inf }
 0x499   : > { %3129 = vmax.xlane.f32.xlu0 %v3128_v46 }
 0x519   : > { %v2326_v32 = vpop.xlane.xlu0 %2325 }
 0x51a   : > { %v2331_v34 = vrot.slane %v2326_v32, %v3890_v15  ;;  %v2335_v9 = vrot.slane %v2326_v32, %v4252_v22  ;;  %v2339_v19 = vrot.slane %v2326_v32, %v4295_v43  ;;  %v2347_v40 = vrot.slane %v2326_v32, %v4320_v44 }
 0x51b   : > { %v2343_v26 = vrot.slane %v2326_v32, %v4311_v50  ;;  %v2355_v2 = vrot.slane %v2326_v32, %v4334_v62  ;;  %v2351_v16 = vrot.slane %v2326_v32, %v4328_v56 }
 0x51c   : > { %v2368_v38 = vsub.f32 %v4744_v37, %v2331_v34  ;;  %v2369_v52 = vsub.f32 %v4742_v5, %v2335_v9  ;;  %v2370_v4 = vsub.f32 %v4750_v58, %v2339_v19  ;;  %v2372_v55 = vsub.f32 %v4775_v29, %v2347_v40 }
 0x51d   : > { %v2371_v59 = vsub.f32 %v4760_v24, %v2343_v26  ;;  %v2374_v48 = vsub.f32 %v4798_v7, %v2355_v2  ;;  %v2359_v5 = vrot.slane %v2326_v32, %v4340_v42  ;;  %v2373_v58 = vsub.f32 %v4773_v33, %v2351_v16 }
 0x51e   : > { %v2376_v20 = vmul.f32 1.442695, %v2368_v38  ;;  %v2380_v25 = vmul.f32 1.442695, %v2370_v4  ;;  %v2378_v46 = vmul.f32 1.442695, %v2369_v52 }
 0x51f   : > { %v2384_v37 = vmul.f32 1.442695, %v2372_v55  ;;  %v2382_v34 = vmul.f32 1.442695, %v2371_v59  ;;  %v2388_v29 = vmul.f32 1.442695, %v2374_v48  ;;  %v2375_v9 = vsub.f32 %v4814_v35, %v2359_v5 }
 0x520   : > { %3768 = vpow2.f32 %v2376_v20  ;;  %v2386_v24 = vmul.f32 1.442695, %v2373_v58  ;;  %v5630_v52 = vld [vmem:[#allocation4_spill] sm:$0xff]  ;;  %v5632_v5 = vld [vmem:[#allocation5_spill] sm:$0xff] }
 0x521   : > { %3770 = vpow2.f32 %v2380_v25  ;;  %v2390_v7 = vmul.f32 1.442695, %v2375_v9  ;;  %v5631_v25 = vld [vmem:[#allocation3_spill] sm:$0xff] }
 0x522   : > { %3772 = vpow2.f32 %v2378_v46 }
 0x523   : > { %3774 = vrcp.f32 %v4734_v53 }
 0x524   : > { %3776 = vpow2.f32 %v2384_v37 }
 0x525   : > { %3778 = vpow2.f32 %v2382_v34 }
 0x526   : > { %3780 = vpow2.f32 %v2388_v29 }
 0x527   : > { %3782 = vrcp.f32 %v4732_v27 }
 0x528   : > { %3784 = vpow2.f32 %v2386_v24  ;;  %v5633_v24 = vld [vmem:[#allocation7_spill] sm:$0xff] }
 0x529   : > { %3786 = vpow2.f32 %v2390_v7 }
 0x52a   : > { %3788 = vrcp.f32 %v4736_v21 }
 0x52b   : > { %3790 = vrcp.f32 %v4740_v6 }
 0x52d   : > { %v4880_v19 = vpop.eup %3768 }
 0x52e   : > { %2401 = vperm.xlu1 %3666, %v4880_v19   ;;  %v4883_v33 = vpop.eup %3770 }
 0x52f   : > { %2407 = vperm.xlu0 %3667, %v4883_v33   ;;  %v4886_v53 = vpop.eup %3772 }
 0x530   : > { %v3775_v48 = vpop.eup %3774 }
 0x531   : > { %v4889_v35 = vpop.eup %3776  ;;  %v454_v32 = vrot.slane %v3775_v48, %v3890_v15  ;;  %v458_v2 = vrot.slane %v3775_v48, %v4252_v22  ;;  %v462_v59 = vrot.slane %v3775_v48, %v4295_v43  ;;  %v466_v34 = vrot.slane %v3775_v48, %v4311_v50 }
 0x532   : > { %2404 = vperm.xlu1 %3666, %v4886_v53   ;;  %v4892_v27 = vpop.eup %3778 }
 0x533   : > { %2413 = vperm.xlu0 %3667, %v4889_v35   ;;  %v4896_v40 = vpop.eup %3780  ;;  %v491_v4 = vmul.f32 %v5630_v52, %v454_v32  ;;  %v492_v16 = vmul.f32 %v5631_v25, %v458_v2  ;;  %v493_v58 = vmul.f32 %v5632_v5, %v462_v59  ;;  %v494_v7 = vmul.f32 %v5633_v24, %v466_v34  ;;  %v4933_v25 = vpop.xlane.xlu0 %2727 }
 0x534   : > { %v4898_v26 = vpop.eup %3782  ;;  %v478_v59 = vrot.slane %v3775_v48, %v4334_v62 }
 0x535   : > { %v4901_v38 = vpop.eup %3784  ;;  %v1668_v55 = vrot.slane %v4898_v26, %v3890_v15  ;;  %v1672_v37 = vrot.slane %v4898_v26, %v4252_v22  ;;  %v1676_v9 = vrot.slane %v4898_v26, %v4295_v43  ;;  %v1680_v52 = vrot.slane %v4898_v26, %v4311_v50 }
 0x536   : > { %2410 = vperm.xlu1 %3666, %v4892_v27   ;;  %v4908_v20 = vpop.eup %3786  ;;  %v1688_v6 = vrot.slane %v4898_v26, %v4328_v56 }
 0x537   : > { %2419 = vperm.xlu0 %3667, %v4896_v40   ;;  %v1705_v46 = vmul.f32 %v4551_v57, %v1668_v55  ;;  %v1706_v29 = vmul.f32 %v4534_v10, %v1672_v37  ;;  %v470_v57 = vrot.slane %v3775_v48, %v4320_v44  ;;  %v1707_v32 = vmul.f32 %v4560_v63, %v1676_v9  ;;  %v5635_v63 = vld [vmem:[#allocation9_spill] sm:$0xff]  ;;  %v4944_v34 = vpop.eup %3788 }
 0x538   : > { %v474_v10 = vrot.slane %v3775_v48, %v4328_v56  ;;  %v1708_v21 = vmul.f32 %v4569_v60, %v1680_v52  ;;  %v1684_v55 = vrot.slane %v4898_v26, %v4320_v44  ;;  %v5636_v60 = vld [vmem:[#allocation10_spill] sm:$0xff]  ;;  %v1710_v24 = vmul.f32 %v4576_v49, %v1688_v6  ;;  %v4957_v52 = vpop.eup %3790 }
 0x539   : > { %v497_v5 = vmul.f32 %v5636_v60, %v478_v59 }
 0x53a   : > { %2416 = vperm.xlu1 %3666, %v4901_v38   ;;  %v1709_v37 = vmul.f32 %v4544_v30, %v1684_v55  ;;  %v1692_v30 = vrot.slane %v4898_v26, %v4334_v62  ;;  %v868_v55 = vrot.slane %v4944_v34, %v4252_v22 }
 0x53b   : > { %501 = vperm.xlu0 %3667, %v491_v4   ;;  %v5634_v4 = vld [vmem:[#allocation8_spill] sm:$0xff] }
 0x53c   : > { %v495_v2 = vmul.f32 %v5634_v4, %v470_v57  ;;  %v902_v59 = vmul.f32 %v4446_v1, %v868_v55  ;;  %v876_v1 = vrot.slane %v4944_v34, %v4311_v50 }
 0x53e   : > { %2422 = vperm.xlu1 %3666, %v4908_v20  }
 0x53f   : > { %506 = vperm.xlu0 %3667, %v492_v16   ;;  %v496_v16 = vmul.f32 %v5635_v63, %v474_v10  ;;  %v4963_v10 = vpop.xlane.xlu0 %3129  ;;  %v2078_v63 = vrot.slane %v4957_v52, %v4295_v43 }
 0x542   : > { %1715 = vperm.xlu1 %3666, %v1705_v46   ;;  %v2733_v46 = vrot.slane %v4933_v25, %v3890_v15 }
 0x543   : > { %511 = vperm.xlu0 %3667, %v493_v58   ;;  %v482_v58 = vrot.slane %v3775_v48, %v4340_v42  ;;  %v1696_v48 = vrot.slane %v4898_v26, %v4340_v42 }
 0x544   : > { %v2770_v9 = vsub.f32 %v4756_v31, %v2733_v46  ;;  %v2741_v31 = vrot.slane %v4933_v25, %v4295_v43  ;;  %v2109_v46 = vmul.f32 %v4593_v8, %v2078_v63 }
 0x545   : > { %v1712_v26 = vmul.f32 %v4582_v45, %v1696_v48  ;;  %v2082_v45 = vrot.slane %v4957_v52, %v4311_v50 }
 0x546   : > { %1720 = vperm.xlu1 %3666, %v1706_v29   ;;  %v2737_v29 = vrot.slane %v4933_v25, %v4252_v22  ;;  %v2778_v49 = vmul.f32 1.442695, %v2770_v9 }
 0x547   : > { %516 = vperm.xlu0 %3667, %v494_v7   ;;  %v5637_v7 = vld [vmem:[#allocation12_spill] sm:$0xff] }
 0x548   : > { %v498_v57 = vmul.f32 %v5637_v7, %v482_v58  ;;  %v2771_v4 = vsub.f32 %v4748_v36, %v2737_v29  ;;  %3792 = vpow2.f32 %v2778_v49  ;;  %v2110_v58 = vmul.f32 %v4571_v17, %v2082_v45  ;;  %v5643_v45 = vld [vmem:[#allocation39_spill] sm:$0xff] }
 0x549   : > { %v904_v29 = vmul.f32 %v4467_v61, %v876_v1  ;;  %v884_v17 = vrot.slane %v4944_v34, %v4328_v56 }
 0x54a   : > { %1725 = vperm.xlu1 %3666, %v1707_v32   ;;  %v864_v32 = vrot.slane %v4944_v34, %v3890_v15  ;;  %v2780_v36 = vmul.f32 1.442695, %v2771_v4  ;;  %v3143_v4 = vrot.slane %v4963_v10, %v4295_v43 }
 0x54b   : > { %521 = vperm.xlu0 %3667, %v495_v2   ;;  %v1711_v2 = vmul.f32 %v4553_v11, %v1692_v30  ;;  %v3135_v11 = vrot.slane %v4963_v10, %v3890_v15  ;;  %v906_v61 = vmul.f32 %v4460_v14, %v884_v17  ;;  %v2745_v30 = vrot.slane %v4933_v25, %v4311_v50  ;;  %v5647_v17 = vld [vmem:[#allocation16_spill] sm:$0xff] }
 0x54c   : > { %3794 = vpow2.f32 %v2780_v36 }
 0x54d   : > { %v3172_v6 = vsub.f32 %v4783_v54, %v3135_v11  ;;  %v880_v54 = vrot.slane %v4944_v34, %v4320_v44 }
 0x54e   : > { %1730 = vperm.xlu1 %3666, %v1708_v21   ;;  %v901_v21 = vmul.f32 %v4441_v47, %v864_v32  ;;  %v872_v47 = vrot.slane %v4944_v34, %v4295_v43  ;;  %v892_v32 = vrot.slane %v4944_v34, %v4340_v42 }
 0x54f   : > { %526 = vperm.xlu0 %3667, %v496_v16   ;;  %v2772_v16 = vsub.f32 %v4752_v0, %v2741_v31  ;;  %v3139_v0 = vrot.slane %v4963_v10, %v4252_v22  ;;  %v5639_v31 = vld [vmem:[#allocation13_spill] sm:$0xff] }
 0x550   : > { %v903_v60 = vmul.f32 %v4455_v13, %v872_v47  ;;  %v2773_v14 = vsub.f32 %v5639_v31, %v2745_v30  ;;  %v3151_v30 = vrot.slane %v4963_v10, %v4320_v44  ;;  %v5649_v31 = vld [vmem:[#allocation40_spill] sm:$0xff] }
 0x551   : > { %v3173_v8 = vsub.f32 %v4786_v39, %v3139_v0  ;;  %v905_v39 = vmul.f32 %v4479_v28, %v880_v54  ;;  %v5638_v28 = vld [vmem:[#allocation30_spill] sm:$0xff]  ;;  %v2094_v0 = vrot.slane %v4957_v52, %v4334_v62  ;;  %v5646_v54 = vld [vmem:[#allocation43_spill] sm:$0xff] }
 0x552   : > { %1735 = vperm.xlu1 %3666, %v1709_v37   ;;  %v2782_v37 = vmul.f32 1.442695, %v2772_v16  ;;  %v2784_v63 = vmul.f32 1.442695, %v2773_v14  ;;  %v5641_v16 = vld [vmem:[#allocation18_spill] sm:$0xff] }
 0x553   : > { %531 = vperm.xlu0 %3667, %v497_v5   ;;  %v3180_v5 = vmul.f32 1.442695, %v3172_v6  ;;  %v3182_v13 = vmul.f32 1.442695, %v3173_v8  ;;  %v3174_v36 = vsub.f32 %v5641_v16, %v3143_v4  ;;  %v2753_v6 = vrot.slane %v4933_v25, %v4328_v56 }
 0x554   : > { %3796 = vpow2.f32 %v2782_v37  ;;  %v2757_v4 = vrot.slane %v4933_v25, %v4334_v62 }
 0x555   : > { %3798 = vrcp.f32 %v4738_v41  ;;  %v4992_v9 = vpop.eup %3792  ;;  %v3184_v8 = vmul.f32 1.442695, %v3174_v36  ;;  %v3155_v36 = vrot.slane %v4963_v10, %v4328_v56 }
 0x556   : > { %1740 = vperm.xlu1 %3666, %v1710_v24   ;;  %3800 = vpow2.f32 %v3180_v5  ;;  %v888_v24 = vrot.slane %v4944_v34, %v4334_v62  ;;  %v2090_v34 = vrot.slane %v4957_v52, %v4328_v56  ;;  %v5645_v5 = vld [vmem:[#allocation32_spill] sm:$0xff] }
 0x557   : > { %536 = vperm.xlu0 %3667, %v498_v57   ;;  %3802 = vpow2.f32 %v3182_v13  ;;  %v2113_v13 = vmul.f32 %v5646_v54, %v2094_v0  ;;  %v5655_v54 = vld [vmem:[#allocation37_spill] sm:$0xff] }
 0x558   : > { %v907_v57 = vmul.f32 %v5638_v28, %v888_v24  ;;  %v2112_v37 = vmul.f32 %v5643_v45, %v2090_v34  ;;  %3804 = vpow2.f32 %v2784_v63  ;;  %v5648_v28 = vld [vmem:[#allocation34_spill] sm:$0xff] }
 0x559   : > { %v4998_v41 = vpop.eup %3794  ;;  %3806 = vpow2.f32 %v3184_v8  ;;  %v5651_v63 = vld [vmem:[#allocation6_spill] sm:$0xff] }
 0x55a   : > { %1745 = vperm.xlu1 %3666, %v1711_v2   ;;  %v5640_v2 = vld [vmem:[#allocation28_spill] sm:$0xff]  ;;  %v2776_v16 = vsub.f32 %v5651_v63, %v2757_v4  ;;  %v5661_v4 = vld [vmem:[#allocation41_spill] sm:$0xff] }
 0x55b   : > { %911 = vperm.xlu0 %3667, %v901_v21   ;;  %v908_v21 = vmul.f32 %v5640_v2, %v892_v32 }
 0x55c   : > { %v2790_v0 = vmul.f32 1.442695, %v2776_v16 }
 0x55e   : > { %1750 = vperm.xlu1 %3666, %v1712_v26   ;;  %v2749_v26 = vrot.slane %v4933_v25, %v4320_v44 }
 0x55f   : > { %916 = vperm.xlu0 %3667, %v902_v59   ;;  %v5642_v59 = vld [vmem:[#allocation29_spill] sm:$0xff] }
 0x561   : > { %v5006_v7 = vpop.eup %3796 }
 0x562   : > { %2127 = vperm.xlu1 %3666, %v2109_v46   ;;  %v5012_v48 = vpop.eup %3798 }
 0x563   : > { %921 = vperm.xlu0 %3667, %v903_v60   ;;  %v5017_v49 = vpop.eup %3800  ;;  %v1266_v55 = vrot.slane %v5012_v48, %v3890_v15  ;;  %v1270_v46 = vrot.slane %v5012_v48, %v4252_v22  ;;  %v5644_v60 = vld [vmem:[#allocation15_spill] sm:$0xff]  ;;  %v1278_v32 = vrot.slane %v5012_v48, %v4311_v50 }
 0x564   : > { %v5028_v11 = vpop.eup %3802  ;;  %v2774_v1 = vsub.f32 %v5644_v60, %v2749_v26  ;;  %v1282_v26 = vrot.slane %v5012_v48, %v4320_v44 }
 0x565   : > { %v1303_v47 = vmul.f32 %v5642_v59, %v1266_v55  ;;  %v5650_v55 = vld [vmem:[#allocation31_spill] sm:$0xff] }
 0x566   : > { %2132 = vperm.xlu1 %3666, %v2110_v58   ;;  %v1304_v58 = vmul.f32 %v5645_v5, %v1270_v46  ;;  %v2786_v24 = vmul.f32 1.442695, %v2774_v1  ;;  %v1306_v34 = vmul.f32 %v5650_v55, %v1278_v32  ;;  %v5652_v46 = vld [vmem:[#allocation36_spill] sm:$0xff]  ;;  %v5653_v1 = vld [vmem:[#allocation33_spill] sm:$0xff]  ;;  %v1290_v5 = vrot.slane %v5012_v48, %v4334_v62 }
 0x567   : > { %926 = vperm.xlu0 %3667, %v904_v29   ;;  %v1274_v29 = vrot.slane %v5012_v48, %v4295_v43  ;;  %v1307_v45 = vmul.f32 %v5652_v46, %v1282_v26 }
 0x568   : > { %3808 = vpow2.f32 %v2786_v24  ;;  %v5657_v24 = vld [vmem:[#allocation35_spill] sm:$0xff] }
 0x56a   : > { %2803 = vperm.xlu1 %3666, %v4992_v9  }
 0x56b   : > { %931 = vperm.xlu0 %3667, %v905_v39   ;;  %v2098_v39 = vrot.slane %v4957_v52, %v4340_v42 }
 0x56d   : > { %v2114_v14 = vmul.f32 %v5649_v31, %v2098_v39  ;;  %v1294_v39 = vrot.slane %v5012_v48, %v4340_v42 }
 0x56e   : > { %2806 = vperm.xlu1 %3666, %v4998_v41  }
 0x56f   : > { %936 = vperm.xlu0 %3667, %v906_v61   ;;  %v2775_v61 = vsub.f32 %v5647_v17, %v2753_v6  ;;  %v3177_v6 = vsub.f32 %v4837_v51, %v3155_v36 }
 0x571   : > { %v2788_v2 = vmul.f32 1.442695, %v2775_v61 }
 0x572   : > { %2809 = vperm.xlu1 %3666, %v5006_v7  }
 0x573   : > { %941 = vperm.xlu0 %3667, %v907_v57   ;;  %v1305_v57 = vmul.f32 %v5648_v28, %v1274_v29  ;;  %3810 = vpow2.f32 %v2788_v2  ;;  %v3190_v29 = vmul.f32 1.442695, %v3177_v6  ;;  %v2070_v28 = vrot.slane %v4957_v52, %v3890_v15 }
 0x576   : > { %3205 = vperm.xlu1 %3666, %v5017_v49  }
 0x577   : > { %946 = vperm.xlu0 %3667, %v908_v21   ;;  %v3176_v21 = vsub.f32 %v4833_v12, %v3151_v30  ;;  %v1286_v12 = vrot.slane %v5012_v48, %v4328_v56  ;;  %v1310_v30 = vmul.f32 %v5657_v24, %v1294_v39  ;;  %v5659_v48 = vld [vmem:[#allocation38_spill] sm:$0xff]  ;;  %v3147_v24 = vrot.slane %v4963_v10, %v4311_v50 }
 0x578   : > { %v2107_v31 = vmul.f32 %v5659_v48, %v2070_v28  ;;  %v5666_v39 = vld [vmem:[#allocation2_spill] sm:$0xff] }
 0x579   : > { %v3188_v59 = vmul.f32 1.442695, %v3176_v21  ;;  %v1308_v8 = vmul.f32 %v5653_v1, %v1286_v12  ;;  %v2086_v21 = vrot.slane %v4957_v52, %v4320_v44 }
 0x57a   : > { %3208 = vperm.xlu1 %3666, %v5028_v11  }
 0x57b   : > { %1313 = vperm.xlu0 %3667, %v1303_v47   ;;  %v5062_v47 = vpop.eup %3804  ;;  %3812 = vpow2.f32 %v3188_v59 }
 0x57c   : > { %v5071_v60 = vpop.eup %3806  ;;  %3814 = vpow2.f32 %v2790_v0 }
 0x57d   : > { %v5080_v51 = vpop.eup %3808  ;;  %3816 = vpow2.f32 %v3190_v29 }
 0x57e   : > { %2142 = vperm.xlu1 %3666, %v2112_v37   ;;  %v2761_v37 = vrot.slane %v4933_v25, %v4340_v42  ;;  %v3163_v25 = vrot.slane %v4963_v10, %v4340_v42  ;;  %5654 = vst [vmem:[#allocation14_spill] sm:$0xff] %v5080_v51 }
 0x57f   : > { %1318 = vperm.xlu0 %3667, %v1304_v58  }
 0x580   : > { %v2777_v58 = vsub.f32 %v4812_v18, %v2761_v37  ;;  %v3179_v61 = vsub.f32 %v4844_v23, %v3163_v25  ;;  %v5087_v18 = vpop.eup %3810  ;;  %v2074_v23 = vrot.slane %v4957_v52, %v4252_v22 }
 0x581   : > { %5656 = vst [vmem:[#allocation23_spill] sm:$0xff] %v5087_v18 }
 0x582   : > { %2147 = vperm.xlu1 %3666, %v2113_v13   ;;  %v1309_v13 = vmul.f32 %v5655_v54, %v1290_v5  ;;  %v2792_v17 = vmul.f32 1.442695, %v2777_v58  ;;  %v2108_v2 = vmul.f32 %v5661_v4, %v2074_v23 }
 0x583   : > { %1323 = vperm.xlu0 %3667, %v1305_v57   ;;  %v3194_v57 = vmul.f32 1.442695, %v3179_v61 }
 0x584   : > { %3818 = vpow2.f32 %v2792_v17 }
 0x585   : > { %3820 = vpow2.f32 %v3194_v57 }
 0x586   : > { %2152 = vperm.xlu1 %3666, %v2114_v14  }
 0x587   : > { %1328 = vperm.xlu0 %3667, %v1306_v34   ;;  %v5663_v34 = vld [vmem:[#allocation42_spill] sm:$0xff] }
 0x588   : > { %v5093_v32 = vpop.eup %3812  ;;  %v2111_v26 = vmul.f32 %v5663_v34, %v2086_v21  ;;  %v3159_v21 = vrot.slane %v4963_v10, %v4334_v62 }
 0x589   : > { %5658 = vst [vmem:[#allocation19_spill] sm:$0xff] %v5093_v32  ;;  %v5099_v14 = vpop.eup %3814 }
 0x58a   : > { %2812 = vperm.xlu1 %3666, %v5062_v47   ;;  %5660 = vst [vmem:[#allocation25_spill] sm:$0xff] %v5099_v14  ;;  %v5105_v55 = vpop.eup %3816 }
 0x58b   : > { %1333 = vperm.xlu0 %3667, %v1307_v45   ;;  %5662 = vst [vmem:[#allocation17_spill] sm:$0xff] %v5105_v55 }
 0x58e   : > { %3211 = vperm.xlu1 %3666, %v5071_v60  }
 0x58f   : > { %1338 = vperm.xlu0 %3667, %v1308_v8  }
 0x591   : > { %v5109_v63 = vpop.eup %3818 }
 0x592   : > { %2815 = vperm.xlu1 %3666, %v5080_v51   ;;  %5664 = vst [vmem:[#allocation27_spill] sm:$0xff] %v5109_v63  ;;  %v5112_v16 = vpop.eup %3820 }
 0x593   : > { %1343 = vperm.xlu0 %3667, %v1309_v13   ;;  %5665 = vst [vmem:[#allocation20_spill] sm:$0xff] %v5112_v16 }
 0x596   : > { %2818 = vperm.xlu1 %3666, %v5087_v18  }
 0x597   : > { %1348 = vperm.xlu0 %3667, %v1310_v30  }
 0x59a   : > { %3217 = vperm.xlu1 %3666, %v5093_v32  }
 0x59b   : > { %2117 = vperm.xlu0 %3667, %v2107_v31  }
 0x59e   : > { %2821 = vperm.xlu1 %3666, %v5099_v14  }
 0x59f   : > { %2122 = vperm.xlu0 %3667, %v2108_v2  }
 0x5a2   : > { %3220 = vperm.xlu1 %3666, %v5105_v55  }
 0x5a3   : > { %2137 = vperm.xlu0 %3667, %v2111_v26  }
 0x5a6   : > { %2824 = vperm.xlu1 %3666, %v5109_v63  }
 0x5a9   : > { %v2402_v36 = vpop.permute.xlu1 %2401 }
 0x5aa   : > { %3226 = vperm.xlu1 %3666, %v5112_v16   ;;  %v2408_v59 = vpop.permute.xlu0 %2407  ;;  %v2427_v12 = vrot.slane %v2402_v36, %v3875_v3  ;;  %v5667_v36 = vld [vmem:[#allocation11_spill] sm:$0xff] }
 0x5ab   : > { %v2435_v8 = vrot.slane %v2408_v59, %v3875_v3  ;;  %v3175_v59 = vsub.f32 %v5667_v36, %v3147_v24 }
 0x5ad   : > { %v2405_v46 = vpop.permute.xlu1 %2404 }
 0x5ae   : > { %v2414_v52 = vpop.permute.xlu0 %2413  ;;  %v2431_v45 = vrot.slane %v2405_v46, %v3875_v3 }
 0x5af   : > { %v2443_v13 = vrot.slane %v2414_v52, %v3875_v3 }
 0x5b0   : > { %v2456_v0 = vsel %vm290_vm1, %v2431_v45, %v2427_v12 }
 0x5b1   : > { %v2411_v37 = vpop.permute.xlu1 %2410  ;;  %v2457_v58 = vsel %vm292_vm2, %v2435_v8, %v2456_v0  ;;  %v5668_v8 = vld [vmem:[#allocation21_spill] sm:$0xff] }
 0x5b2   : > { %v2420_v6 = vpop.permute.xlu0 %2419  ;;  %v2439_v1 = vrot.slane %v2411_v37, %v3875_v3 }
 0x5b3   : > { %v2451_v4 = vrot.slane %v2420_v6, %v3875_v3 }
 0x5b4   : > { %v2458_v25 = vsel %vm294_vm3, %v2439_v1, %v2457_v58 }
 0x5b5   : > { %v2417_v5 = vpop.permute.xlu1 %2416  ;;  %v2459_v28 = vsel %vm296_vm4, %v2443_v13, %v2458_v25  ;;  %v3186_v13 = vmul.f32 1.442695, %v3175_v59 }
 0x5b6   : > { %v502_v29 = vpop.permute.xlu0 %501  ;;  %v2447_v54 = vrot.slane %v2417_v5, %v3875_v3  ;;  %v3178_v5 = vsub.f32 %v5668_v8, %v3159_v21 }
 0x5b7   : > { %v539_v17 = vmul.f32 %v502_v29, %v5666_v39  ;;  %3822 = vpow2.f32 %v3186_v13 }
 0x5b8   : > { %v2460_v48 = vsel %vm298_vm5, %v2447_v54, %v2459_v28 }
 0x5b9   : > { %v2423_v61 = vpop.permute.xlu1 %2422  ;;  %v548_v30 = vsel %vm547_vm9, %v539_v17, 0.0  ;;  %v2461_v45 = vsel %vm300_vm6, %v2451_v4, %v2460_v48 }
 0x5ba   : > { %v549_v57 = vrot.slane %v548_v30, 4  ;;  %v507_v31 = vpop.permute.xlu0 %506  ;;  %v2455_v23 = vrot.slane %v2423_v61, %v3875_v3 }
 0x5bb   : > { %v540_v2 = vmul.f32 %v507_v31, %v5666_v39 }
 0x5bc   : > { %v550_v34 = vadd.f32 %v549_v57, %v548_v30  ;;  %v2462_v6 = vsel %vm302_vm7, %v2455_v23, %v2461_v45 }
 0x5bd   : > { %v1716_v26 = vpop.permute.xlu1 %1715  ;;  %v555_v46 = vsel %vm547_vm9, %v540_v2, 0.0  ;;  %v2464_v61 = vsel %vm305_vm8, %v2462_v6, 0.0  ;;  %v3192_v2 = vmul.f32 1.442695, %v3178_v5 }
 0x5be   : > { %v1753_v52 = vmul.f32 %v1716_v26, %v5666_v39  ;;  %v551_v12 = vrot.slane %v550_v34, 2  ;;  %v556_v37 = vrot.slane %v555_v46, 4  ;;  %v512_v0 = vpop.permute.xlu0 %511 }
 0x5bf   : > { %v541_v1 = vmul.f32 %v512_v0, %v5666_v39  ;;  %3824 = vpow2.f32 %v3192_v2 }
 0x5c0   : > { %v1762_v10 = vsel %vm1761_vm10, %v1753_v52, 0.0  ;;  %v552_v58 = vadd.f32 %v551_v12, %v550_v34  ;;  %v557_v25 = vadd.f32 %v556_v37, %v555_v46 }
 0x5c1   : > { %v1763_v29 = vrot.slane %v1762_v10, 4  ;;  %v1721_v54 = vpop.permute.xlu1 %1720  ;;  %v562_v17 = vsel %vm547_vm9, %v541_v1, 0.0 }
 0x5c2   : > { %v1754_v24 = vmul.f32 %v1721_v54, %v5666_v39  ;;  %v558_v30 = vrot.slane %v557_v25, 2  ;;  %v563_v28 = vrot.slane %v562_v17, 4  ;;  %v517_v48 = vpop.permute.xlu0 %516  ;;  %2465 = vadd.xlane.f32.xlu0 %v2464_v61  ;;  %v553_v31 = vrot.slane %v552_v58, 1 }
 0x5c3   : > { %v1764_v57 = vadd.f32 %v1763_v29, %v1762_v10  ;;  %v542_v23 = vmul.f32 %v517_v48, %v5666_v39 }
 0x5c4   : > { %v1769_v4 = vsel %vm1761_vm10, %v1754_v24, 0.0  ;;  %v559_v21 = vadd.f32 %v558_v30, %v557_v25  ;;  %v564_v34 = vadd.f32 %v563_v28, %v562_v17  ;;  %v554_v1 = vadd.f32 %v553_v31, %v552_v58 }
 0x5c5   : > { %v1765_v26 = vrot.slane %v1764_v57, 2  ;;  %v1726_v36 = vpop.permute.xlu1 %1725  ;;  %v569_v59 = vsel %vm547_vm9, %v542_v23, 0.0  ;;  %v1770_v46 = vrot.slane %v1769_v4, 4 }
 0x5c6   : > { %v1755_v52 = vmul.f32 %v1726_v36, %v5666_v39  ;;  %v560_v45 = vrot.slane %v559_v21, 1  ;;  %v565_v12 = vrot.slane %v564_v34, 2  ;;  %v570_v0 = vrot.slane %v569_v59, 4  ;;  %v522_v6 = vpop.permute.xlu0 %521 }
 0x5c7   : > { %v1766_v37 = vadd.f32 %v1765_v26, %v1764_v57  ;;  %v1771_v10 = vadd.f32 %v1770_v46, %v1769_v4  ;;  %v543_v8 = vmul.f32 %v522_v6, %v5666_v39 }
 0x5c8   : > { %v1776_v5 = vsel %vm1761_vm10, %v1755_v52, 0.0  ;;  %v561_v25 = vadd.f32 %v560_v45, %v559_v21  ;;  %v566_v29 = vadd.f32 %v565_v12, %v564_v34  ;;  %v571_v13 = vadd.f32 %v570_v0, %v569_v59 }
 0x5c9   : > { %v1767_v54 = vrot.slane %v1766_v37, 1  ;;  %v1731_v17 = vpop.permute.xlu1 %1730  ;;  %v1772_v61 = vrot.slane %v1771_v10, 2  ;;  %v576_v24 = vsel %vm547_vm9, %v543_v8, 0.0  ;;  %v1777_v30 = vrot.slane %v1776_v5, 4 }
 0x5ca   : > { %v1756_v28 = vmul.f32 %v1731_v17, %v5666_v39  ;;  %v3434_v57 = vsel %vm290_vm1, %v561_v25, %v554_v1  ;;  %v567_v58 = vrot.slane %v566_v29, 1  ;;  %v572_v48 = vrot.slane %v571_v13, 2  ;;  %v527_v31 = vpop.permute.xlu0 %526 }
 0x5cb   : > { %v1773_v23 = vadd.f32 %v1772_v61, %v1771_v10  ;;  %v577_v4 = vrot.slane %v576_v24, 4  ;;  %v1778_v26 = vadd.f32 %v1777_v30, %v1776_v5  ;;  %v544_v21 = vmul.f32 %v527_v31, %v5666_v39 }
 0x5cc   : > { %v568_v34 = vadd.f32 %v567_v58, %v566_v29  ;;  %v1768_v36 = vadd.f32 %v1767_v54, %v1766_v37  ;;  %v573_v59 = vadd.f32 %v572_v48, %v571_v13  ;;  %v1783_v46 = vsel %vm1761_vm10, %v1756_v28, 0.0 }
 0x5cd   : > { %v1736_v52 = vpop.permute.xlu1 %1735  ;;  %v1774_v45 = vrot.slane %v1773_v23, 1  ;;  %v578_v12 = vadd.f32 %v577_v4, %v576_v24  ;;  %v1779_v0 = vrot.slane %v1778_v26, 2  ;;  %v583_v2 = vsel %vm547_vm9, %v544_v21, 0.0 }
 0x5ce   : > { %v3435_v6 = vsel %vm292_vm2, %v568_v34, %v3434_v57  ;;  %v574_v1 = vrot.slane %v573_v59, 1  ;;  %v584_v8 = vrot.slane %v583_v2, 4  ;;  %v1784_v10 = vrot.slane %v1783_v46, 4  ;;  %v532_v25 = vpop.permute.xlu0 %531  ;;  %v5162_v57 = vpop.eup %3822 }
 0x5cf   : > { %v1775_v5 = vadd.f32 %v1774_v45, %v1773_v23  ;;  %v579_v17 = vrot.slane %v578_v12, 2  ;;  %v1780_v61 = vadd.f32 %v1779_v0, %v1778_v26  ;;  %v545_v37 = vmul.f32 %v532_v25, %v5666_v39  ;;  %5669 = vst [vmem:[#allocation22_spill] sm:$0xff] %v5162_v57 }
 0x5d0   : > { %v575_v29 = vadd.f32 %v574_v1, %v573_v59  ;;  %v585_v54 = vadd.f32 %v584_v8, %v583_v2  ;;  %v1785_v13 = vadd.f32 %v1784_v10, %v1783_v46  ;;  %v1757_v30 = vmul.f32 %v1736_v52, %v5666_v39 }
 0x5d1   : > { %v1741_v24 = vpop.permute.xlu1 %1740  ;;  %v3488_v28 = vsel %vm290_vm1, %v1775_v5, %v1768_v36  ;;  %v580_v58 = vadd.f32 %v579_v17, %v578_v12  ;;  %v1781_v48 = vrot.slane %v1780_v61, 1  ;;  %v590_v26 = vsel %vm547_vm9, %v545_v37, 0.0 }
 0x5d2   : > { %v3436_v31 = vsel %vm294_vm3, %v575_v29, %v3435_v6  ;;  %v586_v4 = vrot.slane %v585_v54, 2  ;;  %v1786_v23 = vrot.slane %v1785_v13, 2  ;;  %v537_v21 = vpop.permute.xlu0 %536  ;;  %v1790_v46 = vsel %vm1761_vm10, %v1757_v30, 0.0 }
 0x5d3   : > { %v581_v34 = vrot.slane %v580_v58, 1  ;;  %v1782_v59 = vadd.f32 %v1781_v48, %v1780_v61  ;;  %v546_v52 = vmul.f32 %v537_v21, %v5666_v39  ;;  %v1791_v36 = vrot.slane %v1790_v46, 4  ;;  %v5170_v61 = vpop.eup %3824 }
 0x5d4   : > { %v587_v45 = vadd.f32 %v586_v4, %v585_v54  ;;  %v1787_v0 = vadd.f32 %v1786_v23, %v1785_v13  ;;  %v1758_v6 = vmul.f32 %v1741_v24, %v5666_v39  ;;  %v591_v25 = vrot.slane %v590_v26, 4  ;;  %5670 = vst [vmem:[#allocation24_spill] sm:$0xff] %v5170_v61 }
 0x5d5   : > { %v1746_v12 = vpop.permute.xlu1 %1745  ;;  %v582_v2 = vadd.f32 %v581_v34, %v580_v58  ;;  %v3489_v1 = vsel %vm292_vm2, %v1782_v59, %v3488_v28  ;;  %v1792_v5 = vadd.f32 %v1791_v36, %v1790_v46  ;;  %v597_v29 = vsel %vm547_vm9, %v546_v52, 0.0 }
 0x5d6   : > { %v588_v8 = vrot.slane %v587_v45, 1  ;;  %v1788_v10 = vrot.slane %v1787_v0, 1  ;;  %v912_v17 = vpop.permute.xlu0 %911  ;;  %v1797_v54 = vsel %vm1761_vm10, %v1758_v6, 0.0  ;;  %v1759_v23 = vmul.f32 %v1746_v12, %v5666_v39 }
 0x5d7   : > { %v3437_v37 = vsel %vm296_vm4, %v582_v2, %v3436_v31  ;;  %v949_v13 = vmul.f32 %v912_v17, %v5666_v39  ;;  %v1793_v58 = vrot.slane %v1792_v5, 2  ;;  %v1798_v48 = vrot.slane %v1797_v54, 4 }
 0x5d8   : > { %v589_v30 = vadd.f32 %v588_v8, %v587_v45  ;;  %v1789_v28 = vadd.f32 %v1788_v10, %v1787_v0  ;;  %3214 = vperm.xlu0 %3667, %v5162_v57   ;;  %v598_v59 = vrot.slane %v597_v29, 4  ;;  %v592_v52 = vadd.f32 %v591_v25, %v590_v26 }
 0x5d9   : > { %v1751_v24 = vpop.permute.xlu1 %1750  ;;  %v958_v4 = vsel %vm957_vm11, %v949_v13, 0.0  ;;  %v1794_v34 = vadd.f32 %v1793_v58, %v1792_v5  ;;  %v1799_v45 = vadd.f32 %v1798_v48, %v1797_v54  ;;  %v1804_v36 = vsel %vm1761_vm10, %v1759_v23, 0.0 }
 0x5da   : > { %v5180_v21 = vsel %vm298_vm5, %v589_v30, %v3437_v37  ;;  %v3490_v31 = vsel %vm294_vm3, %v1789_v28, %v3489_v1  ;;  %v917_v46 = vpop.permute.xlu0 %916  ;;  %v959_v0 = vrot.slane %v958_v4, 4  ;;  %v1805_v6 = vrot.slane %v1804_v36, 4 }
 0x5db   : > { %v1795_v2 = vrot.slane %v1794_v34, 1  ;;  %v950_v8 = vmul.f32 %v917_v46, %v5666_v39  ;;  %v1800_v10 = vrot.slane %v1799_v45, 2  ;;  %v1760_v1 = vmul.f32 %v1751_v24, %v5666_v39 }
 0x5dc   : > { %3223 = vperm.xlu0 %3667, %v5170_v61   ;;  %v960_v17 = vadd.f32 %v959_v0, %v958_v4  ;;  %v599_v37 = vadd.f32 %v598_v59, %v597_v29  ;;  %v593_v54 = vrot.slane %v592_v52, 2  ;;  %v1806_v48 = vadd.f32 %v1805_v6, %v1804_v36 }
 0x5dd   : > { %v5186_v12 = vpop.permute.xlu1 %2127  ;;  %v1796_v5 = vadd.f32 %v1795_v2, %v1794_v34  ;;  %v965_v26 = vsel %vm957_vm11, %v950_v8, 0.0  ;;  %v1801_v13 = vadd.f32 %v1800_v10, %v1799_v45  ;;  %v1811_v23 = vsel %vm1761_vm10, %v1760_v1, 0.0 }
 0x5de   : > { %v922_v25 = vpop.permute.xlu0 %921  ;;  %v961_v30 = vrot.slane %v960_v17, 2  ;;  %v966_v28 = vrot.slane %v965_v26, 4  ;;  %v600_v29 = vrot.slane %v599_v37, 2  ;;  %v1812_v59 = vrot.slane %v1811_v23, 4 }
 0x5df   : > { %v3491_v58 = vsel %vm296_vm4, %v1796_v5, %v3490_v31  ;;  %v951_v46 = vmul.f32 %v922_v25, %v5666_v39  ;;  %v1802_v4 = vrot.slane %v1801_v13, 1  ;;  %v594_v63 = vadd.f32 %v593_v54, %v592_v52 }
 0x5e0   : > { %v962_v24 = vadd.f32 %v961_v30, %v960_v17  ;;  %v967_v34 = vadd.f32 %v966_v28, %v965_v26  ;;  %v1807_v31 = vrot.slane %v1806_v48, 2  ;;  %v1813_v36 = vadd.f32 %v1812_v59, %v1811_v23 }
 0x5e1   : > { %v5193_v16 = vpop.permute.xlu1 %2132  ;;  %v972_v0 = vsel %vm957_vm11, %v951_v46, 0.0  ;;  %v1803_v45 = vadd.f32 %v1802_v4, %v1801_v13  ;;  %v601_v30 = vadd.f32 %v600_v29, %v599_v37  ;;  %v595_v52 = vrot.slane %v594_v63, 1 }
 0x5e2   : > { %v927_v2 = vpop.permute.xlu0 %926  ;;  %v968_v8 = vrot.slane %v967_v34, 2  ;;  %v973_v10 = vrot.slane %v972_v0, 4  ;;  %v963_v25 = vrot.slane %v962_v24, 1  ;;  %v1814_v28 = vrot.slane %v1813_v36, 2 }
 0x5e3   : > { %v952_v6 = vmul.f32 %v927_v2, %v5666_v39  ;;  %v3492_v5 = vsel %vm298_vm5, %v1803_v45, %v3491_v58  ;;  %v1808_v54 = vadd.f32 %v1807_v31, %v1806_v48  ;;  %v596_v32 = vadd.f32 %v595_v52, %v594_v63 }
 0x5e4   : > { %v969_v17 = vadd.f32 %v968_v8, %v967_v34  ;;  %v974_v26 = vadd.f32 %v973_v10, %v972_v0  ;;  %v964_v2 = vadd.f32 %v963_v25, %v962_v24  ;;  %v602_v34 = vrot.slane %v601_v30, 1 }
 0x5e5   : > { %v5197_v1 = vpop.permute.xlu1 %2803  ;;  %v979_v46 = vsel %vm957_vm11, %v952_v6, 0.0  ;;  %v1815_v0 = vadd.f32 %v1814_v28, %v1813_v36  ;;  %v1809_v48 = vrot.slane %v1808_v54, 1  ;;  %vm3369_vm9 = vcmask 786144  }
 0x5e6   : > { %v932_v61 = vpop.permute.xlu0 %931  ;;  %v970_v13 = vrot.slane %v969_v17, 1  ;;  %v975_v4 = vrot.slane %v974_v26, 2  ;;  %v980_v14 = vrot.slane %v979_v46, 4 }
 0x5e7   : > { %v953_v23 = vmul.f32 %v932_v61, %v5666_v39 }
 0x5e8   : > { %v971_v55 = vadd.f32 %v970_v13, %v969_v17  ;;  %v976_v58 = vadd.f32 %v975_v4, %v974_v26  ;;  %v981_v45 = vadd.f32 %v980_v14, %v979_v46  ;;  %v603_v14 = vadd.f32 %v602_v34, %v601_v30 }
 0x5e9   : > { %v5202_v59 = vpop.permute.xlu1 %2806  ;;  %v986_v37 = vsel %vm957_vm11, %v953_v23, 0.0  ;;  %v1816_v26 = vrot.slane %v1815_v0, 1  ;;  %v1810_v23 = vadd.f32 %v1809_v48, %v1808_v54 }
 0x5ea   : > { %v937_v29 = vpop.permute.xlu0 %936  ;;  %v3452_v8 = vsel %vm290_vm1, %v971_v55, %v964_v2  ;;  %v977_v10 = vrot.slane %v976_v58, 1  ;;  %v982_v6 = vrot.slane %v981_v45, 2  ;;  %v987_v18 = vrot.slane %v986_v37, 4 }
 0x5eb   : > { %v954_v61 = vmul.f32 %v937_v29, %v5666_v39  ;;  %v3439_v2 = vsel %vm300_vm6, %v596_v32, %v5180_v21  ;;  %v1817_v30 = vadd.f32 %v1816_v26, %v1815_v0  ;;  %v3493_v32 = vsel %vm300_vm6, %v1810_v23, %v3492_v5 }
 0x5ec   : > { %v978_v24 = vadd.f32 %v977_v10, %v976_v58  ;;  %v983_v25 = vadd.f32 %v982_v6, %v981_v45  ;;  %v988_v17 = vadd.f32 %v987_v18, %v986_v37  ;;  %v5216_v29 = vsel %vm302_vm7, %v603_v14, %v3439_v2 }
 0x5ed   : > { %v5207_v31 = vpop.permute.xlu1 %2809  ;;  %v993_v36 = vsel %vm957_vm11, %v954_v61, 0.0  ;;  %5671 = vst [vmem:[#allocation26_spill] sm:$0xff] %v5216_v29 }
 0x5ee   : > { %v942_v28 = vpop.permute.xlu0 %941  ;;  %v3453_v46 = vsel %vm292_vm2, %v978_v24, %v3452_v8  ;;  %v984_v55 = vrot.slane %v983_v25, 1  ;;  %v989_v13 = vrot.slane %v988_v17, 2  ;;  %v994_v4 = vrot.slane %v993_v36, 4 }
 0x5ef   : > { %v955_v63 = vmul.f32 %v942_v28, %v5666_v39 }
 0x5f0   : > { %v985_v58 = vadd.f32 %v984_v55, %v983_v25  ;;  %v990_v45 = vadd.f32 %v989_v13, %v988_v17  ;;  %v995_v18 = vadd.f32 %v994_v4, %v993_v36  ;;  %v5225_v36 = vsel %vm302_vm7, %v1817_v30, %v3493_v32 }
 0x5f1   : > { %v3206_v52 = vpop.permute.xlu1 %3205  ;;  %v1000_v34 = vsel %vm957_vm11, %v955_v63, 0.0 }
 0x5f2   : > { %v947_v37 = vpop.permute.xlu0 %946  ;;  %v3454_v8 = vsel %vm294_vm3, %v985_v58, %v3453_v46  ;;  %v991_v10 = vrot.slane %v990_v45, 1  ;;  %v996_v54 = vrot.slane %v995_v18, 2  ;;  %v1001_v6 = vrot.slane %v1000_v34, 4 }
 0x5f3   : > { %v956_v48 = vmul.f32 %v947_v37, %v5666_v39  ;;  %v3231_v14 = vrot.slane %v3206_v52, %v3875_v3 }
 0x5f4   : > { %v992_v21 = vadd.f32 %v991_v10, %v990_v45  ;;  %v997_v24 = vadd.f32 %v996_v54, %v995_v18  ;;  %v1002_v25 = vadd.f32 %v1001_v6, %v1000_v34 }
 0x5f5   : > { %v3209_v61 = vpop.permute.xlu1 %3208  ;;  %v1007_v17 = vsel %vm957_vm11, %v956_v48, 0.0 }
 0x5f6   : > { %v3235_v0 = vrot.slane %v3209_v61, %v3875_v3  ;;  %v1314_v26 = vpop.permute.xlu0 %1313  ;;  %v3455_v28 = vsel %vm296_vm4, %v992_v21, %v3454_v8  ;;  %v998_v46 = vrot.slane %v997_v24, 1  ;;  %v1003_v55 = vrot.slane %v1002_v25, 2 }
 0x5f7   : > { %v1008_v13 = vrot.slane %v1007_v17, 4  ;;  %v1351_v5 = vmul.f32 %v1314_v26, %v5666_v39  ;;  %v2157_v26 = vmul.f32 %v5186_v12, %v5666_v39 }
 0x5f8   : > { %v5230_v4 = vsel %vm290_vm1, %v3235_v0, %v3231_v14  ;;  %v999_v63 = vadd.f32 %v998_v46, %v997_v24  ;;  %v1004_v2 = vadd.f32 %v1003_v55, %v1002_v25 }
 0x5f9   : > { %v5232_v23 = vpop.permute.xlu1 %2142  ;;  %v1009_v52 = vadd.f32 %v1008_v13, %v1007_v17  ;;  %v1360_v58 = vsel %vm1359_vm12, %v1351_v5, 0.0 }
 0x5fa   : > { %v1319_v45 = vpop.permute.xlu0 %1318  ;;  %v3456_v18 = vsel %vm298_vm5, %v999_v63, %v3455_v28  ;;  %v1005_v30 = vrot.slane %v1004_v2, 1  ;;  %v1361_v37 = vrot.slane %v1360_v58, 4 }
 0x5fb   : > { %v1010_v34 = vrot.slane %v1009_v52, 2  ;;  %v1352_v8 = vmul.f32 %v1319_v45, %v5666_v39 }
 0x5fc   : > { %v1006_v54 = vadd.f32 %v1005_v30, %v1004_v2  ;;  %v1362_v48 = vadd.f32 %v1361_v37, %v1360_v58 }
 0x5fd   : > { %v5237_v10 = vpop.permute.xlu1 %2147  ;;  %v1011_v6 = vadd.f32 %v1010_v34, %v1009_v52  ;;  %v1367_v61 = vsel %vm1359_vm12, %v1352_v8, 0.0 }
 0x5fe   : > { %v1324_v32 = vpop.permute.xlu0 %1323  ;;  %v1363_v24 = vrot.slane %v1362_v48, 2  ;;  %v1368_v25 = vrot.slane %v1367_v61, 4  ;;  %v3457_v14 = vsel %vm300_vm6, %v1006_v54, %v3456_v18  ;;  %v2178_v18 = vsel %vm2163_vm13, %v2157_v26, 0.0 }
 0x5ff   : > { %v1012_v21 = vrot.slane %v1011_v6, 1  ;;  %v1353_v0 = vmul.f32 %v1324_v32, %v5666_v39  ;;  %v2158_v26 = vmul.f32 %v5193_v16, %v5666_v39 }
 0x600   : > { %v1364_v46 = vadd.f32 %v1363_v24, %v1362_v48  ;;  %v1369_v55 = vadd.f32 %v1368_v25, %v1367_v61  ;;  %v2179_v61 = vrot.slane %v2178_v18, 4 }
 0x601   : > { %v5241_v17 = vpop.permute.xlu1 %2152  ;;  %v1013_v28 = vadd.f32 %v1012_v21, %v1011_v6  ;;  %v1374_v13 = vsel %vm1359_vm12, %v1353_v0, 0.0 }
 0x602   : > { %v1329_v5 = vpop.permute.xlu0 %1328  ;;  %v1370_v63 = vrot.slane %v1369_v55, 2  ;;  %v1375_v2 = vrot.slane %v1374_v13, 4  ;;  %v1365_v52 = vrot.slane %v1364_v46, 1 }
 0x603   : > { %v1354_v58 = vmul.f32 %v1329_v5, %v5666_v39  ;;  %v5251_v30 = vsel %vm302_vm7, %v1013_v28, %v3457_v14 }
 0x604   : > { %5672 = vst [vmem:[#allocation4_spill] sm:$0xff] %v5251_v30  ;;  %v1371_v12 = vadd.f32 %v1370_v63, %v1369_v55  ;;  %v1376_v34 = vadd.f32 %v1375_v2, %v1374_v13  ;;  %v1366_v32 = vadd.f32 %v1365_v52, %v1364_v46 }
 0x605   : > { %v5248_v45 = vpop.permute.xlu1 %2812  ;;  %v1381_v37 = vsel %vm1359_vm12, %v1354_v58, 0.0  ;;  %v2180_v58 = vadd.f32 %v2179_v61, %v2178_v18 }
 0x606   : > { %v1334_v8 = vpop.permute.xlu0 %1333  ;;  %v1372_v54 = vrot.slane %v1371_v12, 1  ;;  %v1377_v6 = vrot.slane %v1376_v34, 2  ;;  %v1382_v48 = vrot.slane %v1381_v37, 4 }
 0x607   : > { %v1355_v21 = vmul.f32 %v1334_v8, %v5666_v39 }
 0x608   : > { %v1373_v25 = vadd.f32 %v1372_v54, %v1371_v12  ;;  %v1378_v0 = vadd.f32 %v1377_v6, %v1376_v34  ;;  %v1383_v5 = vadd.f32 %v1382_v48, %v1381_v37  ;;  %v2185_v6 = vsel %vm2163_vm13, %v2158_v26, 0.0 }
 0x609   : > { %v3212_v24 = vpop.permute.xlu1 %3211  ;;  %v1388_v28 = vsel %vm1359_vm12, %v1355_v21, 0.0 }
 0x60a   : > { %v3239_v14 = vrot.slane %v3212_v24, %v3875_v3  ;;  %v1339_v55 = vpop.permute.xlu0 %1338  ;;  %v3470_v63 = vsel %vm290_vm1, %v1373_v25, %v1366_v32  ;;  %v1379_v46 = vrot.slane %v1378_v0, 1  ;;  %v1384_v2 = vrot.slane %v1383_v5, 2 }
 0x60b   : > { %v1389_v52 = vrot.slane %v1388_v28, 4  ;;  %v1356_v12 = vmul.f32 %v1339_v55, %v5666_v39  ;;  %v2181_v25 = vrot.slane %v2180_v58, 2 }
 0x60c   : > { %v5266_v34 = vsel %vm292_vm2, %v3239_v14, %v5230_v4  ;;  %v1380_v16 = vadd.f32 %v1379_v46, %v1378_v0  ;;  %v1385_v8 = vadd.f32 %v1384_v2, %v1383_v5  ;;  %v2160_v4 = vmul.f32 %v5232_v23, %v5666_v39 }
 0x60d   : > { %v5268_v37 = vpop.permute.xlu1 %2815  ;;  %v1390_v54 = vadd.f32 %v1389_v52, %v1388_v28  ;;  %v1395_v48 = vsel %vm1359_vm12, %v1356_v12, 0.0  ;;  %v2161_v0 = vmul.f32 %v5237_v10, %v5666_v39  ;;  %v2186_v46 = vrot.slane %v2185_v6, 4 }
 0x60e   : > { %v1344_v32 = vpop.permute.xlu0 %1343  ;;  %v3471_v21 = vsel %vm292_vm2, %v1380_v16, %v3470_v63  ;;  %v1386_v24 = vrot.slane %v1385_v8, 1  ;;  %v1396_v61 = vrot.slane %v1395_v48, 4  ;;  %v2829_v63 = vrot.slane %v5197_v1, %v3875_v3 }
 0x60f   : > { %v1391_v18 = vrot.slane %v1390_v54, 2  ;;  %v1357_v14 = vmul.f32 %v1344_v32, %v5666_v39  ;;  %v2162_v2 = vmul.f32 %v5241_v17, %v5666_v39  ;;  %v5286_v29 = vadd.f32 %v2181_v25, %v2180_v58 }
 0x610   : > { %v1387_v5 = vadd.f32 %v1386_v24, %v1385_v8  ;;  %v1397_v28 = vadd.f32 %v1396_v61, %v1395_v48  ;;  %v2833_v10 = vrot.slane %v5202_v59, %v3875_v3  ;;  %v2199_v8 = vsel %vm2163_vm13, %v2160_v4, 0.0 }
 0x611   : > { %v5276_v55 = vpop.permute.xlu1 %2818  ;;  %v1392_v26 = vadd.f32 %v1391_v18, %v1390_v54  ;;  %v1402_v52 = vsel %vm1359_vm12, %v1357_v14, 0.0  ;;  %v2206_v17 = vsel %vm2163_vm13, %v2161_v0, 0.0  ;;  %v2837_v61 = vrot.slane %v5207_v31, %v3875_v3 }
 0x612   : > { %v1349_v23 = vpop.permute.xlu0 %1348  ;;  %v3472_v12 = vsel %vm294_vm3, %v1387_v5, %v3471_v21  ;;  %v1398_v32 = vrot.slane %v1397_v28, 2  ;;  %v1403_v13 = vrot.slane %v1402_v52, 4  ;;  %v2187_v21 = vadd.f32 %v2186_v46, %v2185_v6 }
 0x613   : > { %v1393_v16 = vrot.slane %v1392_v26, 1  ;;  %v1358_v1 = vmul.f32 %v1349_v23, %v5666_v39  ;;  %v2213_v58 = vsel %vm2163_vm13, %v2162_v2, 0.0  ;;  %v2858_v30 = vsel %vm290_vm1, %v2833_v10, %v2829_v63 }
 0x614   : > { %v1399_v24 = vadd.f32 %v1398_v32, %v1397_v28  ;;  %v1404_v18 = vadd.f32 %v1403_v13, %v1402_v52  ;;  %v2200_v0 = vrot.slane %v2199_v8, 4  ;;  %v2214_v28 = vrot.slane %v2213_v58, 4 }
 0x615   : > { %v5292_v54 = vpop.permute.xlu1 %3217  ;;  %v1394_v48 = vadd.f32 %v1393_v16, %v1392_v26  ;;  %v1409_v25 = vsel %vm1359_vm12, %v1358_v1, 0.0  ;;  %v2207_v26 = vrot.slane %v2206_v17, 4  ;;  %v2188_v2 = vrot.slane %v2187_v21, 2 }
 0x616   : > { %v2118_v59 = vpop.permute.xlu0 %2117  ;;  %v1400_v14 = vrot.slane %v1399_v24, 1  ;;  %v1405_v5 = vrot.slane %v1404_v18, 2  ;;  %v1410_v23 = vrot.slane %v1409_v25, 4  ;;  %v2859_v16 = vsel %vm292_vm2, %v2837_v61, %v2858_v30 }
 0x617   : > { %v3473_v4 = vsel %vm296_vm4, %v1394_v48, %v3472_v12  ;;  %v2155_v13 = vmul.f32 %v2118_v59, %v5666_v39  ;;  %v2841_v12 = vrot.slane %v5248_v45, %v3875_v3  ;;  %v2201_v59 = vadd.f32 %v2200_v0, %v2199_v8 }
 0x618   : > { %v1401_v46 = vadd.f32 %v1400_v14, %v1399_v24  ;;  %v1406_v31 = vadd.f32 %v1405_v5, %v1404_v18  ;;  %v1411_v52 = vadd.f32 %v1410_v23, %v1409_v25  ;;  %v2208_v57 = vadd.f32 %v2207_v26, %v2206_v17 }
 0x619   : > { %v2822_v6 = vpop.permute.xlu1 %2821  ;;  %v2164_v32 = vsel %vm2163_vm13, %v2155_v13, 0.0  ;;  %v2845_v24 = vrot.slane %v5268_v37, %v3875_v3  ;;  %v2215_v30 = vadd.f32 %v2214_v28, %v2213_v58  ;;  %v2860_v5 = vsel %vm294_vm3, %v2841_v12, %v2859_v16 }
 0x61a   : > { %v2123_v1 = vpop.permute.xlu0 %2122  ;;  %v3474_v63 = vsel %vm298_vm5, %v1401_v46, %v3473_v4  ;;  %v1407_v10 = vrot.slane %v1406_v31, 1  ;;  %v1412_v48 = vrot.slane %v1411_v52, 2  ;;  %v2165_v51 = vrot.slane %v2164_v32, 4 }
 0x61b   : > { %v2156_v18 = vmul.f32 %v2123_v1, %v5666_v39  ;;  %v2849_v4 = vrot.slane %v5276_v55, %v3875_v3  ;;  %v2853_v8 = vrot.slane %v2822_v6, %v3875_v3  ;;  %v2189_v46 = vadd.f32 %v2188_v2, %v2187_v21 }
 0x61c   : > { %v1408_v61 = vadd.f32 %v1407_v10, %v1406_v31  ;;  %v1413_v45 = vadd.f32 %v1412_v48, %v1411_v52  ;;  %v2166_v14 = vadd.f32 %v2165_v51, %v2164_v32  ;;  %v2202_v58 = vrot.slane %v2201_v59, 2 }
 0x61d   : > { %v5310_v25 = vpop.permute.xlu1 %3220  ;;  %v2171_v23 = vsel %vm2163_vm13, %v2156_v18, 0.0  ;;  %v2861_v28 = vsel %vm296_vm4, %v2845_v24, %v2860_v5  ;;  %v2209_v32 = vrot.slane %v2208_v57, 2  ;;  %v2216_v48 = vrot.slane %v2215_v30, 2 }
 0x61e   : > { %v2138_v17 = vpop.permute.xlu0 %2137  ;;  %v1414_v0 = vrot.slane %v1413_v45, 1  ;;  %v2167_v37 = vrot.slane %v2166_v14, 2  ;;  %v2172_v26 = vrot.slane %v2171_v23, 4  ;;  %v3475_v31 = vsel %vm300_vm6, %v1408_v61, %v3474_v63 }
 0x61f   : > { %v2159_v13 = vmul.f32 %v2138_v17, %v5666_v39  ;;  %v2862_v6 = vsel %vm298_vm5, %v2849_v4, %v2861_v28  ;;  %v2210_v17 = vadd.f32 %v2209_v32, %v2208_v57 }
 0x620   : > { %v1415_v52 = vadd.f32 %v1414_v0, %v1413_v45  ;;  %v2168_v16 = vadd.f32 %v2167_v37, %v2166_v14  ;;  %v2173_v55 = vadd.f32 %v2172_v26, %v2171_v23  ;;  %v2863_v21 = vsel %vm300_vm6, %v2853_v8, %v2862_v6 }
 0x621   : > { %v2825_v51 = vpop.permute.xlu1 %2824  ;;  %v2192_v12 = vsel %vm2163_vm13, %v2159_v13, 0.0  ;;  %v2203_v45 = vadd.f32 %v2202_v58, %v2201_v59  ;;  %v2183_v23 = vrot.slane %v5286_v29, 1  ;;  %v2190_v8 = vrot.slane %v2189_v46, 1 }
 0x622   : > { %v2193_v1 = vrot.slane %v2192_v12, 4  ;;  %v2857_v10 = vrot.slane %v2825_v51, %v3875_v3  ;;  %v2174_v18 = vrot.slane %v2173_v55, 2  ;;  %v5325_v2 = vsel %vm302_vm7, %v1415_v52, %v3475_v31 }
 0x623   : > { %v3673_v61 = vpack.i.bf16 %v5225_v36, %v5325_v2  ;;  %v2169_v14 = vrot.slane %v2168_v16, 1  ;;  %v2217_v37 = vadd.f32 %v2216_v48, %v2215_v30  ;;  %v2204_v28 = vrot.slane %v2203_v45, 1 }
 0x624   : > { %v2194_v24 = vadd.f32 %v2193_v1, %v2192_v12  ;;  %v2864_v63 = vsel %vm302_vm7, %v2857_v10, %v2863_v21  ;;  %v2175_v5 = vadd.f32 %v2174_v18, %v2173_v55  ;;  %v2184_v52 = vadd.f32 %v2183_v23, %v5286_v29 }
 0x625   : > { %v2866_v4 = vsel %vm305_vm8, %v2864_v63, 0.0  ;;  %v2170_v51 = vadd.f32 %v2169_v14, %v2168_v16  ;;  %v2211_v12 = vrot.slane %v2210_v17, 1  ;;  %v2191_v58 = vadd.f32 %v2190_v8, %v2189_v46 }
 0x626   : > { %v2195_v0 = vrot.slane %v2194_v24, 2  ;;  %2867 = vadd.xlane.f32.xlu0 %v2866_v4  ;;  %v2176_v26 = vrot.slane %v2175_v5, 1  ;;  %v2218_v55 = vrot.slane %v2217_v37, 1  ;;  %v2205_v32 = vadd.f32 %v2204_v28, %v2203_v45 }
 0x627   : > { %v2212_v30 = vadd.f32 %v2211_v12, %v2210_v17  ;;  %v3247_v45 = vrot.slane %v5292_v54, %v3875_v3  ;;  %v3251_v14 = vrot.slane %v5310_v25, %v3875_v3 }
 0x628   : > { %v2196_v13 = vadd.f32 %v2195_v0, %v2194_v24  ;;  %v2177_v31 = vadd.f32 %v2176_v26, %v2175_v5  ;;  %v2219_v18 = vadd.f32 %v2218_v55, %v2217_v37  ;;  %v3227_v5 = vpop.permute.xlu1 %3226 }
 0x629   : > { %v3259_v26 = vrot.slane %v3227_v5, %v3875_v3 }
 0x62a   : > { %v2197_v59 = vrot.slane %v2196_v13, 1  ;;  %v3506_v6 = vsel %vm290_vm1, %v2177_v31, %v2170_v51 }
 0x62b   : > { %v3507_v1 = vsel %vm292_vm2, %v2184_v52, %v3506_v6 }
 0x62c   : > { %v2198_v57 = vadd.f32 %v2197_v59, %v2196_v13  ;;  %v3508_v10 = vsel %vm294_vm3, %v2191_v58, %v3507_v1 }
 0x62e   : > { %v3509_v48 = vsel %vm296_vm4, %v2198_v57, %v3508_v10 }
 0x62f   : > { %v3510_v16 = vsel %vm298_vm5, %v2205_v32, %v3509_v48 }
 0x630   : > { %v3511_v29 = vsel %vm300_vm6, %v2212_v30, %v3510_v16 }
 0x631   : > { %v5340_v21 = vsel %vm302_vm7, %v2219_v18, %v3511_v29 }
 0x64b   : > { %v2466_v46 = vpop.xlane.xlu0 %2465 }
 0x64c   : > { %3826 = vrcp.f32 %v2466_v46 }
 0x653   : > { %v3215_v24 = vpop.permute.xlu0 %3214 }
 0x654   : > { %v3243_v63 = vrot.slane %v3215_v24, %v3875_v3 }
 0x656   : > { %v3262_v4 = vsel %vm294_vm3, %v3243_v63, %v5266_v34 }
 0x657   : > { %v3263_v23 = vsel %vm296_vm4, %v3247_v45, %v3262_v4  ;;  %v3224_v17 = vpop.permute.xlu0 %3223 }
 0x658   : > { %v3255_v0 = vrot.slane %v3224_v17, %v3875_v3  ;;  %v3264_v8 = vsel %vm298_vm5, %v3251_v14, %v3263_v23 }
 0x659   : > { %v3827_v37 = vpop.eup %3826 }
 0x65a   : > { %v3265_v13 = vsel %vm300_vm6, %v3255_v0, %v3264_v8  ;;  %v2472_v54 = vrot.slane %v3827_v37, %v3890_v15  ;;  %v2480_v51 = vrot.slane %v3827_v37, %v4295_v43  ;;  %v2488_v52 = vrot.slane %v3827_v37, %v4320_v44 }
 0x65b   : > { %v3266_v25 = vsel %vm302_vm7, %v3259_v26, %v3265_v13  ;;  %v2496_v12 = vrot.slane %v3827_v37, %v4334_v62  ;;  %v2476_v58 = vrot.slane %v3827_v37, %v4252_v22  ;;  %v2484_v55 = vrot.slane %v3827_v37, %v4311_v50 }
 0x65c   : > { %v3268_v28 = vsel %vm305_vm8, %v3266_v25, 0.0  ;;  %v2509_v34 = vmul.f32 %v4880_v19, %v2472_v54  ;;  %v2511_v31 = vmul.f32 %v4883_v33, %v2480_v51  ;;  %v2513_v3 = vmul.f32 %v4889_v35, %v2488_v52 }
 0x65d   : > { %3269 = vadd.xlane.f32.xlu1 %v3268_v28  ;;  %v2515_v59 = vmul.f32 %v4896_v40, %v2496_v12  ;;  %v2510_v19 = vmul.f32 %v4886_v53, %v2476_v58  ;;  %v2512_v33 = vmul.f32 %v4892_v27, %v2484_v55  ;;  %v2492_v6 = vrot.slane %v3827_v37, %v4328_v56 }
 0x65e   : > { %2519 = vperm.xlu0 %3667, %v2509_v34   ;;  %v2500_v1 = vrot.slane %v3827_v37, %v4340_v42 }
 0x65f   : > { %v2514_v35 = vmul.f32 %v4901_v38, %v2492_v6 }
 0x660   : > { %v2516_v40 = vmul.f32 %v4908_v20, %v2500_v1 }
 0x662   : > { %2529 = vperm.xlu0 %3667, %v2511_v31  }
 0x666   : > { %2539 = vperm.xlu0 %3667, %v2513_v3  }
 0x66a   : > { %2549 = vperm.xlu0 %3667, %v2515_v59  }
 0x66e   : > { %2524 = vperm.xlu1 %3666, %v2510_v19  }
 0x672   : > { %2534 = vperm.xlu1 %3666, %v2512_v33  }
 0x676   : > { %2544 = vperm.xlu1 %3666, %v2514_v35  }
 0x67a   : > { %2554 = vperm.xlu1 %3666, %v2516_v40  }
 0x6af   : > { %v2868_v57 = vpop.xlane.xlu0 %2867 }
 0x6b0   : > { %3828 = vrcp.f32 %v2868_v57 }
 0x6bd   : > { %v5372_v32 = vpop.eup %3828 }
 0x6be   : > { %v2874_v53 = vrot.slane %v5372_v32, %v3890_v15  ;;  %v2878_v27 = vrot.slane %v5372_v32, %v4252_v22  ;;  %v2882_v30 = vrot.slane %v5372_v32, %v4295_v43  ;;  %v2886_v40 = vrot.slane %v5372_v32, %v4311_v50 }
 0x6c0   : > { %v2911_v10 = vmul.f32 %v4992_v9, %v2874_v53  ;;  %v2912_v38 = vmul.f32 %v4998_v41, %v2878_v27  ;;  %v2913_v20 = vmul.f32 %v5006_v7, %v2882_v30 }
 0x6c2   : > { %2921 = vperm.xlu0 %3667, %v2911_v10   ;;  %2926 = vperm.xlu1 %3666, %v2912_v38  }
 0x6c6   : > { %2931 = vperm.xlu0 %3667, %v2913_v20  }
 0x6d9   : > { %v2520_v48 = vpop.permute.xlu0 %2519 }
 0x6da   : > { %v2557_v29 = vmul.f32 %v2520_v48, %v5666_v39 }
 0x6dc   : > { %v2566_v41 = vsel %vm2565_vm14, %v2557_v29, 0.0 }
 0x6dd   : > { %v2530_v18 = vpop.permute.xlu0 %2529  ;;  %v2567_v14 = vrot.slane %v2566_v41, 4 }
 0x6de   : > { %v2559_v46 = vmul.f32 %v2530_v18, %v5666_v39 }
 0x6df   : > { %v2568_v13 = vadd.f32 %v2567_v14, %v2566_v41 }
 0x6e0   : > { %v2580_v45 = vsel %vm2565_vm14, %v2559_v46, 0.0 }
 0x6e1   : > { %v2540_v9 = vpop.permute.xlu0 %2539  ;;  %v2581_v8 = vrot.slane %v2580_v45, 4  ;;  %v2569_v33 = vrot.slane %v2568_v13, 2 }
 0x6e2   : > { %v2561_v5 = vmul.f32 %v2540_v9, %v5666_v39 }
 0x6e3   : > { %v2582_v52 = vadd.f32 %v2581_v8, %v2580_v45 }
 0x6e4   : > { %v2594_v54 = vsel %vm2565_vm14, %v2561_v5, 0.0 }
 0x6e5   : > { %v2550_v17 = vpop.permute.xlu0 %2549  ;;  %v2595_v59 = vrot.slane %v2594_v54, 4  ;;  %v2583_v30 = vrot.slane %v2582_v52, 2 }
 0x6e6   : > { %v3270_v16 = vpop.xlane.xlu1 %3269  ;;  %v2563_v25 = vmul.f32 %v2550_v17, %v5666_v39  ;;  %v2894_v17 = vrot.slane %v5372_v32, %v4328_v56 }
 0x6e7   : > { %3830 = vrcp.f32 %v3270_v16  ;;  %v2596_v20 = vadd.f32 %v2595_v59, %v2594_v54  ;;  %v2570_v16 = vadd.f32 %v2569_v33, %v2568_v13  ;;  %v2584_v45 = vadd.f32 %v2583_v30, %v2582_v52  ;;  %v5676_v52 = vld [vmem:[#allocation23_spill] sm:$0xff] }
 0x6e8   : > { %v2608_v6 = vsel %vm2565_vm14, %v2563_v25, 0.0 }
 0x6e9   : > { %v2609_v48 = vrot.slane %v2608_v6, 4  ;;  %v2571_v5 = vrot.slane %v2570_v16, 1  ;;  %v2585_v13 = vrot.slane %v2584_v45, 1 }
 0x6ea   : > { %v2525_v24 = vpop.permute.xlu1 %2524 }
 0x6eb   : > { %v2558_v63 = vmul.f32 %v2525_v24, %v5666_v39  ;;  %v2610_v14 = vadd.f32 %v2609_v48, %v2608_v6  ;;  %v2586_v33 = vadd.f32 %v2585_v13, %v2584_v45  ;;  %v5683_v45 = vld [vmem:[#allocation26_spill] sm:$0xff] }
 0x6ed   : > { %v2573_v7 = vsel %vm2565_vm14, %v2558_v63, 0.0  ;;  %v2611_v25 = vrot.slane %v2610_v14, 2 }
 0x6ee   : > { %v2574_v4 = vrot.slane %v2573_v7, 4  ;;  %v2535_v23 = vpop.permute.xlu1 %2534 }
 0x6ef   : > { %v2560_v0 = vmul.f32 %v2535_v23, %v5666_v39  ;;  %v5674_v23 = vld [vmem:[#allocation14_spill] sm:$0xff] }
 0x6f0   : > { %v2575_v37 = vadd.f32 %v2574_v4, %v2573_v7  ;;  %v2597_v7 = vrot.slane %v2596_v20, 2  ;;  %v5673_v4 = vld [vmem:[#allocation22_spill] sm:$0xff] }
 0x6f1   : > { %v2587_v26 = vsel %vm2565_vm14, %v2560_v0, 0.0 }
 0x6f2   : > { %v2588_v28 = vrot.slane %v2587_v26, 4  ;;  %v2545_v34 = vpop.permute.xlu1 %2544  ;;  %v2576_v3 = vrot.slane %v2575_v37, 2  ;;  %v2598_v54 = vadd.f32 %v2597_v7, %v2596_v20 }
 0x6f3   : > { %v2562_v51 = vmul.f32 %v2545_v34, %v5666_v39  ;;  %v5675_v34 = vld [vmem:[#allocation19_spill] sm:$0xff] }
 0x6f4   : > { %v5395_v31 = vpop.eup %3830  ;;  %v2589_v12 = vadd.f32 %v2588_v28, %v2587_v26  ;;  %v2577_v10 = vadd.f32 %v2576_v3, %v2575_v37  ;;  %v2572_v28 = vadd.f32 %v2571_v5, %v2570_v16  ;;  %v2916_v3 = vmul.f32 %v5676_v52, %v2894_v17  ;;  %v5680_v16 = vld [vmem:[#allocation27_spill] sm:$0xff] }
 0x6f5   : > { %v2601_v58 = vsel %vm2565_vm14, %v2562_v51, 0.0  ;;  %v3280_v19 = vrot.slane %v5395_v31, %v4252_v22  ;;  %v3276_v55 = vrot.slane %v5395_v31, %v3890_v15  ;;  %v3284_v22 = vrot.slane %v5395_v31, %v4295_v43 }
 0x6f6   : > { %v2602_v35 = vrot.slane %v2601_v58, 4  ;;  %v2555_v1 = vpop.permute.xlu1 %2554  ;;  %v2590_v38 = vrot.slane %v2589_v12, 2  ;;  %v2890_v43 = vrot.slane %v5372_v32, %v4320_v44  ;;  %v2578_v9 = vrot.slane %v2577_v10, 1 }
 0x6f7   : > { %v2564_v57 = vmul.f32 %v2555_v1, %v5666_v39  ;;  %v3314_v53 = vmul.f32 %v5028_v11, %v3280_v19  ;;  %v3313_v27 = vmul.f32 %v5017_v49, %v3276_v55  ;;  %v3315_v46 = vmul.f32 %v5071_v60, %v3284_v22 }
 0x6f8   : > { %v2603_v15 = vadd.f32 %v2602_v35, %v2601_v58  ;;  %v2914_v11 = vmul.f32 %v5062_v47, %v2886_v40  ;;  %v3288_v49 = vrot.slane %v5395_v31, %v4311_v50  ;;  %v2591_v24 = vadd.f32 %v2590_v38, %v2589_v12 }
 0x6f9   : > { %v2615_v18 = vsel %vm2565_vm14, %v2564_v57, 0.0  ;;  %3328 = vperm.xlu0 %3667, %v3314_v53   ;;  %3323 = vperm.xlu1 %3666, %v3313_v27   ;;  %v2915_v47 = vmul.f32 %v5674_v23, %v2890_v43  ;;  %v3292_v50 = vrot.slane %v5395_v31, %v4320_v44  ;;  %v2579_v0 = vadd.f32 %v2578_v9, %v2577_v10  ;;  %v5677_v57 = vld [vmem:[#allocation17_spill] sm:$0xff]  ;;  %v5681_v43 = vld [vmem:[#allocation20_spill] sm:$0xff] }
 0x6fa   : > { %v2616_v29 = vrot.slane %v2615_v18, 4  ;;  %v2604_v41 = vrot.slane %v2603_v15, 2  ;;  %v3316_v60 = vmul.f32 %v5673_v4, %v3288_v49  ;;  %v2592_v8 = vrot.slane %v2591_v24, 1  ;;  %v5678_v53 = vld [vmem:[#allocation25_spill] sm:$0xff] }
 0x6fb   : > { %v3317_v51 = vmul.f32 %v5675_v34, %v3292_v50  ;;  %v3296_v44 = vrot.slane %v5395_v31, %v4328_v56  ;;  %v2898_v12 = vrot.slane %v5372_v32, %v4334_v62  ;;  %v3524_v59 = vsel %vm290_vm1, %v2579_v0, %v2572_v28 }
 0x6fc   : > { %v2617_v63 = vadd.f32 %v2616_v29, %v2615_v18  ;;  %v2605_v37 = vadd.f32 %v2604_v41, %v2603_v15  ;;  %v2593_v58 = vadd.f32 %v2592_v8, %v2591_v24  ;;  %v2599_v6 = vrot.slane %v2598_v54, 1 }
 0x6fd   : > { %3333 = vperm.xlu0 %3667, %v3315_v46   ;;  %2936 = vperm.xlu1 %3666, %v2914_v11   ;;  %v2612_v35 = vadd.f32 %v2611_v25, %v2610_v14  ;;  %v2902_v1 = vrot.slane %v5372_v32, %v4340_v42  ;;  %v3525_v40 = vsel %vm292_vm2, %v2586_v33, %v3524_v59  ;;  %v5679_v32 = vld [vmem:[#allocation24_spill] sm:$0xff] }
 0x6fe   : > { %v2618_v26 = vrot.slane %v2617_v63, 2  ;;  %v2606_v19 = vrot.slane %v2605_v37, 1  ;;  %v3318_v56 = vmul.f32 %v5677_v57, %v3296_v44  ;;  %v2917_v27 = vmul.f32 %v5678_v53, %v2898_v12 }
 0x6ff   : > { %v3300_v22 = vrot.slane %v5395_v31, %v4334_v62  ;;  %v3526_v10 = vsel %vm294_vm3, %v2593_v58, %v3525_v40  ;;  %v2600_v30 = vadd.f32 %v2599_v6, %v2598_v54  ;;  %v2613_v20 = vrot.slane %v2612_v35, 1 }
 0x700   : > { %v2619_v55 = vadd.f32 %v2618_v26, %v2617_v63  ;;  %v2607_v38 = vadd.f32 %v2606_v19, %v2605_v37  ;;  %v2918_v29 = vmul.f32 %v5680_v16, %v2902_v1  ;;  %v3304_v46 = vrot.slane %v5395_v31, %v4340_v42  ;;  %v5682_v63 = vld [vmem:[#allocation4_spill] sm:$0xff] }
 0x701   : > { %3338 = vperm.xlu0 %3667, %v3316_v60   ;;  %2941 = vperm.xlu1 %3666, %v2915_v47   ;;  %v3527_v48 = vsel %vm296_vm4, %v2600_v30, %v3526_v10  ;;  %v3319_v18 = vmul.f32 %v5679_v32, %v3300_v22  ;;  %v2614_v49 = vadd.f32 %v2613_v20, %v2612_v35 }
 0x702   : > { %v2620_v15 = vrot.slane %v2619_v55, 1  ;;  %v3528_v11 = vsel %vm298_vm5, %v2607_v38, %v3527_v48  ;;  %v3320_v9 = vmul.f32 %v5681_v43, %v3304_v46  ;;  %v5684_v7 = vpack.i.bf16 %v5682_v63, %v5683_v45 }
 0x703   : > { %v3529_v24 = vsel %vm300_vm6, %v2614_v49, %v3528_v11 }
 0x704   : > { %v2621_v62 = vadd.f32 %v2620_v15, %v2619_v55 }
 0x705   : > { %3343 = vperm.xlu0 %3667, %v3317_v51   ;;  %2946 = vperm.xlu1 %3666, %v2916_v3  }
 0x706   : > { %v3530_v41 = vsel %vm302_vm7, %v2621_v62, %v3529_v24 }
 0x707   : > { %v3678_v42 = vpack.i.bf16 %v3530_v41, %v5340_v21 }
 0x709   : > { %3348 = vperm.xlu0 %3667, %v3318_v56   ;;  %2951 = vperm.xlu1 %3666, %v2917_v27  }
 0x70d   : > { %3353 = vperm.xlu0 %3667, %v3319_v18   ;;  %2956 = vperm.xlu1 %3666, %v2918_v29  }
 0x711   : > { %3669 = vrot.lane.b32.xlu0 %v5684_v7, %s3850_s20  ;;  %3358 = vperm.xlu1 %3666, %v3320_v9  }
 0x715   : > { %3674 = vrot.lane.b32.xlu1 %v3673_v61, %s3850_s20  ;;  %3679 = vrot.lane.b32.xlu0 %v3678_v42, %s3850_s20 }
 0x73d   : > { %v2922_v31 = vpop.permute.xlu0 %2921  ;;  %v2927_v14 = vpop.permute.xlu1 %2926 }
 0x73e   : > { %v2959_v5 = vmul.f32 %v2922_v31, %v5666_v39  ;;  %v2960_v60 = vmul.f32 %v2927_v14, %v5666_v39 }
 0x740   : > { %v2968_v23 = vsel %vm2967_vm15, %v2959_v5, 0.0  ;;  %v2975_v21 = vsel %vm2967_vm15, %v2960_v60, 0.0 }
 0x741   : > { %v2932_v4 = vpop.permute.xlu0 %2931  ;;  %v2969_v17 = vrot.slane %v2968_v23, 4  ;;  %v2976_v2 = vrot.slane %v2975_v21, 4 }
 0x742   : > { %v2961_v36 = vmul.f32 %v2932_v4, %v5666_v39 }
 0x743   : > { %v2970_v13 = vadd.f32 %v2969_v17, %v2968_v23  ;;  %v2977_v25 = vadd.f32 %v2976_v2, %v2975_v21 }
 0x744   : > { %v2982_v54 = vsel %vm2967_vm15, %v2961_v36, 0.0 }
 0x745   : > { %v2971_v58 = vrot.slane %v2970_v13, 2  ;;  %v2983_v19 = vrot.slane %v2982_v54, 4  ;;  %v2978_v33 = vrot.slane %v2977_v25, 2 }
 0x747   : > { %v2972_v10 = vadd.f32 %v2971_v58, %v2970_v13  ;;  %v2984_v38 = vadd.f32 %v2983_v19, %v2982_v54  ;;  %v5479_v32 = vadd.f32 %v2978_v33, %v2977_v25 }
 0x749   : > { %v2973_v9 = vrot.slane %v2972_v10, 1  ;;  %v2985_v63 = vrot.slane %v2984_v38, 2  ;;  %v2980_v31 = vrot.slane %v5479_v32, 1 }
 0x774   : > { %v3329_v47 = vpop.permute.xlu0 %3328  ;;  %v3324_v50 = vpop.permute.xlu1 %3323 }
 0x775   : > { %v3362_v61 = vmul.f32 %v3329_v47, %v5666_v39  ;;  %v3361_v37 = vmul.f32 %v3324_v50, %v5666_v39 }
 0x777   : > { %v3377_v28 = vsel %vm3369_vm9, %v3362_v61, 0.0  ;;  %v3370_v3 = vsel %vm3369_vm9, %v3361_v37, 0.0 }
 0x778   : > { %v3334_v0 = vpop.permute.xlu0 %3333  ;;  %v2937_v8 = vpop.permute.xlu1 %2936  ;;  %v3378_v55 = vrot.slane %v3377_v28, 4  ;;  %v3371_v6 = vrot.slane %v3370_v3, 4 }
 0x779   : > { %v3363_v26 = vmul.f32 %v3334_v0, %v5666_v39  ;;  %v2962_v34 = vmul.f32 %v2937_v8, %v5666_v39  ;;  %v2986_v8 = vadd.f32 %v2985_v63, %v2984_v38 }
 0x77a   : > { %v3379_v15 = vadd.f32 %v3378_v55, %v3377_v28  ;;  %v3372_v11 = vadd.f32 %v3371_v6, %v3370_v3 }
 0x77b   : > { %v3384_v44 = vsel %vm3369_vm9, %v3363_v26, 0.0  ;;  %v2989_v1 = vsel %vm2967_vm15, %v2962_v34, 0.0  ;;  %v2987_v33 = vrot.slane %v2986_v8, 1 }
 0x77c   : > { %v3339_v51 = vpop.permute.xlu0 %3338  ;;  %v2942_v52 = vpop.permute.xlu1 %2941  ;;  %v3385_v35 = vrot.slane %v3384_v44, 4  ;;  %v2990_v30 = vrot.slane %v2989_v1, 4  ;;  %v3380_v45 = vrot.slane %v3379_v15, 2  ;;  %v3373_v47 = vrot.slane %v3372_v11, 2 }
 0x77d   : > { %v3364_v12 = vmul.f32 %v3339_v51, %v5666_v39  ;;  %v2963_v59 = vmul.f32 %v2942_v52, %v5666_v39  ;;  %v2974_v51 = vadd.f32 %v2973_v9, %v2972_v10 }
 0x77e   : > { %v3386_v62 = vadd.f32 %v3385_v35, %v3384_v44  ;;  %v2991_v7 = vadd.f32 %v2990_v30, %v2989_v1  ;;  %v3381_v37 = vadd.f32 %v3380_v45, %v3379_v15  ;;  %v3374_v52 = vadd.f32 %v3373_v47, %v3372_v11 }
 0x77f   : > { %v3391_v56 = vsel %vm3369_vm9, %v3364_v12, 0.0  ;;  %v2996_v53 = vsel %vm2967_vm15, %v2963_v59, 0.0  ;;  %v2981_v11 = vadd.f32 %v2980_v31, %v5479_v32 }
 0x780   : > { %v3344_v40 = vpop.permute.xlu0 %3343  ;;  %v2947_v57 = vpop.permute.xlu1 %2946  ;;  %v3392_v18 = vrot.slane %v3391_v56, 4  ;;  %v2997_v16 = vrot.slane %v2996_v53, 4  ;;  %v3387_v50 = vrot.slane %v3386_v62, 2  ;;  %v2992_v26 = vrot.slane %v2991_v7, 2 }
 0x781   : > { %v3365_v27 = vmul.f32 %v3344_v40, %v5666_v39  ;;  %v2964_v22 = vmul.f32 %v2947_v57, %v5666_v39  ;;  %v3382_v40 = vrot.slane %v3381_v37, 1  ;;  %v3375_v15 = vrot.slane %v3374_v52, 1 }
 0x782   : > { %v3393_v14 = vadd.f32 %v3392_v18, %v3391_v56  ;;  %v2998_v5 = vadd.f32 %v2997_v16, %v2996_v53  ;;  %v3388_v12 = vadd.f32 %v3387_v50, %v3386_v62  ;;  %v2993_v57 = vadd.f32 %v2992_v26, %v2991_v7 }
 0x783   : > { %v3398_v20 = vsel %vm3369_vm9, %v3365_v27, 0.0  ;;  %v3003_v48 = vsel %vm2967_vm15, %v2964_v22, 0.0  ;;  %v3383_v9 = vadd.f32 %v3382_v40, %v3381_v37  ;;  %v3376_v45 = vadd.f32 %v3375_v15, %v3374_v52 }
 0x784   : > { %v3349_v29 = vpop.permute.xlu0 %3348  ;;  %v2952_v46 = vpop.permute.xlu1 %2951  ;;  %v3399_v49 = vrot.slane %v3398_v20, 4  ;;  %v3004_v24 = vrot.slane %v3003_v48, 4  ;;  %v3394_v54 = vrot.slane %v3393_v14, 2  ;;  %v2999_v25 = vrot.slane %v2998_v5, 2 }
 0x785   : > { %v3366_v43 = vmul.f32 %v3349_v29, %v5666_v39  ;;  %v2965_v41 = vmul.f32 %v2952_v46, %v5666_v39  ;;  %v3389_v30 = vrot.slane %v3388_v12, 1  ;;  %v2994_v62 = vrot.slane %v2993_v57, 1 }
 0x786   : > { %v3400_v21 = vadd.f32 %v3399_v49, %v3398_v20  ;;  %v3005_v36 = vadd.f32 %v3004_v24, %v3003_v48  ;;  %v3395_v56 = vadd.f32 %v3394_v54, %v3393_v14  ;;  %v3000_v53 = vadd.f32 %v2999_v25, %v2998_v5 }
 0x787   : > { %v3405_v42 = vsel %vm3369_vm9, %v3366_v43, 0.0  ;;  %v3010_v17 = vsel %vm2967_vm15, %v2965_v41, 0.0  ;;  %v2988_v14 = vadd.f32 %v2987_v33, %v2986_v8  ;;  %v3390_v5 = vadd.f32 %v3389_v30, %v3388_v12 }
 0x788   : > { %v3406_v4 = vrot.slane %v3405_v42, 4  ;;  %v3354_v60 = vpop.permute.xlu0 %3353  ;;  %v2957_v23 = vpop.permute.xlu1 %2956  ;;  %v3011_v61 = vrot.slane %v3010_v17, 4  ;;  %v3401_v3 = vrot.slane %v3400_v21, 2  ;;  %v3006_v59 = vrot.slane %v3005_v36, 2 }
 0x789   : > { %v3367_v0 = vmul.f32 %v3354_v60, %v5666_v39  ;;  %v2966_v13 = vmul.f32 %v2957_v23, %v5666_v39  ;;  %v3396_v49 = vrot.slane %v3395_v56, 1  ;;  %v3001_v24 = vrot.slane %v3000_v53, 1 }
 0x78a   : > { %v3407_v2 = vadd.f32 %v3406_v4, %v3405_v42  ;;  %v3012_v28 = vadd.f32 %v3011_v61, %v3010_v17  ;;  %v3402_v27 = vadd.f32 %v3401_v3, %v3400_v21  ;;  %v3007_v20 = vadd.f32 %v3006_v59, %v3005_v36 }
 0x78b   : > { %v3412_v34 = vsel %vm3369_vm9, %v3367_v0, 0.0  ;;  %v3017_v19 = vsel %vm2967_vm15, %v2966_v13, 0.0  ;;  %v2995_v23 = vadd.f32 %v2994_v62, %v2993_v57  ;;  %v3397_v47 = vadd.f32 %v3396_v49, %v3395_v56 }
 0x78c   : > { %v3413_v44 = vrot.slane %v3412_v34, 4  ;;  %v3408_v58 = vrot.slane %v3407_v2, 2  ;;  %v3359_v55 = vpop.permute.xlu1 %3358  ;;  %v3013_v6 = vrot.slane %v3012_v28, 2  ;;  %v3018_v1 = vrot.slane %v3017_v19, 4 }
 0x78d   : > { %v3368_v38 = vmul.f32 %v3359_v55, %v5666_v39  ;;  %v3403_v41 = vrot.slane %v3402_v27, 1  ;;  %v3008_v39 = vrot.slane %v3007_v20, 1  ;;  %v3542_v32 = vsel %vm290_vm1, %v2981_v11, %v2974_v51 }
 0x78e   : > { %v3414_v35 = vadd.f32 %v3413_v44, %v3412_v34  ;;  %v3019_v10 = vadd.f32 %v3018_v1, %v3017_v19  ;;  %v3409_v48 = vadd.f32 %v3408_v58, %v3407_v2  ;;  %v3014_v18 = vadd.f32 %v3013_v6, %v3012_v28  ;;  %v3670_v6 = vpop.permute.xlu0 %3669 }
 0x78f   : > { %v3419_v46 = vsel %vm3369_vm9, %v3368_v38, 0.0  ;;  %v3002_v31 = vadd.f32 %v3001_v24, %v3000_v53  ;;  %v3404_v17 = vadd.f32 %v3403_v41, %v3402_v27  ;;  %v3560_v36 = vsel %vm290_vm1, %v3383_v9, %v3376_v45 }
 0x790   : > { %v3415_v22 = vrot.slane %v3414_v35, 2  ;;  %v3020_v29 = vrot.slane %v3019_v10, 2  ;;  %v3420_v43 = vrot.slane %v3419_v46, 4  ;;  %v3410_v7 = vrot.slane %v3409_v48, 1 }
 0x791   : > { %v3015_v4 = vrot.slane %v3014_v18, 1  ;;  %v3009_v2 = vadd.f32 %v3008_v39, %v3007_v20  ;;  %v3543_v37 = vsel %vm292_vm2, %v2988_v14, %v3542_v32  ;;  %v3561_v8 = vsel %vm292_vm2, %v3390_v5, %v3560_v36 }
 0x792   : > { %v3416_v16 = vadd.f32 %v3415_v22, %v3414_v35  ;;  %v3021_v63 = vadd.f32 %v3020_v29, %v3019_v10  ;;  %v3421_v42 = vadd.f32 %v3420_v43, %v3419_v46  ;;  %v3411_v61 = vadd.f32 %v3410_v7, %v3409_v48  ;;  %v3675_v35 = vpop.permute.xlu1 %3674  ;;  %v3680_v22 = vpop.permute.xlu0 %3679 }
 0x793   : > { %v3016_v26 = vadd.f32 %v3015_v4, %v3014_v18  ;;  %v3544_v54 = vsel %vm294_vm3, %v2995_v23, %v3543_v37  ;;  %v3562_v25 = vsel %vm294_vm3, %v3397_v47, %v3561_v8  ;;  %v3672_v1 = vunpack.i.h.bf16 %v3670_v6 }
 0x794   : > { %v3417_v60 = vrot.slane %v3416_v16, 1  ;;  %v3022_v50 = vrot.slane %v3021_v63, 1  ;;  %v3422_v21 = vrot.slane %v3421_v42, 2  ;;  %v3545_v51 = vsel %vm296_vm4, %v3002_v31, %v3544_v54 }
 0x795   : > { %v3563_v52 = vsel %vm296_vm4, %v3404_v17, %v3562_v25  ;;  %v3546_v3 = vsel %vm298_vm5, %v3009_v2, %v3545_v51  ;;  %v3671_v40 = vunpack.i.l.bf16 %v3670_v6  ;;  %v3676_v57 = vunpack.i.l.bf16 %v3675_v35 }
 0x796   : > { %v3423_v0 = vadd.f32 %v3422_v21, %v3421_v42  ;;  %v3418_v13 = vadd.f32 %v3417_v60, %v3416_v16  ;;  %v3023_v28 = vadd.f32 %v3022_v50, %v3021_v63  ;;  %v3564_v44 = vsel %vm298_vm5, %v3411_v61, %v3563_v52 }
 0x797   : > { %v3547_v59 = vsel %vm300_vm6, %v3016_v26, %v3546_v3  ;;  %v3570_v56 = vsel %vm215_vm0, %v3671_v40, %v3672_v1  ;;  %v3677_v53 = vunpack.i.h.bf16 %v3675_v35  ;;  %vm3572_vm1 = vcmask 97280  }
 0x798   : > { %v3424_v34 = vrot.slane %v3423_v0, 1  ;;  %v3565_v58 = vsel %vm300_vm6, %v3418_v13, %v3564_v44  ;;  %v3548_v19 = vsel %vm302_vm7, %v3023_v28, %v3547_v59  ;;  %v3571_v27 = vsel %vm305_vm8, %v3570_v56, %v3676_v57 }
 0x799   : > { %vm3574_vm2 = vcmask 130048   ;;  %v3573_v10 = vsel %vm3572_vm1, %v3571_v27, %v3677_v53  ;;  %v3681_v38 = vunpack.i.l.bf16 %v3680_v22  ;;  %vm3576_vm3 = vcmask 162816  }
 0x79a   : > { %v3425_v12 = vadd.f32 %v3424_v34, %v3423_v0  ;;  %v3682_v30 = vunpack.i.h.bf16 %v3680_v22  ;;  %vm3578_vm4 = vcmask 195584   ;;  %vm3580_vm5 = vcmask 228352  }
 0x79b   : > { %v3575_v15 = vsel %vm3574_vm2, %v3573_v10, %v3681_v38  ;;  %vm3583_vm0 = vcmask 257024  }
 0x79c   : > { %v3566_v55 = vsel %vm302_vm7, %v3425_v12, %v3565_v58  ;;  %v3577_v16 = vsel %vm3576_vm3, %v3575_v15, %v3682_v30 }
 0x79d   : > { %v3683_v33 = vpack.i.bf16 %v3566_v55, %v3548_v19 }
 0x79f   : > { %3684 = vrot.lane.b32.xlu1 %v3683_v33, %s3850_s20 }
 0x811   : > { %v3685_v20 = vpop.permute.xlu1 %3684 }
 0x812   : > { %v3687_v48 = vunpack.i.h.bf16 %v3685_v20  ;;  %v3686_v18 = vunpack.i.l.bf16 %v3685_v20 }
 0x814   : > { %v3579_v29 = vsel %vm3578_vm4, %v3577_v16, %v3686_v18 }
 0x815   : > { %v3581_v46 = vsel %vm3580_vm5, %v3579_v29, %v3687_v48 }
 0x816   : > { %v3582_v11 = vpack.c.bf16 %v3581_v46, %v3581_v46 }
 0x818   : > { %3584 = vst.msk [vmem:[%s111_s23] sm:$0xf] %vm3583_vm0, %v3582_v11 }
 0x819 PF: > { %s11_s6 = sadd.s32 1, %s3838_s6  }
 0x81a   : > { %p8_p4 = scmp.ge.s32.totalorder %s11_s6, 4  }
 0x81c   :  { %10 = sbr.rel (!%p8_p4) target bundleno = 1 (0x1), region = 54 }

// kernel: crossformers_forward.57
= control target key start
LH: loop header
LB: loop body
LE: loop exit
PB: predicated region body
PF: predicated region fallthrough
CT: control target
= control target key end

     0   :  { %v117_v0 = vmov 0.0   ;;  %vm118_vm0 = vmmov 0   ;;  %vm45_vm1 = vcmask 261120   ;;  %s157_s1 = inlined_call_operand.vmem [shape: bf16[32,128], index: 1, kind: input, shape index: {}]   ;;  %s158_s0 = inlined_call_operand.vmem [shape: bf16[16,32], index: 0, kind: input, shape index: {}]   ;;  %s159_s2 = inlined_call_operand.vmem [shape: f32[1,128], index: 2, kind: input, shape index: {}]   ;;  %s160_s3 = inlined_call_operand.vmem [shape: f32[16,128], index: 3, kind: output, shape index: {}]  }
   0x1   :  { %104 = vmatprep.subr.bf16.mxu0 %v117_v0  ;;  %v114_v1 = vld [vmem:[%s157_s1 + $0x8] sm:$0xff]   ;;  %108 = vmatprep.mubr.msk.bf16.mxu0 %vm118_vm0, %v117_v0  ;;  %v115_v2 = vld [vmem:[%s157_s1] sm:$0xff]  }
   0x2   :  { %105 = vmatpush3.bf16.msra.mxu0 %v114_v1  ;;  %v116_v3 = vld [vmem:[%s158_s0] sm:$0xff]  }
   0x3   :  { %106 = vmatprep.subr.bf16.mxu0 %v117_v0  ;;  %v96_v4 = vld [vmem:[%s159_s2] ss:$0 sm:$0xff] }
   0x6   :  { %107 = vmatpush3.bf16.msra.mxu0 %v115_v2 }
   0x9   :  { %109 = vmatmul.mubr.msk.bf16.vlgmr.msra.gmra.mxu0 %vm45_vm1, %v116_v3 }
  0xc9   :  { %v83_v5 = vpop.f32.mrf.mxu0 }
  0xca   :  { %v84_v6 = vadd.f32 %v96_v4, %v83_v5 }
  0xcb   :  { %v110_v7 = vpop.f32.mrf.mxu0 }
  0xcc   :  { %90 = vst [vmem:[%s160_s3] sm:$0xff] %v84_v6 }
  0xcd   :  { %v86_v8 = vpop.f32.mrf.mxu0 }
  0xce   :  { %v87_v9 = vadd.f32 %v96_v4, %v86_v8 }
  0xcf   :  { %v111_v10 = vpop.f32.mrf.mxu0 }
  0xd0   :  { %91 = vst [vmem:[%s160_s3 + $0x8] sm:$0xff] %v87_v9 }

// kernel: crossformers_forward.40
= control target key start
LH: loop header
LB: loop body
LE: loop exit
PB: predicated region body
PF: predicated region fallthrough
CT: control target
= control target key end

     0   :  { %s2428_s6 = smov 0   ;;  %s3350_s0 = inlined_call_operand.vmem [shape: bf16[2,8,128], index: 0, kind: input, shape index: {}]   ;;  %s3351_s1 = inlined_call_operand.vmem [shape: bf16[2,8,32], index: 1, kind: output, shape index: {}]  }
   0x1 LB: > { %s2321_s7 = sadd.s32 4294967295, %s2406_s6   ;;  %p2325_p0 = scmp.ge.s32.totalorder %s2406_s6, 1  ;;  %s2406_s6 = sphi %s2428_s6, %s11_s6  }
   0x2   : > { %p86_p1 = scmp.lt.s32.totalorder %s2406_s6, 3 }
   0x4   : > { %p87_p2 = pnand %p2325_p0, %p86_p1 }
   0x5   : > { %p104_p3 = scmp.lt.s32.totalorder (!%p87_p2), %s2321_s7, 1  ;;  %s2408_s12 = smov (!%p87_p2), 96  }
   0x6   : > { %90 = sbr.rel (%p87_p2) target bundleno = 1241 (0x4d9), region = 24  ;;  %s2410_s13 = smov (!%p87_p2), 124  }
   0x7   : > { %s2411_s14 = smov (!%p87_p2), 120   ;;  %s2412_s15 = smov (!%p87_p2), 116  }
   0x8   : > { %s2413_s16 = smov (!%p87_p2), 112   ;;  %s2414_s17 = smov (!%p87_p2), 108  }
   0x9   : > { %s2415_s18 = smov (!%p87_p2), 104   ;;  %s2416_s19 = smov (!%p87_p2), 100  }
   0xa   : > { %s2417_s20 = smov (!%p87_p2), 64  }
   0xb   : > { %s3355_s7 = smov (!%p104_p3, %s2321_s7), 1  ;;  %v114_v2 = vlaneseq  ;;  %v2409_v3 = vmov 1966171168   ;;  %vm220_vm0 = vcmask 31744   ;;  %vm293_vm1 = vcmask 1041409  }
   0xc   : > { %s2326_s8 = sshll.u32 %s3355_s7, 2  ;;  %v122_v4 = vunpack.c.l.s4 %v2409_v3  ;;  %vm295_vm2 = vcmask 1042434   ;;  %vm297_vm3 = vcmask 1043459   ;;  %vm299_vm4 = vcmask 1044484  }
   0xd   : > { %s107_s11 = scalar_lea.vmem %s3350_s0, %s2326_s8  ;;  %v2448_v5 = vshrl.u32 %v114_v2, 7  ;;  %vm301_vm5 = vcmask 1045509   ;;  %vm303_vm6 = vcmask 1046534   ;;  %vm305_vm7 = vcmask 1047559   ;;  %s111_s23 = scalar_lea.vmem %s3351_s1, %s2326_s8 }
   0xe   : > { %v112_v0 = vld [vmem:[%s107_s11] sm:$0xf]  ;;  %v123_v6 = vunpack.c.0.s8 %v122_v4  ;;  %vm309_vm9 = vcmask 64512   ;;  %vm385_vm10 = vcmask 556544   ;;  %vm630_vm11 = vcmask 589344  }
   0xf   : > { %v2444_v1 = vunpack.c.l.bf16 %v112_v0  ;;  %v2455_v12 = vsub.s32 0, %v2448_v5  ;;  %vm867_vm12 = vcmask 622144   ;;  %vm1104_vm13 = vcmask 654944  }
  0x10   : > { %v126_v7 = vsub.s32 %v123_v6, %v2448_v5  ;;  %vm1341_vm14 = vcmask 687744   ;;  %vm1578_vm15 = vcmask 720544  }
  0x11   : > { %209 = vrot.lane.b32.xlu0 %v2444_v1, %s2408_s12  ;;  %v120_v9 = vcombine.high %v2444_v1, %v2444_v1 }
  0x12   : > { %v127_v8 = vrot.slane %v2444_v1, %v126_v7 }
  0x13   : > { %v134_v11 = vrot.slane %v120_v9, %v126_v7 }
  0x14   : > { %v135_v10 = vcombine.high %v127_v8, %v127_v8  ;;  %v143_v13 = vrot.slane %v127_v8, %v126_v7 }
  0x15   : > { %v136_v15 = vcombine.high %v134_v11, %v134_v11  ;;  %v150_v21 = vrot.slane %v134_v11, %v126_v7 }
  0x16   : > { %v157_v14 = vrot.slane %v135_v10, %v126_v7  ;;  %v165_v16 = vcombine.high %v143_v13, %v143_v13  ;;  %v172_v18 = vrot.slane %v143_v13, %v2455_v12 }
  0x17   : > { %v164_v22 = vrot.slane %v136_v15, %v126_v7  ;;  %v166_v27 = vcombine.high %v150_v21, %v150_v21  ;;  %v188_v28 = vrot.slane %v150_v21, %v2455_v12 }
  0x18   : > { %v167_v17 = vcombine.high %v157_v14, %v157_v14  ;;  %v176_v19 = vrot.slane %v157_v14, %v2455_v12  ;;  %v180_v23 = vrot.slane %v165_v16, %v2455_v12 }
  0x19   : > { %v168_v29 = vcombine.high %v164_v22, %v164_v22  ;;  %v192_v30 = vrot.slane %v164_v22, %v2455_v12  ;;  %v196_v33 = vrot.slane %v166_v27, %v2455_v12 }
  0x1a   : > { %v184_v24 = vrot.slane %v167_v17, %v2455_v12 }
  0x1b   : > { %v200_v34 = vrot.slane %v168_v29, %v2455_v12 }
  0x83   : > { %v210_v20 = vpop.permute.xlu0 %209 }
  0x84   : > { %v2461_v25 = vmul.f32 %v210_v20, %v172_v18  ;;  %v2463_v26 = vmul.f32 %v210_v20, %v176_v19  ;;  %v2469_v31 = vmul.f32 %v210_v20, %v180_v23  ;;  %v2471_v32 = vmul.f32 %v210_v20, %v184_v24 }
  0x85   : > { %v2477_v35 = vmul.f32 %v210_v20, %v188_v28  ;;  %v2479_v36 = vmul.f32 %v210_v20, %v192_v30  ;;  %v2483_v37 = vmul.f32 %v210_v20, %v196_v33  ;;  %v2485_v38 = vmul.f32 %v210_v20, %v200_v34 }
  0x86   : > { %450 = vrot.lane.b32.xlu1 %v2461_v25, %s2410_s13  ;;  %452 = vrot.lane.b32.xlu0 %v2463_v26, %s2410_s13  ;;  %v221_v40 = vsel %vm220_vm0, %v2461_v25, 0.0  ;;  %v224_v42 = vsel %vm220_vm0, %v2463_v26, 0.0  ;;  %v227_v44 = vsel %vm220_vm0, %v2469_v31, 0.0  ;;  %v230_v46 = vsel %vm220_vm0, %v2471_v32, 0.0 }
  0x87   : > { %v233_v48 = vsel %vm220_vm0, %v2477_v35, 0.0  ;;  %v236_v51 = vsel %vm220_vm0, %v2479_v36, 0.0  ;;  %v239_v53 = vsel %vm220_vm0, %v2483_v37, 0.0  ;;  %v242_v55 = vsel %vm220_vm0, %v2485_v38, 0.0 }
  0x8a   : > { %454 = vrot.lane.b32.xlu1 %v2469_v31, %s2410_s13  ;;  %456 = vrot.lane.b32.xlu0 %v2471_v32, %s2410_s13 }
  0x8e   : > { %458 = vrot.lane.b32.xlu1 %v2477_v35, %s2410_s13  ;;  %460 = vrot.lane.b32.xlu0 %v2479_v36, %s2410_s13 }
  0x92   : > { %462 = vrot.lane.b32.xlu1 %v2483_v37, %s2410_s13  ;;  %464 = vrot.lane.b32.xlu0 %v2485_v38, %s2410_s13 }
  0x96   : > { %687 = vrot.lane.b32.xlu1 %v2461_v25, %s2411_s14  ;;  %689 = vrot.lane.b32.xlu0 %v2463_v26, %s2411_s14 }
  0x9a   : > { %691 = vrot.lane.b32.xlu1 %v2469_v31, %s2411_s14  ;;  %924 = vrot.lane.b32.xlu0 %v2461_v25, %s2412_s15 }
  0x9e   : > { %926 = vrot.lane.b32.xlu1 %v2463_v26, %s2412_s15  ;;  %693 = vrot.lane.b32.xlu0 %v2471_v32, %s2411_s14 }
  0xa2   : > { %928 = vrot.lane.b32.xlu1 %v2469_v31, %s2412_s15  ;;  %1161 = vrot.lane.b32.xlu0 %v2461_v25, %s2413_s16 }
  0xa6   : > { %1163 = vrot.lane.b32.xlu1 %v2463_v26, %s2413_s16  ;;  %695 = vrot.lane.b32.xlu0 %v2477_v35, %s2411_s14 }
  0xaa   : > { %930 = vrot.lane.b32.xlu1 %v2471_v32, %s2412_s15  ;;  %1165 = vrot.lane.b32.xlu0 %v2469_v31, %s2413_s16 }
  0xae   : > { %1398 = vrot.lane.b32.xlu1 %v2461_v25, %s2414_s17  ;;  %1400 = vrot.lane.b32.xlu0 %v2463_v26, %s2414_s17 }
  0xb2   : > { %697 = vrot.lane.b32.xlu1 %v2479_v36, %s2411_s14  ;;  %932 = vrot.lane.b32.xlu0 %v2477_v35, %s2412_s15 }
  0xb6   : > { %1167 = vrot.lane.b32.xlu1 %v2471_v32, %s2413_s16  ;;  %1402 = vrot.lane.b32.xlu0 %v2469_v31, %s2414_s17 }
  0xba   : > { %1635 = vrot.lane.b32.xlu1 %v2461_v25, %s2415_s18  ;;  %1637 = vrot.lane.b32.xlu0 %v2463_v26, %s2415_s18 }
  0xbe   : > { %699 = vrot.lane.b32.xlu1 %v2483_v37, %s2411_s14  ;;  %934 = vrot.lane.b32.xlu0 %v2479_v36, %s2412_s15 }
  0xc2   : > { %1169 = vrot.lane.b32.xlu1 %v2477_v35, %s2413_s16  ;;  %1404 = vrot.lane.b32.xlu0 %v2471_v32, %s2414_s17 }
  0xc6   : > { %1639 = vrot.lane.b32.xlu1 %v2469_v31, %s2415_s18  ;;  %1872 = vrot.lane.b32.xlu0 %v2461_v25, %s2416_s19 }
  0xca   : > { %1874 = vrot.lane.b32.xlu1 %v2463_v26, %s2416_s19  ;;  %701 = vrot.lane.b32.xlu0 %v2485_v38, %s2411_s14 }
  0xce   : > { %936 = vrot.lane.b32.xlu1 %v2483_v37, %s2412_s15  ;;  %1171 = vrot.lane.b32.xlu0 %v2479_v36, %s2413_s16 }
  0xd2   : > { %1406 = vrot.lane.b32.xlu1 %v2477_v35, %s2414_s17  ;;  %1641 = vrot.lane.b32.xlu0 %v2471_v32, %s2415_s18 }
  0xd6   : > { %1876 = vrot.lane.b32.xlu1 %v2469_v31, %s2416_s19  ;;  %938 = vrot.lane.b32.xlu0 %v2485_v38, %s2412_s15 }
  0xda   : > { %1173 = vrot.lane.b32.xlu1 %v2483_v37, %s2413_s16  ;;  %1408 = vrot.lane.b32.xlu0 %v2479_v36, %s2414_s17 }
  0xde   : > { %1643 = vrot.lane.b32.xlu1 %v2477_v35, %s2415_s18  ;;  %1878 = vrot.lane.b32.xlu0 %v2471_v32, %s2416_s19 }
  0xe2   : > { %1175 = vrot.lane.b32.xlu1 %v2485_v38, %s2413_s16  ;;  %1410 = vrot.lane.b32.xlu0 %v2483_v37, %s2414_s17 }
  0xe6   : > { %1645 = vrot.lane.b32.xlu1 %v2479_v36, %s2415_s18 }
  0xf8   : > { %v2571_v39 = vpop.permute.xlu1 %450  ;;  %v453_v47 = vpop.permute.xlu0 %452 }
  0xf9   : > { %v477_v6 = vsel %vm220_vm0, %v453_v47, 0.0  ;;  %v474_v24 = vsel %vm220_vm0, %v2571_v39, 0.0 }
  0xfc   : > { %v455_v41 = vpop.permute.xlu1 %454  ;;  %v457_v50 = vpop.permute.xlu0 %456 }
  0xfd   : > { %v480_v8 = vsel %vm220_vm0, %v455_v41, 0.0  ;;  %v483_v28 = vsel %vm220_vm0, %v457_v50, 0.0 }
 0x100   : > { %v459_v43 = vpop.permute.xlu1 %458  ;;  %v461_v54 = vpop.permute.xlu0 %460 }
 0x101   : > { %222 = vadd.xlane.f32.xlu0 %v221_v40  ;;  %v486_v11 = vsel %vm220_vm0, %v459_v43, 0.0  ;;  %v489_v31 = vsel %vm220_vm0, %v461_v54, 0.0 }
 0x104   : > { %v463_v45 = vpop.permute.xlu1 %462  ;;  %v465_v57 = vpop.permute.xlu0 %464 }
 0x105   : > { %v492_v14 = vsel %vm220_vm0, %v463_v45, 0.0  ;;  %v495_v34 = vsel %vm220_vm0, %v465_v57, 0.0 }
 0x108   : > { %v2583_v49 = vpop.permute.xlu1 %687  ;;  %v690_v59 = vpop.permute.xlu0 %689 }
 0x109   : > { %v714_v16 = vsel %vm220_vm0, %v690_v59, 0.0 }
 0x10a   : > { %225 = vadd.xlane.f32.xlu1 %v224_v42 }
 0x10c   : > { %v692_v52 = vpop.permute.xlu1 %691  ;;  %v925_v61 = vpop.permute.xlu0 %924 }
 0x10d   : > { %v717_v19 = vsel %vm220_vm0, %v692_v52, 0.0  ;;  %v948_v41 = vsel %vm220_vm0, %v925_v61, 0.0 }
 0x10e   : > { %228 = vadd.xlane.f32.xlu1 %v227_v44 }
 0x110   : > { %v927_v56 = vpop.permute.xlu1 %926  ;;  %v2601_v63 = vpop.permute.xlu0 %693 }
 0x111   : > { %v951_v21 = vsel %vm220_vm0, %v927_v56, 0.0  ;;  %v720_v44 = vsel %vm220_vm0, %v2601_v63, 0.0 }
 0x112   : > { %231 = vadd.xlane.f32.xlu1 %v230_v46 }
 0x114   : > { %v929_v58 = vpop.permute.xlu1 %928  ;;  %v2607_v3 = vpop.permute.xlu0 %1161 }
 0x115   : > { %v954_v23 = vsel %vm220_vm0, %v929_v58, 0.0 }
 0x116   : > { %234 = vadd.xlane.f32.xlu1 %v233_v48  ;;  %v1185_v48 = vsel %vm220_vm0, %v2607_v3, 0.0 }
 0x117   : > { %1880 = vrot.lane.b32.xlu0 %v2477_v35, %s2416_s19 }
 0x118   : > { %v1164_v60 = vpop.permute.xlu1 %1163  ;;  %v2610_v7 = vpop.permute.xlu0 %695 }
 0x119   : > { %v1188_v27 = vsel %vm220_vm0, %v1164_v60, 0.0 }
 0x11a   : > { %237 = vadd.xlane.f32.xlu1 %v236_v51  ;;  %v723_v51 = vsel %vm220_vm0, %v2610_v7, 0.0 }
 0x11b   : > { %1647 = vrot.lane.b32.xlu0 %v2483_v37, %s2415_s18 }
 0x11c   : > { %v931_v62 = vpop.permute.xlu1 %930  ;;  %v2613_v10 = vpop.permute.xlu0 %1165 }
 0x11d   : > { %v957_v30 = vsel %vm220_vm0, %v931_v62, 0.0  ;;  %v1191_v54 = vsel %vm220_vm0, %v2613_v10, 0.0 }
 0x11e   : > { %240 = vadd.xlane.f32.xlu1 %v239_v53 }
 0x11f   : > { %1649 = vrot.lane.b32.xlu0 %v2485_v38, %s2415_s18 }
 0x120   : > { %v1399_v0 = vpop.permute.xlu1 %1398  ;;  %v2617_v15 = vpop.permute.xlu0 %1400 }
 0x121   : > { %v1422_v33 = vsel %vm220_vm0, %v1399_v0, 0.0  ;;  %v1425_v58 = vsel %vm220_vm0, %v2617_v15, 0.0 }
 0x122   : > { %243 = vadd.xlane.f32.xlu1 %v242_v55 }
 0x123   : > { %1886 = vrot.lane.b32.xlu0 %v2485_v38, %s2416_s19 }
 0x124   : > { %v698_v4 = vpop.permute.xlu1 %697  ;;  %v2620_v18 = vpop.permute.xlu0 %932 }
 0x125   : > { %v960_v61 = vsel %vm220_vm0, %v2620_v18, 0.0 }
 0x128   : > { %v1168_v9 = vpop.permute.xlu1 %1167  ;;  %v2624_v22 = vpop.permute.xlu0 %1402 }
 0x129   : > { %v1194_v40 = vsel %vm220_vm0, %v1168_v9, 0.0  ;;  %v1428_v0 = vsel %vm220_vm0, %v2624_v22, 0.0 }
 0x12c   : > { %v1636_v13 = vpop.permute.xlu1 %1635  ;;  %v2629_v26 = vpop.permute.xlu0 %1637 }
 0x12d   : > { %v1659_v43 = vsel %vm220_vm0, %v1636_v13, 0.0  ;;  %v1662_v7 = vsel %vm220_vm0, %v2629_v26, 0.0 }
 0x130   : > { %v700_v17 = vpop.permute.xlu1 %699  ;;  %v2635_v32 = vpop.permute.xlu0 %934 }
 0x131   : > { %v729_v47 = vsel %vm220_vm0, %v700_v17, 0.0  ;;  %v963_v10 = vsel %vm220_vm0, %v2635_v32, 0.0 }
 0x133   : > { %1412 = vrot.lane.b32.xlu1 %v2485_v38, %s2414_s17  ;;  %v711_v38 = vsel %vm220_vm0, %v2583_v49, 0.0 }
 0x134   : > { %v1170_v20 = vpop.permute.xlu1 %1169 }
 0x135   : > { %v1197_v50 = vsel %vm220_vm0, %v1170_v20, 0.0 }
 0x137   : > { %1882 = vrot.lane.b32.xlu1 %v2479_v36, %s2416_s19  ;;  %v1405_v36 = vpop.permute.xlu0 %1404 }
 0x138   : > { %v1640_v25 = vpop.permute.xlu1 %1639  ;;  %v1431_v15 = vsel %vm220_vm0, %v1405_v36, 0.0 }
 0x139   : > { %v1665_v53 = vsel %vm220_vm0, %v1640_v25, 0.0 }
 0x13b   : > { %1884 = vrot.lane.b32.xlu1 %v2483_v37, %s2416_s19  ;;  %v726_v37 = vsel %vm220_vm0, %v698_v4, 0.0  ;;  %v1873_v42 = vpop.permute.xlu0 %1872 }
 0x13c   : > { %v1875_v29 = vpop.permute.xlu1 %1874 }
 0x13d   : > { %v1899_v57 = vsel %vm220_vm0, %v1875_v29, 0.0 }
 0x13f   : > { %v702_v46 = vpop.permute.xlu0 %701 }
 0x140   : > { %v937_v35 = vpop.permute.xlu1 %936  ;;  %v732_v25 = vsel %vm220_vm0, %v702_v46, 0.0 }
 0x141   : > { %v966_v60 = vsel %vm220_vm0, %v937_v35, 0.0 }
 0x142   : > { %478 = vadd.xlane.f32.xlu0 %v477_v6 }
 0x143   : > { %v2653_v52 = vpop.permute.xlu0 %1171 }
 0x144   : > { %v1407_v39 = vpop.permute.xlu1 %1406 }
 0x145   : > { %v1434_v63 = vsel %vm220_vm0, %v1407_v39, 0.0 }
 0x146   : > { %481 = vadd.xlane.f32.xlu0 %v480_v8 }
 0x147   : > { %v2658_v56 = vpop.permute.xlu0 %1641 }
 0x148   : > { %v1877_v45 = vpop.permute.xlu1 %1876 }
 0x149   : > { %v1902_v6 = vsel %vm220_vm0, %v1877_v45, 0.0 }
 0x14a   : > { %487 = vadd.xlane.f32.xlu0 %v486_v11 }
 0x14b   : > { %v2666_v62 = vpop.permute.xlu0 %938 }
 0x14c   : > { %v1174_v49 = vpop.permute.xlu1 %1173 }
 0x14d   : > { %v1203_v9 = vsel %vm220_vm0, %v1174_v49, 0.0 }
 0x14e   : > { %493 = vadd.xlane.f32.xlu0 %v492_v14 }
 0x14f   : > { %v2671_v4 = vpop.permute.xlu0 %1408 }
 0x150   : > { %v1644_v55 = vpop.permute.xlu1 %1643 }
 0x151   : > { %v1671_v14 = vsel %vm220_vm0, %v1644_v55, 0.0 }
 0x152   : > { %715 = vadd.xlane.f32.xlu0 %v714_v16 }
 0x153   : > { %v2679_v11 = vpop.permute.xlu0 %1878 }
 0x154   : > { %v1176_v59 = vpop.permute.xlu1 %1175 }
 0x155   : > { %v1206_v18 = vsel %vm220_vm0, %v1176_v59, 0.0 }
 0x156   : > { %718 = vadd.xlane.f32.xlu0 %v717_v19  ;;  %v1896_v19 = vsel %vm220_vm0, %v1873_v42, 0.0 }
 0x157   : > { %v2683_v17 = vpop.permute.xlu0 %1410 }
 0x158   : > { %v1646_v3 = vpop.permute.xlu1 %1645 }
 0x15a   : > { %952 = vadd.xlane.f32.xlu0 %v951_v21  ;;  %v117_v21 = vand.u32 127, %v114_v2 }
 0x15c   : > { %vm2706_vm8 = vcmp.ge.s32.totalorder %v2448_v5, %v117_v21 }
 0x15e   : > { %955 = vadd.xlane.f32.xlu0 %v954_v23  ;;  %v1674_v23 = vsel %vm220_vm0, %v1646_v3, 0.0  ;;  %v1668_v3 = vsel %vm220_vm0, %v2658_v56, 0.0 }
 0x15f   : > { %475 = vadd.xlane.f32.xlu1 %v474_v24 }
 0x162   : > { %1189 = vadd.xlane.f32.xlu0 %v1188_v27 }
 0x163   : > { %484 = vadd.xlane.f32.xlu1 %v483_v28  ;;  %v2691_v28 = vsub.s32 %v117_v21, %v2448_v5 }
 0x166   : > { %958 = vadd.xlane.f32.xlu0 %v957_v30 }
 0x167   : > { %490 = vadd.xlane.f32.xlu1 %v489_v31 }
 0x16a   : > { %1423 = vadd.xlane.f32.xlu0 %v1422_v33 }
 0x16b   : > { %496 = vadd.xlane.f32.xlu1 %v495_v34 }
 0x16e   : > { %727 = vadd.xlane.f32.xlu0 %v726_v37 }
 0x16f   : > { %712 = vadd.xlane.f32.xlu1 %v711_v38 }
 0x172   : > { %1195 = vadd.xlane.f32.xlu0 %v1194_v40 }
 0x173   : > { %949 = vadd.xlane.f32.xlu1 %v948_v41 }
 0x176   : > { %1660 = vadd.xlane.f32.xlu0 %v1659_v43 }
 0x177   : > { %721 = vadd.xlane.f32.xlu1 %v720_v44 }
 0x17a   : > { %730 = vadd.xlane.f32.xlu0 %v729_v47 }
 0x17b   : > { %1186 = vadd.xlane.f32.xlu1 %v1185_v48 }
 0x17e   : > { %1198 = vadd.xlane.f32.xlu0 %v1197_v50 }
 0x17f   : > { %724 = vadd.xlane.f32.xlu1 %v723_v51 }
 0x182   : > { %1666 = vadd.xlane.f32.xlu0 %v1665_v53 }
 0x183   : > { %1192 = vadd.xlane.f32.xlu1 %v1191_v54 }
 0x186   : > { %1900 = vadd.xlane.f32.xlu0 %v1899_v57 }
 0x187   : > { %1426 = vadd.xlane.f32.xlu1 %v1425_v58 }
 0x18a   : > { %967 = vadd.xlane.f32.xlu0 %v966_v60  ;;  %v223_v22 = vpop.xlane.xlu0 %222 }
 0x18b   : > { %961 = vadd.xlane.f32.xlu1 %v960_v61  ;;  %v245_v29 = vmul.f32 0.5, %v223_v22  ;;  %v1200_v61 = vsel %vm220_vm0, %v2653_v52, 0.0  ;;  %v1905_v52 = vsel %vm220_vm0, %v2679_v11, 0.0 }
 0x18d   : > { %v264_v35 = vrot.slane %v245_v29, %v2691_v28 }
 0x18e   : > { %1435 = vadd.xlane.f32.xlu0 %v1434_v63  ;;  %v1881_v60 = vpop.permute.xlu0 %1880 }
 0x18f   : > { %1429 = vadd.xlane.f32.xlu1 %v1428_v0 }
 0x192   : > { %1903 = vadd.xlane.f32.xlu0 %v1902_v6  ;;  %v1648_v6 = vpop.permute.xlu0 %1647 }
 0x193   : > { %v226_v8 = vpop.xlane.xlu1 %225  ;;  %1663 = vadd.xlane.f32.xlu1 %v1662_v7  ;;  %v969_v7 = vsel %vm220_vm0, %v2666_v62, 0.0  ;;  %v1677_v62 = vsel %vm220_vm0, %v1648_v6, 0.0 }
 0x194   : > { %v246_v24 = vmul.f32 0.5, %v226_v8 }
 0x196   : > { %1204 = vadd.xlane.f32.xlu0 %v1203_v9  ;;  %v268_v32 = vrot.slane %v246_v24, %v2691_v28  ;;  %v1650_v8 = vpop.permute.xlu0 %1649  ;;  %v1437_v9 = vsel %vm220_vm0, %v2671_v4, 0.0 }
 0x197   : > { %v229_v13 = vpop.xlane.xlu1 %228  ;;  %964 = vadd.xlane.f32.xlu1 %v963_v10  ;;  %v1680_v4 = vsel %vm220_vm0, %v1650_v8, 0.0 }
 0x198   : > { %v247_v26 = vmul.f32 0.5, %v229_v13  ;;  %v294_v39 = vsel %vm293_vm1, %v268_v32, %v264_v35  ;;  %v1440_v13 = vsel %vm220_vm0, %v2683_v17, 0.0 }
 0x19a   : > { %1672 = vadd.xlane.f32.xlu0 %v1671_v14  ;;  %v272_v2 = vrot.slane %v247_v26, %v2691_v28  ;;  %v1887_v10 = vpop.permute.xlu0 %1886  ;;  %v1908_v14 = vsel %vm220_vm0, %v1881_v60, 0.0 }
 0x19b   : > { %v232_v16 = vpop.xlane.xlu1 %231  ;;  %1432 = vadd.xlane.f32.xlu1 %v1431_v15  ;;  %v1917_v11 = vsel %vm220_vm0, %v1887_v10, 0.0 }
 0x19c   : > { %v248_v30 = vmul.f32 0.5, %v232_v16  ;;  %v296_v41 = vsel %vm295_vm2, %v272_v2, %v294_v39 }
 0x19e   : > { %1207 = vadd.xlane.f32.xlu0 %v1206_v18  ;;  %v276_v36 = vrot.slane %v248_v30, %v2691_v28 }
 0x19f   : > { %v235_v20 = vpop.xlane.xlu1 %234  ;;  %1897 = vadd.xlane.f32.xlu1 %v1896_v19 }
 0x1a0   : > { %v249_v31 = vmul.f32 0.5, %v235_v20  ;;  %v298_v44 = vsel %vm297_vm3, %v276_v36, %v296_v41 }
 0x1a2   : > { %1675 = vadd.xlane.f32.xlu0 %v1674_v23  ;;  %v280_v38 = vrot.slane %v249_v31, %v2691_v28 }
 0x1a3   : > { %v238_v27 = vpop.xlane.xlu1 %237  ;;  %733 = vadd.xlane.f32.xlu1 %v732_v25 }
 0x1a4   : > { %v250_v33 = vmul.f32 0.5, %v238_v27  ;;  %v300_v46 = vsel %vm299_vm4, %v280_v38, %v298_v44 }
 0x1a6   : > { %v284_v40 = vrot.slane %v250_v33, %v2691_v28 }
 0x1a7   : > { %v241_v34 = vpop.xlane.xlu1 %240 }
 0x1a8   : > { %v251_v37 = vmul.f32 0.5, %v241_v34  ;;  %v302_v49 = vsel %vm301_vm5, %v284_v40, %v300_v46 }
 0x1aa   : > { %v288_v42 = vrot.slane %v251_v37, %v2691_v28 }
 0x1ab   : > { %v244_v43 = vpop.xlane.xlu1 %243 }
 0x1ac   : > { %v252_v45 = vmul.f32 0.5, %v244_v43  ;;  %v304_v51 = vsel %vm303_vm6, %v288_v42, %v302_v49 }
 0x1ae   : > { %v292_v47 = vrot.slane %v252_v45, %v2691_v28 }
 0x1af   : > { %v1413_v50 = vpop.permute.xlu1 %1412 }
 0x1b0   : > { %v1443_v53 = vsel %vm220_vm0, %v1413_v50, 0.0  ;;  %v306_v54 = vsel %vm305_vm7, %v292_v47, %v304_v51 }
 0x1b1   : > { %1444 = vadd.xlane.f32.xlu0 %v1443_v53  ;;  %v2716_v55 = vsel %vm2706_vm8, %v306_v54, -1e+09 }
 0x1b2   : > { %v310_v57 = vsel %vm309_vm9, %v2716_v55, -inf }
 0x1b3   : > { %311 = vmax.xlane.f32.xlu1 %v310_v57  ;;  %v1883_v58 = vpop.permute.xlu1 %1882 }
 0x1b4   : > { %v1911_v59 = vsel %vm220_vm0, %v1883_v58, 0.0 }
 0x1b5   : > { %1912 = vadd.xlane.f32.xlu0 %v1911_v59 }
 0x1b7   : > { %1201 = vadd.xlane.f32.xlu1 %v1200_v61  ;;  %v1885_v63 = vpop.permute.xlu1 %1884 }
 0x1b8   : > { %v1914_v0 = vsel %vm220_vm0, %v1885_v63, 0.0 }
 0x1b9   : > { %1915 = vadd.xlane.f32.xlu0 %v1914_v0 }
 0x1bb   : > { %1669 = vadd.xlane.f32.xlu1 %v1668_v3 }
 0x1bf   : > { %970 = vadd.xlane.f32.xlu1 %v969_v7 }
 0x1c3   : > { %1438 = vadd.xlane.f32.xlu1 %v1437_v9 }
 0x1c7   : > { %1906 = vadd.xlane.f32.xlu1 %v1905_v52 }
 0x1cb   : > { %v479_v56 = vpop.xlane.xlu0 %478  ;;  %1441 = vadd.xlane.f32.xlu1 %v1440_v13 }
 0x1cc   : > { %v499_v21 = vmul.f32 0.5, %v479_v56 }
 0x1ce   : > { %v521_v26 = vrot.slane %v499_v21, %v2691_v28 }
 0x1cf   : > { %v482_v15 = vpop.xlane.xlu0 %481  ;;  %1909 = vadd.xlane.f32.xlu1 %v1908_v14 }
 0x1d0   : > { %v500_v25 = vmul.f32 0.5, %v482_v15 }
 0x1d2   : > { %v525_v33 = vrot.slane %v500_v25, %v2691_v28 }
 0x1d3   : > { %v488_v16 = vpop.xlane.xlu0 %487  ;;  %1678 = vadd.xlane.f32.xlu1 %v1677_v62 }
 0x1d4   : > { %v502_v2 = vmul.f32 0.5, %v488_v16 }
 0x1d6   : > { %v533_v40 = vrot.slane %v502_v2, %v2691_v28 }
 0x1d7   : > { %v494_v18 = vpop.xlane.xlu0 %493  ;;  %1681 = vadd.xlane.f32.xlu1 %v1680_v4 }
 0x1d8   : > { %v504_v41 = vmul.f32 0.5, %v494_v18 }
 0x1da   : > { %v541_v49 = vrot.slane %v504_v41, %v2691_v28 }
 0x1db   : > { %v716_v19 = vpop.xlane.xlu0 %715  ;;  %1918 = vadd.xlane.f32.xlu1 %v1917_v11 }
 0x1dc   : > { %v736_v16 = vmul.f32 0.5, %v716_v19 }
 0x1de   : > { %v758_v25 = vrot.slane %v736_v16, %v2691_v28 }
 0x1df   : > { %v719_v20 = vpop.xlane.xlu0 %718 }
 0x1e3   : > { %v2738_v17 = vpop.xlane.xlu0 %952 }
 0x1e7   : > { %v2740_v22 = vpop.xlane.xlu0 %955 }
 0x1e8   : > { %v476_v23 = vpop.xlane.xlu1 %475 }
 0x1e9   : > { %v498_v24 = vmul.f32 0.5, %v476_v23  ;;  %v737_v23 = vmul.f32 0.5, %v719_v20 }
 0x1eb   : > { %v517_v27 = vrot.slane %v498_v24, %v2691_v28  ;;  %v2744_v29 = vpop.xlane.xlu0 %1189 }
 0x1ec   : > { %v485_v30 = vpop.xlane.xlu1 %484 }
 0x1ed   : > { %v546_v31 = vsel %vm293_vm1, %v521_v26, %v517_v27  ;;  %v501_v32 = vmul.f32 0.5, %v485_v30 }
 0x1ee   : > { %v547_v36 = vsel %vm295_vm2, %v525_v33, %v546_v31  ;;  %v762_v31 = vrot.slane %v737_v23, %v2691_v28 }
 0x1ef   : > { %v529_v34 = vrot.slane %v501_v32, %v2691_v28  ;;  %v2749_v35 = vpop.xlane.xlu0 %958 }
 0x1f0   : > { %v491_v37 = vpop.xlane.xlu1 %490 }
 0x1f1   : > { %v548_v38 = vsel %vm297_vm3, %v529_v34, %v547_v36  ;;  %v503_v39 = vmul.f32 0.5, %v491_v37 }
 0x1f2   : > { %v549_v45 = vsel %vm299_vm4, %v533_v40, %v548_v38 }
 0x1f3   : > { %v537_v42 = vrot.slane %v503_v39, %v2691_v28  ;;  %v2755_v43 = vpop.xlane.xlu0 %1423 }
 0x1f4   : > { %v497_v44 = vpop.xlane.xlu1 %496 }
 0x1f5   : > { %v505_v46 = vmul.f32 0.5, %v497_v44  ;;  %v550_v47 = vsel %vm301_vm5, %v537_v42, %v549_v45 }
 0x1f6   : > { %v551_v54 = vsel %vm303_vm6, %v541_v49, %v550_v47 }
 0x1f7   : > { %v545_v50 = vrot.slane %v505_v46, %v2691_v28  ;;  %v728_v51 = vpop.xlane.xlu0 %727 }
 0x1f8   : > { %v713_v53 = vpop.xlane.xlu1 %712  ;;  %v740_v33 = vmul.f32 0.5, %v728_v51 }
 0x1f9   : > { %v552_v57 = vsel %vm305_vm7, %v545_v50, %v551_v54  ;;  %v735_v62 = vmul.f32 0.5, %v713_v53 }
 0x1fa   : > { %v2765_v58 = vsel %vm2706_vm8, %v552_v57, -1e+09  ;;  %v774_v38 = vrot.slane %v740_v33, %v2691_v28  ;;  %v1210_v57 = vmul.f32 0.5, %v2744_v29 }
 0x1fb   : > { %v555_v59 = vsel %vm309_vm9, %v2765_v58, -inf  ;;  %v1196_v60 = vpop.xlane.xlu0 %1195  ;;  %v754_v11 = vrot.slane %v735_v62, %v2691_v28 }
 0x1fc   : > { %556 = vmax.xlane.f32.xlu0 %v555_v59  ;;  %v950_v61 = vpop.xlane.xlu1 %949  ;;  %v1232_v16 = vrot.slane %v1210_v57, %v2691_v28 }
 0x1fd   : > { %v783_v27 = vsel %vm293_vm1, %v758_v25, %v754_v11  ;;  %v972_v59 = vmul.f32 0.5, %v950_v61  ;;  %v1212_v11 = vmul.f32 0.5, %v1196_v60  ;;  %v974_v61 = vmul.f32 0.5, %v2740_v22 }
 0x1fe   : > { %v784_v2 = vsel %vm295_vm2, %v762_v31, %v783_v27  ;;  %v975_v27 = vmul.f32 0.5, %v2749_v35 }
 0x1ff   : > { %v2769_v0 = vpop.xlane.xlu0 %1660  ;;  %v999_v22 = vrot.slane %v974_v61, %v2691_v28 }
 0x200   : > { %v722_v63 = vpop.xlane.xlu1 %721 }
 0x201   : > { %v738_v21 = vmul.f32 0.5, %v722_v63 }
 0x203   : > { %v731_v6 = vpop.xlane.xlu0 %730  ;;  %v766_v30 = vrot.slane %v738_v21, %v2691_v28  ;;  %v991_v21 = vrot.slane %v972_v59, %v2691_v28 }
 0x204   : > { %v1187_v3 = vpop.xlane.xlu1 %1186  ;;  %v741_v36 = vmul.f32 0.5, %v731_v6 }
 0x205   : > { %v785_v20 = vsel %vm297_vm3, %v766_v30, %v784_v2  ;;  %v1209_v53 = vmul.f32 0.5, %v1187_v3 }
 0x206   : > { %v778_v44 = vrot.slane %v741_v36, %v2691_v28 }
 0x207   : > { %v1199_v9 = vpop.xlane.xlu0 %1198  ;;  %v1228_v6 = vrot.slane %v1209_v53, %v2691_v28 }
 0x208   : > { %v725_v7 = vpop.xlane.xlu1 %724 }
 0x209   : > { %v739_v24 = vmul.f32 0.5, %v725_v7  ;;  %v973_v7 = vmul.f32 0.5, %v2738_v17  ;;  %v1257_v3 = vsel %vm293_vm1, %v1232_v16, %v1228_v6  ;;  %v1240_v17 = vrot.slane %v1212_v11, %v2691_v28 }
 0x20b   : > { %v2773_v10 = vpop.xlane.xlu0 %1666  ;;  %v770_v19 = vrot.slane %v739_v24, %v2691_v28  ;;  %v995_v29 = vrot.slane %v973_v7, %v2691_v28 }
 0x20c   : > { %v1193_v8 = vpop.xlane.xlu1 %1192 }
 0x20d   : > { %v786_v37 = vsel %vm299_vm4, %v770_v19, %v785_v20  ;;  %v1211_v54 = vmul.f32 0.5, %v1193_v8  ;;  %v1213_v8 = vmul.f32 0.5, %v1199_v9  ;;  %v1020_v60 = vsel %vm293_vm1, %v995_v29, %v991_v21 }
 0x20e   : > { %v787_v42 = vsel %vm301_vm5, %v774_v38, %v786_v37  ;;  %v1021_v38 = vsel %vm295_vm2, %v999_v22, %v1020_v60  ;;  %v1446_v21 = vmul.f32 0.5, %v2755_v43 }
 0x20f   : > { %v2777_v14 = vpop.xlane.xlu0 %1900  ;;  %v788_v46 = vsel %vm303_vm6, %v778_v44, %v787_v42  ;;  %v1236_v62 = vrot.slane %v1211_v54, %v2691_v28  ;;  %v1244_v9 = vrot.slane %v1213_v8, %v2691_v28  ;;  %v1003_v42 = vrot.slane %v975_v27, %v2691_v28 }
 0x210   : > { %v2771_v52 = vpop.xlane.xlu1 %1426  ;;  %v1465_v43 = vrot.slane %v1446_v21, %v2691_v28 }
 0x211   : > { %v1258_v24 = vsel %vm295_vm2, %v1236_v62, %v1257_v3 }
 0x212   : > { %v1259_v33 = vsel %vm297_vm3, %v1240_v17, %v1258_v24 }
 0x213   : > { %v2781_v4 = vpop.xlane.xlu0 %967 }
 0x214   : > { %v962_v13 = vpop.xlane.xlu1 %961 }
 0x215   : > { %v976_v30 = vmul.f32 0.5, %v962_v13 }
 0x217   : > { %v2791_v32 = vpop.xlane.xlu0 %1435  ;;  %v1007_v35 = vrot.slane %v976_v30, %v2691_v28 }
 0x218   : > { %v2775_v56 = vpop.xlane.xlu1 %1429 }
 0x219   : > { %v1448_v16 = vmul.f32 0.5, %v2775_v56 }
 0x21b   : > { %v2799_v39 = vpop.xlane.xlu0 %1903  ;;  %v1473_v56 = vrot.slane %v1448_v16, %v2691_v28 }
 0x21c   : > { %v2779_v15 = vpop.xlane.xlu1 %1663 }
 0x21f   : > { %v1205_v49 = vpop.xlane.xlu0 %1204 }
 0x220   : > { %v965_v18 = vpop.xlane.xlu1 %964  ;;  %v1215_v31 = vmul.f32 0.5, %v1205_v49  ;;  %v1022_v49 = vsel %vm297_vm3, %v1003_v42, %v1021_v38 }
 0x221   : > { %v977_v2 = vmul.f32 0.5, %v965_v18  ;;  %v1023_v53 = vsel %vm299_vm4, %v1007_v35, %v1022_v49 }
 0x223   : > { %v2813_v63 = vpop.xlane.xlu0 %1672  ;;  %v1011_v18 = vrot.slane %v977_v2, %v2691_v28 }
 0x224   : > { %v2785_v26 = vpop.xlane.xlu1 %1432 }
 0x225   : > { %v1024_v7 = vsel %vm301_vm5, %v1011_v18, %v1023_v53  ;;  %v1449_v3 = vmul.f32 0.5, %v2785_v26  ;;  %v1684_v26 = vmul.f32 0.5, %v2779_v15 }
 0x227   : > { %v1208_v25 = vpop.xlane.xlu0 %1207  ;;  %v1477_v27 = vrot.slane %v1449_v3, %v2691_v28  ;;  %v1706_v22 = vrot.slane %v1684_v26, %v2691_v28 }
 0x228   : > { %v2794_v34 = vpop.xlane.xlu1 %1897  ;;  %v1216_v20 = vmul.f32 0.5, %v1208_v25 }
 0x22a   : > { %v1256_v44 = vrot.slane %v1216_v20, %v2691_v28  ;;  %v1685_v20 = vmul.f32 0.5, %v2773_v10  ;;  %v1921_v10 = vmul.f32 0.5, %v2777_v14 }
 0x22b   : > { %v1676_v8 = vpop.xlane.xlu0 %1675 }
 0x22c   : > { %v734_v40 = vpop.xlane.xlu1 %733  ;;  %v1688_v16 = vmul.f32 0.5, %v1676_v8 }
 0x22d   : > { %v742_v41 = vmul.f32 0.5, %v734_v40  ;;  %v1252_v40 = vrot.slane %v1215_v31, %v2691_v28  ;;  %v1450_v31 = vmul.f32 0.5, %v2791_v32  ;;  %v1920_v32 = vmul.f32 0.5, %v2794_v34 }
 0x22f   : > { %v782_v45 = vrot.slane %v742_v41, %v2691_v28  ;;  %v1260_v41 = vsel %vm299_vm4, %v1244_v9, %v1259_v33  ;;  %v1683_v33 = vmul.f32 0.5, %v2769_v0  ;;  %v1481_v35 = vrot.slane %v1450_v31, %v2691_v28 }
 0x230   : > { %v1939_v49 = vrot.slane %v1920_v32, %v2691_v28 }
 0x231   : > { %v789_v47 = vsel %vm305_vm7, %v782_v45, %v788_v46  ;;  %v978_v46 = vmul.f32 0.5, %v2781_v4  ;;  %v1447_v4 = vmul.f32 0.5, %v2771_v52 }
 0x232   : > { %v2808_v50 = vsel %vm2706_vm8, %v789_v47, -1e+09 }
 0x233   : > { %v792_v51 = vsel %vm309_vm9, %v2808_v50, -inf  ;;  %v1015_v62 = vrot.slane %v978_v46, %v2691_v28  ;;  %v1469_v25 = vrot.slane %v1447_v4, %v2691_v28 }
 0x234   : > { %793 = vmax.xlane.f32.xlu0 %v792_v51 }
 0x235   : > { %v1025_v61 = vsel %vm303_vm6, %v1015_v62, %v1024_v7  ;;  %v1494_v2 = vsel %vm293_vm1, %v1469_v25, %v1465_v43  ;;  %v1943_v7 = vrot.slane %v1921_v10, %v2691_v28 }
 0x23c   : > { %v2820_v23 = vpop.xlane.xlu1 %311 }
 0x23d   : > { %v313_v42 = vsub.f32 %v2716_v55, %v2820_v23  ;;  %v1922_v23 = vmul.f32 0.5, %v2799_v39  ;;  %v1968_v39 = vsel %vm293_vm1, %v1943_v7, %v1939_v49 }
 0x23f   : > { %v314_v4 = vmul.f32 1.442695, %v313_v42 }
 0x240   : > { %v1202_v19 = vpop.xlane.xlu1 %1201 }
 0x241   : > { %v1214_v36 = vmul.f32 0.5, %v1202_v19  ;;  %v1445_v19 = vpop.xlane.xlu0 %1444  ;;  %2368 = vpow2.f32 %v314_v4 }
 0x242   : > { %v1453_v9 = vmul.f32 0.5, %v1445_v19 }
 0x243   : > { %v1248_v37 = vrot.slane %v1214_v36, %v2691_v28  ;;  %v1495_v36 = vsel %vm295_vm2, %v1473_v56, %v1494_v2 }
 0x244   : > { %v1670_v13 = vpop.xlane.xlu1 %1669  ;;  %v1496_v15 = vsel %vm297_vm3, %v1477_v27, %v1495_v36 }
 0x245   : > { %v1261_v45 = vsel %vm301_vm5, %v1248_v37, %v1260_v41  ;;  %v1702_v41 = vrot.slane %v1683_v33, %v2691_v28  ;;  %v1497_v18 = vsel %vm299_vm4, %v1481_v35, %v1496_v15 }
 0x246   : > { %v1262_v47 = vsel %vm303_vm6, %v1252_v40, %v1261_v45  ;;  %v1686_v40 = vmul.f32 0.5, %v1670_v13  ;;  %v1710_v45 = vrot.slane %v1685_v20, %v2691_v28 }
 0x247   : > { %v1263_v51 = vsel %vm305_vm7, %v1256_v44, %v1262_v47  ;;  %v1731_v46 = vsel %vm293_vm1, %v1706_v22, %v1702_v41  ;;  %v1493_v47 = vrot.slane %v1453_v9, %v2691_v28 }
 0x248   : > { %v971_v54 = vpop.xlane.xlu1 %970  ;;  %v2848_v57 = vsel %vm2706_vm8, %v1263_v51, -1e+09  ;;  %v1913_v51 = vpop.xlane.xlu0 %1912  ;;  %v1714_v14 = vrot.slane %v1686_v40, %v2691_v28 }
 0x249   : > { %v979_v59 = vmul.f32 0.5, %v971_v54  ;;  %v1266_v6 = vsel %vm309_vm9, %v2848_v57, -inf  ;;  %v1687_v54 = vmul.f32 0.5, %v2813_v63  ;;  %v1925_v56 = vmul.f32 0.5, %v1913_v51 }
 0x24a   : > { %1267 = vmax.xlane.f32.xlu0 %v1266_v6 }
 0x24b   : > { %v1019_v11 = vrot.slane %v979_v59, %v2691_v28  ;;  %v1718_v25 = vrot.slane %v1687_v54, %v2691_v28  ;;  %v1959_v20 = vrot.slane %v1925_v56, %v2691_v28 }
 0x24c   : > { %v1439_v29 = vpop.xlane.xlu1 %1438 }
 0x24d   : > { %v1026_v24 = vsel %vm305_vm7, %v1019_v11, %v1025_v61  ;;  %v1451_v60 = vmul.f32 0.5, %v1439_v29  ;;  %v1732_v11 = vsel %vm295_vm2, %v1710_v45, %v1731_v46 }
 0x24e   : > { %v2864_v52 = vsel %vm2706_vm8, %v1026_v24, -1e+09  ;;  %v1733_v63 = vsel %vm297_vm3, %v1714_v14, %v1732_v11  ;;  %v1947_v24 = vrot.slane %v1922_v23, %v2691_v28  ;;  %v2369_v45 = vpop.eup %2368 }
 0x24f   : > { %v1029_v17 = vsel %vm309_vm9, %v2864_v52, -inf  ;;  %v1485_v37 = vrot.slane %v1451_v60, %v2691_v28  ;;  %v1734_v60 = vsel %vm299_vm4, %v1718_v25, %v1733_v63  ;;  %v316_v46 = vsel %vm309_vm9, %v2369_v45, 0.0 }
 0x250   : > { %1030 = vmax.xlane.f32.xlu1 %v1029_v17  ;;  %v1907_v30 = vpop.xlane.xlu1 %1906  ;;  %v1916_v17 = vpop.xlane.xlu0 %1915  ;;  %v1969_v43 = vsel %vm295_vm2, %v1947_v24, %v1968_v39 }
 0x251   : > { %v1498_v34 = vsel %vm301_vm5, %v1485_v37, %v1497_v18  ;;  %v1923_v53 = vmul.f32 0.5, %v1907_v30  ;;  %v1722_v30 = vrot.slane %v1688_v16, %v2691_v28  ;;  %v1926_v33 = vmul.f32 0.5, %v1916_v17 }
 0x253   : > { %v1951_v29 = vrot.slane %v1923_v53, %v2691_v28  ;;  %v1735_v22 = vsel %vm301_vm5, %v1722_v30, %v1734_v60  ;;  %v1963_v32 = vrot.slane %v1926_v33, %v2691_v28  ;;  %v2969_v30 = vsub.s32 1, %v2448_v5 }
 0x254   : > { %v1442_v38 = vpop.xlane.xlu1 %1441 }
 0x255   : > { %v1452_v0 = vmul.f32 0.5, %v1442_v38  ;;  %v1970_v31 = vsel %vm297_vm3, %v1951_v29, %v1969_v43 }
 0x257   : > { %v1489_v44 = vrot.slane %v1452_v0, %v2691_v28 }
 0x258   : > { %v1910_v13 = vpop.xlane.xlu1 %1909 }
 0x259   : > { %v1499_v55 = vsel %vm303_vm6, %v1489_v44, %v1498_v34  ;;  %v1924_v59 = vmul.f32 0.5, %v1910_v13 }
 0x25a   : > { %v1500_v6 = vsel %vm305_vm7, %v1493_v47, %v1499_v55 }
 0x25b   : > { %v2901_v62 = vsel %vm2706_vm8, %v1500_v6, -1e+09  ;;  %v1955_v8 = vrot.slane %v1924_v59, %v2691_v28 }
 0x25c   : > { %v1679_v21 = vpop.xlane.xlu1 %1678  ;;  %v1503_v3 = vsel %vm309_vm9, %v2901_v62, -inf }
 0x25d   : > { %v1689_v61 = vmul.f32 0.5, %v1679_v21  ;;  %1504 = vmax.xlane.f32.xlu1 %v1503_v3  ;;  %v1971_v2 = vsel %vm299_vm4, %v1955_v8, %v1970_v31 }
 0x25e   : > { %v1972_v35 = vsel %vm301_vm5, %v1959_v20, %v1971_v2  ;;  %v2977_v2 = vsub.s32 3, %v2448_v5 }
 0x25f   : > { %v1726_v26 = vrot.slane %v1689_v61, %v2691_v28  ;;  %v1973_v10 = vsel %vm303_vm6, %v1963_v32, %v1972_v35  ;;  %v2993_v35 = vsub.s32 7, %v2448_v5 }
 0x260   : > { %v1682_v27 = vpop.xlane.xlu1 %1681 }
 0x261   : > { %v1690_v19 = vmul.f32 0.5, %v1682_v27  ;;  %v1736_v9 = vsel %vm303_vm6, %v1726_v26, %v1735_v22 }
 0x263   : > { %v1730_v36 = vrot.slane %v1690_v19, %v2691_v28  ;;  %v2973_v19 = vsub.s32 2, %v2448_v5 }
 0x264   : > { %v1919_v15 = vpop.xlane.xlu1 %1918 }
 0x265   : > { %v1927_v37 = vmul.f32 0.5, %v1919_v15  ;;  %v1737_v38 = vsel %vm305_vm7, %v1730_v36, %v1736_v9  ;;  %v2981_v36 = vsub.s32 4, %v2448_v5  ;;  %v2985_v15 = vsub.s32 5, %v2448_v5 }
 0x266   : > { %v1739_v40 = vsel %vm2706_vm8, %v1737_v38, -1e+09 }
 0x267   : > { %v1967_v0 = vrot.slane %v1927_v37, %v2691_v28  ;;  %v1740_v41 = vsel %vm309_vm9, %v1739_v40, -inf  ;;  %v2989_v37 = vsub.s32 6, %v2448_v5 }
 0x268   : > { %1741 = vmax.xlane.f32.xlu0 %v1740_v41 }
 0x269   : > { %v1974_v42 = vsel %vm305_vm7, %v1967_v0, %v1973_v10 }
 0x26a   : > { %v1976_v18 = vsel %vm2706_vm8, %v1974_v42, -1e+09  ;;  %vm1815_vm8 = vcmask 753344  }
 0x26b   : > { %v1977_v44 = vsel %vm309_vm9, %v1976_v18, -inf }
 0x26c   : > { %1978 = vmax.xlane.f32.xlu1 %v1977_v44 }
 0x270   : > { %317 = vadd.xlane.f32.xlu1 %v316_v46 }
 0x285   : > { %v557_v47 = vpop.xlane.xlu0 %556 }
 0x286   : > { %v558_v28 = vsub.f32 %v2765_v58, %v557_v47 }
 0x288   : > { %v559_v34 = vmul.f32 1.442695, %v558_v28 }
 0x28a   : > { %2370 = vpow2.f32 %v559_v34 }
 0x297   : > { %v2936_v13 = vpop.eup %2370 }
 0x298   : > { %v561_v49 = vsel %vm309_vm9, %v2936_v13, 0.0 }
 0x299   : > { %562 = vadd.xlane.f32.xlu1 %v561_v49 }
 0x2bd   : > { %v794_v48 = vpop.xlane.xlu0 %793 }
 0x2be   : > { %v795_v51 = vsub.f32 %v2808_v50, %v794_v48 }
 0x2c0   : > { %v796_v14 = vmul.f32 1.442695, %v795_v51 }
 0x2c2   : > { %2372 = vpow2.f32 %v796_v14 }
 0x2cf   : > { %v2941_v53 = vpop.eup %2372 }
 0x2d0   : > { %v798_v55 = vsel %vm309_vm9, %v2941_v53, 0.0 }
 0x2d1   : > { %799 = vadd.xlane.f32.xlu0 %v798_v55 }
 0x2d3   : > { %v1268_v58 = vpop.xlane.xlu0 %1267 }
 0x2d4   : > { %v1269_v23 = vsub.f32 %v2848_v57, %v1268_v58 }
 0x2d6   : > { %v1270_v54 = vmul.f32 1.442695, %v1269_v23 }
 0x2d8   : > { %2374 = vpow2.f32 %v1270_v54 }
 0x2d9   : > { %v1031_v59 = vpop.xlane.xlu1 %1030 }
 0x2da   : > { %v1032_v6 = vsub.f32 %v2864_v52, %v1031_v59 }
 0x2dc   : > { %v1033_v7 = vmul.f32 1.442695, %v1032_v6 }
 0x2de   : > { %2376 = vpow2.f32 %v1033_v7 }
 0x2e5   : > { %v2947_v4 = vpop.eup %2374 }
 0x2e6   : > { %v1505_v50 = vpop.xlane.xlu1 %1504  ;;  %v1272_v16 = vsel %vm309_vm9, %v2947_v4, 0.0 }
 0x2e7   : > { %v1506_v11 = vsub.f32 %v2901_v62, %v1505_v50  ;;  %1273 = vadd.xlane.f32.xlu0 %v1272_v16 }
 0x2e9   : > { %v1507_v21 = vmul.f32 1.442695, %v1506_v11 }
 0x2eb   : > { %v2952_v3 = vpop.eup %2376  ;;  %2378 = vpow2.f32 %v1507_v21 }
 0x2ec   : > { %v1035_v57 = vsel %vm309_vm9, %v2952_v3, 0.0 }
 0x2ed   : > { %1036 = vadd.xlane.f32.xlu1 %v1035_v57 }
 0x2f1   : > { %v1742_v52 = vpop.xlane.xlu0 %1741 }
 0x2f2   : > { %v1743_v39 = vsub.f32 %v1739_v40, %v1742_v52 }
 0x2f4   : > { %v1744_v63 = vmul.f32 1.442695, %v1743_v39 }
 0x2f5   : > { %v1979_v29 = vpop.xlane.xlu1 %1978 }
 0x2f6   : > { %2380 = vpow2.f32 %v1744_v63  ;;  %v1980_v61 = vsub.f32 %v1976_v18, %v1979_v29 }
 0x2f8   : > { %v2956_v24 = vpop.eup %2378  ;;  %v1981_v25 = vmul.f32 1.442695, %v1980_v61 }
 0x2f9   : > { %v1509_v62 = vsel %vm309_vm9, %v2956_v24, 0.0  ;;  %v318_v8 = vpop.xlane.xlu1 %317 }
 0x2fa   : > { %2382 = vpow2.f32 %v1981_v25  ;;  %1510 = vadd.xlane.f32.xlu1 %v1509_v62 }
 0x2fb   : > { %2384 = vrcp.f32 %v318_v8 }
 0x303   : > { %v2960_v56 = vpop.eup %2380 }
 0x304   : > { %v1746_v17 = vsel %vm309_vm9, %v2960_v56, 0.0 }
 0x305   : > { %1747 = vadd.xlane.f32.xlu0 %v1746_v17 }
 0x307   : > { %v2964_v43 = vpop.eup %2382 }
 0x308   : > { %v1983_v26 = vsel %vm309_vm9, %v2964_v43, 0.0  ;;  %v2385_v27 = vpop.eup %2384 }
 0x309   : > { %1984 = vadd.xlane.f32.xlu1 %v1983_v26  ;;  %v320_v60 = vmul.f32 %v2385_v27, %v2369_v45 }
 0x30b   : > { %v331_v31 = vrot.slane %v320_v60, %v2969_v30  ;;  %v324_v33 = vrot.slane %v320_v60, %v2455_v12  ;;  %v338_v20 = vrot.slane %v320_v60, %v2973_v19  ;;  %v345_v22 = vrot.slane %v320_v60, %v2977_v2 }
 0x30c   : > { %v352_v9 = vrot.slane %v320_v60, %v2981_v36  ;;  %v359_v38 = vrot.slane %v320_v60, %v2985_v15  ;;  %v366_v40 = vrot.slane %v320_v60, %v2989_v37  ;;  %v373_v0 = vrot.slane %v320_v60, %v2993_v35 }
 0x31a   : > { %333 = vbcast.lane.b32.xlu1 %v331_v31, 256 }
 0x31b   : > { %326 = vbcast.lane.b32.xlu0 %v324_v33, 256 }
 0x31e   : > { %340 = vbcast.lane.b32.xlu1 %v338_v20, 256 }
 0x31f   : > { %347 = vbcast.lane.b32.xlu0 %v345_v22, 256 }
 0x322   : > { %354 = vbcast.lane.b32.xlu1 %v352_v9, 256  ;;  %v563_v32 = vpop.xlane.xlu1 %562 }
 0x323   : > { %2386 = vrcp.f32 %v563_v32  ;;  %361 = vbcast.lane.b32.xlu0 %v359_v38, 256 }
 0x326   : > { %368 = vbcast.lane.b32.xlu1 %v366_v40, 256 }
 0x327   : > { %375 = vbcast.lane.b32.xlu0 %v373_v0, 256 }
 0x330   : > { %v2387_v41 = vpop.eup %2386 }
 0x331   : > { %v565_v10 = vmul.f32 %v2387_v41, %v2936_v13 }
 0x333   : > { %v576_v42 = vrot.slane %v565_v10, %v2969_v30  ;;  %v569_v18 = vrot.slane %v565_v10, %v2455_v12  ;;  %v583_v5 = vrot.slane %v565_v10, %v2973_v19  ;;  %v590_v44 = vrot.slane %v565_v10, %v2977_v2 }
 0x334   : > { %v597_v45 = vrot.slane %v565_v10, %v2981_v36  ;;  %v604_v46 = vrot.slane %v565_v10, %v2985_v15  ;;  %v611_v47 = vrot.slane %v565_v10, %v2989_v37  ;;  %v618_v28 = vrot.slane %v565_v10, %v2993_v35 }
 0x335   : > { %578 = vbcast.lane.b32.xlu1 %v576_v42, 256  ;;  %571 = vbcast.lane.b32.xlu0 %v569_v18, 256 }
 0x339   : > { %585 = vbcast.lane.b32.xlu1 %v583_v5, 256  ;;  %592 = vbcast.lane.b32.xlu0 %v590_v44, 256 }
 0x33d   : > { %599 = vbcast.lane.b32.xlu1 %v597_v45, 256  ;;  %606 = vbcast.lane.b32.xlu0 %v604_v46, 256 }
 0x341   : > { %613 = vbcast.lane.b32.xlu1 %v611_v47, 256  ;;  %620 = vbcast.lane.b32.xlu0 %v618_v28, 256 }
 0x35a   : > { %v800_v34 = vpop.xlane.xlu0 %799 }
 0x35b   : > { %2388 = vrcp.f32 %v800_v34 }
 0x368   : > { %v2389_v13 = vpop.eup %2388 }
 0x369   : > { %v802_v49 = vmul.f32 %v2389_v13, %v2941_v53 }
 0x36b   : > { %v806_v48 = vrot.slane %v802_v49, %v2455_v12  ;;  %v813_v51 = vrot.slane %v802_v49, %v2969_v30  ;;  %v827_v14 = vrot.slane %v802_v49, %v2977_v2  ;;  %v820_v55 = vrot.slane %v802_v49, %v2973_v19 }
 0x36c   : > { %v834_v58 = vrot.slane %v802_v49, %v2981_v36  ;;  %v841_v23 = vrot.slane %v802_v49, %v2985_v15  ;;  %v848_v53 = vrot.slane %v802_v49, %v2989_v37  ;;  %v855_v59 = vrot.slane %v802_v49, %v2993_v35 }
 0x36d   : > { %808 = vbcast.lane.b32.xlu1 %v806_v48, 256  ;;  %815 = vbcast.lane.b32.xlu0 %v813_v51, 256 }
 0x370   : > { %v1274_v6 = vpop.xlane.xlu0 %1273 }
 0x371   : > { %829 = vbcast.lane.b32.xlu1 %v827_v14, 256  ;;  %822 = vbcast.lane.b32.xlu0 %v820_v55, 256 }
 0x375   : > { %836 = vbcast.lane.b32.xlu1 %v834_v58, 256  ;;  %843 = vbcast.lane.b32.xlu0 %v841_v23, 256 }
 0x376   : > { %v1037_v54 = vpop.xlane.xlu1 %1036 }
 0x377   : > { %2390 = vrcp.f32 %v1037_v54 }
 0x378   : > { %2392 = vrcp.f32 %v1274_v6 }
 0x379   : > { %850 = vbcast.lane.b32.xlu1 %v848_v53, 256  ;;  %857 = vbcast.lane.b32.xlu0 %v855_v59, 256 }
 0x383   : > { %v1511_v52 = vpop.xlane.xlu1 %1510 }
 0x384   : > { %v2391_v7 = vpop.eup %2390  ;;  %2394 = vrcp.f32 %v1511_v52 }
 0x385   : > { %v1039_v50 = vmul.f32 %v2391_v7, %v2952_v3  ;;  %v2393_v61 = vpop.eup %2392 }
 0x386   : > { %v1276_v62 = vmul.f32 %v2393_v61, %v2947_v4 }
 0x387   : > { %v1050_v16 = vrot.slane %v1039_v50, %v2969_v30  ;;  %v1043_v11 = vrot.slane %v1039_v50, %v2455_v12  ;;  %v1064_v21 = vrot.slane %v1039_v50, %v2977_v2  ;;  %v1057_v57 = vrot.slane %v1039_v50, %v2973_v19 }
 0x388   : > { %v1078_v63 = vrot.slane %v1039_v50, %v2985_v15  ;;  %v1071_v29 = vrot.slane %v1039_v50, %v2981_v36  ;;  %v1092_v8 = vrot.slane %v1039_v50, %v2993_v35  ;;  %v1085_v17 = vrot.slane %v1039_v50, %v2989_v37 }
 0x389   : > { %1052 = vbcast.lane.b32.xlu0 %v1050_v16, 256  ;;  %1045 = vbcast.lane.b32.xlu1 %v1043_v11, 256  ;;  %v1287_v60 = vrot.slane %v1276_v62, %v2969_v30  ;;  %v1280_v31 = vrot.slane %v1276_v62, %v2455_v12  ;;  %v1301_v4 = vrot.slane %v1276_v62, %v2977_v2 }
 0x38a   : > { %v1294_v22 = vrot.slane %v1276_v62, %v2973_v19  ;;  %v1315_v40 = vrot.slane %v1276_v62, %v2985_v15  ;;  %v1308_v0 = vrot.slane %v1276_v62, %v2981_v36  ;;  %v1329_v45 = vrot.slane %v1276_v62, %v2993_v35 }
 0x38b   : > { %v1322_v46 = vrot.slane %v1276_v62, %v2989_v37 }
 0x38d   : > { %1066 = vbcast.lane.b32.xlu0 %v1064_v21, 256  ;;  %1059 = vbcast.lane.b32.xlu1 %v1057_v57, 256 }
 0x38e   : > { %v1748_v39 = vpop.xlane.xlu0 %1747 }
 0x38f   : > { %2396 = vrcp.f32 %v1748_v39 }
 0x391   : > { %1080 = vbcast.lane.b32.xlu0 %v1078_v63, 256  ;;  %1073 = vbcast.lane.b32.xlu1 %v1071_v29, 256  ;;  %v2395_v41 = vpop.eup %2394 }
 0x392   : > { %v327_v3 = vpop.permute.xlu0 %326  ;;  %v1985_v25 = vpop.xlane.xlu1 %1984  ;;  %v3036_v18 = vmul.f32 %v2395_v41, %v2956_v24 }
 0x393   : > { %v377_v33 = vmul.f32 %v327_v3, %v2444_v1  ;;  %2398 = vrcp.f32 %v1985_v25 }
 0x394   : > { %v1524_v24 = vrot.slane %v3036_v18, %v2969_v30  ;;  %v1517_v48 = vrot.slane %v3036_v18, %v2455_v12  ;;  %v1538_v6 = vrot.slane %v3036_v18, %v2977_v2  ;;  %v1531_v16 = vrot.slane %v3036_v18, %v2973_v19 }
 0x395   : > { %1094 = vbcast.lane.b32.xlu0 %v1092_v8, 256  ;;  %1087 = vbcast.lane.b32.xlu1 %v1085_v17, 256  ;;  %v386_v38 = vsel %vm385_vm10, %v377_v33, 0.0  ;;  %v1552_v61 = vrot.slane %v3036_v18, %v2985_v15  ;;  %v1559_v33 = vrot.slane %v3036_v18, %v2989_v37 }
 0x396   : > { %v334_v26 = vpop.permute.xlu1 %333  ;;  %v348_v27 = vpop.permute.xlu0 %347  ;;  %v387_v10 = vrot.slane %v386_v38, 4 }
 0x397   : > { %v380_v5 = vmul.f32 %v348_v27, %v2444_v1  ;;  %v378_v47 = vmul.f32 %v334_v26, %v2444_v1  ;;  %v1545_v26 = vrot.slane %v3036_v18, %v2981_v36 }
 0x398   : > { %v388_v28 = vadd.f32 %v387_v10, %v386_v38 }
 0x399   : > { %1289 = vbcast.lane.b32.xlu0 %v1287_v60, 256  ;;  %1282 = vbcast.lane.b32.xlu1 %v1280_v31, 256  ;;  %v407_v34 = vsel %vm385_vm10, %v380_v5, 0.0  ;;  %v393_v51 = vsel %vm385_vm10, %v378_v47, 0.0 }
 0x39a   : > { %v341_v20 = vpop.permute.xlu1 %340  ;;  %v362_v9 = vpop.permute.xlu0 %361  ;;  %v389_v14 = vrot.slane %v388_v28, 2  ;;  %v408_v58 = vrot.slane %v407_v34, 4  ;;  %v394_v54 = vrot.slane %v393_v51, 4 }
 0x39b   : > { %v379_v50 = vmul.f32 %v341_v20, %v2444_v1  ;;  %v382_v21 = vmul.f32 %v362_v9, %v2444_v1 }
 0x39c   : > { %v2397_v7 = vpop.eup %2396  ;;  %v390_v11 = vadd.f32 %v389_v14, %v388_v28  ;;  %v3060_v39 = vadd.f32 %v408_v58, %v407_v34  ;;  %v3069_v25 = vadd.f32 %v394_v54, %v393_v51 }
 0x39d   : > { %1303 = vbcast.lane.b32.xlu0 %v1301_v4, 256  ;;  %1296 = vbcast.lane.b32.xlu1 %v1294_v22, 256  ;;  %v3067_v3 = vmul.f32 %v2397_v7, %v2960_v56  ;;  %v400_v27 = vsel %vm385_vm10, %v379_v50, 0.0  ;;  %v3079_v56 = vsel %vm385_vm10, %v382_v21, 0.0 }
 0x39e   : > { %v355_v32 = vpop.permute.xlu1 %354  ;;  %v3039_v44 = vpop.permute.xlu0 %375  ;;  %v391_v20 = vrot.slane %v390_v11, 1  ;;  %v410_v9 = vrot.slane %v3060_v39, 2  ;;  %v401_v41 = vrot.slane %v400_v27, 4  ;;  %v422_v28 = vrot.slane %v3079_v56, 4 }
 0x39f   : > { %v381_v60 = vmul.f32 %v355_v32, %v2444_v1  ;;  %v396_v32 = vrot.slane %v3069_v25, 2  ;;  %v384_v34 = vmul.f32 %v3039_v44, %v2444_v1 }
 0x3a0   : > { %v2399_v47 = vpop.eup %2398 }
 0x3a1   : > { %1317 = vbcast.lane.b32.xlu0 %v1315_v40, 256  ;;  %1310 = vbcast.lane.b32.xlu1 %v1308_v0, 256  ;;  %v3099_v44 = vmul.f32 %v2399_v47, %v2964_v43  ;;  %v1775_v47 = vrot.slane %v3067_v3, %v2977_v2 }
 0x3a2   : > { %v3033_v42 = vpop.permute.xlu1 %368 }
 0x3a5   : > { %1331 = vbcast.lane.b32.xlu0 %v1329_v45, 256  ;;  %1324 = vbcast.lane.b32.xlu1 %v1322_v46, 256  ;;  %v1754_v46 = vrot.slane %v3067_v3, %v2455_v12 }
 0x3a7   : > { %v572_v13 = vpop.permute.xlu0 %571  ;;  %v579_v49 = vpop.permute.xlu1 %578 }
 0x3a8   : > { %v622_v55 = vmul.f32 %v572_v13, %v2444_v1  ;;  %v623_v23 = vmul.f32 %v579_v49, %v2444_v1  ;;  %v414_v13 = vsel %vm385_vm10, %v381_v60, 0.0 }
 0x3a9   : > { %1526 = vbcast.lane.b32.xlu0 %v1524_v24, 256  ;;  %1519 = vbcast.lane.b32.xlu1 %v1517_v48, 256  ;;  %v383_v24 = vmul.f32 %v3033_v42, %v2444_v1  ;;  %v1768_v42 = vrot.slane %v3067_v3, %v2973_v19  ;;  %v415_v7 = vrot.slane %v414_v13, 4 }
 0x3aa   : > { %v631_v57 = vsel %vm630_vm11, %v622_v55, 0.0  ;;  %v638_v63 = vsel %vm630_vm11, %v623_v23, 0.0 }
 0x3ab   : > { %v593_v53 = vpop.permute.xlu0 %592  ;;  %v586_v59 = vpop.permute.xlu1 %585  ;;  %v632_v31 = vrot.slane %v631_v57, 4  ;;  %v639_v4 = vrot.slane %v638_v63, 4  ;;  %v428_v21 = vsel %vm385_vm10, %v383_v24, 0.0 }
 0x3ac   : > { %v624_v52 = vmul.f32 %v586_v59, %v2444_v1  ;;  %v625_v29 = vmul.f32 %v593_v53, %v2444_v1  ;;  %v402_v53 = vadd.f32 %v401_v41, %v400_v27  ;;  %v416_v27 = vadd.f32 %v415_v7, %v414_v13 }
 0x3ad   : > { %1540 = vbcast.lane.b32.xlu0 %v1538_v6, 256  ;;  %1533 = vbcast.lane.b32.xlu1 %v1531_v16, 256  ;;  %v633_v49 = vadd.f32 %v632_v31, %v631_v57  ;;  %v640_v48 = vadd.f32 %v639_v4, %v638_v63  ;;  %v3104_v6 = vadd.f32 %v391_v20, %v390_v11  ;;  %v429_v60 = vrot.slane %v428_v21, 4 }
 0x3ae   : > { %v645_v62 = vsel %vm630_vm11, %v624_v52, 0.0  ;;  %v652_v38 = vsel %vm630_vm11, %v625_v29, 0.0  ;;  %v1761_v16 = vrot.slane %v3067_v3, %v2969_v30  ;;  %v3111_v11 = vadd.f32 %v410_v9, %v3060_v39 }
 0x3af   : > { %v607_v8 = vpop.permute.xlu0 %606  ;;  %v600_v17 = vpop.permute.xlu1 %599  ;;  %v646_v40 = vrot.slane %v645_v62, 4  ;;  %v653_v51 = vrot.slane %v652_v38, 4  ;;  %v634_v50 = vrot.slane %v633_v49, 2  ;;  %v641_v57 = vrot.slane %v640_v48, 2 }
 0x3b0   : > { %v626_v22 = vmul.f32 %v600_v17, %v2444_v1  ;;  %v627_v0 = vmul.f32 %v607_v8, %v2444_v1  ;;  %v403_v8 = vrot.slane %v402_v53, 2  ;;  %v435_v17 = vsel %vm385_vm10, %v384_v34, 0.0 }
 0x3b1   : > { %1554 = vbcast.lane.b32.xlu0 %v1552_v61, 256  ;;  %1547 = vbcast.lane.b32.xlu1 %v1545_v26, 256  ;;  %v647_v55 = vadd.f32 %v646_v40, %v645_v62  ;;  %v654_v52 = vadd.f32 %v653_v51, %v652_v38  ;;  %v1998_v26 = vrot.slane %v3099_v44, %v2969_v30  ;;  %vm2052_vm10 = vcmask 786144  }
 0x3b2   : > { %v659_v10 = vsel %vm630_vm11, %v626_v22, 0.0  ;;  %v666_v58 = vsel %vm630_vm11, %v627_v0, 0.0  ;;  %v635_v31 = vadd.f32 %v634_v50, %v633_v49  ;;  %v642_v20 = vadd.f32 %v641_v57, %v640_v48 }
 0x3b3   : > { %v621_v5 = vpop.permute.xlu0 %620  ;;  %v614_v45 = vpop.permute.xlu1 %613  ;;  %v660_v23 = vrot.slane %v659_v10, 4  ;;  %v667_v63 = vrot.slane %v666_v58, 4  ;;  %v648_v43 = vrot.slane %v647_v55, 2  ;;  %v655_v4 = vrot.slane %v654_v52, 2 }
 0x3b4   : > { %v628_v14 = vmul.f32 %v614_v45, %v2444_v1  ;;  %v629_v54 = vmul.f32 %v621_v5, %v2444_v1  ;;  %v397_v39 = vadd.f32 %v396_v32, %v3069_v25  ;;  %v423_v41 = vadd.f32 %v422_v28, %v3079_v56 }
 0x3b5   : > { %1756 = vbcast.lane.b32.xlu0 %v1754_v46, 256  ;;  %1561 = vbcast.lane.b32.xlu1 %v1559_v33, 256  ;;  %v661_v29 = vadd.f32 %v660_v23, %v659_v10  ;;  %v1991_v33 = vrot.slane %v3099_v44, %v2455_v12  ;;  %v668_v22 = vadd.f32 %v667_v63, %v666_v58  ;;  %v436_v10 = vrot.slane %v435_v17, 4 }
 0x3b6   : > { %v673_v59 = vsel %vm630_vm11, %v628_v14, 0.0  ;;  %v680_v61 = vsel %vm630_vm11, %v629_v54, 0.0  ;;  %v649_v9 = vadd.f32 %v648_v43, %v647_v55  ;;  %v404_v30 = vadd.f32 %v403_v8, %v402_v53 }
 0x3b7   : > { %v674_v62 = vrot.slane %v673_v59, 4  ;;  %v681_v38 = vrot.slane %v680_v61, 4  ;;  %v662_v40 = vrot.slane %v661_v29, 2  ;;  %v2005_v5 = vrot.slane %v3099_v44, %v2973_v19 }
 0x3b8   : > { %v417_v45 = vrot.slane %v416_v27, 2  ;;  %v430_v12 = vadd.f32 %v429_v60, %v428_v21  ;;  %v636_v46 = vrot.slane %v635_v31, 1  ;;  %v643_v34 = vrot.slane %v642_v20, 1 }
 0x3b9   : > { %1770 = vbcast.lane.b32.xlu0 %v1768_v42, 256  ;;  %1763 = vbcast.lane.b32.xlu1 %v1761_v16, 256  ;;  %v675_v0 = vadd.f32 %v674_v62, %v673_v59  ;;  %v656_v13 = vadd.f32 %v655_v4, %v654_v52  ;;  %v669_v25 = vrot.slane %v668_v22, 2  ;;  %v682_v32 = vadd.f32 %v681_v38, %v680_v61 }
 0x3ba   : > { %v398_v49 = vrot.slane %v397_v39, 1  ;;  %v650_v24 = vrot.slane %v649_v9, 1  ;;  %v663_v48 = vadd.f32 %v662_v40, %v661_v29  ;;  %v424_v28 = vrot.slane %v423_v41, 2 }
 0x3bb   : > { %v676_v56 = vrot.slane %v675_v0, 2  ;;  %v405_v51 = vrot.slane %v404_v30, 1  ;;  %v437_v14 = vadd.f32 %v436_v10, %v435_v17  ;;  %v2012_v19 = vrot.slane %v3099_v44, %v2977_v2 }
 0x3bc   : > { %v418_v55 = vadd.f32 %v417_v45, %v416_v27  ;;  %v431_v58 = vrot.slane %v430_v12, 2  ;;  %v637_v23 = vadd.f32 %v636_v46, %v635_v31  ;;  %v1782_v54 = vrot.slane %v3067_v3, %v2981_v36 }
 0x3bd   : > { %2000 = vbcast.lane.b32.xlu0 %v1998_v26, 256  ;;  %1993 = vbcast.lane.b32.xlu1 %v1991_v33, 256  ;;  %v644_v53 = vadd.f32 %v643_v34, %v642_v20  ;;  %v657_v59 = vrot.slane %v656_v13, 1  ;;  %v670_v42 = vadd.f32 %v669_v25, %v668_v22  ;;  %v683_v7 = vrot.slane %v682_v32, 2 }
 0x3be   : > { %v412_v50 = vrot.slane %v3111_v11, 1  ;;  %v651_v16 = vadd.f32 %v650_v24, %v649_v9  ;;  %v664_v21 = vrot.slane %v663_v48, 1  ;;  %v677_v57 = vadd.f32 %v676_v56, %v675_v0 }
 0x3bf   : > { %v399_v52 = vadd.f32 %v398_v49, %v397_v39  ;;  %v425_v63 = vadd.f32 %v424_v28, %v423_v41  ;;  %v438_v2 = vrot.slane %v437_v14, 2  ;;  %v2019_v43 = vrot.slane %v3099_v44, %v2981_v36 }
 0x3c0   : > { %v406_v29 = vadd.f32 %v405_v51, %v404_v30  ;;  %v419_v61 = vrot.slane %v418_v55, 1  ;;  %v432_v62 = vadd.f32 %v431_v58, %v430_v12  ;;  %v1789_v8 = vrot.slane %v3067_v3, %v2985_v15 }
 0x3c1   : > { %2007 = vbcast.lane.b32.xlu0 %v2005_v5, 256  ;;  %1777 = vbcast.lane.b32.xlu1 %v1775_v47, 256  ;;  %v2135_v17 = vsel %vm293_vm1, %v644_v53, %v637_v23  ;;  %v658_v26 = vadd.f32 %v657_v59, %v656_v13  ;;  %v671_v27 = vrot.slane %v670_v42, 1  ;;  %v684_v60 = vadd.f32 %v683_v7, %v682_v32 }
 0x3c2   : > { %v2136_v31 = vsel %vm295_vm2, %v651_v16, %v2135_v17  ;;  %v665_v33 = vadd.f32 %v664_v21, %v663_v48  ;;  %v678_v20 = vrot.slane %v677_v57, 1  ;;  %v413_v4 = vadd.f32 %v412_v50, %v3111_v11 }
 0x3c3   : > { %v2117_v36 = vsel %vm293_vm1, %v399_v52, %v3104_v6  ;;  %v1796_v22 = vrot.slane %v3067_v3, %v2989_v37  ;;  %v1566_v38 = vrot.slane %v3036_v18, %v2993_v35  ;;  %v426_v39 = vrot.slane %v425_v63, 1 }
 0x3c4   : > { %v2118_v9 = vsel %vm295_vm2, %v406_v29, %v2117_v36  ;;  %v420_v40 = vadd.f32 %v419_v61, %v418_v55  ;;  %v433_v0 = vrot.slane %v432_v62, 1  ;;  %v439_v41 = vadd.f32 %v438_v2, %v437_v14 }
 0x3c5   : > { %2014 = vbcast.lane.b32.xlu0 %v2012_v19, 256  ;;  %1784 = vbcast.lane.b32.xlu1 %v1782_v54, 256  ;;  %v672_v30 = vadd.f32 %v671_v27, %v670_v42  ;;  %v2137_v10 = vsel %vm297_vm3, %v658_v26, %v2136_v31  ;;  %v685_v5 = vrot.slane %v684_v60, 1  ;;  %v679_v6 = vadd.f32 %v678_v20, %v677_v57 }
 0x3c6   : > { %v2138_v11 = vsel %vm299_vm4, %v665_v33, %v2137_v10  ;;  %v2119_v45 = vsel %vm297_vm3, %v413_v4, %v2118_v9  ;;  %v1803_v18 = vrot.slane %v3067_v3, %v2993_v35  ;;  %v434_v46 = vadd.f32 %v433_v0, %v432_v62 }
 0x3c7   : > { %v2120_v12 = vsel %vm299_vm4, %v420_v40, %v2119_v45  ;;  %v2026_v47 = vrot.slane %v3099_v44, %v2985_v15  ;;  %v427_v34 = vadd.f32 %v426_v39, %v425_v63  ;;  %v440_v13 = vrot.slane %v439_v41, 1 }
 0x3c8   : > { %v686_v25 = vadd.f32 %v685_v5, %v684_v60  ;;  %v2139_v32 = vsel %vm301_vm5, %v672_v30, %v2138_v11  ;;  %v2040_v24 = vrot.slane %v3099_v44, %v2993_v35  ;;  %v2033_v48 = vrot.slane %v3099_v44, %v2989_v37 }
 0x3c9   : > { %2021 = vbcast.lane.b32.xlu0 %v2019_v43, 256  ;;  %1791 = vbcast.lane.b32.xlu1 %v1789_v8, 256  ;;  %v2140_v49 = vsel %vm303_vm6, %v679_v6, %v2139_v32  ;;  %v2121_v3 = vsel %vm301_vm5, %v427_v34, %v2120_v12  ;;  %v441_v15 = vadd.f32 %v440_v13, %v439_v41 }
 0x3ca   : > { %v2122_v56 = vsel %vm303_vm6, %v434_v46, %v2121_v3  ;;  %v2141_v28 = vsel %vm305_vm7, %v686_v25, %v2140_v49 }
 0x3cb   : > { %v2123_v51 = vsel %vm305_vm7, %v441_v15, %v2122_v56 }
 0x3cc   : > { %v2348_v14 = vpack.i.bf16 %v2141_v28, %v2123_v51 }
 0x3cd   : > { %1798 = vbcast.lane.b32.xlu0 %v1796_v22, 256  ;;  %1568 = vbcast.lane.b32.xlu1 %v1566_v38, 256 }
 0x3d1   : > { %1805 = vbcast.lane.b32.xlu0 %v1803_v18, 256  ;;  %2028 = vbcast.lane.b32.xlu1 %v2026_v47, 256 }
 0x3d5   : > { %2042 = vbcast.lane.b32.xlu0 %v2040_v24, 256  ;;  %2035 = vbcast.lane.b32.xlu1 %v2033_v48, 256 }
 0x3d9   : > { %2349 = vrot.lane.b32.xlu1 %v2348_v14, %s2417_s20 }
 0x3df   : > { %v816_v19 = vpop.permute.xlu0 %815  ;;  %v809_v35 = vpop.permute.xlu1 %808 }
 0x3e0   : > { %v860_v55 = vmul.f32 %v816_v19, %v2444_v1  ;;  %v859_v58 = vmul.f32 %v809_v35, %v2444_v1 }
 0x3e2   : > { %v875_v23 = vsel %vm867_vm12, %v860_v55, 0.0  ;;  %v868_v54 = vsel %vm867_vm12, %v859_v58, 0.0 }
 0x3e3   : > { %v823_v37 = vpop.permute.xlu0 %822  ;;  %v830_v44 = vpop.permute.xlu1 %829  ;;  %v876_v7 = vrot.slane %v875_v23, 4  ;;  %v869_v50 = vrot.slane %v868_v54, 4 }
 0x3e4   : > { %v861_v53 = vmul.f32 %v823_v37, %v2444_v1  ;;  %v862_v59 = vmul.f32 %v830_v44, %v2444_v1 }
 0x3e5   : > { %v877_v63 = vadd.f32 %v876_v7, %v875_v23  ;;  %v870_v2 = vadd.f32 %v869_v50, %v868_v54 }
 0x3e6   : > { %v882_v42 = vsel %vm867_vm12, %v861_v53, 0.0  ;;  %v889_v52 = vsel %vm867_vm12, %v862_v59, 0.0 }
 0x3e7   : > { %v844_v16 = vpop.permute.xlu0 %843  ;;  %v837_v21 = vpop.permute.xlu1 %836  ;;  %v883_v57 = vrot.slane %v882_v42, 4  ;;  %v890_v61 = vrot.slane %v889_v52, 4  ;;  %v878_v8 = vrot.slane %v877_v63, 2  ;;  %v871_v17 = vrot.slane %v870_v2, 2 }
 0x3e8   : > { %v864_v43 = vmul.f32 %v844_v16, %v2444_v1  ;;  %v863_v29 = vmul.f32 %v837_v21, %v2444_v1 }
 0x3e9   : > { %v884_v62 = vadd.f32 %v883_v57, %v882_v42  ;;  %v891_v31 = vadd.f32 %v890_v61, %v889_v52  ;;  %v879_v38 = vadd.f32 %v878_v8, %v877_v63  ;;  %v872_v39 = vadd.f32 %v871_v17, %v870_v2 }
 0x3ea   : > { %v903_v26 = vsel %vm867_vm12, %v864_v43, 0.0  ;;  %v896_v27 = vsel %vm867_vm12, %v863_v29, 0.0 }
 0x3eb   : > { %v858_v60 = vpop.permute.xlu0 %857  ;;  %v885_v33 = vrot.slane %v884_v62, 2  ;;  %v904_v20 = vrot.slane %v903_v26, 4  ;;  %v897_v4 = vrot.slane %v896_v27, 4  ;;  %v851_v22 = vpop.permute.xlu1 %850  ;;  %v892_v9 = vrot.slane %v891_v31, 2 }
 0x3ec   : > { %v866_v36 = vmul.f32 %v858_v60, %v2444_v1  ;;  %v865_v0 = vmul.f32 %v851_v22, %v2444_v1  ;;  %v880_v5 = vrot.slane %v879_v38, 1  ;;  %v873_v11 = vrot.slane %v872_v39, 1 }
 0x3ed   : > { %v886_v40 = vadd.f32 %v885_v33, %v884_v62  ;;  %v905_v41 = vadd.f32 %v904_v20, %v903_v26  ;;  %v898_v30 = vadd.f32 %v897_v4, %v896_v27  ;;  %v893_v6 = vadd.f32 %v892_v9, %v891_v31 }
 0x3ee   : > { %v917_v10 = vsel %vm867_vm12, %v866_v36, 0.0  ;;  %v910_v12 = vsel %vm867_vm12, %v865_v0, 0.0  ;;  %v881_v34 = vadd.f32 %v880_v5, %v879_v38  ;;  %v874_v13 = vadd.f32 %v873_v11, %v872_v39 }
 0x3ef   : > { %v887_v45 = vrot.slane %v886_v40, 1  ;;  %v918_v18 = vrot.slane %v917_v10, 4  ;;  %v906_v46 = vrot.slane %v905_v41, 2  ;;  %v899_v47 = vrot.slane %v898_v30, 2 }
 0x3f0   : > { %v894_v49 = vrot.slane %v893_v6, 1  ;;  %v911_v24 = vrot.slane %v910_v12, 4  ;;  %v2153_v35 = vsel %vm293_vm1, %v881_v34, %v874_v13 }
 0x3f1   : > { %v888_v56 = vadd.f32 %v887_v45, %v886_v40  ;;  %v919_v15 = vadd.f32 %v918_v18, %v917_v10  ;;  %v907_v28 = vadd.f32 %v906_v46, %v905_v41  ;;  %v900_v51 = vadd.f32 %v899_v47, %v898_v30 }
 0x3f2   : > { %v895_v23 = vadd.f32 %v894_v49, %v893_v6  ;;  %v912_v54 = vadd.f32 %v911_v24, %v910_v12 }
 0x3f3   : > { %v2154_v42 = vsel %vm295_vm2, %v888_v56, %v2153_v35  ;;  %v920_v7 = vrot.slane %v919_v15, 2  ;;  %v908_v21 = vrot.slane %v907_v28, 1  ;;  %v901_v57 = vrot.slane %v900_v51, 1 }
 0x3f4   : > { %v913_v17 = vrot.slane %v912_v54, 2  ;;  %v2155_v4 = vsel %vm297_vm3, %v895_v23, %v2154_v42 }
 0x3f5   : > { %v3191_v36 = vadd.f32 %v920_v7, %v919_v15  ;;  %v909_v39 = vadd.f32 %v908_v21, %v907_v28  ;;  %v902_v9 = vadd.f32 %v901_v57, %v900_v51 }
 0x3f6   : > { %v914_v45 = vadd.f32 %v913_v17, %v912_v54 }
 0x3fb   : > { %v1053_v25 = vpop.permute.xlu0 %1052  ;;  %v1046_v32 = vpop.permute.xlu1 %1045 }
 0x3fc   : > { %v1097_v3 = vmul.f32 %v1053_v25, %v2444_v1  ;;  %v1096_v48 = vmul.f32 %v1046_v32, %v2444_v1  ;;  %v2156_v32 = vsel %vm299_vm4, %v902_v9, %v2155_v4 }
 0x3fe   : > { %v1112_v14 = vsel %vm1104_vm13, %v1097_v3, 0.0  ;;  %v1105_v19 = vsel %vm1104_vm13, %v1096_v48, 0.0 }
 0x3ff   : > { %v1113_v55 = vrot.slane %v1112_v14, 4  ;;  %v1106_v58 = vrot.slane %v1105_v19, 4  ;;  %v1067_v37 = vpop.permute.xlu0 %1066  ;;  %v1060_v44 = vpop.permute.xlu1 %1059 }
 0x400   : > { %v1099_v53 = vmul.f32 %v1067_v37, %v2444_v1  ;;  %v1098_v59 = vmul.f32 %v1060_v44, %v2444_v1 }
 0x401   : > { %v1114_v50 = vadd.f32 %v1113_v55, %v1112_v14  ;;  %v1107_v16 = vadd.f32 %v1106_v58, %v1105_v19  ;;  %v915_v19 = vrot.slane %v914_v45, 1 }
 0x402   : > { %v1126_v52 = vsel %vm1104_vm13, %v1099_v53, 0.0  ;;  %v1119_v63 = vsel %vm1104_vm13, %v1098_v59, 0.0  ;;  %v922_v53 = vrot.slane %v3191_v36, 1 }
 0x403   : > { %v1115_v2 = vrot.slane %v1114_v50, 2  ;;  %v1108_v43 = vrot.slane %v1107_v16, 2  ;;  %v1127_v29 = vrot.slane %v1126_v52, 4  ;;  %v1120_v61 = vrot.slane %v1119_v63, 4  ;;  %v1081_v62 = vpop.permute.xlu0 %1080  ;;  %v1074_v8 = vpop.permute.xlu1 %1073 }
 0x404   : > { %v1101_v26 = vmul.f32 %v1081_v62, %v2444_v1  ;;  %v1100_v27 = vmul.f32 %v1074_v8, %v2444_v1  ;;  %v916_v62 = vadd.f32 %v915_v19, %v914_v45 }
 0x405   : > { %v1116_v60 = vadd.f32 %v1115_v2, %v1114_v50  ;;  %v1109_v31 = vadd.f32 %v1108_v43, %v1107_v16  ;;  %v1128_v33 = vadd.f32 %v1127_v29, %v1126_v52  ;;  %v1121_v20 = vadd.f32 %v1120_v61, %v1119_v63 }
 0x406   : > { %v1140_v22 = vsel %vm1104_vm13, %v1101_v26, 0.0  ;;  %v1133_v38 = vsel %vm1104_vm13, %v1100_v27, 0.0  ;;  %v3206_v16 = vsel %vm301_vm5, %v909_v39, %v2156_v32 }
 0x407   : > { %v1129_v40 = vrot.slane %v1128_v33, 2  ;;  %v1122_v0 = vrot.slane %v1121_v20, 2  ;;  %v1095_v41 = vpop.permute.xlu0 %1094  ;;  %v1088_v30 = vpop.permute.xlu1 %1087  ;;  %v1141_v10 = vrot.slane %v1140_v22, 4  ;;  %v1134_v5 = vrot.slane %v1133_v38, 4 }
 0x408   : > { %v1103_v11 = vmul.f32 %v1095_v41, %v2444_v1  ;;  %v1102_v6 = vmul.f32 %v1088_v30, %v2444_v1  ;;  %v1117_v18 = vrot.slane %v1116_v60, 1  ;;  %v1110_v12 = vrot.slane %v1109_v31, 1 }
 0x409   : > { %v1123_v46 = vadd.f32 %v1122_v0, %v1121_v20  ;;  %v1142_v47 = vadd.f32 %v1141_v10, %v1140_v22  ;;  %v1135_v34 = vadd.f32 %v1134_v5, %v1133_v38  ;;  %v1130_v49 = vadd.f32 %v1129_v40, %v1128_v33 }
 0x40a   : > { %v1154_v13 = vsel %vm1104_vm13, %v1103_v11, 0.0  ;;  %v1147_v25 = vsel %vm1104_vm13, %v1102_v6, 0.0  ;;  %v1118_v35 = vadd.f32 %v1117_v18, %v1116_v60  ;;  %v1111_v37 = vadd.f32 %v1110_v12, %v1109_v31 }
 0x40b   : > { %v1124_v24 = vrot.slane %v1123_v46, 1  ;;  %v1155_v3 = vrot.slane %v1154_v13, 4  ;;  %v1290_v48 = vpop.permute.xlu0 %1289  ;;  %v1283_v56 = vpop.permute.xlu1 %1282  ;;  %v1143_v15 = vrot.slane %v1142_v47, 2  ;;  %v1136_v28 = vrot.slane %v1135_v34, 2 }
 0x40c   : > { %v1148_v51 = vrot.slane %v1147_v25, 4  ;;  %v1334_v14 = vmul.f32 %v1290_v48, %v2444_v1  ;;  %v1333_v58 = vmul.f32 %v1283_v56, %v2444_v1  ;;  %v1131_v21 = vrot.slane %v1130_v49, 1 }
 0x40d   : > { %v1156_v55 = vadd.f32 %v1155_v3, %v1154_v13  ;;  %v1137_v44 = vadd.f32 %v1136_v28, %v1135_v34  ;;  %v1125_v57 = vadd.f32 %v1124_v24, %v1123_v46  ;;  %v1144_v52 = vadd.f32 %v1143_v15, %v1142_v47 }
 0x40e   : > { %v1149_v23 = vadd.f32 %v1148_v51, %v1147_v25  ;;  %v1349_v54 = vsel %vm1341_vm14, %v1334_v14, 0.0  ;;  %v1342_v42 = vsel %vm1341_vm14, %v1333_v58, 0.0  ;;  %v2171_v8 = vsel %vm293_vm1, %v1118_v35, %v1111_v37 }
 0x40f   : > { %v1350_v59 = vrot.slane %v1349_v54, 4  ;;  %v1304_v7 = vpop.permute.xlu0 %1303  ;;  %v1297_v50 = vpop.permute.xlu1 %1296  ;;  %v1157_v2 = vrot.slane %v1156_v55, 2  ;;  %v1343_v29 = vrot.slane %v1342_v42, 4  ;;  %v1138_v17 = vrot.slane %v1137_v44, 1 }
 0x410   : > { %v1150_v63 = vrot.slane %v1149_v23, 2  ;;  %v1336_v61 = vmul.f32 %v1304_v7, %v2444_v1  ;;  %v1335_v26 = vmul.f32 %v1297_v50, %v2444_v1  ;;  %v1132_v22 = vadd.f32 %v1131_v21, %v1130_v49 }
 0x411   : > { %v1351_v43 = vadd.f32 %v1350_v59, %v1349_v54  ;;  %v1344_v31 = vadd.f32 %v1343_v29, %v1342_v42  ;;  %v2172_v38 = vsel %vm295_vm2, %v1125_v57, %v2171_v8  ;;  %v1145_v40 = vrot.slane %v1144_v52, 1 }
 0x412   : > { %v1151_v27 = vadd.f32 %v1150_v63, %v1149_v23  ;;  %v1363_v33 = vsel %vm1341_vm14, %v1336_v61, 0.0  ;;  %v1356_v9 = vsel %vm1341_vm14, %v1335_v26, 0.0  ;;  %v1158_v0 = vadd.f32 %v1157_v2, %v1156_v55 }
 0x413   : > { %v1352_v60 = vrot.slane %v1351_v43, 2  ;;  %v1318_v20 = vpop.permute.xlu0 %1317  ;;  %v1311_v4 = vpop.permute.xlu1 %1310  ;;  %v1364_v39 = vrot.slane %v1363_v33, 4  ;;  %v1345_v41 = vrot.slane %v1344_v31, 2  ;;  %v1357_v30 = vrot.slane %v1356_v9, 4 }
 0x414   : > { %v1338_v11 = vmul.f32 %v1318_v20, %v2444_v1  ;;  %v1337_v6 = vmul.f32 %v1311_v4, %v2444_v1  ;;  %v1139_v45 = vadd.f32 %v1138_v17, %v1137_v44  ;;  %v1152_v18 = vrot.slane %v1151_v27, 1 }
 0x415   : > { %v1353_v10 = vadd.f32 %v1352_v60, %v1351_v43  ;;  %v1365_v5 = vadd.f32 %v1364_v39, %v1363_v33  ;;  %v1346_v12 = vadd.f32 %v1345_v41, %v1344_v31  ;;  %v1358_v46 = vadd.f32 %v1357_v30, %v1356_v9 }
 0x416   : > { %v1377_v25 = vsel %vm1341_vm14, %v1338_v11, 0.0  ;;  %v1370_v32 = vsel %vm1341_vm14, %v1337_v6, 0.0  ;;  %v2173_v24 = vsel %vm297_vm3, %v1132_v22, %v2172_v38  ;;  %v1159_v3 = vrot.slane %v1158_v0, 1 }
 0x417   : > { %v1332_v47 = vpop.permute.xlu0 %1331  ;;  %v1325_v34 = vpop.permute.xlu1 %1324  ;;  %v1366_v13 = vrot.slane %v1365_v5, 2  ;;  %v1359_v48 = vrot.slane %v1358_v46, 2  ;;  %v1378_v56 = vrot.slane %v1377_v25, 4  ;;  %v1146_v15 = vadd.f32 %v1145_v40, %v1144_v52 }
 0x418   : > { %v1340_v49 = vmul.f32 %v1332_v47, %v2444_v1  ;;  %v1354_v28 = vrot.slane %v1353_v10, 1  ;;  %v1371_v51 = vrot.slane %v1370_v32, 4  ;;  %v2174_v19 = vsel %vm299_vm4, %v1139_v45, %v2173_v24 }
 0x419   : > { %v1347_v35 = vrot.slane %v1346_v12, 1  ;;  %v1360_v55 = vadd.f32 %v1359_v48, %v1358_v46  ;;  %v1339_v58 = vmul.f32 %v1325_v34, %v2444_v1  ;;  %v1153_v23 = vadd.f32 %v1152_v18, %v1151_v27 }
 0x41a   : > { %v1391_v14 = vsel %vm1341_vm14, %v1340_v49, 0.0  ;;  %v1367_v54 = vadd.f32 %v1366_v13, %v1365_v5  ;;  %v1379_v59 = vadd.f32 %v1378_v56, %v1377_v25  ;;  %v923_v7 = vadd.f32 %v922_v53, %v3191_v36 }
 0x41b   : > { %v1527_v37 = vpop.permute.xlu0 %1526  ;;  %v1520_v44 = vpop.permute.xlu1 %1519  ;;  %v1160_v50 = vadd.f32 %v1159_v3, %v1158_v0  ;;  %v1392_v21 = vrot.slane %v1391_v14, 4  ;;  %v2158_v57 = vsel %vm303_vm6, %v916_v62, %v3206_v16  ;;  %v1355_v52 = vadd.f32 %v1354_v28, %v1353_v10 }
 0x41c   : > { %v1571_v42 = vmul.f32 %v1527_v37, %v2444_v1  ;;  %v1372_v63 = vadd.f32 %v1371_v51, %v1370_v32  ;;  %v2175_v43 = vsel %vm301_vm5, %v1146_v15, %v2174_v19  ;;  %v1348_v29 = vadd.f32 %v1347_v35, %v1346_v12 }
 0x41d   : > { %v1361_v61 = vrot.slane %v1360_v55, 1  ;;  %v1384_v8 = vsel %vm1341_vm14, %v1339_v58, 0.0  ;;  %v1368_v27 = vrot.slane %v1367_v54, 1  ;;  %v1380_v60 = vrot.slane %v1379_v59, 2 }
 0x41e   : > { %v1586_v2 = vsel %vm1578_vm15, %v1571_v42, 0.0  ;;  %v2176_v36 = vsel %vm303_vm6, %v1153_v23, %v2175_v43  ;;  %v1570_v53 = vmul.f32 %v1520_v44, %v2444_v1  ;;  %v1393_v16 = vadd.f32 %v1392_v21, %v1391_v14 }
 0x41f   : > { %v1587_v17 = vrot.slane %v1586_v2, 4  ;;  %v1541_v26 = vpop.permute.xlu0 %1540  ;;  %v1534_v31 = vpop.permute.xlu1 %1533  ;;  %v1373_v33 = vrot.slane %v1372_v63, 2  ;;  %v1385_v20 = vrot.slane %v1384_v8, 4  ;;  %v2159_v4 = vsel %vm305_vm7, %v923_v7, %v2158_v57 }
 0x420   : > { %v2177_v22 = vsel %vm305_vm7, %v1160_v50, %v2176_v36  ;;  %v2189_v38 = vsel %vm293_vm1, %v1355_v52, %v1348_v29  ;;  %v1362_v39 = vadd.f32 %v1361_v61, %v1360_v55  ;;  %v1369_v0 = vadd.f32 %v1368_v27, %v1367_v54 }
 0x421   : > { %v1588_v62 = vadd.f32 %v1587_v17, %v1586_v2  ;;  %v2353_v9 = vpack.i.bf16 %v2177_v22, %v2159_v4  ;;  %v1381_v41 = vadd.f32 %v1380_v60, %v1379_v59  ;;  %v1579_v30 = vsel %vm1578_vm15, %v1570_v53, 0.0 }
 0x422   : > { %v1573_v10 = vmul.f32 %v1541_v26, %v2444_v1  ;;  %v1394_v11 = vrot.slane %v1393_v16, 2  ;;  %v1580_v45 = vrot.slane %v1579_v30, 4  ;;  %v1572_v18 = vmul.f32 %v1534_v31, %v2444_v1 }
 0x423   : > { %v1555_v40 = vpop.permute.xlu0 %1554  ;;  %v1548_v5 = vpop.permute.xlu1 %1547  ;;  %v1589_v6 = vrot.slane %v1588_v62, 2  ;;  %2354 = vrot.lane.b32.xlu0 %v2353_v9, %s2417_s20  ;;  %v1374_v12 = vadd.f32 %v1373_v33, %v1372_v63  ;;  %v1386_v46 = vadd.f32 %v1385_v20, %v1384_v8  ;;  %v2190_v13 = vsel %vm295_vm2, %v1362_v39, %v2189_v38 }
 0x424   : > { %v1600_v47 = vsel %vm1578_vm15, %v1573_v10, 0.0  ;;  %v1575_v34 = vmul.f32 %v1555_v40, %v2444_v1  ;;  %v1581_v25 = vadd.f32 %v1580_v45, %v1579_v30  ;;  %v1593_v49 = vsel %vm1578_vm15, %v1572_v18, 0.0 }
 0x425   : > { %v1601_v32 = vrot.slane %v1600_v47, 4  ;;  %v1382_v3 = vrot.slane %v1381_v41, 1  ;;  %v1594_v48 = vrot.slane %v1593_v49, 4  ;;  %v1574_v15 = vmul.f32 %v1548_v5, %v2444_v1 }
 0x426   : > { %v1614_v56 = vsel %vm1578_vm15, %v1575_v34, 0.0  ;;  %v1590_v51 = vadd.f32 %v1589_v6, %v1588_v62  ;;  %v1582_v14 = vrot.slane %v1581_v25, 2  ;;  %v1375_v23 = vrot.slane %v1374_v12, 1 }
 0x427   : > { %v1757_v24 = vpop.permute.xlu0 %1756  ;;  %v1562_v28 = vpop.permute.xlu1 %1561  ;;  %v1602_v19 = vadd.f32 %v1601_v32, %v1600_v47  ;;  %v1615_v35 = vrot.slane %v1614_v56, 4  ;;  %v1595_v55 = vadd.f32 %v1594_v48, %v1593_v49  ;;  %v1607_v58 = vsel %vm1578_vm15, %v1574_v15, 0.0 }
 0x428   : > { %v1807_v37 = vmul.f32 %v1757_v24, %v2444_v1  ;;  %v1576_v44 = vmul.f32 %v1562_v28, %v2444_v1  ;;  %v1395_v54 = vadd.f32 %v1394_v11, %v1393_v16  ;;  %v1583_v59 = vadd.f32 %v1582_v14, %v1581_v25 }
 0x429   : > { %v1608_v42 = vrot.slane %v1607_v58, 4  ;;  %v1387_v50 = vrot.slane %v1386_v46, 2  ;;  %v1596_v21 = vrot.slane %v1595_v55, 2  ;;  %v1591_v2 = vrot.slane %v1590_v51, 1 }
 0x42a   : > { %v1816_v57 = vsel %vm1815_vm8, %v1807_v37, 0.0  ;;  %v1603_v43 = vrot.slane %v1602_v19, 2  ;;  %v1621_v61 = vsel %vm1578_vm15, %v1576_v44, 0.0  ;;  %v1584_v8 = vrot.slane %v1583_v59, 1 }
 0x42b   : > { %v1771_v7 = vpop.permute.xlu0 %1770  ;;  %v1764_v63 = vpop.permute.xlu1 %1763  ;;  %v1609_v29 = vadd.f32 %v1608_v42, %v1607_v58  ;;  %v1616_v17 = vadd.f32 %v1615_v35, %v1614_v56  ;;  %v1817_v26 = vrot.slane %v1816_v57, 4  ;;  %v1396_v60 = vrot.slane %v1395_v54, 1 }
 0x42c   : > { %v1809_v52 = vmul.f32 %v1771_v7, %v2444_v1  ;;  %v1597_v36 = vadd.f32 %v1596_v21, %v1595_v55  ;;  %v1376_v31 = vadd.f32 %v1375_v23, %v1374_v12  ;;  %v1622_v62 = vrot.slane %v1621_v61, 4 }
 0x42d   : > { %v1610_v16 = vrot.slane %v1609_v29, 2  ;;  %v3254_v4 = vadd.f32 %v1382_v3, %v1381_v41  ;;  %v2191_v22 = vsel %vm297_vm3, %v1369_v0, %v2190_v13  ;;  %v3257_v38 = vadd.f32 %v1387_v50, %v1386_v46 }
 0x42e   : > { %v1830_v27 = vsel %vm1815_vm8, %v1809_v52, 0.0  ;;  %v1604_v39 = vadd.f32 %v1603_v43, %v1602_v19  ;;  %v1592_v9 = vadd.f32 %v1591_v2, %v1590_v51  ;;  %v1585_v40 = vadd.f32 %v1584_v8, %v1583_v59 }
 0x42f   : > { %v2001_v53 = vpop.permute.xlu0 %2000  ;;  %v1831_v33 = vrot.slane %v1830_v27, 4  ;;  %v1994_v20 = vpop.permute.xlu1 %1993  ;;  %v1617_v30 = vrot.slane %v1616_v17, 2  ;;  %v1818_v10 = vadd.f32 %v1817_v26, %v1816_v57  ;;  %v3259_v5 = vadd.f32 %v1396_v60, %v1395_v54 }
 0x430   : > { %v1598_v11 = vrot.slane %v1597_v36, 1  ;;  %v1808_v6 = vmul.f32 %v1764_v63, %v2444_v1  ;;  %v2045_v45 = vmul.f32 %v2001_v53, %v2444_v1  ;;  %v3264_v41 = vsel %vm299_vm4, %v1376_v31, %v2191_v22 }
 0x431   : > { %v1611_v12 = vadd.f32 %v1610_v16, %v1609_v29  ;;  %v1623_v0 = vadd.f32 %v1622_v62, %v1621_v61  ;;  %v1832_v46 = vadd.f32 %v1831_v33, %v1830_v27  ;;  %v1389_v34 = vrot.slane %v3257_v38, 1 }
 0x432   : > { %v1605_v13 = vrot.slane %v1604_v39, 1  ;;  %v1823_v25 = vsel %vm1815_vm8, %v1808_v6, 0.0  ;;  %v2060_v32 = vsel %vm2052_vm10, %v2045_v45, 0.0  ;;  %v2207_v49 = vsel %vm293_vm1, %v1592_v9, %v1585_v40 }
 0x433   : > { %v2008_v18 = vpop.permute.xlu0 %2007  ;;  %v1778_v47 = vpop.permute.xlu1 %1777  ;;  %v1618_v24 = vadd.f32 %v1617_v30, %v1616_v17  ;;  %v1819_v3 = vrot.slane %v1818_v10, 2  ;;  %v1824_v48 = vrot.slane %v1823_v25, 4  ;;  %v1599_v56 = vadd.f32 %v1598_v11, %v1597_v36 }
 0x434   : > { %v2061_v15 = vrot.slane %v2060_v32, 4  ;;  %v2044_v28 = vmul.f32 %v1994_v20, %v2444_v1  ;;  %v2046_v51 = vmul.f32 %v2008_v18, %v2444_v1  ;;  %v1612_v19 = vrot.slane %v1611_v12, 1 }
 0x435   : > { %v1624_v35 = vrot.slane %v1623_v0, 2  ;;  %v1833_v55 = vrot.slane %v1832_v46, 2  ;;  %v1825_v58 = vadd.f32 %v1824_v48, %v1823_v25  ;;  %v1810_v59 = vmul.f32 %v1778_v47, %v2444_v1 }
 0x436   : > { %v2062_v44 = vadd.f32 %v2061_v15, %v2060_v32  ;;  %v2053_v23 = vsel %vm2052_vm10, %v2044_v28, 0.0  ;;  %v2067_v54 = vsel %vm2052_vm10, %v2046_v51, 0.0  ;;  %v1820_v42 = vadd.f32 %v1819_v3, %v1818_v10 }
 0x437   : > { %v2015_v14 = vpop.permute.xlu0 %2014  ;;  %v1785_v37 = vpop.permute.xlu1 %1784  ;;  %v1826_v7 = vrot.slane %v1825_v58, 2  ;;  %v2054_v50 = vrot.slane %v2053_v23, 4  ;;  %v2068_v21 = vrot.slane %v2067_v54, 4  ;;  %v1837_v52 = vsel %vm1815_vm8, %v1810_v59, 0.0 }
 0x438   : > { %v2063_v57 = vrot.slane %v2062_v44, 2  ;;  %v2047_v63 = vmul.f32 %v2015_v14, %v2444_v1  ;;  %v1811_v2 = vmul.f32 %v1785_v37, %v2444_v1  ;;  %v1838_v17 = vrot.slane %v1837_v52, 4 }
 0x439   : > { %v1827_v29 = vadd.f32 %v1826_v7, %v1825_v58  ;;  %v2055_v61 = vadd.f32 %v2054_v50, %v2053_v23  ;;  %v2069_v8 = vadd.f32 %v2068_v21, %v2067_v54  ;;  %v1606_v27 = vadd.f32 %v1605_v13, %v1604_v39 }
 0x43a   : > { %v1619_v60 = vrot.slane %v1618_v24, 1  ;;  %v1834_v36 = vadd.f32 %v1833_v55, %v1832_v46  ;;  %v1625_v31 = vadd.f32 %v1624_v35, %v1623_v0  ;;  %v2074_v62 = vsel %vm2052_vm10, %v2047_v63, 0.0 }
 0x43b   : > { %v2022_v43 = vpop.permute.xlu0 %2021  ;;  %v1792_v26 = vpop.permute.xlu1 %1791  ;;  %v1828_v16 = vrot.slane %v1827_v29, 1  ;;  %v1844_v33 = vsel %vm1815_vm8, %v1811_v2, 0.0  ;;  %v2208_v20 = vsel %vm295_vm2, %v1599_v56, %v2207_v49  ;;  %v2064_v22 = vadd.f32 %v2063_v57, %v2062_v44 }
 0x43c   : > { %v2048_v53 = vmul.f32 %v2022_v43, %v2444_v1  ;;  %v2056_v9 = vrot.slane %v2055_v61, 2  ;;  %v2070_v40 = vrot.slane %v2069_v8, 2  ;;  %v1613_v10 = vadd.f32 %v1612_v19, %v1611_v12 }
 0x43d   : > { %v1821_v11 = vrot.slane %v1820_v42, 1  ;;  %v1839_v6 = vadd.f32 %v1838_v17, %v1837_v52  ;;  %v3284_v18 = vadd.f32 %v1389_v34, %v3257_v38  ;;  %v1835_v0 = vrot.slane %v1834_v36, 1 }
 0x43e   : > { %v2081_v39 = vsel %vm2052_vm10, %v2048_v53, 0.0  ;;  %v2075_v46 = vrot.slane %v2074_v62, 4  ;;  %v1845_v47 = vrot.slane %v1844_v33, 4  ;;  %v3286_v13 = vadd.f32 %v1619_v60, %v1618_v24 }
 0x43f   : > { %v1799_v30 = vpop.permute.xlu0 %1798  ;;  %v1569_v45 = vpop.permute.xlu1 %1568  ;;  %v2209_v25 = vsel %vm297_vm3, %v1606_v27, %v2208_v20  ;;  %v1626_v32 = vrot.slane %v1625_v31, 1  ;;  %v1829_v49 = vadd.f32 %v1828_v16, %v1827_v29  ;;  %v2065_v3 = vrot.slane %v2064_v22, 1 }
 0x440   : > { %v2057_v48 = vadd.f32 %v2056_v9, %v2055_v61  ;;  %v2071_v12 = vadd.f32 %v2070_v40, %v2069_v8  ;;  %v2082_v56 = vrot.slane %v2081_v39, 4  ;;  %v3290_v15 = vsel %vm299_vm4, %v1613_v10, %v2209_v25 }
 0x441   : > { %v1822_v28 = vadd.f32 %v1821_v11, %v1820_v42  ;;  %v1840_v51 = vrot.slane %v1839_v6, 2  ;;  %v1812_v38 = vmul.f32 %v1792_v26, %v2444_v1  ;;  %v1836_v34 = vadd.f32 %v1835_v0, %v1834_v36 }
 0x442   : > { %v2076_v14 = vadd.f32 %v2075_v46, %v2074_v62  ;;  %v1846_v19 = vadd.f32 %v1845_v47, %v1844_v33  ;;  %v1813_v24 = vmul.f32 %v1799_v30, %v2444_v1  ;;  %v3294_v58 = vadd.f32 %v1626_v32, %v1625_v31 }
 0x443   : > { %v1806_v35 = vpop.permute.xlu0 %1805  ;;  %v2029_v55 = vpop.permute.xlu1 %2028  ;;  %v2225_v37 = vsel %vm293_vm1, %v1829_v49, %v1822_v28  ;;  %v1851_v44 = vsel %vm1815_vm8, %v1812_v38, 0.0  ;;  %v1577_v23 = vmul.f32 %v1569_v45, %v2444_v1  ;;  %v2066_v54 = vadd.f32 %v2065_v3, %v2064_v22 }
 0x444   : > { %v2058_v59 = vrot.slane %v2057_v48, 1  ;;  %v2072_v42 = vrot.slane %v2071_v12, 1  ;;  %v2083_v7 = vadd.f32 %v2082_v56, %v2081_v39  ;;  %v1841_v50 = vadd.f32 %v1840_v51, %v1839_v6 }
 0x445   : > { %v1852_v21 = vrot.slane %v1851_v44, 4  ;;  %v1858_v57 = vsel %vm1815_vm8, %v1813_v24, 0.0  ;;  %v1628_v52 = vsel %vm1578_vm15, %v1577_v23, 0.0  ;;  %v3302_v63 = vsel %vm295_vm2, %v1836_v34, %v2225_v37 }
 0x446   : > { %v2077_v2 = vrot.slane %v2076_v14, 2  ;;  %v1847_v43 = vrot.slane %v1846_v19, 2  ;;  %v1859_v29 = vrot.slane %v1858_v57, 4  ;;  %v1629_v8 = vrot.slane %v1628_v52, 4 }
 0x447   : > { %v1853_v61 = vadd.f32 %v1852_v21, %v1851_v44  ;;  %v1814_v17 = vmul.f32 %v1806_v35, %v2444_v1  ;;  %v2049_v26 = vmul.f32 %v2029_v55, %v2444_v1  ;;  %v2059_v27 = vadd.f32 %v2058_v59, %v2057_v48  ;;  %v2043_v31 = vpop.permute.xlu0 %2042  ;;  %v2036_v16 = vpop.permute.xlu1 %2035 }
 0x448   : > { %v2073_v60 = vadd.f32 %v2072_v42, %v2071_v12  ;;  %v2084_v36 = vrot.slane %v2083_v7, 2  ;;  %v1860_v53 = vadd.f32 %v1859_v29, %v1858_v57  ;;  %v1630_v33 = vadd.f32 %v1629_v8, %v1628_v52 }
 0x449   : > { %v1854_v62 = vrot.slane %v1853_v61, 2  ;;  %v1865_v20 = vsel %vm1815_vm8, %v1814_v17, 0.0  ;;  %v2088_v22 = vsel %vm2052_vm10, %v2049_v26, 0.0  ;;  %v1842_v9 = vrot.slane %v1841_v50, 1 }
 0x44a   : > { %v2078_v40 = vadd.f32 %v2077_v2, %v2076_v14  ;;  %v1866_v30 = vrot.slane %v1865_v20, 4  ;;  %v2089_v10 = vrot.slane %v2088_v22, 4  ;;  %v1861_v11 = vrot.slane %v1860_v53, 2 }
 0x44b   : > { %v1631_v6 = vrot.slane %v1630_v33, 2  ;;  %v2051_v39 = vmul.f32 %v2043_v31, %v2444_v1  ;;  %v2050_v45 = vmul.f32 %v2036_v16, %v2444_v1  ;;  %v1848_v0 = vadd.f32 %v1847_v43, %v1846_v19 }
 0x44c   : > { %v2085_v46 = vadd.f32 %v2084_v36, %v2083_v7  ;;  %v1867_v47 = vadd.f32 %v1866_v30, %v1865_v20  ;;  %v2090_v25 = vadd.f32 %v2089_v10, %v2088_v22  ;;  %v1855_v32 = vadd.f32 %v1854_v62, %v1853_v61 }
 0x44d   : > { %v1632_v49 = vadd.f32 %v1631_v6, %v1630_v33  ;;  %v2102_v3 = vsel %vm2052_vm10, %v2051_v39, 0.0  ;;  %v2095_v48 = vsel %vm2052_vm10, %v2050_v45, 0.0  ;;  %v2243_v12 = vsel %vm293_vm1, %v2066_v54, %v2059_v27  ;;  %v2350_v39 = vpop.permute.xlu1 %2349 }
 0x44e   : > { %v1868_v56 = vrot.slane %v1867_v47, 2  ;;  %v2091_v28 = vrot.slane %v2090_v25, 2  ;;  %v2103_v51 = vrot.slane %v2102_v3, 4  ;;  %v2079_v38 = vrot.slane %v2078_v40, 1 }
 0x44f   : > { %v1862_v34 = vadd.f32 %v1861_v11, %v1860_v53  ;;  %v1633_v14 = vrot.slane %v1632_v49, 1  ;;  %v2096_v24 = vrot.slane %v2095_v48, 4  ;;  %v1849_v1 = vrot.slane %v1848_v0, 1 }
 0x450   : > { %v1869_v19 = vadd.f32 %v1868_v56, %v1867_v47  ;;  %v2092_v35 = vadd.f32 %v2091_v28, %v2090_v25  ;;  %v2104_v55 = vadd.f32 %v2103_v51, %v2102_v3  ;;  %v1843_v37 = vadd.f32 %v1842_v9, %v1841_v50 }
 0x451   : > { %v2086_v44 = vrot.slane %v2085_v46, 1  ;;  %v1856_v23 = vrot.slane %v1855_v32, 1  ;;  %v2097_v59 = vadd.f32 %v2096_v24, %v2095_v48  ;;  %v1634_v42 = vadd.f32 %v1633_v14, %v1632_v49 }
 0x452   : > { %v2093_v7 = vrot.slane %v2092_v35, 1  ;;  %v2105_v21 = vrot.slane %v2104_v55, 2  ;;  %v2193_v54 = vsel %vm301_vm5, %v3254_v4, %v3264_v41  ;;  %v2080_v57 = vadd.f32 %v2079_v38, %v2078_v40 }
 0x453   : > { %v1863_v52 = vrot.slane %v1862_v34, 1  ;;  %v2098_v2 = vrot.slane %v2097_v59, 2  ;;  %v2194_v43 = vsel %vm303_vm6, %v3284_v18, %v2193_v54  ;;  %v1850_v29 = vadd.f32 %v1849_v1, %v1848_v0 }
 0x454   : > { %v1870_v61 = vrot.slane %v1869_v19, 1  ;;  %v2106_v8 = vadd.f32 %v2105_v21, %v2104_v55  ;;  %v2211_v50 = vsel %vm301_vm5, %v3286_v13, %v3290_v15  ;;  %v2087_v17 = vadd.f32 %v2086_v44, %v2085_v46 }
 0x455   : > { %v1857_v26 = vadd.f32 %v1856_v23, %v1855_v32  ;;  %v2099_v27 = vadd.f32 %v2098_v2, %v2097_v59  ;;  %v2212_v36 = vsel %vm303_vm6, %v3294_v58, %v2211_v50  ;;  %v2094_v4 = vadd.f32 %v2093_v7, %v2092_v35 }
 0x456   : > { %v2107_v41 = vrot.slane %v2106_v8, 1  ;;  %v2195_v53 = vsel %vm305_vm7, %v3259_v5, %v2194_v43  ;;  %v2213_v18 = vsel %vm305_vm7, %v1634_v42, %v2212_v36  ;;  %v2244_v31 = vsel %vm295_vm2, %v2073_v60, %v2243_v12 }
 0x457   : > { %v1864_v16 = vadd.f32 %v1863_v52, %v1862_v34  ;;  %v2100_v62 = vrot.slane %v2099_v27, 1  ;;  %v2358_v33 = vpack.i.bf16 %v2213_v18, %v2195_v53  ;;  %v2227_v13 = vsel %vm297_vm3, %v1843_v37, %v3302_v63 }
 0x458   : > { %v2245_v15 = vsel %vm297_vm3, %v2080_v57, %v2244_v31  ;;  %v1871_v20 = vadd.f32 %v1870_v61, %v1869_v19  ;;  %v2108_v22 = vadd.f32 %v2107_v41, %v2106_v8  ;;  %v2228_v58 = vsel %vm299_vm4, %v1850_v29, %v2227_v13 }
 0x459   : > { %v2246_v9 = vsel %vm299_vm4, %v2087_v17, %v2245_v15  ;;  %v2101_v40 = vadd.f32 %v2100_v62, %v2099_v27  ;;  %2359 = vrot.lane.b32.xlu1 %v2358_v33, %s2417_s20  ;;  %v2229_v5 = vsel %vm301_vm5, %v1857_v26, %v2228_v58  ;;  %v2352_v0 = vunpack.i.h.bf16 %v2350_v39 }
 0x45a   : > { %v2247_v60 = vsel %vm301_vm5, %v2094_v4, %v2246_v9  ;;  %v2230_v30 = vsel %vm303_vm6, %v1864_v16, %v2229_v5  ;;  %v2351_v46 = vunpack.i.l.bf16 %v2350_v39  ;;  %vm2255_vm1 = vcmask 97280  }
 0x45b   : > { %v2248_v10 = vsel %vm303_vm6, %v2101_v40, %v2247_v60  ;;  %v2231_v63 = vsel %vm305_vm7, %v1871_v20, %v2230_v30  ;;  %vm2257_vm2 = vcmask 130048   ;;  %vm2259_vm3 = vcmask 162816  }
 0x45c   : > { %v2249_v11 = vsel %vm305_vm7, %v2108_v22, %v2248_v10  ;;  %v2253_v25 = vsel %vm220_vm0, %v2351_v46, %v2352_v0  ;;  %vm2261_vm4 = vcmask 195584   ;;  %vm2263_vm5 = vcmask 228352  }
 0x45d   : > { %v2363_v6 = vpack.i.bf16 %v2249_v11, %v2231_v63  ;;  %vm2266_vm0 = vcmask 257024  }
 0x45f   : > { %2364 = vrot.lane.b32.xlu0 %v2363_v6, %s2417_s20 }
 0x495   : > { %v2355_v45 = vpop.permute.xlu0 %2354 }
 0x496   : > { %v2356_v47 = vunpack.i.l.bf16 %v2355_v45  ;;  %v2357_v32 = vunpack.i.h.bf16 %v2355_v45 }
 0x498   : > { %v2254_v3 = vsel %vm309_vm9, %v2253_v25, %v2356_v47 }
 0x499   : > { %v2256_v12 = vsel %vm2255_vm1, %v2254_v3, %v2357_v32 }
 0x4cb   : > { %v2360_v49 = vpop.permute.xlu1 %2359 }
 0x4cc   : > { %v2361_v48 = vunpack.i.l.bf16 %v2360_v49  ;;  %v2362_v56 = vunpack.i.h.bf16 %v2360_v49 }
 0x4ce   : > { %v2258_v28 = vsel %vm2257_vm2, %v2256_v12, %v2361_v48 }
 0x4cf   : > { %v2260_v14 = vsel %vm2259_vm3, %v2258_v28, %v2362_v56 }
 0x4d1   : > { %v2365_v51 = vpop.permute.xlu0 %2364 }
 0x4d2   : > { %v2367_v38 = vunpack.i.h.bf16 %v2365_v51  ;;  %v2366_v34 = vunpack.i.l.bf16 %v2365_v51 }
 0x4d4   : > { %v2262_v24 = vsel %vm2261_vm4, %v2260_v14, %v2366_v34 }
 0x4d5   : > { %v2264_v1 = vsel %vm2263_vm5, %v2262_v24, %v2367_v38 }
 0x4d6   : > { %v2265_v19 = vpack.c.bf16 %v2264_v1, %v2264_v1 }
 0x4d8   : > { %2267 = vst.msk [vmem:[%s111_s23] sm:$0xf] %vm2266_vm0, %v2265_v19 }
 0x4d9 PF: > { %s11_s6 = sadd.s32 1, %s2406_s6  }
 0x4da   : > { %p8_p4 = scmp.ge.s32.totalorder %s11_s6, 4  }
 0x4dc   :  { %10 = sbr.rel (!%p8_p4) target bundleno = 1 (0x1), region = 54 }

// kernel: crossformers_forward.44
= control target key start
LH: loop header
LB: loop body
LE: loop exit
PB: predicated region body
PF: predicated region fallthrough
CT: control target
= control target key end

     0   :  { %s3920_s9 = smov 0   ;;  %s5569_s0 = inlined_call_operand.vmem [shape: bf16[2,8,128], index: 0, kind: input, shape index: {}]   ;;  %s5570_s1 = inlined_call_operand.vmem [shape: bf16[2,8,128], index: 1, kind: input, shape index: {}]   ;;  %s5571_s2 = inlined_call_operand.vmem [shape: bf16[2,8,32], index: 2, kind: output, shape index: {}]  }
   0x1 LB: > { %s3693_s10 = sadd.s32 4294967295, %s3893_s9   ;;  %p3697_p0 = scmp.ge.s32.totalorder %s3893_s9, 1  ;;  %s3893_s9 = sphi %s3920_s9, %s12_s9  }
   0x2   : > { %p120_p1 = scmp.lt.s32.totalorder %s3893_s9, 3 }
   0x4   : > { %p121_p2 = pnand %p3697_p0, %p120_p1 }
   0x6   : > { %124 = sbr.rel (%p121_p2) target bundleno = 2362 (0x93a), region = 28 }
   0xb   : > { %p144_p3 = scmp.lt.s32.totalorder %s3693_s10, 1  ;;  %v165_v0 = vlaneseq  ;;  %v3895_v1 = vmov 1966171168   ;;  %vm258_vm0 = vcmask 31744   ;;  %s3896_s18 = smov 124   ;;  %vm333_vm1 = vcmask 1041409  }
   0xc   : > { %v163_v2 = vunpack.c.l.s4 %v3895_v1  ;;  %s3897_s19 = smov 120   ;;  %s3898_s20 = smov 116   ;;  %vm335_vm2 = vcmask 1042434   ;;  %vm337_vm3 = vcmask 1043459   ;;  %vm339_vm4 = vcmask 1044484  }
   0xd   : > { %s5666_s10 = smov (!%p144_p3, %s3693_s10), 1  ;;  %v3929_v3 = vshrl.u32 %v165_v0, 7  ;;  %vm341_vm5 = vcmask 1045509   ;;  %vm343_vm6 = vcmask 1046534   ;;  %vm345_vm7 = vcmask 1047559   ;;  %s3899_s21 = smov 112  }
   0xe   : > { %v164_v4 = vunpack.c.0.s8 %v163_v2  ;;  %s3931_s11 = sshll.u32 %s5666_s10, 2  ;;  %vm348_vm8 = vcmask 64512   ;;  %s3901_s22 = smov 108   ;;  %vm1402_vm9 = vcmask 359744   ;;  %vm1804_vm10 = vcmask 392544  }
   0xf   : > { %s147_s14 = scalar_lea.vmem %s5569_s0, %s3931_s11  ;;  %s151_s17 = scalar_lea.vmem %s5570_s1, %s3931_s11  ;;  %v3943_v10 = vsub.s32 0, %v3929_v3  ;;  %vm2206_vm11 = vcmask 425344   ;;  %vm590_vm12 = vcmask 294144   ;;  %vm1000_vm13 = vcmask 326944  }
  0x10   : > { %v167_v5 = vsub.s32 %v164_v4, %v3929_v3  ;;  %v156_v6 = vld [vmem:[%s147_s14] sm:$0xf]  ;;  %s3902_s23 = smov 104   ;;  %s3903_s24 = smov 100   ;;  %vm2608_vm14 = vcmask 458144   ;;  %vm3010_vm15 = vcmask 490944  }
  0x11   : > { %v157_v7 = vunpack.c.l.bf16 %v156_v6  ;;  %v158_v8 = vld [vmem:[%s151_s17] sm:$0xf]  ;;  %s3904_s25 = smov 96   ;;  %s155_s28 = scalar_lea.vmem %s5571_s2, %s3931_s11 }
  0x12   : > { %v3945_v12 = vunpack.c.l.bf16 %v158_v8 }
  0x13   : > { %v168_v9 = vrot.slane %v157_v7, %v167_v5  ;;  %v161_v11 = vcombine.high %v157_v7, %v157_v7 }
  0x14   : > { %5596 = vst [vmem:[#allocation2_spill] sm:$0xff] %v3945_v12 }
  0x15   : > { %v184_v13 = vrot.slane %v168_v9, %v167_v5  ;;  %v176_v14 = vcombine.high %v168_v9, %v168_v9  ;;  %v175_v15 = vrot.slane %v161_v11, %v167_v5 }
  0x17   : > { %v213_v16 = vrot.slane %v184_v13, %v3943_v10  ;;  %v206_v17 = vcombine.high %v184_v13, %v184_v13  ;;  %v198_v18 = vrot.slane %v176_v14, %v167_v5  ;;  %v191_v19 = vrot.slane %v175_v15, %v167_v5 }
  0x18   : > { %v177_v20 = vcombine.high %v175_v15, %v175_v15 }
  0x19   : > { %v3949_v21 = vmul.f32 %v213_v16, %v3945_v12  ;;  %v221_v22 = vrot.slane %v206_v17, %v3943_v10  ;;  %v217_v23 = vrot.slane %v198_v18, %v3943_v10  ;;  %v208_v24 = vcombine.high %v198_v18, %v198_v18 }
  0x1a   : > { %v229_v25 = vrot.slane %v191_v19, %v3943_v10  ;;  %v205_v26 = vrot.slane %v177_v20, %v167_v5  ;;  %v207_v27 = vcombine.high %v191_v19, %v191_v19 }
  0x1b   : > { %v259_v28 = vsel %vm258_vm0, %v3949_v21, 0.0  ;;  %v3957_v29 = vmul.f32 %v221_v22, %v3945_v12  ;;  %v3960_v30 = vmul.f32 %v217_v23, %v3945_v12  ;;  %v225_v31 = vrot.slane %v208_v24, %v3943_v10 }
  0x1c   : > { %260 = vadd.xlane.f32.xlu0 %v259_v28  ;;  %v3964_v32 = vmul.f32 %v229_v25, %v3945_v12  ;;  %v233_v33 = vrot.slane %v205_v26, %v3943_v10  ;;  %v209_v34 = vcombine.high %v205_v26, %v205_v26  ;;  %v237_v38 = vrot.slane %v207_v27, %v3943_v10 }
  0x1d   : > { %v265_v35 = vsel %vm258_vm0, %v3957_v29, 0.0  ;;  %v262_v36 = vsel %vm258_vm0, %v3960_v30, 0.0  ;;  %v3972_v37 = vmul.f32 %v225_v31, %v3945_v12  ;;  %v300_v31 = vand.u32 127, %v165_v0 }
  0x1e   : > { %266 = vadd.xlane.f32.xlu1 %v265_v35  ;;  %v3978_v40 = vmul.f32 %v233_v33, %v3945_v12  ;;  %v241_v41 = vrot.slane %v209_v34, %v3943_v10  ;;  %v271_v42 = vsel %vm258_vm0, %v3964_v32, 0.0  ;;  %v3984_v43 = vmul.f32 %v237_v38, %v3945_v12 }
  0x1f   : > { %v268_v39 = vsel %vm258_vm0, %v3972_v37, 0.0  ;;  %v4049_v34 = vsub.s32 %v300_v31, %v3929_v3 }
  0x20   : > { %263 = vadd.xlane.f32.xlu0 %v262_v36  ;;  %v274_v44 = vsel %vm258_vm0, %v3978_v40, 0.0  ;;  %v3989_v45 = vmul.f32 %v241_v41, %v3945_v12  ;;  %v277_v46 = vsel %vm258_vm0, %v3984_v43, 0.0 }
  0x22   : > { %269 = vadd.xlane.f32.xlu1 %v268_v39  ;;  %v280_v47 = vsel %vm258_vm0, %v3989_v45, 0.0 }
  0x24   : > { %272 = vadd.xlane.f32.xlu0 %v271_v42 }
  0x26   : > { %275 = vadd.xlane.f32.xlu1 %v274_v44 }
  0x28   : > { %278 = vadd.xlane.f32.xlu0 %v277_v46 }
  0x2a   : > { %281 = vadd.xlane.f32.xlu1 %v280_v47 }
  0x3b   : > { %655 = vrot.lane.b32.xlu1 %v3949_v21, %s3896_s18 }
  0x3e   : > { %657 = vrot.lane.b32.xlu0 %v3960_v30, %s3896_s18 }
  0x3f   : > { %665 = vrot.lane.b32.xlu1 %v3978_v40, %s3896_s18 }
  0x42   : > { %659 = vrot.lane.b32.xlu0 %v3957_v29, %s3896_s18 }
  0x43   : > { %669 = vrot.lane.b32.xlu1 %v3989_v45, %s3896_s18 }
  0x46   : > { %661 = vrot.lane.b32.xlu0 %v3972_v37, %s3896_s18 }
  0x47   : > { %1059 = vrot.lane.b32.xlu1 %v3960_v30, %s3897_s19 }
  0x4a   : > { %663 = vrot.lane.b32.xlu0 %v3964_v32, %s3896_s18 }
  0x4b   : > { %1069 = vrot.lane.b32.xlu1 %v3984_v43, %s3897_s19 }
  0x4e   : > { %667 = vrot.lane.b32.xlu0 %v3984_v43, %s3896_s18 }
  0x52   : > { %1057 = vrot.lane.b32.xlu0 %v3949_v21, %s3897_s19 }
  0x56   : > { %1061 = vrot.lane.b32.xlu0 %v3957_v29, %s3897_s19 }
  0x5a   : > { %1063 = vrot.lane.b32.xlu0 %v3972_v37, %s3897_s19 }
  0x5e   : > { %1065 = vrot.lane.b32.xlu0 %v3964_v32, %s3897_s19 }
  0x62   : > { %1067 = vrot.lane.b32.xlu0 %v3978_v40, %s3897_s19 }
  0x66   : > { %1071 = vrot.lane.b32.xlu0 %v3989_v45, %s3897_s19 }
  0xa5   : > { %v4011_v48 = vpop.xlane.xlu0 %260 }
  0xa6   : > { %v4052_v35 = vmul.f32 0.5, %v4011_v48 }
  0xa7   : > { %v4013_v49 = vpop.xlane.xlu1 %266 }
  0xa8   : > { %v4056_v36 = vmul.f32 0.5, %v4013_v49  ;;  %v304_v38 = vrot.slane %v4052_v35, %v4049_v34 }
  0xa9   : > { %v264_v50 = vpop.xlane.xlu0 %263 }
  0xaa   : > { %v4046_v33 = vmul.f32 0.5, %v264_v50  ;;  %v312_v41 = vrot.slane %v4056_v36, %v4049_v34 }
  0xab   : > { %v4015_v51 = vpop.xlane.xlu1 %269 }
  0xac   : > { %v308_v0 = vrot.slane %v4046_v33, %v4049_v34  ;;  %v4063_v39 = vmul.f32 0.5, %v4015_v51 }
  0xad   : > { %v4017_v52 = vpop.xlane.xlu0 %272 }
  0xae   : > { %v334_v42 = vsel %vm333_vm1, %v308_v0, %v304_v38  ;;  %v4070_v44 = vmul.f32 0.5, %v4017_v52  ;;  %v316_v46 = vrot.slane %v4063_v39, %v4049_v34 }
  0xaf   : > { %v4019_v53 = vpop.xlane.xlu1 %275  ;;  %v336_v47 = vsel %vm335_vm2, %v312_v41, %v334_v42 }
  0xb0   : > { %v4077_v48 = vmul.f32 0.5, %v4019_v53  ;;  %v320_v49 = vrot.slane %v4070_v44, %v4049_v34  ;;  %v338_v50 = vsel %vm337_vm3, %v316_v46, %v336_v47 }
  0xb1   : > { %v4021_v54 = vpop.xlane.xlu0 %278 }
  0xb2   : > { %v4084_v51 = vmul.f32 0.5, %v4021_v54  ;;  %v324_v52 = vrot.slane %v4077_v48, %v4049_v34 }
  0xb3   : > { %v4023_v55 = vpop.xlane.xlu1 %281 }
  0xb4   : > { %v4090_v53 = vmul.f32 0.5, %v4023_v55 }
  0xb5   : > { %v658_v56 = vpop.permute.xlu0 %657 }
  0xb6   : > { %v682_v57 = vsel %vm258_vm0, %v658_v56, 0.0  ;;  %v340_v56 = vsel %vm339_vm4, %v320_v49, %v338_v50 }
  0xb7   : > { %683 = vadd.xlane.f32.xlu1 %v682_v57  ;;  %v656_v58 = vpop.permute.xlu1 %655  ;;  %v328_v57 = vrot.slane %v4084_v51, %v4049_v34 }
  0xb8   : > { %v679_v59 = vsel %vm258_vm0, %v656_v58, 0.0  ;;  %v342_v58 = vsel %vm341_vm5, %v324_v52, %v340_v56 }
  0xb9   : > { %v660_v60 = vpop.permute.xlu0 %659  ;;  %680 = vadd.xlane.f32.xlu0 %v679_v59  ;;  %v332_v59 = vrot.slane %v4090_v53, %v4049_v34  ;;  %v344_v54 = vsel %vm343_vm6, %v328_v57, %v342_v58 }
  0xba   : > { %v685_v62 = vsel %vm258_vm0, %v660_v60, 0.0 }
  0xbb   : > { %v666_v61 = vpop.permute.xlu1 %665  ;;  %v346_v60 = vsel %vm345_vm7, %v332_v59, %v344_v54 }
  0xbc   : > { %v694_v6 = vsel %vm258_vm0, %v666_v61, 0.0  ;;  %v349_v61 = vsel %vm348_vm8, %v346_v60, -inf }
  0xbd   : > { %v662_v63 = vpop.permute.xlu0 %661  ;;  %686 = vadd.xlane.f32.xlu0 %v685_v62 }
  0xbe   : > { %v688_v2 = vsel %vm258_vm0, %v662_v63, 0.0 }
  0xbf   : > { %v670_v1 = vpop.permute.xlu1 %669 }
  0xc0   : > { %v700_v17 = vsel %vm258_vm0, %v670_v1, 0.0 }
  0xc1   : > { %v664_v4 = vpop.permute.xlu0 %663  ;;  %689 = vadd.xlane.f32.xlu0 %v688_v2 }
  0xc2   : > { %v691_v5 = vsel %vm258_vm0, %v664_v4, 0.0 }
  0xc3   : > { %692 = vadd.xlane.f32.xlu1 %v691_v5  ;;  %v1060_v7 = vpop.permute.xlu1 %1059 }
  0xc4   : > { %v1084_v11 = vsel %vm258_vm0, %v1060_v7, 0.0 }
  0xc5   : > { %v668_v8 = vpop.permute.xlu0 %667  ;;  %695 = vadd.xlane.f32.xlu0 %v694_v6 }
  0xc6   : > { %v697_v9 = vsel %vm258_vm0, %v668_v8, 0.0 }
  0xc7   : > { %698 = vadd.xlane.f32.xlu1 %v697_v9  ;;  %v1070_v20 = vpop.permute.xlu1 %1069 }
  0xc8   : > { %v1099_v24 = vsel %vm258_vm0, %v1070_v20, 0.0 }
  0xc9   : > { %v1058_v13 = vpop.permute.xlu0 %1057  ;;  %1085 = vadd.xlane.f32.xlu0 %v1084_v11 }
  0xca   : > { %v1081_v14 = vsel %vm258_vm0, %v1058_v13, 0.0 }
  0xcb   : > { %1082 = vadd.xlane.f32.xlu1 %v1081_v14 }
  0xcd   : > { %v1062_v15 = vpop.permute.xlu0 %1061 }
  0xce   : > { %v1087_v16 = vsel %vm258_vm0, %v1062_v15, 0.0 }
  0xcf   : > { %1088 = vadd.xlane.f32.xlu0 %v1087_v16 }
  0xd1   : > { %v1064_v18 = vpop.permute.xlu0 %1063 }
  0xd2   : > { %v1090_v23 = vsel %vm258_vm0, %v1064_v18, 0.0 }
  0xd3   : > { %701 = vadd.xlane.f32.xlu0 %v700_v17 }
  0xd5   : > { %v1066_v19 = vpop.permute.xlu0 %1065 }
  0xd6   : > { %v1093_v22 = vsel %vm258_vm0, %v1066_v19, 0.0 }
  0xd7   : > { %1094 = vadd.xlane.f32.xlu1 %v1093_v22  ;;  %1091 = vadd.xlane.f32.xlu0 %v1090_v23 }
  0xd9   : > { %v1068_v25 = vpop.permute.xlu0 %1067 }
  0xda   : > { %v1096_v26 = vsel %vm258_vm0, %v1068_v25, 0.0 }
  0xdb   : > { %1097 = vadd.xlane.f32.xlu0 %v1096_v26  ;;  %1100 = vadd.xlane.f32.xlu1 %v1099_v24 }
  0xdd   : > { %v1072_v27 = vpop.permute.xlu0 %1071 }
  0xde   : > { %v1102_v28 = vsel %vm258_vm0, %v1072_v27, 0.0 }
  0xdf   : > { %1103 = vadd.xlane.f32.xlu0 %v1102_v28 }
  0xec   : > { %1459 = vrot.lane.b32.xlu1 %v3949_v21, %s3898_s20 }
  0xf0   : > { %1461 = vrot.lane.b32.xlu1 %v3960_v30, %s3898_s20 }
  0xf4   : > { %1463 = vrot.lane.b32.xlu1 %v3957_v29, %s3898_s20 }
  0xf5   : > { %1471 = vrot.lane.b32.xlu0 %v3984_v43, %s3898_s20 }
  0xf8   : > { %1465 = vrot.lane.b32.xlu1 %v3972_v37, %s3898_s20 }
  0xfc   : > { %1467 = vrot.lane.b32.xlu1 %v3964_v32, %s3898_s20 }
 0x100   : > { %1469 = vrot.lane.b32.xlu1 %v3978_v40, %s3898_s20 }
 0x104   : > { %1473 = vrot.lane.b32.xlu1 %v3989_v45, %s3898_s20 }
 0x114   : > { %350 = vmax.xlane.f32.xlu0 %v349_v61 }
 0x140   : > { %v684_v63 = vpop.xlane.xlu1 %683 }
 0x141   : > { %v4130_v49 = vmul.f32 0.5, %v684_v63  ;;  %v3900_v63 = vmov 0  }
 0x142   : > { %v681_v55 = vpop.xlane.xlu0 %680  ;;  %3722 = vset.pattern.permute.xlu0 %v3900_v63  ;;  %3721 = vset.pattern.permute.xlu1 %v3900_v63 }
 0x143   : > { %v4126_v46 = vmul.f32 0.5, %v681_v55  ;;  %v726_v58 = vrot.slane %v4130_v49, %v4049_v34 }
 0x145   : > { %v722_v52 = vrot.slane %v4126_v46, %v4049_v34 }
 0x146   : > { %v687_v62 = vpop.xlane.xlu0 %686 }
 0x147   : > { %v4128_v47 = vmul.f32 0.5, %v687_v62  ;;  %v751_v61 = vsel %vm333_vm1, %v726_v58, %v722_v52 }
 0x149   : > { %v730_v56 = vrot.slane %v4128_v47, %v4049_v34 }
 0x14a   : > { %v690_v1 = vpop.xlane.xlu0 %689 }
 0x14b   : > { %v4132_v50 = vmul.f32 0.5, %v690_v1  ;;  %v752_v1 = vsel %vm335_vm2, %v730_v56, %v751_v61 }
 0x14c   : > { %v693_v2 = vpop.xlane.xlu1 %692 }
 0x14d   : > { %v4140_v57 = vmul.f32 0.5, %v693_v2  ;;  %v734_v59 = vrot.slane %v4132_v50, %v4049_v34 }
 0x14e   : > { %v696_v4 = vpop.xlane.xlu0 %695 }
 0x14f   : > { %v4153_v55 = vmul.f32 0.5, %v696_v4  ;;  %v738_v2 = vrot.slane %v4140_v57, %v4049_v34 }
 0x150   : > { %v4100_v5 = vpop.xlane.xlu1 %698 }
 0x151   : > { %v4166_v4 = vmul.f32 0.5, %v4100_v5 }
 0x152   : > { %v1086_v6 = vpop.xlane.xlu0 %1085 }
 0x153   : > { %v4148_v54 = vmul.f32 0.5, %v1086_v6  ;;  %v753_v6 = vsel %vm337_vm3, %v734_v59, %v752_v1 }
 0x154   : > { %v1083_v7 = vpop.xlane.xlu1 %1082 }
 0x155   : > { %v4150_v60 = vmul.f32 0.5, %v1083_v7  ;;  %v1128_v7 = vrot.slane %v4148_v54, %v4049_v34 }
 0x158   : > { %v1089_v8 = vpop.xlane.xlu0 %1088 }
 0x159   : > { %v4155_v62 = vmul.f32 0.5, %v1089_v8  ;;  %v1124_v8 = vrot.slane %v4150_v60, %v4049_v34 }
 0x15c   : > { %v4104_v11 = vpop.xlane.xlu0 %701 }
 0x160   : > { %v4102_v9 = vpop.xlane.xlu1 %1094  ;;  %v1092_v14 = vpop.xlane.xlu0 %1091 }
 0x164   : > { %v4106_v13 = vpop.xlane.xlu1 %1100  ;;  %v1098_v19 = vpop.xlane.xlu0 %1097 }
 0x168   : > { %v1460_v15 = vpop.permute.xlu1 %1459  ;;  %v4111_v23 = vpop.xlane.xlu0 %1103 }
 0x169   : > { %v1483_v16 = vsel %vm258_vm0, %v1460_v15, 0.0  ;;  %v4160_v15 = vmul.f32 0.5, %v1092_v14  ;;  %v1132_v14 = vrot.slane %v4155_v62, %v4049_v34 }
 0x16a   : > { %1484 = vadd.xlane.f32.xlu0 %v1483_v16  ;;  %v742_v16 = vrot.slane %v4153_v55, %v4049_v34 }
 0x16b   : > { %v1136_v5 = vrot.slane %v4160_v15, %v4049_v34 }
 0x16c   : > { %v1462_v17 = vpop.permute.xlu1 %1461  ;;  %v1472_v27 = vpop.permute.xlu0 %1471 }
 0x16d   : > { %v1486_v18 = vsel %vm258_vm0, %v1462_v17, 0.0  ;;  %v1501_v31 = vsel %vm258_vm0, %v1472_v27, 0.0  ;;  %v4177_v17 = vmul.f32 0.5, %v4102_v9 }
 0x16e   : > { %1487 = vadd.xlane.f32.xlu1 %v1486_v18  ;;  %v4180_v18 = vmul.f32 0.5, %v4104_v11 }
 0x16f   : > { %v1140_v11 = vrot.slane %v4177_v17, %v4049_v34 }
 0x170   : > { %v1464_v20 = vpop.permute.xlu1 %1463  ;;  %v750_v27 = vrot.slane %v4180_v18, %v4049_v34 }
 0x171   : > { %v1489_v22 = vsel %vm258_vm0, %v1464_v20, 0.0  ;;  %v4184_v20 = vmul.f32 0.5, %v1098_v19 }
 0x172   : > { %1490 = vadd.xlane.f32.xlu0 %v1489_v22  ;;  %v754_v22 = vsel %vm339_vm4, %v738_v2, %v753_v6 }
 0x173   : > { %v755_v19 = vsel %vm341_vm5, %v742_v16, %v754_v22 }
 0x174   : > { %v1466_v24 = vpop.permute.xlu1 %1465 }
 0x175   : > { %v1492_v25 = vsel %vm258_vm0, %v1466_v24, 0.0  ;;  %v746_v24 = vrot.slane %v4166_v4, %v4049_v34 }
 0x176   : > { %1493 = vadd.xlane.f32.xlu0 %v1492_v25  ;;  %v1153_v25 = vsel %vm333_vm1, %v1128_v7, %v1124_v8 }
 0x177   : > { %v1154_v9 = vsel %vm335_vm2, %v1132_v14, %v1153_v25 }
 0x178   : > { %v1468_v26 = vpop.permute.xlu1 %1467 }
 0x179   : > { %v1495_v28 = vsel %vm258_vm0, %v1468_v26, 0.0  ;;  %v4196_v26 = vmul.f32 0.5, %v4106_v13 }
 0x17a   : > { %1496 = vadd.xlane.f32.xlu1 %v1495_v28  ;;  %v1155_v28 = vsel %vm337_vm3, %v1136_v5, %v1154_v9 }
 0x17b   : > { %v1156_v13 = vsel %vm339_vm4, %v1140_v11, %v1155_v28 }
 0x17c   : > { %v1470_v0 = vpop.permute.xlu1 %1469 }
 0x17d   : > { %v1498_v38 = vsel %vm258_vm0, %v1470_v0, 0.0  ;;  %v4205_v0 = vmul.f32 0.5, %v4111_v23 }
 0x17e   : > { %1502 = vadd.xlane.f32.xlu1 %v1501_v31  ;;  %1499 = vadd.xlane.f32.xlu0 %v1498_v38  ;;  %v1144_v31 = vrot.slane %v4184_v20, %v4049_v34  ;;  %v1148_v38 = vrot.slane %v4196_v26, %v4049_v34 }
 0x180   : > { %v1474_v41 = vpop.permute.xlu1 %1473  ;;  %v1157_v56 = vsel %vm341_vm5, %v1144_v31, %v1156_v13 }
 0x181   : > { %v1504_v42 = vsel %vm258_vm0, %v1474_v41, 0.0  ;;  %v756_v41 = vsel %vm343_vm6, %v746_v24, %v755_v19  ;;  %v1158_v59 = vsel %vm343_vm6, %v1148_v38, %v1157_v56 }
 0x182   : > { %1505 = vadd.xlane.f32.xlu0 %v1504_v42  ;;  %v1152_v42 = vrot.slane %v4205_v0, %v4049_v34  ;;  %v757_v52 = vsel %vm345_vm7, %v750_v27, %v756_v41 }
 0x183   : > { %v759_v58 = vsel %vm348_vm8, %v757_v52, -inf }
 0x184   : > { %v1159_v23 = vsel %vm345_vm7, %v1152_v42, %v1158_v59 }
 0x185   : > { %v1161_v61 = vsel %vm348_vm8, %v1159_v23, -inf }
 0x18f   : > { %1863 = vrot.lane.b32.xlu1 %v3960_v30, %s3899_s21 }
 0x193   : > { %1873 = vrot.lane.b32.xlu1 %v3984_v43, %s3899_s21 }
 0x198   : > { %1861 = vrot.lane.b32.xlu0 %v3949_v21, %s3899_s21 }
 0x19c   : > { %1865 = vrot.lane.b32.xlu0 %v3957_v29, %s3899_s21 }
 0x19d   : > { %v4219_v63 = vpop.xlane.xlu0 %350 }
 0x1a0   : > { %1867 = vrot.lane.b32.xlu0 %v3972_v37, %s3899_s21 }
 0x1a4   : > { %1869 = vrot.lane.b32.xlu0 %v3964_v32, %s3899_s21 }
 0x1a8   : > { %1871 = vrot.lane.b32.xlu0 %v3978_v40, %s3899_s21 }
 0x1ac   : > { %1875 = vrot.lane.b32.xlu0 %v3989_v45, %s3899_s21 }
 0x1b7   : > { %760 = vmax.xlane.f32.xlu1 %v759_v58 }
 0x1bb   : > { %1162 = vmax.xlane.f32.xlu1 %v1161_v61 }
 0x1f3   : > { %v1485_v1 = vpop.xlane.xlu0 %1484 }
 0x1f4   : > { %v4225_v14 = vmul.f32 0.5, %v1485_v1 }
 0x1f6   : > { %v1526_v11 = vrot.slane %v4225_v14, %v4049_v34 }
 0x1f7   : > { %v1488_v6 = vpop.xlane.xlu1 %1487 }
 0x1f8   : > { %v4221_v8 = vmul.f32 0.5, %v1488_v6 }
 0x1fa   : > { %v1530_v24 = vrot.slane %v4221_v8, %v4049_v34 }
 0x1fb   : > { %v1491_v2 = vpop.xlane.xlu0 %1490 }
 0x1fc   : > { %v4223_v16 = vmul.f32 0.5, %v1491_v2  ;;  %v1555_v38 = vsel %vm333_vm1, %v1530_v24, %v1526_v11 }
 0x1fe   : > { %v1534_v9 = vrot.slane %v4223_v16, %v4049_v34 }
 0x1ff   : > { %v1494_v7 = vpop.xlane.xlu0 %1493 }
 0x200   : > { %v4227_v5 = vmul.f32 0.5, %v1494_v7  ;;  %v1556_v42 = vsel %vm335_vm2, %v1534_v9, %v1555_v38 }
 0x202   : > { %v1538_v19 = vrot.slane %v4227_v5, %v4049_v34 }
 0x203   : > { %v1497_v22 = vpop.xlane.xlu1 %1496 }
 0x204   : > { %v4231_v25 = vmul.f32 0.5, %v1497_v22  ;;  %v1557_v52 = vsel %vm337_vm3, %v1538_v19, %v1556_v42 }
 0x206   : > { %v1542_v27 = vrot.slane %v4231_v25, %v4049_v34 }
 0x207   : > { %v1500_v28 = vpop.xlane.xlu0 %1499  ;;  %v1503_v31 = vpop.xlane.xlu1 %1502 }
 0x208   : > { %v4242_v41 = vmul.f32 0.5, %v1500_v28  ;;  %v4244_v13 = vmul.f32 0.5, %v1503_v31  ;;  %v1558_v61 = vsel %vm339_vm4, %v1542_v27, %v1557_v52 }
 0x20a   : > { %v1546_v56 = vrot.slane %v4242_v41, %v4049_v34  ;;  %v1550_v58 = vrot.slane %v4244_v13, %v4049_v34 }
 0x20b   : > { %v1506_v59 = vpop.xlane.xlu0 %1505  ;;  %v1864_v23 = vpop.permute.xlu1 %1863 }
 0x20c   : > { %v4253_v1 = vmul.f32 0.5, %v1506_v59  ;;  %v1888_v2 = vsel %vm258_vm0, %v1864_v23, 0.0  ;;  %v1559_v6 = vsel %vm341_vm5, %v1546_v56, %v1558_v61 }
 0x20d   : > { %1889 = vadd.xlane.f32.xlu0 %v1888_v2  ;;  %v1560_v24 = vsel %vm343_vm6, %v1550_v58, %v1559_v6  ;;  %v4267_v58 = vsub.s32 1, %v3929_v3 }
 0x20e   : > { %v1554_v7 = vrot.slane %v4253_v1, %v4049_v34 }
 0x20f   : > { %v1862_v22 = vpop.permute.xlu0 %1861  ;;  %v1874_v52 = vpop.permute.xlu1 %1873  ;;  %v360_v2 = vrot.slane %v4219_v63, %v4267_v58 }
 0x210   : > { %v1561_v9 = vsel %vm345_vm7, %v1554_v7, %v1560_v24  ;;  %v1885_v28 = vsel %vm258_vm0, %v1862_v22, 0.0  ;;  %v1903_v59 = vsel %vm258_vm0, %v1874_v52, 0.0  ;;  %v4295_v52 = vsub.s32 7, %v3929_v3 }
 0x211   : > { %v1563_v11 = vsel %vm348_vm8, %v1561_v9, -inf  ;;  %v394_v22 = vsub.f32 %v4046_v33, %v360_v2 }
 0x212   : > { %1564 = vmax.xlane.f32.xlu1 %v1563_v11  ;;  %v4279_v11 = vsub.s32 3, %v3929_v3  ;;  %5597 = vst [vmem:[#allocation3_spill] sm:$0xff] %v4295_v52 }
 0x213   : > { %v1866_v19 = vpop.permute.xlu0 %1865  ;;  %v403_v24 = vmul.f32 1.442695, %v394_v22 }
 0x214   : > { %v1891_v27 = vsel %vm258_vm0, %v1866_v19, 0.0 }
 0x215   : > { %1892 = vadd.xlane.f32.xlu0 %v1891_v27  ;;  %3743 = vpow2.f32 %v403_v24  ;;  %v4284_v27 = vsub.s32 5, %v3929_v3 }
 0x216   : > { %1886 = vadd.xlane.f32.xlu1 %v1885_v28 }
 0x217   : > { %v1868_v31 = vpop.permute.xlu0 %1867 }
 0x218   : > { %v1894_v38 = vsel %vm258_vm0, %v1868_v31, 0.0 }
 0x219   : > { %1895 = vadd.xlane.f32.xlu0 %v1894_v38 }
 0x21b   : > { %v1870_v42 = vpop.permute.xlu0 %1869 }
 0x21c   : > { %v1897_v56 = vsel %vm258_vm0, %v1870_v42, 0.0 }
 0x21d   : > { %1898 = vadd.xlane.f32.xlu1 %v1897_v56 }
 0x21f   : > { %v1872_v23 = vpop.permute.xlu0 %1871 }
 0x220   : > { %v1900_v61 = vsel %vm258_vm0, %v1872_v23, 0.0 }
 0x221   : > { %1901 = vadd.xlane.f32.xlu0 %v1900_v61  ;;  %1904 = vadd.xlane.f32.xlu1 %v1903_v59 }
 0x222   : > { %v4275_v9 = vpop.eup %3743 }
 0x223   : > { %v1876_v6 = vpop.permute.xlu0 %1875 }
 0x224   : > { %v1906_v7 = vsel %vm258_vm0, %v1876_v6, 0.0 }
 0x225   : > { %1907 = vadd.xlane.f32.xlu0 %v1906_v7 }
 0x23b   : > { %429 = vperm.xlu0 %3722, %v4275_v9  }
 0x240   : > { %v4281_v19 = vpop.xlane.xlu1 %760 }
 0x241   : > { %v766_v28 = vrot.slane %v4281_v19, %v3943_v10  ;;  %v778_v33 = vrot.slane %v4281_v19, %v4279_v11  ;;  %v786_v31 = vrot.slane %v4281_v19, %v4284_v27  ;;  %v794_v59 = vrot.slane %v4281_v19, %v4295_v52 }
 0x243   : > { %v803_v38 = vsub.f32 %v4126_v46, %v766_v28  ;;  %v806_v42 = vsub.f32 %v4132_v50, %v778_v33  ;;  %v808_v23 = vsub.f32 %v4153_v55, %v786_v31  ;;  %v810_v6 = vsub.f32 %v4180_v18, %v794_v59 }
 0x244   : > { %v4300_v2 = vpop.xlane.xlu1 %1162  ;;  %v4306_v50 = vsub.s32 4, %v3929_v3  ;;  %v4312_v28 = vsub.s32 6, %v3929_v3 }
 0x245   : > { %v811_v56 = vmul.f32 1.442695, %v803_v38  ;;  %v817_v61 = vmul.f32 1.442695, %v806_v42  ;;  %v821_v7 = vmul.f32 1.442695, %v808_v23  ;;  %v1168_v46 = vrot.slane %v4300_v2, %v3943_v10 }
 0x246   : > { %v825_v22 = vmul.f32 1.442695, %v810_v6  ;;  %v1184_v24 = vrot.slane %v4300_v2, %v4306_v50  ;;  %v1192_v18 = vrot.slane %v4300_v2, %v4312_v28 }
 0x247   : > { %3745 = vpow2.f32 %v811_v56  ;;  %v1205_v55 = vsub.f32 %v4150_v60, %v1168_v46 }
 0x248   : > { %3747 = vpow2.f32 %v817_v61  ;;  %v1209_v33 = vsub.f32 %v4177_v17, %v1184_v24  ;;  %v1211_v42 = vsub.f32 %v4196_v26, %v1192_v18 }
 0x249   : > { %3749 = vpow2.f32 %v821_v7  ;;  %v1213_v31 = vmul.f32 1.442695, %v1205_v55 }
 0x24a   : > { %3751 = vpow2.f32 %v825_v22  ;;  %v1221_v56 = vmul.f32 1.442695, %v1209_v33  ;;  %v1225_v60 = vmul.f32 1.442695, %v1211_v42 }
 0x24b   : > { %3753 = vpow2.f32 %v1213_v31 }
 0x24c   : > { %3755 = vpow2.f32 %v1221_v56 }
 0x24d   : > { %3757 = vpow2.f32 %v1225_v60 }
 0x254   : > { %v4317_v38 = vpop.eup %3745 }
 0x255   : > { %5598 = vst [vmem:[#allocation4_spill] sm:$0xff] %v4317_v38  ;;  %836 = vperm.xlu0 %3722, %v4317_v38   ;;  %v4321_v59 = vpop.eup %3747 }
 0x256   : > { %5599 = vst [vmem:[#allocation5_spill] sm:$0xff] %v4321_v59  ;;  %v4324_v23 = vpop.eup %3749 }
 0x257   : > { %5600 = vst [vmem:[#allocation6_spill] sm:$0xff] %v4324_v23  ;;  %v4327_v17 = vpop.eup %3751 }
 0x258   : > { %5601 = vst [vmem:[#allocation7_spill] sm:$0xff] %v4327_v17  ;;  %v4330_v61 = vpop.eup %3753 }
 0x259   : > { %845 = vperm.xlu0 %3722, %v4321_v59   ;;  %5602 = vst [vmem:[#allocation8_spill] sm:$0xff] %v4330_v61  ;;  %v4333_v26 = vpop.eup %3755 }
 0x25a   : > { %5603 = vst [vmem:[#allocation9_spill] sm:$0xff] %v4333_v26  ;;  %v4336_v6 = vpop.eup %3757 }
 0x25b   : > { %5604 = vst [vmem:[#allocation10_spill] sm:$0xff] %v4336_v6 }
 0x25d   : > { %851 = vperm.xlu0 %3722, %v4324_v23  }
 0x261   : > { %857 = vperm.xlu0 %3722, %v4327_v17  }
 0x265   : > { %1238 = vperm.xlu0 %3722, %v4330_v61  }
 0x269   : > { %1250 = vperm.xlu0 %3722, %v4333_v26  }
 0x26d   : > { %1256 = vperm.xlu0 %3722, %v4336_v6  }
 0x296   : > { %v1890_v7 = vpop.xlane.xlu0 %1889 }
 0x297   : > { %v4349_v42 = vmul.f32 0.5, %v1890_v7 }
 0x299   : > { %v1932_v59 = vrot.slane %v4349_v42, %v4049_v34 }
 0x29b   : > { %v4339_v46 = vpop.xlane.xlu1 %1564 }
 0x29c   : > { %v1570_v22 = vrot.slane %v4339_v46, %v3943_v10  ;;  %v1582_v24 = vrot.slane %v4339_v46, %v4279_v11  ;;  %v1590_v55 = vrot.slane %v4339_v46, %v4284_v27  ;;  %v1598_v12 = vrot.slane %v4339_v46, %v4295_v52 }
 0x29e   : > { %v1607_v18 = vsub.f32 %v4225_v14, %v1570_v22  ;;  %v1610_v33 = vsub.f32 %v4227_v5, %v1582_v24  ;;  %v1893_v31 = vpop.xlane.xlu0 %1892  ;;  %v1612_v17 = vsub.f32 %v4242_v41, %v1590_v55  ;;  %v1614_v22 = vsub.f32 %v4253_v1, %v1598_v12 }
 0x29f   : > { %v1887_v60 = vpop.xlane.xlu1 %1886  ;;  %v4358_v14 = vmul.f32 0.5, %v1893_v31 }
 0x2a0   : > { %v1615_v56 = vmul.f32 1.442695, %v1607_v18  ;;  %v1621_v23 = vmul.f32 1.442695, %v1610_v33  ;;  %v4356_v26 = vmul.f32 0.5, %v1887_v60  ;;  %v4380_v60 = vsub.s32 2, %v3929_v3 }
 0x2a1   : > { %v1625_v24 = vmul.f32 1.442695, %v1612_v17  ;;  %v1936_v33 = vrot.slane %v4358_v14, %v4049_v34 }
 0x2a2   : > { %3759 = vpow2.f32 %v1615_v56  ;;  %v1896_v6 = vpop.xlane.xlu0 %1895  ;;  %v1928_v5 = vrot.slane %v4356_v26, %v4049_v34  ;;  %v1629_v56 = vmul.f32 1.442695, %v1614_v22  ;;  %v364_v38 = vrot.slane %v4219_v63, %v4380_v60 }
 0x2a3   : > { %v4362_v7 = vmul.f32 0.5, %v1896_v6  ;;  %3761 = vpow2.f32 %v1621_v23 }
 0x2a4   : > { %v1957_v55 = vsel %vm333_vm1, %v1932_v59, %v1928_v5  ;;  %3763 = vpow2.f32 %v1625_v24  ;;  %v356_v5 = vrot.slane %v4219_v63, %v3943_v10 }
 0x2a5   : > { %v1940_v31 = vrot.slane %v4362_v7, %v4049_v34  ;;  %v1958_v6 = vsel %vm335_vm2, %v1936_v33, %v1957_v55  ;;  %3765 = vpow2.f32 %v1629_v56 }
 0x2a6   : > { %v1899_v41 = vpop.xlane.xlu1 %1898 }
 0x2a7   : > { %v4366_v18 = vmul.f32 0.5, %v1899_v41  ;;  %v1959_v24 = vsel %vm337_vm3, %v1940_v31, %v1958_v6  ;;  %v393_v31 = vsub.f32 %v4052_v35, %v356_v5 }
 0x2a9   : > { %v1944_v12 = vrot.slane %v4366_v18, %v4049_v34 }
 0x2aa   : > { %v1902_v1 = vpop.xlane.xlu0 %1901  ;;  %v1905_v23 = vpop.xlane.xlu1 %1904 }
 0x2ab   : > { %v4375_v17 = vmul.f32 0.5, %v1902_v1  ;;  %v4377_v59 = vmul.f32 0.5, %v1905_v23  ;;  %v1960_v33 = vsel %vm339_vm4, %v1944_v12, %v1959_v24  ;;  %v368_v24 = vrot.slane %v4219_v63, %v4279_v11 }
 0x2ad   : > { %v1948_v22 = vrot.slane %v4375_v17, %v4049_v34  ;;  %v1952_v41 = vrot.slane %v4377_v59, %v4049_v34 }
 0x2ae   : > { %v1908_v55 = vpop.xlane.xlu0 %1907 }
 0x2af   : > { %v4390_v1 = vpop.eup %3759  ;;  %v4392_v23 = vmul.f32 0.5, %v1908_v55  ;;  %v1961_v3 = vsel %vm341_vm5, %v1948_v22, %v1960_v33  ;;  %v395_v22 = vsub.f32 %v4056_v36, %v364_v38  ;;  %v401_v55 = vmul.f32 1.442695, %v393_v31 }
 0x2b0   : > { %1640 = vperm.xlu0 %3722, %v4390_v1   ;;  %v1962_v6 = vsel %vm343_vm6, %v1952_v41, %v1961_v3  ;;  %v4402_v61 = vpop.eup %3761  ;;  %v372_v41 = vrot.slane %v4219_v63, %v4306_v50  ;;  %v396_v33 = vsub.f32 %v4063_v39, %v368_v24  ;;  %v376_v36 = vrot.slane %v4219_v63, %v4284_v27 }
 0x2b1   : > { %v1956_v56 = vrot.slane %v4392_v23, %v4049_v34  ;;  %5605 = vst [vmem:[#allocation11_spill] sm:$0xff] %v4402_v61  ;;  %v4410_v5 = vpop.eup %3763  ;;  %3767 = vpow2.f32 %v401_v55  ;;  %v405_v3 = vmul.f32 1.442695, %v395_v22  ;;  %v384_v24 = vrot.slane %v4219_v63, %v4295_v52 }
 0x2b2   : > { %5606 = vst [vmem:[#allocation12_spill] sm:$0xff] %v4410_v5  ;;  %v397_v38 = vsub.f32 %v4070_v44, %v372_v41  ;;  %v407_v31 = vmul.f32 1.442695, %v396_v33  ;;  %v398_v39 = vsub.f32 %v4077_v48, %v376_v36  ;;  %v770_v48 = vrot.slane %v4281_v19, %v4267_v58 }
 0x2b3   : > { %v1963_v12 = vsel %vm345_vm7, %v1956_v56, %v1962_v6  ;;  %v4416_v56 = vpop.eup %3765  ;;  %3769 = vpow2.f32 %v405_v3  ;;  %v380_v6 = vrot.slane %v4219_v63, %v4312_v28  ;;  %v400_v44 = vsub.f32 %v4090_v53, %v384_v24 }
 0x2b4   : > { %1649 = vperm.xlu0 %3722, %v4402_v61   ;;  %v1965_v35 = vsel %vm348_vm8, %v1963_v12, -inf  ;;  %5607 = vst [vmem:[#allocation13_spill] sm:$0xff] %v4416_v56  ;;  %3771 = vpow2.f32 %v407_v31  ;;  %v409_v12 = vmul.f32 1.442695, %v397_v38  ;;  %v411_v55 = vmul.f32 1.442695, %v398_v39 }
 0x2b5   : > { %1966 = vmax.xlane.f32.xlu1 %v1965_v35  ;;  %v399_v22 = vsub.f32 %v4084_v51, %v380_v6  ;;  %v415_v63 = vmul.f32 1.442695, %v400_v44  ;;  %v774_v51 = vrot.slane %v4281_v19, %v4380_v60  ;;  %v804_v3 = vsub.f32 %v4130_v49, %v770_v48 }
 0x2b6   : > { %3773 = vpow2.f32 %v409_v12  ;;  %v782_v53 = vrot.slane %v4281_v19, %v4306_v50  ;;  %v790_v39 = vrot.slane %v4281_v19, %v4312_v28  ;;  %v430_v61 = vpop.permute.xlu0 %429 }
 0x2b7   : > { %3775 = vpow2.f32 %v411_v55  ;;  %v413_v41 = vmul.f32 1.442695, %v399_v22  ;;  %v805_v38 = vsub.f32 %v4128_v47, %v774_v51  ;;  %v813_v31 = vmul.f32 1.442695, %v804_v3 }
 0x2b8   : > { %1655 = vperm.xlu0 %3722, %v4410_v5   ;;  %v807_v49 = vsub.f32 %v4140_v57, %v782_v53  ;;  %v809_v22 = vsub.f32 %v4166_v4, %v790_v39  ;;  %v1172_v55 = vrot.slane %v4300_v2, %v4267_v58  ;;  %v1176_v57 = vrot.slane %v4300_v2, %v4380_v60 }
 0x2b9   : > { %3777 = vpow2.f32 %v413_v41  ;;  %v815_v12 = vmul.f32 1.442695, %v805_v38  ;;  %v1180_v4 = vrot.slane %v4300_v2, %v4279_v11  ;;  %v1188_v53 = vrot.slane %v4300_v2, %v4284_v27 }
 0x2ba   : > { %3779 = vpow2.f32 %v415_v63  ;;  %v819_v47 = vmul.f32 1.442695, %v807_v49  ;;  %v823_v19 = vmul.f32 1.442695, %v809_v22  ;;  %v1206_v41 = vsub.f32 %v4148_v54, %v1172_v55 }
 0x2bb   : > { %3781 = vpow2.f32 %v813_v31  ;;  %v1207_v63 = vsub.f32 %v4155_v62, %v1176_v57  ;;  %v1208_v54 = vsub.f32 %v4160_v15, %v1180_v4  ;;  %v1196_v39 = vrot.slane %v4300_v2, %v4295_v52 }
 0x2bc   : > { %1661 = vperm.xlu0 %3722, %v4416_v56   ;;  %3783 = vpow2.f32 %v815_v12  ;;  %v1215_v51 = vmul.f32 1.442695, %v1206_v41  ;;  %v1210_v62 = vsub.f32 %v4184_v20, %v1188_v53  ;;  %v1578_v20 = vrot.slane %v4339_v46, %v4380_v60 }
 0x2bd   : > { %3785 = vpow2.f32 %v819_v47  ;;  %v1217_v38 = vmul.f32 1.442695, %v1207_v63  ;;  %v1219_v49 = vmul.f32 1.442695, %v1208_v54  ;;  %v1212_v22 = vsub.f32 %v4205_v0, %v1196_v39 }
 0x2be   : > { %v4428_v35 = vpop.eup %3767  ;;  %3787 = vpow2.f32 %v823_v19  ;;  %v1223_v15 = vmul.f32 1.442695, %v1210_v62  ;;  %v1574_v47 = vrot.slane %v4339_v46, %v4267_v58  ;;  %v1609_v0 = vsub.f32 %v4223_v16, %v1578_v20 }
 0x2bf   : > { %3789 = vpow2.f32 %v1215_v51  ;;  %v1227_v2 = vmul.f32 1.442695, %v1212_v22 }
 0x2c0   : > { %v4434_v33 = vpop.eup %3769  ;;  %3791 = vpow2.f32 %v1217_v38  ;;  %v1608_v19 = vsub.f32 %v4221_v8, %v1574_v47  ;;  %v1619_v63 = vmul.f32 1.442695, %v1609_v0 }
 0x2c1   : > { %v4440_v36 = vpop.eup %3771  ;;  %3793 = vpow2.f32 %v1219_v49 }
 0x2c2   : > { %3795 = vpow2.f32 %v1223_v15  ;;  %v1617_v41 = vmul.f32 1.442695, %v1608_v19 }
 0x2c3   : > { %v4446_v6 = vpop.eup %3773  ;;  %3797 = vpow2.f32 %v1227_v2 }
 0x2c4   : > { %v4452_v24 = vpop.eup %3775  ;;  %3799 = vpow2.f32 %v1617_v41 }
 0x2c5   : > { %3801 = vpow2.f32 %v1619_v63 }
 0x2c6   : > { %426 = vperm.xlu1 %3721, %v4428_v35   ;;  %v4458_v44 = vpop.eup %3777 }
 0x2c7   : > { %v4464_v48 = vpop.eup %3779 }
 0x2c8   : > { %v4470_v3 = vpop.eup %3781 }
 0x2c9   : > { %v4476_v31 = vpop.eup %3783 }
 0x2ca   : > { %432 = vperm.xlu1 %3721, %v4434_v33   ;;  %v4482_v12 = vpop.eup %3785 }
 0x2cb   : > { %v4488_v55 = vpop.eup %3787 }
 0x2cc   : > { %v4494_v57 = vpop.eup %3789 }
 0x2cd   : > { %v4498_v4 = vpop.eup %3791 }
 0x2ce   : > { %435 = vperm.xlu1 %3721, %v4440_v36   ;;  %v4501_v51 = vpop.eup %3793 }
 0x2cf   : > { %v4504_v8 = vpop.eup %3795 }
 0x2d0   : > { %v4507_v53 = vpop.eup %3797 }
 0x2d1   : > { %v4510_v16 = vpop.eup %3799 }
 0x2d2   : > { %438 = vperm.xlu1 %3721, %v4446_v6   ;;  %v4513_v54 = vpop.eup %3801 }
 0x2d3   : > { %5608 = vst [vmem:[#allocation14_spill] sm:$0xff] %v4513_v54 }
 0x2d6   : > { %441 = vperm.xlu1 %3721, %v4452_v24  }
 0x2da   : > { %444 = vperm.xlu1 %3721, %v4458_v44  }
 0x2de   : > { %447 = vperm.xlu1 %3721, %v4464_v48  }
 0x2e2   : > { %839 = vperm.xlu1 %3721, %v4470_v3  }
 0x2e6   : > { %842 = vperm.xlu1 %3721, %v4476_v31  }
 0x2ea   : > { %848 = vperm.xlu1 %3721, %v4482_v12  }
 0x2ee   : > { %854 = vperm.xlu1 %3721, %v4488_v55  }
 0x2f2   : > { %1241 = vperm.xlu1 %3721, %v4494_v57  }
 0x2f6   : > { %1244 = vperm.xlu1 %3721, %v4498_v4  }
 0x2fa   : > { %1247 = vperm.xlu1 %3721, %v4501_v51  }
 0x2fe   : > { %1253 = vperm.xlu1 %3721, %v4504_v8  }
 0x302   : > { %1259 = vperm.xlu1 %3721, %v4507_v53  }
 0x306   : > { %1643 = vperm.xlu1 %3721, %v4510_v16  }
 0x30a   : > { %1646 = vperm.xlu1 %3721, %v4513_v54  }
 0x33e   : > { %v4516_v38 = vpop.xlane.xlu1 %1966 }
 0x33f   : > { %v1972_v39 = vrot.slane %v4516_v38, %v3943_v10  ;;  %v1988_v62 = vrot.slane %v4516_v38, %v4306_v50  ;;  %v1996_v49 = vrot.slane %v4516_v38, %v4312_v28 }
 0x341   : > { %v2009_v22 = vsub.f32 %v4356_v26, %v1972_v39  ;;  %v2013_v15 = vsub.f32 %v4366_v18, %v1988_v62  ;;  %v2015_v20 = vsub.f32 %v4377_v59, %v1996_v49  ;;  %v456_v59 = vrot.slane %v430_v61, %v4049_v34 }
 0x342   : > { %v427_v47 = vpop.permute.xlu1 %426  ;;  %v1586_v49 = vrot.slane %v4339_v46, %v4306_v50 }
 0x343   : > { %v2017_v2 = vmul.f32 1.442695, %v2009_v22  ;;  %v2025_v19 = vmul.f32 1.442695, %v2013_v15  ;;  %v2029_v41 = vmul.f32 1.442695, %v2015_v20  ;;  %v452_v26 = vrot.slane %v427_v47, %v4049_v34 }
 0x345   : > { %3803 = vpow2.f32 %v2017_v2  ;;  %v4539_v2 = vpop.permute.xlu0 %836  ;;  %v481_v47 = vsel %vm333_vm1, %v456_v59, %v452_v26 }
 0x346   : > { %v433_v0 = vpop.permute.xlu1 %432  ;;  %3805 = vpow2.f32 %v2025_v19 }
 0x347   : > { %3807 = vpow2.f32 %v2029_v41  ;;  %v460_v18 = vrot.slane %v433_v0, %v4049_v34 }
 0x349   : > { %v482_v61 = vsel %vm335_vm2, %v460_v18, %v481_v47 }
 0x34a   : > { %v436_v63 = vpop.permute.xlu1 %435 }
 0x34b   : > { %v464_v39 = vrot.slane %v436_v63, %v4049_v34  ;;  %v1611_v63 = vsub.f32 %v4231_v25, %v1586_v49  ;;  %v1976_v25 = vrot.slane %v4516_v38, %v4267_v58 }
 0x34d   : > { %v483_v0 = vsel %vm337_vm3, %v464_v39, %v482_v61  ;;  %v2010_v61 = vsub.f32 %v4349_v42, %v1976_v25 }
 0x34e   : > { %v439_v56 = vpop.permute.xlu1 %438 }
 0x34f   : > { %v468_v22 = vrot.slane %v439_v56, %v4049_v34  ;;  %v1594_v56 = vrot.slane %v4339_v46, %v4312_v28  ;;  %v1623_v46 = vmul.f32 1.442695, %v1611_v63  ;;  %v2019_v63 = vmul.f32 1.442695, %v2010_v61 }
 0x351   : > { %v1613_v47 = vsub.f32 %v4244_v13, %v1594_v56  ;;  %3809 = vpow2.f32 %v1623_v46  ;;  %v1984_v13 = vrot.slane %v4516_v38, %v4279_v11 }
 0x352   : > { %v4527_v5 = vpop.eup %3803  ;;  %v442_v54 = vpop.permute.xlu1 %441 }
 0x353   : > { %5609 = vst [vmem:[#allocation15_spill] sm:$0xff] %v4527_v5  ;;  %2042 = vperm.xlu0 %3722, %v4527_v5   ;;  %v4534_v62 = vpop.eup %3805  ;;  %v472_v20 = vrot.slane %v442_v54, %v4049_v34  ;;  %v484_v5 = vsel %vm339_vm4, %v468_v22, %v483_v0  ;;  %v1627_v22 = vmul.f32 1.442695, %v1613_v47  ;;  %v2012_v42 = vsub.f32 %v4362_v7, %v1984_v13 }
 0x354   : > { %5610 = vst [vmem:[#allocation16_spill] sm:$0xff] %v4534_v62  ;;  %v4547_v41 = vpop.eup %3807  ;;  %v2000_v47 = vrot.slane %v4516_v38, %v4295_v52 }
 0x355   : > { %v485_v54 = vsel %vm341_vm5, %v472_v20, %v484_v5  ;;  %v1980_v20 = vrot.slane %v4516_v38, %v4380_v60  ;;  %3811 = vpow2.f32 %v1627_v22 }
 0x356   : > { %v445_v15 = vpop.permute.xlu1 %444  ;;  %3813 = vpow2.f32 %v2019_v63 }
 0x357   : > { %2054 = vperm.xlu0 %3722, %v4534_v62   ;;  %v476_v19 = vrot.slane %v445_v15, %v4049_v34  ;;  %v4557_v15 = vpop.permute.xlu0 %845  ;;  %v2011_v56 = vsub.f32 %v4358_v14, %v1980_v20  ;;  %v2023_v14 = vmul.f32 1.442695, %v2012_v42  ;;  %v2016_v20 = vsub.f32 %v4392_v23, %v2000_v47 }
 0x359   : > { %v486_v18 = vsel %vm343_vm6, %v476_v19, %v485_v54 }
 0x35a   : > { %v448_v26 = vpop.permute.xlu1 %447 }
 0x35b   : > { %v480_v59 = vrot.slane %v448_v26, %v4049_v34  ;;  %2060 = vperm.xlu0 %3722, %v4547_v41   ;;  %v4571_v0 = vpop.permute.xlu0 %851 }
 0x35d   : > { %v487_v39 = vsel %vm345_vm7, %v480_v59, %v486_v18  ;;  %v1992_v59 = vrot.slane %v4516_v38, %v4284_v27  ;;  %v2021_v18 = vmul.f32 1.442695, %v2011_v56 }
 0x35e   : > { %v4563_v49 = vpop.permute.xlu1 %839  ;;  %v489_v5 = vsel %vm348_vm8, %v487_v39, 0.0 }
 0x35f   : > { %490 = vadd.xlane.f32.xlu1 %v489_v5  ;;  %v4578_v54 = vpop.permute.xlu0 %857  ;;  %v2014_v46 = vsub.f32 %v4375_v17, %v1992_v59  ;;  %3815 = vpow2.f32 %v2021_v18  ;;  %v4588_v5 = vpop.eup %3809  ;;  %v2031_v59 = vmul.f32 1.442695, %v2016_v20 }
 0x360   : > { %3817 = vpow2.f32 %v2023_v14 }
 0x361   : > { %v2027_v7 = vmul.f32 1.442695, %v2014_v46 }
 0x362   : > { %v4569_v19 = vpop.permute.xlu1 %842  ;;  %v4592_v13 = vpop.eup %3811 }
 0x363   : > { %v1239_v22 = vpop.permute.xlu0 %1238  ;;  %3819 = vpow2.f32 %v2027_v7  ;;  %v4598_v18 = vpop.eup %3813 }
 0x364   : > { %v1264_v17 = vrot.slane %v1239_v22, %v4049_v34  ;;  %3821 = vpow2.f32 %v2031_v59 }
 0x366   : > { %v4576_v26 = vpop.permute.xlu1 %848 }
 0x367   : > { %v1251_v63 = vpop.permute.xlu0 %1250 }
 0x36a   : > { %v4583_v39 = vpop.permute.xlu1 %854 }
 0x36b   : > { %v1257_v20 = vpop.permute.xlu0 %1256 }
 0x36e   : > { %v1242_v25 = vpop.permute.xlu1 %1241 }
 0x36f   : > { %v1268_v56 = vrot.slane %v1242_v25, %v4049_v34  ;;  %v1280_v25 = vrot.slane %v1251_v63, %v4049_v34 }
 0x370   : > { %1652 = vperm.xlu1 %3721, %v4588_v5  }
 0x371   : > { %v1293_v23 = vsel %vm333_vm1, %v1268_v56, %v1264_v17 }
 0x372   : > { %v1245_v61 = vpop.permute.xlu1 %1244 }
 0x373   : > { %v1272_v38 = vrot.slane %v1245_v61, %v4049_v34  ;;  %v4606_v61 = vpop.eup %3815 }
 0x374   : > { %1658 = vperm.xlu1 %3721, %v4592_v13  }
 0x375   : > { %v1294_v46 = vsel %vm335_vm2, %v1272_v38, %v1293_v23  ;;  %v1288_v38 = vrot.slane %v1257_v20, %v4049_v34 }
 0x376   : > { %v1248_v42 = vpop.permute.xlu1 %1247 }
 0x377   : > { %v1276_v47 = vrot.slane %v1248_v42, %v4049_v34  ;;  %v4613_v42 = vpop.eup %3817 }
 0x378   : > { %2045 = vperm.xlu1 %3721, %v4598_v18  }
 0x379   : > { %v1295_v14 = vsel %vm337_vm3, %v1276_v47, %v1294_v46  ;;  %v4620_v46 = vpop.eup %3819 }
 0x37a   : > { %v1254_v22 = vpop.permute.xlu1 %1253  ;;  %v1296_v62 = vsel %vm339_vm4, %v1280_v25, %v1295_v14  ;;  %v866_v14 = vrot.slane %v4563_v49, %v4049_v34  ;;  %v870_v25 = vrot.slane %v4569_v19, %v4049_v34  ;;  %v874_v49 = vrot.slane %v4557_v15, %v4049_v34 }
 0x37b   : > { %v1284_v7 = vrot.slane %v1254_v22, %v4049_v34  ;;  %v862_v22 = vrot.slane %v4539_v2, %v4049_v34  ;;  %v886_v2 = vrot.slane %v4583_v39, %v4049_v34  ;;  %v890_v15 = vrot.slane %v4578_v54, %v4049_v34 }
 0x37c   : > { %2048 = vperm.xlu1 %3721, %v4606_v61  }
 0x37d   : > { %v1297_v56 = vsel %vm341_vm5, %v1284_v7, %v1296_v62  ;;  %v4623_v62 = vpop.eup %3821  ;;  %v891_v20 = vsel %vm333_vm1, %v866_v14, %v862_v22 }
 0x37e   : > { %v1260_v17 = vpop.permute.xlu1 %1259  ;;  %v1298_v59 = vsel %vm343_vm6, %v1288_v38, %v1297_v56  ;;  %v892_v7 = vsel %vm335_vm2, %v870_v25, %v891_v20  ;;  %v878_v56 = vrot.slane %v4576_v26, %v4049_v34  ;;  %v882_v26 = vrot.slane %v4571_v0, %v4049_v34  ;;  %v1641_v0 = vpop.permute.xlu0 %1640 }
 0x37f   : > { %v1292_v63 = vrot.slane %v1260_v17, %v4049_v34  ;;  %v893_v19 = vsel %vm337_vm3, %v874_v49, %v892_v7  ;;  %v1666_v54 = vrot.slane %v1641_v0, %v4049_v34 }
 0x380   : > { %2051 = vperm.xlu1 %3721, %v4613_v42   ;;  %v894_v38 = vsel %vm339_vm4, %v878_v56, %v893_v19 }
 0x381   : > { %v1299_v23 = vsel %vm345_vm7, %v1292_v63, %v1298_v59  ;;  %v895_v17 = vsel %vm341_vm5, %v882_v26, %v894_v38 }
 0x382   : > { %v1301_v47 = vsel %vm348_vm8, %v1299_v23, 0.0  ;;  %v896_v63 = vsel %vm343_vm6, %v886_v2, %v895_v17  ;;  %v1644_v23 = vpop.permute.xlu1 %1643 }
 0x383   : > { %1302 = vadd.xlane.f32.xlu0 %v1301_v47  ;;  %v897_v59 = vsel %vm345_vm7, %v890_v15, %v896_v63  ;;  %v1650_v47 = vpop.permute.xlu0 %1649  ;;  %v1670_v25 = vrot.slane %v1644_v23, %v4049_v34 }
 0x384   : > { %2057 = vperm.xlu1 %3721, %v4620_v46   ;;  %v899_v39 = vsel %vm348_vm8, %v897_v59, 0.0  ;;  %v1678_v19 = vrot.slane %v1650_v47, %v4049_v34 }
 0x385   : > { %v1695_v56 = vsel %vm333_vm1, %v1670_v25, %v1666_v54 }
 0x386   : > { %v1647_v14 = vpop.permute.xlu1 %1646 }
 0x387   : > { %v1674_v22 = vrot.slane %v1647_v14, %v4049_v34  ;;  %v1656_v7 = vpop.permute.xlu0 %1655 }
 0x388   : > { %2063 = vperm.xlu1 %3721, %v4623_v62   ;;  %v1686_v15 = vrot.slane %v1656_v7, %v4049_v34 }
 0x389   : > { %v1696_v49 = vsel %vm335_vm2, %v1674_v22, %v1695_v56 }
 0x38a   : > { %v1697_v26 = vsel %vm337_vm3, %v1678_v19, %v1696_v49 }
 0x38b   : > { %v1662_v17 = vpop.permute.xlu0 %1661 }
 0x38c   : > { %2263 = vrot.lane.b32.xlu1 %v3949_v21, %s3901_s22  ;;  %v1694_v0 = vrot.slane %v1662_v17, %v4049_v34 }
 0x399   : > { %2669 = vrot.lane.b32.xlu0 %v3957_v29, %s3902_s23 }
 0x39d   : > { %2673 = vrot.lane.b32.xlu0 %v3964_v32, %s3902_s23 }
 0x3a1   : > { %2275 = vrot.lane.b32.xlu0 %v3984_v43, %s3901_s22 }
 0x3a5   : > { %3075 = vrot.lane.b32.xlu0 %v3964_v32, %s3903_s24 }
 0x3a9   : > { %2677 = vrot.lane.b32.xlu0 %v3984_v43, %s3902_s23 }
 0x3ad   : > { %2679 = vrot.lane.b32.xlu0 %v3989_v45, %s3902_s23 }
 0x3b0   : > { %900 = vadd.xlane.f32.xlu1 %v899_v39 }
 0x3b1   : > { %3081 = vrot.lane.b32.xlu0 %v3989_v45, %s3903_s24 }
 0x3ce   : > { %v2043_v22 = vpop.permute.xlu0 %2042 }
 0x3cf   : > { %v2068_v19 = vrot.slane %v2043_v22, %v4049_v34 }
 0x3e8   : > { %v491_v20 = vpop.xlane.xlu1 %490 }
 0x3e9   : > { %3823 = vrcp.f32 %v491_v20 }
 0x3ec   : > { %v1653_v38 = vpop.permute.xlu1 %1652 }
 0x3ed   : > { %v1682_v2 = vrot.slane %v1653_v38, %v4049_v34  ;;  %v2055_v38 = vpop.permute.xlu0 %2054 }
 0x3ef   : > { %v1698_v63 = vsel %vm339_vm4, %v1682_v2, %v1697_v26 }
 0x3f0   : > { %v1659_v59 = vpop.permute.xlu1 %1658  ;;  %v1699_v23 = vsel %vm341_vm5, %v1686_v15, %v1698_v63 }
 0x3f1   : > { %v1690_v39 = vrot.slane %v1659_v59, %v4049_v34  ;;  %v2084_v59 = vrot.slane %v2055_v38, %v4049_v34 }
 0x3f3   : > { %v1700_v14 = vsel %vm343_vm6, %v1690_v39, %v1699_v23 }
 0x3f4   : > { %v2046_v47 = vpop.permute.xlu1 %2045  ;;  %v1701_v25 = vsel %vm345_vm7, %v1694_v0, %v1700_v14  ;;  %v2061_v0 = vpop.permute.xlu0 %2060 }
 0x3f5   : > { %v1703_v54 = vsel %vm348_vm8, %v1701_v25, 0.0  ;;  %v2072_v49 = vrot.slane %v2046_v47, %v4049_v34  ;;  %v2092_v25 = vrot.slane %v2061_v0, %v4049_v34 }
 0x3f6   : > { %1704 = vadd.xlane.f32.xlu1 %v1703_v54 }
 0x3f7   : > { %v2097_v26 = vsel %vm333_vm1, %v2072_v49, %v2068_v19  ;;  %v3824_v19 = vpop.eup %3823 }
 0x3f8   : > { %v2049_v56 = vpop.permute.xlu1 %2048  ;;  %v497_v38 = vrot.slane %v3824_v19, %v3943_v10 }
 0x3f9   : > { %v2076_v7 = vrot.slane %v2049_v56, %v4049_v34 }
 0x3fa   : > { %v534_v20 = vmul.f32 %v4428_v35, %v497_v38 }
 0x3fb   : > { %v2098_v63 = vsel %vm335_vm2, %v2076_v7, %v2097_v26 }
 0x3fc   : > { %v2052_v2 = vpop.permute.xlu1 %2051 }
 0x3fd   : > { %v2080_v17 = vrot.slane %v2052_v2, %v4049_v34  ;;  %v501_v2 = vrot.slane %v3824_v19, %v4267_v58 }
 0x3ff   : > { %v2099_v15 = vsel %vm337_vm3, %v2080_v17, %v2098_v63  ;;  %v535_v26 = vmul.f32 %v4275_v9, %v501_v2  ;;  %v505_v17 = vrot.slane %v3824_v19, %v4380_v60 }
 0x400   : > { %v2058_v39 = vpop.permute.xlu1 %2057  ;;  %v2100_v14 = vsel %vm339_vm4, %v2084_v59, %v2099_v15  ;;  %v521_v15 = vrot.slane %v3824_v19, %v4312_v28 }
 0x401   : > { %v2088_v23 = vrot.slane %v2058_v39, %v4049_v34  ;;  %v536_v63 = vmul.f32 %v4434_v33, %v505_v17 }
 0x403   : > { %v2101_v47 = vsel %vm341_vm5, %v2088_v23, %v2100_v14 }
 0x404   : > { %v2064_v22 = vpop.permute.xlu1 %2063  ;;  %v2102_v56 = vsel %vm343_vm6, %v2092_v25, %v2101_v47 }
 0x405   : > { %v2096_v54 = vrot.slane %v2064_v22, %v4049_v34 }
 0x407   : > { %2265 = vrot.lane.b32.xlu1 %v3960_v30, %s3901_s22  ;;  %v2103_v49 = vsel %vm345_vm7, %v2096_v54, %v2102_v56 }
 0x408   : > { %v2105_v7 = vsel %vm348_vm8, %v2103_v49, 0.0 }
 0x409   : > { %2106 = vadd.xlane.f32.xlu0 %v2105_v7 }
 0x40b   : > { %2267 = vrot.lane.b32.xlu1 %v3957_v29, %s3901_s22 }
 0x40f   : > { %2665 = vrot.lane.b32.xlu1 %v3949_v21, %s3902_s23 }
 0x413   : > { %2667 = vrot.lane.b32.xlu1 %v3960_v30, %s3902_s23 }
 0x417   : > { %2269 = vrot.lane.b32.xlu1 %v3972_v37, %s3901_s22 }
 0x41b   : > { %3067 = vrot.lane.b32.xlu1 %v3949_v21, %s3903_s24  ;;  %v509_v21 = vrot.slane %v3824_v19, %v4279_v11 }
 0x41d   : > { %v537_v35 = vmul.f32 %v4440_v36, %v509_v21  ;;  %v540_v36 = vmul.f32 %v4458_v44, %v521_v15 }
 0x41f   : > { %3069 = vrot.lane.b32.xlu1 %v3960_v30, %s3903_s24  ;;  %544 = vperm.xlu0 %3722, %v534_v20   ;;  %v513_v30 = vrot.slane %v3824_v19, %v4306_v50 }
 0x421   : > { %v538_v9 = vmul.f32 %v4446_v6, %v513_v30 }
 0x423   : > { %2271 = vrot.lane.b32.xlu1 %v3964_v32, %s3901_s22  ;;  %549 = vperm.xlu0 %3722, %v535_v26   ;;  %v517_v32 = vrot.slane %v3824_v19, %v4284_v27 }
 0x425   : > { %v539_v33 = vmul.f32 %v4452_v24, %v517_v32 }
 0x427   : > { %2671 = vrot.lane.b32.xlu1 %v3972_v37, %s3902_s23  ;;  %554 = vperm.xlu0 %3722, %v536_v63  }
 0x42b   : > { %3071 = vrot.lane.b32.xlu1 %v3957_v29, %s3903_s24  ;;  %559 = vperm.xlu0 %3722, %v537_v35   ;;  %v525_v29 = vrot.slane %v3824_v19, %v4295_v52 }
 0x42d   : > { %v541_v6 = vmul.f32 %v4464_v48, %v525_v29 }
 0x42f   : > { %2273 = vrot.lane.b32.xlu1 %v3978_v40, %s3901_s22  ;;  %564 = vperm.xlu0 %3722, %v538_v9  }
 0x433   : > { %3073 = vrot.lane.b32.xlu1 %v3972_v37, %s3903_s24  ;;  %569 = vperm.xlu0 %3722, %v539_v33   ;;  %v2264_v37 = vpop.permute.xlu1 %2263 }
 0x434   : > { %v2287_v24 = vsel %vm258_vm0, %v2264_v37, 0.0 }
 0x437   : > { %2675 = vrot.lane.b32.xlu1 %v3978_v40, %s3902_s23  ;;  %574 = vperm.xlu0 %3722, %v540_v36  }
 0x439   : > { %v901_v44 = vpop.xlane.xlu1 %900 }
 0x43b   : > { %2277 = vrot.lane.b32.xlu1 %v3989_v45, %s3901_s22  ;;  %579 = vperm.xlu0 %3722, %v541_v6  }
 0x43f   : > { %3077 = vrot.lane.b32.xlu1 %v3978_v40, %s3903_s24 }
 0x443   : > { %3079 = vrot.lane.b32.xlu1 %v3984_v43, %s3903_s24  ;;  %v1303_v43 = vpop.xlane.xlu0 %1302 }
 0x444   : > { %3825 = vrcp.f32 %v1303_v43  ;;  %v5612_v43 = vld [vmem:[#allocation4_spill] sm:$0xff] }
 0x445   : > { %3827 = vrcp.f32 %v901_v44 }
 0x447   : > { %v2670_v25 = vpop.permute.xlu0 %2669 }
 0x448   : > { %v2695_v54 = vsel %vm258_vm0, %v2670_v25, 0.0 }
 0x44b   : > { %v2674_v35 = vpop.permute.xlu0 %2673 }
 0x44c   : > { %v2701_v9 = vsel %vm258_vm0, %v2674_v35, 0.0  ;;  %v5615_v35 = vld [vmem:[#allocation10_spill] sm:$0xff] }
 0x44f   : > { %v2276_v33 = vpop.permute.xlu0 %2275 }
 0x450   : > { %v2305_v36 = vsel %vm258_vm0, %v2276_v33, 0.0 }
 0x451   : > { %v3826_v6 = vpop.eup %3825 }
 0x452   : > { %v1309_v37 = vrot.slane %v3826_v6, %v3943_v10  ;;  %v1321_v25 = vrot.slane %v3826_v6, %v4279_v11 }
 0x467   : > { %2288 = vadd.xlane.f32.xlu1 %v2287_v24  ;;  %v3828_v24 = vpop.eup %3827 }
 0x468   : > { %v911_v44 = vrot.slane %v3828_v24, %v4267_v58  ;;  %v931_v33 = vrot.slane %v3828_v24, %v4312_v28 }
 0x47f   : > { %v4747_v59 = vpop.xlane.xlu1 %1704 }
 0x480   : > { %3829 = vrcp.f32 %v4747_v59 }
 0x483   : > { %v2266_v39 = vpop.permute.xlu1 %2265 }
 0x484   : > { %v2290_v48 = vsel %vm258_vm0, %v2266_v39, 0.0  ;;  %v5611_v39 = vld [vmem:[#allocation8_spill] sm:$0xff] }
 0x485   : > { %2291 = vadd.xlane.f32.xlu0 %v2290_v48  ;;  %v1346_v48 = vmul.f32 %v5611_v39, %v1309_v37 }
 0x487   : > { %v2268_v0 = vpop.permute.xlu1 %2267 }
 0x488   : > { %v2293_v45 = vsel %vm258_vm0, %v2268_v0, 0.0  ;;  %v1313_v0 = vrot.slane %v3826_v6, %v4267_v58 }
 0x489   : > { %2294 = vadd.xlane.f32.xlu0 %v2293_v45  ;;  %v907_v45 = vrot.slane %v3828_v24, %v3943_v10 }
 0x48b   : > { %v2666_v23 = vpop.permute.xlu1 %2665 }
 0x48c   : > { %v2689_v40 = vsel %vm258_vm0, %v2666_v23, 0.0  ;;  %v1347_v23 = vmul.f32 %v4494_v57, %v1313_v0  ;;  %v1349_v57 = vmul.f32 %v4501_v51, %v1321_v25 }
 0x48d   : > { %2690 = vadd.xlane.f32.xlu1 %v2689_v40  ;;  %v1317_v40 = vrot.slane %v3826_v6, %v4380_v60  ;;  %v3830_v37 = vpop.eup %3829 }
 0x48e   : > { %v1711_v0 = vrot.slane %v3830_v37, %v3943_v10  ;;  %v1727_v25 = vrot.slane %v3830_v37, %v4306_v50 }
 0x48f   : > { %v2668_v14 = vpop.permute.xlu1 %2667 }
 0x490   : > { %v2692_v47 = vsel %vm258_vm0, %v2668_v14, 0.0  ;;  %v944_v14 = vmul.f32 %v5612_v43, %v907_v45  ;;  %v1748_v45 = vmul.f32 %v4390_v1, %v1711_v0 }
 0x491   : > { %2693 = vadd.xlane.f32.xlu0 %v2692_v47  ;;  %v1348_v47 = vmul.f32 %v4498_v4, %v1317_v40  ;;  %v1719_v40 = vrot.slane %v3830_v37, %v4380_v60 }
 0x493   : > { %v2270_v22 = vpop.permute.xlu1 %2269 }
 0x494   : > { %v2296_v56 = vsel %vm258_vm0, %v2270_v22, 0.0  ;;  %v945_v22 = vmul.f32 %v4470_v3, %v911_v44 }
 0x495   : > { %2696 = vadd.xlane.f32.xlu0 %v2695_v54  ;;  %2297 = vadd.xlane.f32.xlu1 %v2296_v56  ;;  %v915_v54 = vrot.slane %v3828_v24, %v4380_v60  ;;  %v1325_v56 = vrot.slane %v3826_v6, %v4306_v50 }
 0x497   : > { %v3068_v49 = vpop.permute.xlu1 %3067 }
 0x498   : > { %v3091_v7 = vsel %vm258_vm0, %v3068_v49, 0.0  ;;  %v946_v49 = vmul.f32 %v4476_v31, %v915_v54 }
 0x499   : > { %3092 = vadd.xlane.f32.xlu1 %v3091_v7  ;;  %v919_v7 = vrot.slane %v3828_v24, %v4279_v11 }
 0x49b   : > { %v3070_v19 = vpop.permute.xlu1 %3069 }
 0x49c   : > { %v3094_v38 = vsel %vm258_vm0, %v3070_v19, 0.0  ;;  %v5613_v19 = vld [vmem:[#allocation9_spill] sm:$0xff] }
 0x49d   : > { %3095 = vadd.xlane.f32.xlu0 %v3094_v38  ;;  %v1350_v4 = vmul.f32 %v5613_v19, %v1325_v56  ;;  %v1329_v38 = vrot.slane %v3826_v6, %v4284_v27  ;;  %v5620_v56 = vld [vmem:[#allocation12_spill] sm:$0xff] }
 0x49f   : > { %v2272_v20 = vpop.permute.xlu1 %2271  ;;  %v1351_v51 = vmul.f32 %v4504_v8, %v1329_v38  ;;  %v950_v8 = vmul.f32 %v4488_v55, %v931_v33  ;;  %v1715_v55 = vrot.slane %v3830_v37, %v4267_v58 }
 0x4a0   : > { %v2299_v2 = vsel %vm258_vm0, %v2272_v20, 0.0  ;;  %v5614_v20 = vld [vmem:[#allocation5_spill] sm:$0xff] }
 0x4a1   : > { %2300 = vadd.xlane.f32.xlu1 %v2299_v2  ;;  %v947_v3 = vmul.f32 %v5614_v20, %v919_v7  ;;  %v923_v2 = vrot.slane %v3828_v24, %v4306_v50  ;;  %v1735_v7 = vrot.slane %v3830_v37, %v4312_v28 }
 0x4a3   : > { %v2672_v26 = vpop.permute.xlu1 %2671  ;;  %v948_v31 = vmul.f32 %v4482_v12, %v923_v2  ;;  %v5617_v12 = vld [vmem:[#allocation7_spill] sm:$0xff]  ;;  %v1754_v38 = vmul.f32 %v4592_v13, %v1735_v7  ;;  %v5621_v2 = vld [vmem:[#allocation13_spill] sm:$0xff] }
 0x4a4   : > { %v2698_v17 = vsel %vm258_vm0, %v2672_v26, 0.0  ;;  %v3076_v26 = vpop.permute.xlu0 %3075 }
 0x4a5   : > { %2699 = vadd.xlane.f32.xlu0 %v2698_v17  ;;  %v1333_v17 = vrot.slane %v3826_v6, %v4312_v28 }
 0x4a7   : > { %v3072_v63 = vpop.permute.xlu1 %3071 }
 0x4a8   : > { %v3097_v21 = vsel %vm258_vm0, %v3072_v63, 0.0  ;;  %v927_v63 = vrot.slane %v3828_v24, %v4284_v27 }
 0x4a9   : > { %3098 = vadd.xlane.f32.xlu1 %v3097_v21  ;;  %v2678_v21 = vpop.permute.xlu0 %2677 }
 0x4ab   : > { %v2274_v30 = vpop.permute.xlu1 %2273 }
 0x4ac   : > { %v2302_v32 = vsel %vm258_vm0, %v2274_v30, 0.0  ;;  %v1352_v30 = vmul.f32 %v5615_v35, %v1333_v17 }
 0x4ad   : > { %2702 = vadd.xlane.f32.xlu1 %v2701_v9  ;;  %2303 = vadd.xlane.f32.xlu0 %v2302_v32  ;;  %v5616_v9 = vld [vmem:[#allocation6_spill] sm:$0xff]  ;;  %v2680_v59 = vpop.permute.xlu0 %2679 }
 0x4ae   : > { %v949_v32 = vmul.f32 %v5616_v9, %v927_v63 }
 0x4af   : > { %v3074_v15 = vpop.permute.xlu1 %3073 }
 0x4b0   : > { %v3100_v29 = vsel %vm258_vm0, %v3074_v15, 0.0  ;;  %v935_v15 = vrot.slane %v3828_v24, %v4295_v52  ;;  %v1749_v24 = vmul.f32 %v4510_v16, %v1715_v55  ;;  %v1731_v16 = vrot.slane %v3830_v37, %v4284_v27 }
 0x4b1   : > { %2306 = vadd.xlane.f32.xlu1 %v2305_v36  ;;  %3101 = vadd.xlane.f32.xlu0 %v3100_v29  ;;  %v1337_v29 = vrot.slane %v3826_v6, %v4295_v52  ;;  %v3082_v39 = vpop.permute.xlu0 %3081  ;;  %v5618_v6 = vld [vmem:[#allocation14_spill] sm:$0xff] }
 0x4b2   : > { %v951_v36 = vmul.f32 %v5617_v12, %v935_v15  ;;  %v3112_v17 = vsel %vm258_vm0, %v3082_v39, 0.0 }
 0x4b3   : > { %v2676_v20 = vpop.permute.xlu1 %2675 }
 0x4b4   : > { %v2704_v15 = vsel %vm258_vm0, %v2676_v20, 0.0 }
 0x4c2   : > { %1356 = vperm.xlu1 %3721, %v1346_v48   ;;  %v1353_v48 = vmul.f32 %v4507_v53, %v1337_v29  ;;  %v1723_v53 = vrot.slane %v3830_v37, %v4279_v11 }
 0x4c6   : > { %1361 = vperm.xlu1 %3721, %v1347_v23   ;;  %v2107_v23 = vpop.xlane.xlu0 %2106 }
 0x4c7   : > { %954 = vperm.xlu0 %3722, %v944_v14   ;;  %v1750_v14 = vmul.f32 %v5618_v6, %v1719_v40  ;;  %3831 = vrcp.f32 %v2107_v23 }
 0x4ca   : > { %1366 = vperm.xlu1 %3721, %v1348_v47   ;;  %v4802_v43 = vpop.permute.xlu0 %544  ;;  %v5619_v47 = vld [vmem:[#allocation11_spill] sm:$0xff] }
 0x4cb   : > { %959 = vperm.xlu0 %3722, %v945_v22   ;;  %v1751_v1 = vmul.f32 %v5619_v47, %v1723_v53  ;;  %v1752_v22 = vmul.f32 %v4588_v5, %v1727_v25  ;;  %v1739_v5 = vrot.slane %v3830_v37, %v4295_v52  ;;  %v5625_v25 = vld [vmem:[#allocation2_spill] sm:$0xff] }
 0x4ce   : > { %1371 = vperm.xlu1 %3721, %v1349_v57   ;;  %v4806_v44 = vpop.permute.xlu0 %549  ;;  %v3103_v57 = vsel %vm258_vm0, %v3076_v26, 0.0  ;;  %v1755_v26 = vmul.f32 %v5621_v2, %v1739_v5 }
 0x4cf   : > { %964 = vperm.xlu0 %3722, %v946_v49   ;;  %v1753_v49 = vmul.f32 %v5620_v56, %v1731_v16 }
 0x4d2   : > { %1376 = vperm.xlu1 %3721, %v1350_v4   ;;  %v4812_v54 = vpop.permute.xlu0 %554  ;;  %v2707_v4 = vsel %vm258_vm0, %v2678_v21, 0.0 }
 0x4d3   : > { %969 = vperm.xlu0 %3722, %v947_v3   ;;  %v2710_v3 = vsel %vm258_vm0, %v2680_v59, 0.0 }
 0x4d6   : > { %1381 = vperm.xlu1 %3721, %v1351_v51   ;;  %v4817_v19 = vpop.permute.xlu0 %559 }
 0x4d7   : > { %974 = vperm.xlu0 %3722, %v948_v31   ;;  %v2278_v31 = vpop.permute.xlu1 %2277 }
 0x4da   : > { %1386 = vperm.xlu1 %3721, %v1352_v30   ;;  %v4824_v51 = vpop.permute.xlu0 %564 }
 0x4db   : > { %979 = vperm.xlu0 %3722, %v949_v32   ;;  %v3078_v13 = vpop.permute.xlu1 %3077 }
 0x4dc   : > { %v3106_v37 = vsel %vm258_vm0, %v3078_v13, 0.0 }
 0x4de   : > { %v4827_v63 = vpop.permute.xlu0 %569 }
 0x4df   : > { %984 = vperm.xlu0 %3722, %v950_v8   ;;  %5622 = vst [vmem:[#allocation8_spill] sm:$0xff] %v4827_v63  ;;  %v3080_v35 = vpop.permute.xlu1 %3079 }
 0x4e0   : > { %v3109_v0 = vsel %vm258_vm0, %v3080_v35, 0.0 }
 0x4e2   : > { %v4829_v21 = vpop.permute.xlu0 %574 }
 0x4e3   : > { %989 = vperm.xlu0 %3722, %v951_v36   ;;  %5623 = vst [vmem:[#allocation4_spill] sm:$0xff] %v4829_v21  ;;  %v2308_v36 = vsel %vm258_vm0, %v2278_v31, 0.0 }
 0x4e6   : > { %v4831_v30 = vpop.permute.xlu0 %579 }
 0x4e7   : > { %1391 = vperm.xlu0 %3722, %v1353_v48   ;;  %5624 = vst [vmem:[#allocation9_spill] sm:$0xff] %v4831_v30 }
 0x4eb   : > { %1758 = vperm.xlu0 %3722, %v1748_v45  }
 0x4ef   : > { %1763 = vperm.xlu0 %3722, %v1749_v24  }
 0x4f0   : > { %v4833_v9 = vpop.xlane.xlu1 %2288 }
 0x4f3   : > { %1768 = vperm.xlu0 %3722, %v1750_v14  }
 0x4f7   : > { %1773 = vperm.xlu0 %3722, %v1751_v1   ;;  %v4869_v1 = vpop.eup %3831 }
 0x4fb   : > { %1778 = vperm.xlu0 %3722, %v1752_v22  }
 0x4fe   : > { %3104 = vadd.xlane.f32.xlu1 %v3103_v57 }
 0x4ff   : > { %1783 = vperm.xlu0 %3722, %v1753_v49   ;;  %v2121_v49 = vrot.slane %v4869_v1, %v4380_v60 }
 0x502   : > { %2708 = vadd.xlane.f32.xlu1 %v2707_v4 }
 0x503   : > { %1788 = vperm.xlu0 %3722, %v1754_v38  }
 0x506   : > { %2711 = vadd.xlane.f32.xlu1 %v2710_v3 }
 0x507   : > { %1793 = vperm.xlu0 %3722, %v1755_v26   ;;  %v2152_v26 = vmul.f32 %v4606_v61, %v2121_v49 }
 0x50a   : > { %3113 = vadd.xlane.f32.xlu1 %v3112_v17  ;;  %v2125_v17 = vrot.slane %v4869_v1, %v4279_v11 }
 0x50e   : > { %v4835_v32 = vpop.xlane.xlu0 %2291 }
 0x512   : > { %v4839_v8 = vpop.xlane.xlu0 %2294 }
 0x516   : > { %v4837_v33 = vpop.xlane.xlu1 %2690 }
 0x51a   : > { %v4844_v12 = vpop.xlane.xlu0 %2693 }
 0x51e   : > { %v4842_v59 = vpop.xlane.xlu1 %2297  ;;  %v4850_v39 = vpop.xlane.xlu0 %2696 }
 0x522   : > { %v4847_v29 = vpop.xlane.xlu1 %3092 }
 0x526   : > { %2705 = vadd.xlane.f32.xlu0 %v2704_v15  ;;  %v4855_v45 = vpop.xlane.xlu0 %3095 }
 0x52a   : > { %2309 = vadd.xlane.f32.xlu0 %v2308_v36  ;;  %v4852_v48 = vpop.xlane.xlu1 %2300 }
 0x52e   : > { %3107 = vadd.xlane.f32.xlu0 %v3106_v37  ;;  %v4859_v24 = vpop.xlane.xlu0 %2699 }
 0x532   : > { %3110 = vadd.xlane.f32.xlu0 %v3109_v0  ;;  %v4857_v55 = vpop.xlane.xlu1 %3098 }
 0x536   : > { %v4861_v40 = vpop.xlane.xlu1 %2702  ;;  %v4863_v6 = vpop.xlane.xlu0 %2303 }
 0x53a   : > { %v4865_v14 = vpop.xlane.xlu1 %2306  ;;  %v4867_v53 = vpop.xlane.xlu0 %3101 }
 0x53e   : > { %v1357_v47 = vpop.permute.xlu1 %1356 }
 0x53f   : > { %v1394_v22 = vmul.f32 %v1357_v47, %v5625_v25  ;;  %v2153_v47 = vmul.f32 %v4613_v42, %v2125_v17  ;;  %v2137_v42 = vrot.slane %v4869_v1, %v4312_v28 }
 0x541   : > { %v1403_v23 = vsel %vm1402_vm9, %v1394_v22, 0.0  ;;  %v2133_v22 = vrot.slane %v4869_v1, %v4284_v27 }
 0x542   : > { %v1404_v16 = vrot.slane %v1403_v23, 4  ;;  %v4873_v57 = vpop.permute.xlu0 %954  ;;  %v1362_v56 = vpop.permute.xlu1 %1361 }
 0x543   : > { %5626 = vst [vmem:[#allocation5_spill] sm:$0xff] %v4873_v57  ;;  %v1395_v7 = vmul.f32 %v1362_v56, %v5625_v25 }
 0x544   : > { %v1405_v4 = vadd.f32 %v1404_v16, %v1403_v23 }
 0x545   : > { %v1410_v38 = vsel %vm1402_vm9, %v1395_v7, 0.0 }
 0x546   : > { %v1406_v5 = vrot.slane %v1405_v4, 2  ;;  %v1411_v20 = vrot.slane %v1410_v38, 4  ;;  %v4879_v3 = vpop.permute.xlu0 %959  ;;  %v1367_v2 = vpop.permute.xlu1 %1366 }
 0x547   : > { %5627 = vst [vmem:[#allocation10_spill] sm:$0xff] %v4879_v3  ;;  %v1396_v31 = vmul.f32 %v1367_v2, %v5625_v25 }
 0x548   : > { %v1407_v13 = vadd.f32 %v1406_v5, %v1405_v4  ;;  %v1412_v35 = vadd.f32 %v1411_v20, %v1410_v38  ;;  %2170 = vperm.xlu0 %3722, %v2152_v26   ;;  %v2155_v20 = vmul.f32 %v4620_v46, %v2133_v22  ;;  %v2156_v46 = vmul.f32 %v4547_v41, %v2137_v42 }
 0x549   : > { %v1417_v15 = vsel %vm1402_vm9, %v1396_v31, 0.0  ;;  %v2141_v22 = vrot.slane %v4869_v1, %v4295_v52 }
 0x54a   : > { %v1413_v36 = vrot.slane %v1412_v35, 2  ;;  %v4886_v37 = vpop.permute.xlu0 %964  ;;  %v1372_v0 = vpop.permute.xlu1 %1371  ;;  %v1418_v61 = vrot.slane %v1417_v15, 4  ;;  %v1408_v16 = vrot.slane %v1407_v13, 1 }
 0x54b   : > { %5628 = vst [vmem:[#allocation6_spill] sm:$0xff] %v4886_v37  ;;  %v1397_v23 = vmul.f32 %v1372_v0, %v5625_v25 }
 0x54c   : > { %v1414_v56 = vadd.f32 %v1413_v36, %v1412_v35  ;;  %2175 = vperm.xlu0 %3722, %v2153_v47   ;;  %v1419_v49 = vadd.f32 %v1418_v61, %v1417_v15  ;;  %v1409_v31 = vadd.f32 %v1408_v16, %v1407_v13 }
 0x54d   : > { %v1424_v7 = vsel %vm1402_vm9, %v1397_v23, 0.0 }
 0x54e   : > { %v1415_v4 = vrot.slane %v1414_v56, 1  ;;  %v4893_v38 = vpop.permute.xlu0 %969  ;;  %v1377_v5 = vpop.permute.xlu1 %1376  ;;  %v1420_v2 = vrot.slane %v1419_v49, 2  ;;  %v1425_v26 = vrot.slane %v1424_v7, 4 }
 0x54f   : > { %5629 = vst [vmem:[#allocation7_spill] sm:$0xff] %v4893_v38  ;;  %v1398_v17 = vmul.f32 %v1377_v5, %v5625_v25 }
 0x550   : > { %v1416_v0 = vadd.f32 %v1415_v4, %v1414_v56  ;;  %2185 = vperm.xlu0 %3722, %v2155_v20   ;;  %v1421_v35 = vadd.f32 %v1420_v2, %v1419_v49  ;;  %v1426_v15 = vadd.f32 %v1425_v26, %v1424_v7  ;;  %v2157_v20 = vmul.f32 %v4623_v62, %v2141_v22 }
 0x551   : > { %v1431_v36 = vsel %vm1402_vm9, %v1398_v17, 0.0 }
 0x552   : > { %v3513_v47 = vsel %vm333_vm1, %v1416_v0, %v1409_v31  ;;  %v4901_v61 = vpop.permute.xlu0 %974  ;;  %v1382_v23 = vpop.permute.xlu1 %1381  ;;  %v1422_v30 = vrot.slane %v1421_v35, 1  ;;  %v1427_v38 = vrot.slane %v1426_v15, 2  ;;  %v1432_v5 = vrot.slane %v1431_v36, 4 }
 0x553   : > { %5630 = vst [vmem:[#allocation14_spill] sm:$0xff] %v4901_v61  ;;  %v1399_v13 = vmul.f32 %v1382_v23, %v5625_v25 }
 0x554   : > { %2190 = vperm.xlu0 %3722, %v2156_v46   ;;  %v1423_v16 = vadd.f32 %v1422_v30, %v1421_v35  ;;  %v1428_v56 = vadd.f32 %v1427_v38, %v1426_v15  ;;  %v1433_v49 = vadd.f32 %v1432_v5, %v1431_v36 }
 0x555   : > { %v1438_v26 = vsel %vm1402_vm9, %v1399_v13, 0.0 }
 0x556   : > { %v4907_v7 = vpop.permute.xlu0 %979  ;;  %v1387_v4 = vpop.permute.xlu1 %1386  ;;  %v3514_v2 = vsel %vm335_vm2, %v1423_v16, %v3513_v47  ;;  %v1429_v41 = vrot.slane %v1428_v56, 1  ;;  %v1434_v42 = vrot.slane %v1433_v49, 2  ;;  %v1439_v17 = vrot.slane %v1438_v26, 4 }
 0x557   : > { %5631 = vst [vmem:[#allocation11_spill] sm:$0xff] %v4907_v7  ;;  %v1400_v23 = vmul.f32 %v1387_v4, %v5625_v25 }
 0x558   : > { %2195 = vperm.xlu0 %3722, %v2157_v20   ;;  %v1430_v31 = vadd.f32 %v1429_v41, %v1428_v56  ;;  %v1435_v0 = vadd.f32 %v1434_v42, %v1433_v49  ;;  %v1440_v30 = vadd.f32 %v1439_v17, %v1438_v26 }
 0x559   : > { %v1445_v62 = vsel %vm1402_vm9, %v1400_v23, 0.0 }
 0x55a   : > { %v4913_v38 = vpop.permute.xlu0 %984  ;;  %v3515_v35 = vsel %vm337_vm3, %v1430_v31, %v3514_v2  ;;  %v1436_v15 = vrot.slane %v1435_v0, 1  ;;  %v1441_v36 = vrot.slane %v1440_v30, 2  ;;  %v1446_v46 = vrot.slane %v1445_v62, 4 }
 0x55b   : > { %5632 = vst [vmem:[#allocation12_spill] sm:$0xff] %v4913_v38 }
 0x55c   : > { %v1437_v47 = vadd.f32 %v1436_v15, %v1435_v0  ;;  %v1442_v22 = vadd.f32 %v1441_v36, %v1440_v30  ;;  %v1447_v16 = vadd.f32 %v1446_v46, %v1445_v62 }
 0x55e   : > { %v4917_v5 = vpop.permute.xlu0 %989  ;;  %v3516_v13 = vsel %vm339_vm4, %v1437_v47, %v3515_v35  ;;  %v1443_v56 = vrot.slane %v1442_v22, 1  ;;  %v1448_v49 = vrot.slane %v1447_v16, 2 }
 0x55f   : > { %5633 = vst [vmem:[#allocation13_spill] sm:$0xff] %v4917_v5 }
 0x560   : > { %v1444_v4 = vadd.f32 %v1443_v56, %v1442_v22  ;;  %v1449_v41 = vadd.f32 %v1448_v49, %v1447_v16 }
 0x562   : > { %v1392_v20 = vpop.permute.xlu0 %1391  ;;  %v3517_v42 = vsel %vm341_vm5, %v1444_v4, %v3516_v13  ;;  %v1450_v2 = vrot.slane %v1449_v41, 1 }
 0x563   : > { %v1401_v49 = vmul.f32 %v1392_v20, %v5625_v25 }
 0x564   : > { %v1451_v17 = vadd.f32 %v1450_v2, %v1449_v41 }
 0x566   : > { %v1759_v26 = vpop.permute.xlu0 %1758  ;;  %v4924_v23 = vsel %vm343_vm6, %v1451_v17, %v3517_v42 }
 0x567   : > { %v1796_v31 = vmul.f32 %v1759_v26, %v5625_v25 }
 0x569   : > { %v1805_v0 = vsel %vm1804_vm10, %v1796_v31, 0.0 }
 0x56a   : > { %v1806_v30 = vrot.slane %v1805_v0, 4  ;;  %v1764_v35 = vpop.permute.xlu0 %1763 }
 0x56b   : > { %v1797_v15 = vmul.f32 %v1764_v35, %v5625_v25 }
 0x56c   : > { %v1807_v62 = vadd.f32 %v1806_v30, %v1805_v0  ;;  %v1452_v30 = vsel %vm1402_vm9, %v1401_v49, 0.0  ;;  %vm3412_vm9 = vcmask 523744  }
 0x56d   : > { %v1812_v36 = vsel %vm1804_vm10, %v1797_v15, 0.0  ;;  %v1453_v38 = vrot.slane %v1452_v30, 4 }
 0x56e   : > { %v1813_v47 = vrot.slane %v1812_v36, 4  ;;  %v1769_v46 = vpop.permute.xlu0 %1768  ;;  %v1808_v22 = vrot.slane %v1807_v62, 2 }
 0x56f   : > { %v1798_v13 = vmul.f32 %v1769_v46, %v5625_v25  ;;  %v1454_v37 = vadd.f32 %v1453_v38, %v1452_v30 }
 0x570   : > { %v1814_v16 = vadd.f32 %v1813_v47, %v1812_v36  ;;  %v1809_v2 = vadd.f32 %v1808_v22, %v1807_v62 }
 0x571   : > { %v1819_v56 = vsel %vm1804_vm10, %v1798_v13, 0.0 }
 0x572   : > { %v1815_v4 = vrot.slane %v1814_v16, 2  ;;  %v1820_v41 = vrot.slane %v1819_v56, 4  ;;  %v1774_v42 = vpop.permute.xlu0 %1773  ;;  %v1810_v47 = vrot.slane %v1809_v2, 1 }
 0x573   : > { %v1799_v26 = vmul.f32 %v1774_v42, %v5625_v25 }
 0x574   : > { %v1816_v17 = vadd.f32 %v1815_v4, %v1814_v16  ;;  %v1821_v31 = vadd.f32 %v1820_v41, %v1819_v56  ;;  %v1811_v41 = vadd.f32 %v1810_v47, %v1809_v2 }
 0x575   : > { %v1826_v0 = vsel %vm1804_vm10, %v1799_v26, 0.0 }
 0x576   : > { %v1817_v35 = vrot.slane %v1816_v17, 1  ;;  %v1822_v15 = vrot.slane %v1821_v31, 2  ;;  %v1827_v46 = vrot.slane %v1826_v0, 4  ;;  %v1779_v36 = vpop.permute.xlu0 %1778 }
 0x577   : > { %v1800_v13 = vmul.f32 %v1779_v36, %v5625_v25 }
 0x578   : > { %v1823_v20 = vadd.f32 %v1822_v15, %v1821_v31  ;;  %v1828_v5 = vadd.f32 %v1827_v46, %v1826_v0  ;;  %v1818_v7 = vadd.f32 %v1817_v35, %v1816_v17 }
 0x579   : > { %v1833_v62 = vsel %vm1804_vm10, %v1800_v13, 0.0 }
 0x57a   : > { %v1824_v22 = vrot.slane %v1823_v20, 1  ;;  %v1829_v16 = vrot.slane %v1828_v5, 2  ;;  %v1834_v56 = vrot.slane %v1833_v62, 4  ;;  %v1784_v4 = vpop.permute.xlu0 %1783  ;;  %v3531_v57 = vsel %vm333_vm1, %v1818_v7, %v1811_v41 }
 0x57b   : > { %v1801_v49 = vmul.f32 %v1784_v4, %v5625_v25  ;;  %v1455_v4 = vrot.slane %v1454_v37, 2 }
 0x57c   : > { %v1825_v42 = vadd.f32 %v1824_v22, %v1823_v20  ;;  %v1830_v26 = vadd.f32 %v1829_v16, %v1828_v5  ;;  %v1835_v61 = vadd.f32 %v1834_v56, %v1833_v62 }
 0x57d   : > { %v1840_v31 = vsel %vm1804_vm10, %v1801_v49, 0.0  ;;  %v1456_v41 = vadd.f32 %v1455_v4, %v1454_v37 }
 0x57e   : > { %v3532_v0 = vsel %vm335_vm2, %v1825_v42, %v3531_v57  ;;  %v1831_v17 = vrot.slane %v1830_v26, 1  ;;  %v1836_v35 = vrot.slane %v1835_v61, 2  ;;  %v1841_v15 = vrot.slane %v1840_v31, 4  ;;  %v1789_v46 = vpop.permute.xlu0 %1788 }
 0x57f   : > { %v1802_v36 = vmul.f32 %v1789_v46, %v5625_v25 }
 0x580   : > { %v1832_v13 = vadd.f32 %v1831_v17, %v1830_v26  ;;  %v1837_v2 = vadd.f32 %v1836_v35, %v1835_v61  ;;  %v1842_v47 = vadd.f32 %v1841_v15, %v1840_v31  ;;  %v1457_v15 = vrot.slane %v1456_v41, 1 }
 0x581   : > { %v1847_v5 = vsel %vm1804_vm10, %v1802_v36, 0.0 }
 0x582   : > { %v3533_v38 = vsel %vm337_vm3, %v1832_v13, %v3532_v0  ;;  %v1838_v30 = vrot.slane %v1837_v2, 1  ;;  %v1843_v7 = vrot.slane %v1842_v47, 2  ;;  %v1848_v20 = vrot.slane %v1847_v5, 4  ;;  %v1794_v62 = vpop.permute.xlu0 %1793 }
 0x583   : > { %v1803_v57 = vmul.f32 %v1794_v62, %v5625_v25 }
 0x584   : > { %v1839_v22 = vadd.f32 %v1838_v30, %v1837_v2  ;;  %v1844_v16 = vadd.f32 %v1843_v7, %v1842_v47  ;;  %v1849_v56 = vadd.f32 %v1848_v20, %v1847_v5  ;;  %v1458_v47 = vadd.f32 %v1457_v15, %v1456_v41 }
 0x585   : > { %v1854_v49 = vsel %vm1804_vm10, %v1803_v57, 0.0  ;;  %v4958_v57 = vmul.f32 0.5, %v4844_v12  ;;  %v4973_v41 = vmul.f32 0.5, %v4859_v24  ;;  %v4979_v12 = vmul.f32 0.5, %v4842_v59 }
 0x586   : > { %v3534_v61 = vsel %vm339_vm4, %v1839_v22, %v3533_v38  ;;  %v1845_v42 = vrot.slane %v1844_v16, 1  ;;  %v1850_v26 = vrot.slane %v1849_v56, 2  ;;  %v1855_v31 = vrot.slane %v1854_v49, 4 }
 0x587   : > { %v4950_v38 = vsel %vm345_vm7, %v1458_v47, %v4924_v23  ;;  %v3105_v20 = vpop.xlane.xlu1 %3104  ;;  %v4961_v22 = vmul.f32 0.5, %v4835_v32  ;;  %v4970_v23 = vmul.f32 0.5, %v4837_v33  ;;  %v4982_v32 = vmul.f32 0.5, %v4861_v40 }
 0x588   : > { %v1846_v17 = vadd.f32 %v1845_v42, %v1844_v16  ;;  %v1851_v35 = vadd.f32 %v1850_v26, %v1849_v56  ;;  %v1856_v0 = vadd.f32 %v1855_v31, %v1854_v49  ;;  %5634 = vst [vmem:[#allocation2_spill] sm:$0xff] %v4950_v38  ;;  %v4964_v16 = vmul.f32 0.5, %v4850_v39 }
 0x589   : > { %v4967_v56 = vmul.f32 0.5, %v4839_v8  ;;  %v4976_v49 = vmul.f32 0.5, %v4833_v9  ;;  %v2736_v8 = vrot.slane %v4958_v57, %v4049_v34  ;;  %v2334_v33 = vrot.slane %v4961_v22, %v4049_v34 }
 0x58a   : > { %v3535_v46 = vsel %vm341_vm5, %v1846_v17, %v3534_v61  ;;  %v1852_v36 = vrot.slane %v1851_v35, 1  ;;  %v1857_v13 = vrot.slane %v1856_v0, 2  ;;  %v2740_v24 = vrot.slane %v4964_v16, %v4049_v34 }
 0x58b   : > { %v2709_v39 = vpop.xlane.xlu1 %2708  ;;  %v4991_v61 = vmul.f32 0.5, %v4852_v48  ;;  %v2338_v9 = vrot.slane %v4967_v56, %v4049_v34  ;;  %v2732_v59 = vrot.slane %v4970_v23, %v4049_v34  ;;  %v2744_v40 = vrot.slane %v4973_v41, %v4049_v34 }
 0x58c   : > { %v1853_v62 = vadd.f32 %v1852_v36, %v1851_v35  ;;  %v1858_v2 = vadd.f32 %v1857_v13, %v1856_v0  ;;  %v5000_v42 = vmul.f32 0.5, %v4863_v6  ;;  %v2330_v26 = vrot.slane %v4976_v49, %v4049_v34 }
 0x58d   : > { %v2342_v31 = vrot.slane %v4979_v12, %v4049_v34  ;;  %v2748_v48 = vrot.slane %v4982_v32, %v4049_v34  ;;  %v5009_v17 = vmul.f32 0.5, %v4865_v14  ;;  %v2761_v0 = vsel %vm333_vm1, %v2736_v8, %v2732_v59 }
 0x58e   : > { %v1859_v5 = vrot.slane %v1858_v2, 1  ;;  %v3536_v37 = vsel %vm343_vm6, %v1853_v62, %v3535_v46  ;;  %v2359_v6 = vsel %vm333_vm1, %v2334_v33, %v2330_v26  ;;  %v2762_v46 = vsel %vm335_vm2, %v2740_v24, %v2761_v0 }
 0x58f   : > { %v2346_v36 = vrot.slane %v4991_v61, %v4049_v34  ;;  %v5018_v13 = vmul.f32 0.5, %v2709_v39  ;;  %v2712_v62 = vpop.xlane.xlu1 %2711  ;;  %v2763_v14 = vsel %vm337_vm3, %v2744_v40, %v2762_v46  ;;  %v2350_v47 = vrot.slane %v5000_v42, %v4049_v34 }
 0x590   : > { %v1860_v4 = vadd.f32 %v1859_v5, %v1858_v2  ;;  %v2360_v2 = vsel %vm335_vm2, %v2338_v9, %v2359_v6  ;;  %v2764_v8 = vsel %vm339_vm4, %v2748_v48, %v2763_v14  ;;  %v2354_v39 = vrot.slane %v5009_v17, %v4049_v34 }
 0x591   : > { %v5034_v24 = vmul.f32 0.5, %v4857_v55  ;;  %v5036_v9 = vmul.f32 0.5, %v2712_v62  ;;  %v5042_v26 = vmul.f32 0.5, %v4847_v29  ;;  %v2756_v48 = vrot.slane %v5018_v13, %v4049_v34 }
 0x592   : > { %v4953_v30 = vsel %vm345_vm7, %v1860_v4, %v3536_v37  ;;  %v2361_v37 = vsel %vm337_vm3, %v2342_v31, %v2360_v2  ;;  %v5028_v4 = vmul.f32 0.5, %v4855_v45  ;;  %v5046_v31 = vmul.f32 0.5, %v4867_v53 }
 0x593   : > { %5635 = vst [vmem:[#allocation17_spill] sm:$0xff] %v4953_v30  ;;  %v2362_v45 = vsel %vm339_vm4, %v2346_v36, %v2361_v37  ;;  %v3142_v53 = vrot.slane %v5034_v24, %v4049_v34  ;;  %v3114_v62 = vpop.xlane.xlu1 %3113 }
 0x594   : > { %v2363_v0 = vsel %vm341_vm5, %v2350_v47, %v2362_v45  ;;  %v3138_v6 = vrot.slane %v5028_v4, %v4049_v34  ;;  %v3134_v47 = vrot.slane %v5042_v26, %v4049_v34 }
 0x595   : > { %v2364_v46 = vsel %vm343_vm6, %v2354_v39, %v2363_v0 }
 0x5af   : > { %v2706_v35 = vpop.xlane.xlu0 %2705 }
 0x5b0   : > { %v5012_v15 = vmul.f32 0.5, %v2706_v35  ;;  %v5050_v35 = vmul.f32 0.5, %v3105_v20  ;;  %v2760_v20 = vrot.slane %v5036_v9, %v4049_v34 }
 0x5b2   : > { %v2752_v5 = vrot.slane %v5012_v15, %v4049_v34 }
 0x5b3   : > { %v2310_v33 = vpop.xlane.xlu0 %2309 }
 0x5b4   : > { %v2765_v59 = vsel %vm341_vm5, %v2752_v5, %v2764_v8  ;;  %v5039_v40 = vmul.f32 0.5, %v2310_v33  ;;  %v3146_v5 = vrot.slane %v5046_v31, %v4049_v34  ;;  %v3150_v8 = vrot.slane %v5050_v35, %v4049_v34 }
 0x5b5   : > { %v2766_v36 = vsel %vm343_vm6, %v2756_v48, %v2765_v59  ;;  %v3163_v33 = vsel %vm333_vm1, %v3138_v6, %v3134_v47  ;;  %v5075_v59 = vmul.f32 0.5, %v3114_v62 }
 0x5b6   : > { %v2358_v55 = vrot.slane %v5039_v40, %v4049_v34  ;;  %v2767_v39 = vsel %vm345_vm7, %v2760_v20, %v2766_v36 }
 0x5b7   : > { %v3108_v29 = vpop.xlane.xlu0 %3107  ;;  %v3162_v6 = vrot.slane %v5075_v59, %v4049_v34 }
 0x5b8   : > { %v5063_v2 = vmul.f32 0.5, %v3108_v29  ;;  %v2365_v14 = vsel %vm345_vm7, %v2358_v55, %v2364_v46  ;;  %v3164_v55 = vsel %vm335_vm2, %v3142_v53, %v3163_v33  ;;  %v2769_v46 = vsel %vm348_vm8, %v2767_v39, -inf }
 0x5b9   : > { %v2367_v37 = vsel %vm348_vm8, %v2365_v14, -inf  ;;  %v3165_v29 = vsel %vm337_vm3, %v3146_v5, %v3164_v55  ;;  %v2113_v5 = vrot.slane %v4869_v1, %v3943_v10  ;;  %v2117_v39 = vrot.slane %v4869_v1, %v4267_v58 }
 0x5ba   : > { %2368 = vmax.xlane.f32.xlu1 %v2367_v37  ;;  %v3154_v45 = vrot.slane %v5063_v2, %v4049_v34  ;;  %v3166_v14 = vsel %vm339_vm4, %v3150_v8, %v3165_v29  ;;  %v5636_v37 = vld [vmem:[#allocation15_spill] sm:$0xff] }
 0x5bb   : > { %v3111_v48 = vpop.xlane.xlu0 %3110  ;;  %v2150_v8 = vmul.f32 %v5636_v37, %v2113_v5  ;;  %v2151_v33 = vmul.f32 %v4598_v18, %v2117_v39 }
 0x5bc   : > { %v5080_v0 = vmul.f32 0.5, %v3111_v48  ;;  %v3167_v20 = vsel %vm341_vm5, %v3154_v45, %v3166_v14  ;;  %v2129_v45 = vrot.slane %v4869_v1, %v4306_v50  ;;  %v5637_v48 = vld [vmem:[#allocation16_spill] sm:$0xff] }
 0x5be   : > { %v3158_v36 = vrot.slane %v5080_v0, %v4049_v34  ;;  %2770 = vmax.xlane.f32.xlu1 %v2769_v46  ;;  %v2154_v55 = vmul.f32 %v5637_v48, %v2129_v45 }
 0x5c0   : > { %v3168_v62 = vsel %vm343_vm6, %v3158_v36, %v3167_v20 }
 0x5c1   : > { %v3169_v53 = vsel %vm345_vm7, %v3162_v6, %v3168_v62 }
 0x5c2   : > { %v3171_v47 = vsel %vm348_vm8, %v3169_v53, -inf }
 0x5c3   : > { %3172 = vmax.xlane.f32.xlu1 %v3171_v47  ;;  %v2171_v29 = vpop.permute.xlu0 %2170 }
 0x5c7   : > { %v2176_v46 = vpop.permute.xlu0 %2175 }
 0x5cb   : > { %v2186_v39 = vpop.permute.xlu0 %2185 }
 0x5d4   : > { %2160 = vperm.xlu1 %3721, %v2150_v8  }
 0x5d8   : > { %2165 = vperm.xlu1 %3721, %v2151_v33  }
 0x5dc   : > { %2180 = vperm.xlu1 %3721, %v2154_v55  }
 0x643   : > { %v2369_v14 = vpop.xlane.xlu1 %2368 }
 0x644   : > { %v2374_v36 = vrot.slane %v2369_v14, %v3943_v10  ;;  %v2378_v6 = vrot.slane %v2369_v14, %v4267_v58  ;;  %v2382_v20 = vrot.slane %v2369_v14, %v4380_v60  ;;  %v2386_v62 = vrot.slane %v2369_v14, %v4279_v11 }
 0x645   : > { %v2390_v18 = vrot.slane %v2369_v14, %v4306_v50  ;;  %v2394_v5 = vrot.slane %v2369_v14, %v4284_v27  ;;  %v2398_v48 = vrot.slane %v2369_v14, %v4312_v28 }
 0x646   : > { %v2411_v53 = vsub.f32 %v4976_v49, %v2374_v36  ;;  %v2412_v1 = vsub.f32 %v4961_v22, %v2378_v6  ;;  %v2413_v47 = vsub.f32 %v4967_v56, %v2382_v20  ;;  %v2414_v37 = vsub.f32 %v4979_v12, %v2386_v62  ;;  %v2191_v62 = vpop.permute.xlu0 %2190 }
 0x647   : > { %v5112_v8 = vpop.xlane.xlu1 %2770  ;;  %v2415_v55 = vsub.f32 %v4991_v61, %v2390_v18  ;;  %v2402_v49 = vrot.slane %v2369_v14, %v4295_v52  ;;  %v2416_v22 = vsub.f32 %v5000_v42, %v2394_v5  ;;  %v2200_v36 = vmul.f32 %v2171_v29, %v5625_v25 }
 0x648   : > { %v2419_v33 = vmul.f32 1.442695, %v2411_v53  ;;  %v2421_v45 = vmul.f32 1.442695, %v2412_v1  ;;  %v2423_v7 = vmul.f32 1.442695, %v2413_v47  ;;  %v2201_v6 = vmul.f32 %v2176_v46, %v5625_v25 }
 0x649   : > { %v2425_v56 = vmul.f32 1.442695, %v2414_v37  ;;  %v2203_v20 = vmul.f32 %v2186_v39, %v5625_v25  ;;  %v2417_v61 = vsub.f32 %v5009_v17, %v2398_v48  ;;  %v2427_v18 = vmul.f32 1.442695, %v2415_v55 }
 0x64a   : > { %3833 = vpow2.f32 %v2419_v33  ;;  %v2418_v14 = vsub.f32 %v5039_v40, %v2402_v49  ;;  %v2429_v42 = vmul.f32 1.442695, %v2416_v22  ;;  %v2776_v53 = vrot.slane %v5112_v8, %v3943_v10 }
 0x64b   : > { %3835 = vpow2.f32 %v2421_v45  ;;  %v2221_v29 = vsel %vm2206_vm11, %v2200_v36, 0.0  ;;  %v2228_v47 = vsel %vm2206_vm11, %v2201_v6, 0.0  ;;  %v2204_v46 = vmul.f32 %v2191_v62, %v5625_v25 }
 0x64c   : > { %v5119_v12 = vpop.xlane.xlu1 %3172  ;;  %3837 = vpow2.f32 %v2423_v7  ;;  %v2242_v5 = vsel %vm2206_vm11, %v2203_v20, 0.0  ;;  %v2431_v17 = vmul.f32 1.442695, %v2417_v61  ;;  %v2780_v7 = vrot.slane %v5112_v8, %v4267_v58 }
 0x64d   : > { %3839 = vpow2.f32 %v2425_v56  ;;  %v2222_v40 = vrot.slane %v2221_v29, 4  ;;  %v2433_v37 = vmul.f32 1.442695, %v2418_v14  ;;  %v2813_v39 = vsub.f32 %v4970_v23, %v2776_v53 }
 0x64e   : > { %3841 = vpow2.f32 %v2427_v18  ;;  %v2229_v45 = vrot.slane %v2228_v47, 4  ;;  %v2243_v48 = vrot.slane %v2242_v5, 4  ;;  %v2249_v55 = vsel %vm2206_vm11, %v2204_v46, 0.0 }
 0x64f   : > { %3843 = vpow2.f32 %v2429_v42  ;;  %v2784_v49 = vrot.slane %v5112_v8, %v4380_v60  ;;  %v2814_v22 = vsub.f32 %v4958_v57, %v2780_v7  ;;  %v2223_v36 = vadd.f32 %v2222_v40, %v2221_v29 }
 0x650   : > { %v2161_v1 = vpop.permute.xlu1 %2160  ;;  %3845 = vpow2.f32 %v2431_v17  ;;  %v2821_v6 = vmul.f32 1.442695, %v2813_v39  ;;  %v2250_v62 = vrot.slane %v2249_v55, 4  ;;  %v2230_v61 = vadd.f32 %v2229_v45, %v2228_v47 }
 0x651   : > { %3847 = vpow2.f32 %v2433_v37  ;;  %v2244_v18 = vadd.f32 %v2243_v48, %v2242_v5  ;;  %v2815_v14 = vsub.f32 %v4964_v16, %v2784_v49  ;;  %v2823_v42 = vmul.f32 1.442695, %v2814_v22 }
 0x652   : > { %v2198_v57 = vmul.f32 %v2161_v1, %v5625_v25  ;;  %v2224_v17 = vrot.slane %v2223_v36, 2  ;;  %3849 = vpow2.f32 %v2821_v6  ;;  %v3178_v7 = vrot.slane %v5119_v12, %v3943_v10 }
 0x653   : > { %v2251_v5 = vadd.f32 %v2250_v62, %v2249_v55  ;;  %v2231_v37 = vrot.slane %v2230_v61, 2  ;;  %v2245_v48 = vrot.slane %v2244_v18, 2  ;;  %3851 = vpow2.f32 %v2823_v42 }
 0x654   : > { %v2166_v33 = vpop.permute.xlu1 %2165  ;;  %v2207_v16 = vsel %vm2206_vm11, %v2198_v57, 0.0  ;;  %v2825_v49 = vmul.f32 1.442695, %v2815_v14  ;;  %v3182_v55 = vrot.slane %v5119_v12, %v4267_v58  ;;  %v3215_v6 = vsub.f32 %v5042_v26, %v3178_v7 }
 0x655   : > { %v2199_v53 = vmul.f32 %v2166_v33, %v5625_v25  ;;  %v2208_v39 = vrot.slane %v2207_v16, 4  ;;  %v2252_v38 = vrot.slane %v2251_v5, 2  ;;  %v2232_v30 = vadd.f32 %v2231_v37, %v2230_v61 }
 0x656   : > { %v2246_v21 = vadd.f32 %v2245_v48, %v2244_v18  ;;  %v2788_v63 = vrot.slane %v5112_v8, %v4279_v11  ;;  %3853 = vpow2.f32 %v2825_v49  ;;  %v3216_v26 = vsub.f32 %v5028_v4, %v3182_v55 }
 0x657   : > { %v5138_v56 = vpop.eup %3833  ;;  %v2214_v40 = vsel %vm2206_vm11, %v2199_v53, 0.0  ;;  %v2209_v62 = vadd.f32 %v2208_v39, %v2207_v16  ;;  %v3223_v16 = vmul.f32 1.442695, %v3215_v6  ;;  %v2253_v37 = vadd.f32 %v2252_v38, %v2251_v5 }
 0x658   : > { %v5140_v20 = vpop.eup %3835  ;;  %2444 = vperm.xlu1 %3721, %v5138_v56   ;;  %v2181_v23 = vpop.permute.xlu1 %2180  ;;  %v2215_v33 = vrot.slane %v2214_v40, 4  ;;  %v2233_v39 = vrot.slane %v2232_v30, 1  ;;  %v2247_v48 = vrot.slane %v2246_v21, 1  ;;  %v2816_v4 = vsub.f32 %v4973_v41, %v2788_v63 }
 0x659   : > { %2447 = vperm.xlu0 %3722, %v5140_v20   ;;  %v2202_v29 = vmul.f32 %v2181_v23, %v5625_v25  ;;  %v5148_v46 = vpop.eup %3837  ;;  %v2210_v3 = vrot.slane %v2209_v62, 2  ;;  %3855 = vpow2.f32 %v3223_v16  ;;  %v3225_v49 = vmul.f32 1.442695, %v3216_v26 }
 0x65a   : > { %v5152_v47 = vpop.eup %3839  ;;  %v2216_v23 = vadd.f32 %v2215_v33, %v2214_v40  ;;  %v2254_v5 = vrot.slane %v2253_v37, 1  ;;  %v2792_v63 = vrot.slane %v5112_v8, %v4306_v50  ;;  %v2827_v26 = vmul.f32 1.442695, %v2816_v4 }
 0x65b   : > { %v2235_v1 = vsel %vm2206_vm11, %v2202_v29, 0.0  ;;  %v5161_v22 = vpop.eup %3841  ;;  %v2225_v29 = vadd.f32 %v2224_v17, %v2223_v36  ;;  %v2211_v36 = vadd.f32 %v2210_v3, %v2209_v62  ;;  %v3186_v3 = vrot.slane %v5119_v12, %v4380_v60 }
 0x65c   : > { %2450 = vperm.xlu1 %3721, %v5148_v46   ;;  %v2236_v45 = vrot.slane %v2235_v1, 4  ;;  %v5164_v53 = vpop.eup %3843  ;;  %v2217_v42 = vrot.slane %v2216_v23, 2  ;;  %3857 = vpow2.f32 %v3225_v49 }
 0x65d   : > { %2453 = vperm.xlu0 %3722, %v5152_v47   ;;  %v5171_v7 = vpop.eup %3845  ;;  %v2226_v61 = vrot.slane %v2225_v29, 1  ;;  %v2212_v18 = vrot.slane %v2211_v36, 1  ;;  %3859 = vpow2.f32 %v2827_v26 }
 0x65e   : > { %v2237_v57 = vadd.f32 %v2236_v45, %v2235_v1  ;;  %v2218_v17 = vadd.f32 %v2217_v42, %v2216_v23  ;;  %v5173_v1 = vpop.eup %3847 }
 0x65f   : > { %v2213_v55 = vadd.f32 %v2212_v18, %v2211_v36  ;;  %v5180_v62 = vpop.eup %3849  ;;  %v2227_v38 = vadd.f32 %v2226_v61, %v2225_v29  ;;  %v3217_v36 = vsub.f32 %v5034_v24, %v3186_v3  ;;  %v3190_v24 = vrot.slane %v5119_v12, %v4279_v11 }
 0x660   : > { %2456 = vperm.xlu1 %3721, %v5161_v22   ;;  %v2238_v14 = vrot.slane %v2237_v57, 2  ;;  %v2219_v33 = vrot.slane %v2218_v17, 1  ;;  %v5187_v16 = vpop.eup %3851 }
 0x661   : > { %2459 = vperm.xlu0 %3722, %v5164_v53   ;;  %v3227_v18 = vmul.f32 1.442695, %v3217_v36 }
 0x662   : > { %v2239_v40 = vadd.f32 %v2238_v14, %v2237_v57  ;;  %v2220_v6 = vadd.f32 %v2219_v33, %v2218_v17  ;;  %v2234_v57 = vadd.f32 %v2233_v39, %v2232_v30  ;;  %v2248_v14 = vadd.f32 %v2247_v48, %v2246_v21 }
 0x663   : > { %v2255_v17 = vadd.f32 %v2254_v5, %v2253_v37  ;;  %v5197_v61 = vpop.eup %3853  ;;  %v2817_v39 = vsub.f32 %v4982_v32, %v2792_v63  ;;  %v3194_v33 = vrot.slane %v5119_v12, %v4306_v50  ;;  %3861 = vpow2.f32 %v3227_v18 }
 0x664   : > { %2462 = vperm.xlu1 %3721, %v5171_v7   ;;  %v2240_v45 = vrot.slane %v2239_v40, 1  ;;  %v3549_v42 = vsel %vm333_vm1, %v2220_v6, %v2213_v55  ;;  %v2800_v32 = vrot.slane %v5112_v8, %v4312_v28  ;;  %v2804_v5 = vrot.slane %v5112_v8, %v4295_v52 }
 0x665   : > { %2465 = vperm.xlu0 %3722, %v5173_v1   ;;  %v3550_v41 = vsel %vm335_vm2, %v2227_v38, %v3549_v42  ;;  %v2829_v37 = vmul.f32 1.442695, %v2817_v39  ;;  %v3219_v4 = vsub.f32 %v5050_v35, %v3194_v33  ;;  %v3206_v42 = vrot.slane %v5119_v12, %v4295_v52 }
 0x666   : > { %v2241_v23 = vadd.f32 %v2240_v45, %v2239_v40  ;;  %v3551_v29 = vsel %vm337_vm3, %v2234_v57, %v3550_v41  ;;  %v3218_v45 = vsub.f32 %v5046_v31, %v3190_v24  ;;  %v5206_v48 = vpop.eup %3855  ;;  %v2819_v55 = vsub.f32 %v5018_v13, %v2800_v32 }
 0x667   : > { %3863 = vpow2.f32 %v2829_v37  ;;  %v3198_v31 = vrot.slane %v5119_v12, %v4284_v27  ;;  %v3231_v6 = vmul.f32 1.442695, %v3219_v4  ;;  %v2820_v13 = vsub.f32 %v5036_v9, %v2804_v5 }
 0x668   : > { %v3552_v30 = vsel %vm339_vm4, %v2241_v23, %v3551_v29  ;;  %v3229_v3 = vmul.f32 1.442695, %v3218_v45  ;;  %v2833_v35 = vmul.f32 1.442695, %v2819_v55  ;;  %v3222_v26 = vsub.f32 %v5075_v59, %v3206_v42 }
 0x669   : > { %2846 = vperm.xlu0 %3722, %v5180_v62   ;;  %v3553_v21 = vsel %vm341_vm5, %v2248_v14, %v3552_v30  ;;  %v5212_v49 = vpop.eup %3857  ;;  %v3220_v23 = vsub.f32 %v5063_v2, %v3198_v31  ;;  %v2835_v41 = vmul.f32 1.442695, %v2820_v13 }
 0x66a   : > { %v5195_v40 = vsel %vm343_vm6, %v2255_v17, %v3553_v21  ;;  %3865 = vpow2.f32 %v3229_v3  ;;  %v5218_v38 = vpop.eup %3859  ;;  %v3237_v36 = vmul.f32 1.442695, %v3222_v26  ;;  %v5252_v21 = vpop.permute.xlu0 %2195  ;;  %v3202_v26 = vrot.slane %v5119_v12, %v4312_v28 }
 0x66b   : > { %5638 = vst [vmem:[#allocation15_spill] sm:$0xff] %v5195_v40  ;;  %3867 = vpow2.f32 %v3231_v6  ;;  %v3233_v14 = vmul.f32 1.442695, %v3220_v23  ;;  %v2796_v6 = vrot.slane %v5112_v8, %v4284_v27 }
 0x66c   : > { %3869 = vpow2.f32 %v2833_v35 }
 0x66d   : > { %2849 = vperm.xlu0 %3722, %v5187_v16   ;;  %3871 = vpow2.f32 %v3233_v14 }
 0x66e   : > { %3873 = vpow2.f32 %v2835_v41  ;;  %v2818_v41 = vsub.f32 %v5012_v15, %v2796_v6 }
 0x66f   : > { %3875 = vpow2.f32 %v3237_v36 }
 0x670   : > { %v5224_v57 = vpop.eup %3861 }
 0x671   : > { %2852 = vperm.xlu0 %3722, %v5197_v61  }
 0x674   : > { %v5230_v63 = vpop.eup %3863 }
 0x675   : > { %3248 = vperm.xlu0 %3722, %v5206_v48  }
 0x677   : > { %v5234_v2 = vpop.eup %3865 }
 0x678   : > { %v5237_v9 = vpop.eup %3867 }
 0x679   : > { %3251 = vperm.xlu0 %3722, %v5212_v49   ;;  %5639 = vst [vmem:[#allocation16_spill] sm:$0xff] %v5237_v9  ;;  %v5240_v29 = vpop.eup %3869 }
 0x67a   : > { %v5243_v17 = vpop.eup %3871 }
 0x67b   : > { %5640 = vst [vmem:[#allocation18_spill] sm:$0xff] %v5243_v17  ;;  %v5246_v59 = vpop.eup %3873 }
 0x67c   : > { %5641 = vst [vmem:[#allocation19_spill] sm:$0xff] %v5246_v59  ;;  %v5249_v30 = vpop.eup %3875 }
 0x67d   : > { %2855 = vperm.xlu0 %3722, %v5218_v38   ;;  %5642 = vst [vmem:[#allocation20_spill] sm:$0xff] %v5249_v30 }
 0x681   : > { %3254 = vperm.xlu0 %3722, %v5224_v57  }
 0x685   : > { %2858 = vperm.xlu0 %3722, %v5230_v63  }
 0x689   : > { %3257 = vperm.xlu0 %3722, %v5234_v2  }
 0x68d   : > { %3260 = vperm.xlu0 %3722, %v5237_v9  }
 0x691   : > { %2864 = vperm.xlu0 %3722, %v5240_v29  }
 0x695   : > { %3263 = vperm.xlu0 %3722, %v5243_v17  }
 0x699   : > { %2867 = vperm.xlu0 %3722, %v5246_v59  }
 0x69d   : > { %3269 = vperm.xlu0 %3722, %v5249_v30  }
 0x6d3   : > { %v2445_v39 = vpop.permute.xlu1 %2444 }
 0x6d4   : > { %v2448_v24 = vpop.permute.xlu0 %2447  ;;  %v2470_v37 = vrot.slane %v2445_v39, %v4049_v34 }
 0x6d5   : > { %v2474_v18 = vrot.slane %v2448_v24, %v4049_v34 }
 0x6d7   : > { %v2451_v33 = vpop.permute.xlu1 %2450  ;;  %v2499_v4 = vsel %vm333_vm1, %v2474_v18, %v2470_v37 }
 0x6d8   : > { %v2454_v45 = vpop.permute.xlu0 %2453  ;;  %v2478_v32 = vrot.slane %v2451_v33, %v4049_v34  ;;  %v2831_v33 = vmul.f32 1.442695, %v2818_v41 }
 0x6d9   : > { %v2482_v3 = vrot.slane %v2454_v45, %v4049_v34  ;;  %v3221_v45 = vsub.f32 %v5080_v0, %v3202_v26 }
 0x6da   : > { %v2500_v55 = vsel %vm335_vm2, %v2478_v32, %v2499_v4  ;;  %3877 = vpow2.f32 %v2831_v33 }
 0x6db   : > { %v2457_v31 = vpop.permute.xlu1 %2456  ;;  %v2501_v13 = vsel %vm337_vm3, %v2482_v3, %v2500_v55  ;;  %v3235_v15 = vmul.f32 1.442695, %v3221_v45 }
 0x6dc   : > { %v2460_v5 = vpop.permute.xlu0 %2459  ;;  %v2486_v35 = vrot.slane %v2457_v31, %v4049_v34 }
 0x6dd   : > { %v2490_v23 = vrot.slane %v2460_v5, %v4049_v34  ;;  %3879 = vpow2.f32 %v3235_v15 }
 0x6de   : > { %v2502_v42 = vsel %vm339_vm4, %v2486_v35, %v2501_v13 }
 0x6df   : > { %v2463_v14 = vpop.permute.xlu1 %2462  ;;  %v2503_v24 = vsel %vm341_vm5, %v2490_v23, %v2502_v42 }
 0x6e0   : > { %v2466_v36 = vpop.permute.xlu0 %2465  ;;  %v2494_v39 = vrot.slane %v2463_v14, %v4049_v34 }
 0x6e1   : > { %v2498_v8 = vrot.slane %v2466_v36, %v4049_v34 }
 0x6e2   : > { %v2504_v18 = vsel %vm343_vm6, %v2494_v39, %v2503_v24 }
 0x6e3   : > { %v2505_v37 = vsel %vm345_vm7, %v2498_v8, %v2504_v18 }
 0x6e4   : > { %v2507_v32 = vsel %vm348_vm8, %v2505_v37, 0.0  ;;  %v2847_v3 = vpop.permute.xlu0 %2846 }
 0x6e5   : > { %2508 = vadd.xlane.f32.xlu1 %v2507_v32  ;;  %v2872_v8 = vrot.slane %v2847_v3, %v4049_v34 }
 0x6e7   : > { %v5276_v12 = vpop.eup %3877 }
 0x6e8   : > { %v2850_v55 = vpop.permute.xlu0 %2849 }
 0x6e9   : > { %v2876_v26 = vrot.slane %v2850_v55, %v4049_v34 }
 0x6ea   : > { %v5279_v4 = vpop.eup %3879 }
 0x6eb   : > { %5643 = vst [vmem:[#allocation21_spill] sm:$0xff] %v5279_v4  ;;  %v2901_v45 = vsel %vm333_vm1, %v2876_v26, %v2872_v8 }
 0x6ec   : > { %v2853_v31 = vpop.permute.xlu0 %2852 }
 0x6ed   : > { %v2880_v36 = vrot.slane %v2853_v31, %v4049_v34 }
 0x6ef   : > { %v2902_v55 = vsel %vm335_vm2, %v2880_v36, %v2901_v45 }
 0x6f0   : > { %v3249_v6 = vpop.permute.xlu0 %3248 }
 0x6f1   : > { %v3274_v32 = vrot.slane %v3249_v6, %v4049_v34 }
 0x6f4   : > { %v3252_v5 = vpop.permute.xlu0 %3251 }
 0x6f5   : > { %v3278_v24 = vrot.slane %v3252_v5, %v4049_v34 }
 0x6f6   : > { %2861 = vperm.xlu1 %3721, %v5276_v12  }
 0x6f7   : > { %v3303_v3 = vsel %vm333_vm1, %v3278_v24, %v3274_v32 }
 0x6f8   : > { %v2856_v0 = vpop.permute.xlu0 %2855 }
 0x6f9   : > { %v2884_v18 = vrot.slane %v2856_v0, %v4049_v34 }
 0x6fa   : > { %3266 = vperm.xlu1 %3721, %v5279_v4  }
 0x6fb   : > { %v2903_v5 = vsel %vm337_vm3, %v2884_v18, %v2902_v55 }
 0x6fc   : > { %v3255_v35 = vpop.permute.xlu0 %3254 }
 0x6fd   : > { %v3282_v15 = vrot.slane %v3255_v35, %v4049_v34 }
 0x6ff   : > { %v3304_v35 = vsel %vm335_vm2, %v3282_v15, %v3303_v3 }
 0x700   : > { %v2859_v23 = vpop.permute.xlu0 %2858 }
 0x701   : > { %v2888_v33 = vrot.slane %v2859_v23, %v4049_v34 }
 0x703   : > { %v2904_v23 = vsel %vm339_vm4, %v2888_v33, %v2903_v5 }
 0x704   : > { %v3258_v13 = vpop.permute.xlu0 %3257 }
 0x705   : > { %v3286_v31 = vrot.slane %v3258_v13, %v4049_v34 }
 0x707   : > { %v3305_v24 = vsel %vm337_vm3, %v3286_v31, %v3304_v35 }
 0x708   : > { %v3261_v42 = vpop.permute.xlu0 %3260 }
 0x709   : > { %v3290_v0 = vrot.slane %v3261_v42, %v4049_v34 }
 0x70c   : > { %v2865_v14 = vpop.permute.xlu0 %2864 }
 0x70d   : > { %v2896_v26 = vrot.slane %v2865_v14, %v4049_v34 }
 0x710   : > { %v3264_v41 = vpop.permute.xlu0 %3263 }
 0x711   : > { %v3294_v6 = vrot.slane %v3264_v41, %v4049_v34 }
 0x714   : > { %v2868_v37 = vpop.permute.xlu0 %2867 }
 0x715   : > { %v2900_v13 = vrot.slane %v2868_v37, %v4049_v34 }
 0x718   : > { %v3270_v36 = vpop.permute.xlu0 %3269 }
 0x76e   : > { %v2509_v39 = vpop.xlane.xlu1 %2508 }
 0x76f   : > { %3881 = vrcp.f32 %v2509_v39  ;;  %v3302_v39 = vrot.slane %v3270_v36, %v4049_v34 }
 0x772   : > { %v2862_v40 = vpop.permute.xlu1 %2861 }
 0x773   : > { %v2892_v4 = vrot.slane %v2862_v40, %v4049_v34  ;;  %v3306_v40 = vsel %vm339_vm4, %v3290_v0, %v3305_v24  ;;  %v585_v24 = vmul.f32 %v4817_v19, %v5625_v25  ;;  %v5646_v19 = vld [vmem:[#allocation10_spill] sm:$0xff] }
 0x774   : > { %v3307_v41 = vsel %vm341_vm5, %v3294_v6, %v3306_v40 }
 0x775   : > { %v2905_v8 = vsel %vm341_vm5, %v2892_v4, %v2904_v23  ;;  %v612_v40 = vsel %vm590_vm12, %v585_v24, 0.0 }
 0x776   : > { %v3267_v18 = vpop.permute.xlu1 %3266  ;;  %v2906_v42 = vsel %vm343_vm6, %v2896_v26, %v2905_v8  ;;  %v583_v8 = vmul.f32 %v4806_v44, %v5625_v25  ;;  %v586_v44 = vmul.f32 %v4824_v51, %v5625_v25 }
 0x777   : > { %v3298_v33 = vrot.slane %v3267_v18, %v4049_v34  ;;  %v2907_v14 = vsel %vm345_vm7, %v2900_v13, %v2906_v42 }
 0x778   : > { %v2909_v37 = vsel %vm348_vm8, %v2907_v14, 0.0  ;;  %v5645_v14 = vld [vmem:[#allocation4_spill] sm:$0xff]  ;;  %v619_v51 = vsel %vm590_vm12, %v586_v44, 0.0 }
 0x779   : > { %2910 = vadd.xlane.f32.xlu1 %v2909_v37  ;;  %v3308_v4 = vsel %vm343_vm6, %v3298_v33, %v3307_v41  ;;  %v5644_v33 = vld [vmem:[#allocation8_spill] sm:$0xff]  ;;  %v588_v41 = vmul.f32 %v5645_v14, %v5625_v25 }
 0x77a   : > { %v3309_v45 = vsel %vm345_vm7, %v3302_v39, %v3308_v4  ;;  %v993_v39 = vmul.f32 %v5646_v19, %v5625_v25  ;;  %v613_v4 = vrot.slane %v612_v40, 4 }
 0x77b   : > { %v3311_v32 = vsel %vm348_vm8, %v3309_v45, 0.0  ;;  %v5647_v45 = vld [vmem:[#allocation5_spill] sm:$0xff] }
 0x77c   : > { %3312 = vadd.xlane.f32.xlu0 %v3311_v32  ;;  %v3882_v15 = vpop.eup %3881  ;;  %v992_v32 = vmul.f32 %v5647_v45, %v5625_v25 }
 0x77d   : > { %v2519_v55 = vrot.slane %v3882_v15, %v4267_v58  ;;  %v2523_v3 = vrot.slane %v3882_v15, %v4380_v60  ;;  %v2531_v5 = vrot.slane %v3882_v15, %v4306_v50  ;;  %v2515_v0 = vrot.slane %v3882_v15, %v3943_v10 }
 0x77e   : > { %v2539_v6 = vrot.slane %v3882_v15, %v4312_v28  ;;  %v2527_v35 = vrot.slane %v3882_v15, %v4279_v11 }
 0x77f   : > { %v2553_v31 = vmul.f32 %v5140_v20, %v2519_v55  ;;  %v2554_v34 = vmul.f32 %v5148_v46, %v2523_v3  ;;  %v2556_v23 = vmul.f32 %v5161_v22, %v2531_v5  ;;  %v2552_v26 = vmul.f32 %v5138_v56, %v2515_v0 }
 0x780   : > { %v2558_v20 = vmul.f32 %v5171_v7, %v2539_v6  ;;  %v2555_v13 = vmul.f32 %v5152_v47, %v2527_v35  ;;  %v2535_v46 = vrot.slane %v3882_v15, %v4284_v27  ;;  %v2543_v22 = vrot.slane %v3882_v15, %v4295_v52  ;;  %v5648_v15 = vld [vmem:[#allocation6_spill] sm:$0xff] }
 0x781   : > { %v584_v7 = vmul.f32 %v4812_v54, %v5625_v25  ;;  %v582_v47 = vmul.f32 %v4802_v43, %v5625_v25  ;;  %v587_v43 = vmul.f32 %v5644_v33, %v5625_v25  ;;  %v994_v55 = vmul.f32 %v5648_v15, %v5625_v25 }
 0x782   : > { %v2557_v36 = vmul.f32 %v5164_v53, %v2535_v46  ;;  %v2559_v56 = vmul.f32 %v5173_v1, %v2543_v22  ;;  %v598_v53 = vsel %vm590_vm12, %v583_v8, 0.0  ;;  %v633_v5 = vsel %vm590_vm12, %v588_v41, 0.0  ;;  %v5649_v22 = vld [vmem:[#allocation7_spill] sm:$0xff] }
 0x783   : > { %v605_v18 = vsel %vm590_vm12, %v584_v7, 0.0  ;;  %v591_v1 = vsel %vm590_vm12, %v582_v47, 0.0  ;;  %v599_v42 = vrot.slane %v598_v53, 4  ;;  %v1008_v0 = vsel %vm1000_vm13, %v993_v39, 0.0  ;;  %v5650_v47 = vld [vmem:[#allocation9_spill] sm:$0xff] }
 0x784   : > { %v606_v54 = vrot.slane %v605_v18, 4  ;;  %v592_v37 = vrot.slane %v591_v1, 4  ;;  %v620_v6 = vrot.slane %v619_v51, 4  ;;  %v1001_v35 = vsel %vm1000_vm13, %v992_v32, 0.0 }
 0x785   : > { %v634_v46 = vrot.slane %v633_v5, 4  ;;  %v589_v24 = vmul.f32 %v5650_v47, %v5625_v25 }
 0x786   : > { %v607_v3 = vadd.f32 %v606_v54, %v605_v18 }
 0x787   : > { %v635_v54 = vadd.f32 %v634_v46, %v633_v5  ;;  %v640_v19 = vsel %vm590_vm12, %v589_v24, 0.0 }
 0x788   : > { %v608_v7 = vrot.slane %v607_v3, 2 }
 0x78a   : > { %2567 = vperm.xlu1 %3721, %v2553_v31   ;;  %v600_v31 = vadd.f32 %v599_v42, %v598_v53  ;;  %v1002_v53 = vrot.slane %v1001_v35, 4  ;;  %v609_v41 = vadd.f32 %v608_v7, %v607_v3 }
 0x78c   : > { %v601_v8 = vrot.slane %v600_v31, 2  ;;  %v1003_v39 = vadd.f32 %v1002_v53, %v1001_v35 }
 0x78e   : > { %2572 = vperm.xlu1 %3721, %v2554_v34   ;;  %v626_v34 = vsel %vm590_vm12, %v587_v43, 0.0  ;;  %v602_v14 = vadd.f32 %v601_v8, %v600_v31  ;;  %v1004_v31 = vrot.slane %v1003_v39, 2 }
 0x790   : > { %v603_v5 = vrot.slane %v602_v14, 1 }
 0x792   : > { %2582 = vperm.xlu1 %3721, %v2556_v23   ;;  %2562 = vperm.xlu0 %3722, %v2552_v26   ;;  %v593_v23 = vadd.f32 %v592_v37, %v591_v1  ;;  %v614_v26 = vadd.f32 %v613_v4, %v612_v40  ;;  %v621_v40 = vadd.f32 %v620_v6, %v619_v51  ;;  %v5651_v4 = vld [vmem:[#allocation14_spill] sm:$0xff]  ;;  %v636_v51 = vrot.slane %v635_v54, 2 }
 0x793   : > { %v996_v45 = vmul.f32 %v5651_v4, %v5625_v25  ;;  %v641_v6 = vrot.slane %v640_v19, 4  ;;  %v604_v24 = vadd.f32 %v603_v5, %v602_v14  ;;  %v1005_v4 = vadd.f32 %v1004_v31, %v1003_v39 }
 0x794   : > { %v594_v1 = vrot.slane %v593_v23, 2  ;;  %v615_v42 = vrot.slane %v614_v26, 2 }
 0x795   : > { %v1029_v46 = vsel %vm1000_vm13, %v996_v45, 0.0  ;;  %v642_v53 = vadd.f32 %v641_v6, %v640_v19  ;;  %v1006_v19 = vrot.slane %v1005_v4, 1 }
 0x796   : > { %2592 = vperm.xlu1 %3721, %v2558_v20   ;;  %2577 = vperm.xlu0 %3722, %v2555_v13   ;;  %v1015_v20 = vsel %vm1000_vm13, %v994_v55, 0.0  ;;  %v627_v13 = vrot.slane %v626_v34, 4  ;;  %v595_v32 = vadd.f32 %v594_v1, %v593_v23  ;;  %v616_v15 = vadd.f32 %v615_v42, %v614_v26 }
 0x797   : > { %v1016_v18 = vrot.slane %v1015_v20, 4  ;;  %v637_v26 = vadd.f32 %v636_v51, %v635_v54  ;;  %v1007_v6 = vadd.f32 %v1006_v19, %v1005_v4 }
 0x798   : > { %v628_v44 = vadd.f32 %v627_v13, %v626_v34  ;;  %v596_v35 = vrot.slane %v595_v32, 1 }
 0x799   : > { %v1017_v37 = vadd.f32 %v1016_v18, %v1015_v20  ;;  %v617_v20 = vrot.slane %v616_v15, 1  ;;  %v1030_v18 = vrot.slane %v1029_v46, 4  ;;  %v638_v52 = vrot.slane %v637_v26, 1 }
 0x79a   : > { %2587 = vperm.xlu0 %3722, %v2557_v36   ;;  %v1009_v36 = vrot.slane %v1008_v0, 4  ;;  %v629_v47 = vrot.slane %v628_v44, 2  ;;  %v597_v17 = vadd.f32 %v596_v35, %v595_v32  ;;  %v5653_v35 = vld [vmem:[#allocation12_spill] sm:$0xff] }
 0x79b   : > { %v1018_v3 = vrot.slane %v1017_v37, 2  ;;  %v618_v59 = vadd.f32 %v617_v20, %v616_v15  ;;  %v1031_v54 = vadd.f32 %v1030_v18, %v1029_v46  ;;  %v998_v20 = vmul.f32 %v5653_v35, %v5625_v25 }
 0x79c   : > { %v1010_v33 = vadd.f32 %v1009_v36, %v1008_v0  ;;  %v610_v0 = vrot.slane %v609_v41, 1  ;;  %v630_v23 = vadd.f32 %v629_v47, %v628_v44  ;;  %v643_v44 = vrot.slane %v642_v53, 2 }
 0x79d   : > { %v1019_v30 = vadd.f32 %v1018_v3, %v1017_v37  ;;  %v5652_v37 = vld [vmem:[#allocation11_spill] sm:$0xff]  ;;  %v5380_v47 = vadd.f32 %v638_v52, %v637_v26  ;;  %v1032_v5 = vrot.slane %v1031_v54, 2  ;;  %v5654_v26 = vld [vmem:[#allocation13_spill] sm:$0xff]  ;;  %v2205_v35 = vmul.f32 %v5252_v21, %v5625_v25 }
 0x79e   : > { %2597 = vperm.xlu0 %3722, %v2559_v56   ;;  %v995_v56 = vmul.f32 %v5649_v22, %v5625_v25  ;;  %v622_v22 = vrot.slane %v621_v40, 2  ;;  %v1011_v34 = vrot.slane %v1010_v33, 2  ;;  %v611_v42 = vadd.f32 %v610_v0, %v609_v41 }
 0x79f   : > { %v631_v9 = vrot.slane %v630_v23, 1  ;;  %v997_v32 = vmul.f32 %v5652_v37, %v5625_v25 }
 0x7a0   : > { %v1022_v43 = vsel %vm1000_vm13, %v995_v56, 0.0  ;;  %v623_v56 = vadd.f32 %v622_v22, %v621_v40  ;;  %v1012_v8 = vadd.f32 %v1011_v34, %v1010_v33  ;;  %v3477_v40 = vsel %vm333_vm1, %v604_v24, %v597_v17 }
 0x7a1   : > { %v1023_v55 = vrot.slane %v1022_v43, 4  ;;  %v3478_v14 = vsel %vm335_vm2, %v611_v42, %v3477_v40  ;;  %v5378_v22 = vadd.f32 %v631_v9, %v630_v23  ;;  %v5382_v34 = vadd.f32 %v643_v44, %v642_v53 }
 0x7a2   : > { %v5372_v41 = vsel %vm337_vm3, %v618_v59, %v3478_v14  ;;  %v1036_v52 = vsel %vm1000_vm13, %v997_v32, 0.0  ;;  %v1033_v53 = vadd.f32 %v1032_v5, %v1031_v54  ;;  %v1043_v54 = vsel %vm1000_vm13, %v998_v20, 0.0 }
 0x7a3   : > { %v1024_v36 = vadd.f32 %v1023_v55, %v1022_v43  ;;  %v1013_v43 = vrot.slane %v1012_v8, 1  ;;  %v1020_v55 = vrot.slane %v1019_v30, 1 }
 0x7a5   : > { %v1025_v45 = vrot.slane %v1024_v36, 2  ;;  %v1014_v17 = vadd.f32 %v1013_v43, %v1012_v8  ;;  %v1021_v31 = vadd.f32 %v1020_v55, %v1019_v30  ;;  %v999_v8 = vmul.f32 %v5654_v26, %v5625_v25 }
 0x7a7   : > { %v1026_v39 = vadd.f32 %v1025_v45, %v1024_v36  ;;  %v3495_v23 = vsel %vm333_vm1, %v1014_v17, %v1007_v6  ;;  %v1037_v45 = vrot.slane %v1036_v52, 4  ;;  %v1050_v19 = vsel %vm1000_vm13, %v999_v8, 0.0 }
 0x7a8   : > { %v5408_v44 = vsel %vm335_vm2, %v1021_v31, %v3495_v23 }
 0x7a9   : > { %v1027_v9 = vrot.slane %v1026_v39, 1 }
 0x802   : > { %v2911_v13 = vpop.xlane.xlu1 %2910 }
 0x803   : > { %3883 = vrcp.f32 %v2911_v13  ;;  %v624_v13 = vrot.slane %v623_v56, 1 }
 0x805   : > { %v3313_v7 = vpop.xlane.xlu0 %3312  ;;  %v5376_v15 = vadd.f32 %v624_v13, %v623_v56 }
 0x806   : > { %3885 = vrcp.f32 %v3313_v7  ;;  %v2568_v1 = vpop.permute.xlu1 %2567 }
 0x807   : > { %v2601_v0 = vmul.f32 %v2568_v1, %v5625_v25 }
 0x809   : > { %v2616_v18 = vsel %vm2608_vm14, %v2601_v0, 0.0  ;;  %v5419_v0 = vadd.f32 %v1037_v45, %v1036_v52 }
 0x80a   : > { %v2573_v33 = vpop.permute.xlu1 %2572  ;;  %v2617_v55 = vrot.slane %v2616_v18, 4 }
 0x80b   : > { %v2602_v3 = vmul.f32 %v2573_v33, %v5625_v25  ;;  %v5410_v33 = vadd.f32 %v1027_v9, %v1026_v39  ;;  %v1051_v9 = vrot.slane %v1050_v19, 4 }
 0x80c   : > { %v2618_v20 = vadd.f32 %v2617_v55, %v2616_v18 }
 0x80d   : > { %v2563_v51 = vpop.permute.xlu0 %2562  ;;  %v2623_v13 = vsel %vm2608_vm14, %v2602_v3, 0.0  ;;  %v1044_v3 = vrot.slane %v1043_v54, 4 }
 0x80e   : > { %v2600_v59 = vmul.f32 %v2563_v51, %v5625_v25  ;;  %v2583_v56 = vpop.permute.xlu1 %2582  ;;  %v2624_v17 = vrot.slane %v2623_v13, 4 }
 0x80f   : > { %v2604_v37 = vmul.f32 %v2583_v56, %v5625_v25 }
 0x810   : > { %v5387_v46 = vpop.eup %3883  ;;  %v2609_v36 = vsel %vm2608_vm14, %v2600_v59, 0.0 }
 0x811   : > { %v2578_v30 = vpop.permute.xlu0 %2577  ;;  %v2921_v7 = vrot.slane %v5387_v46, %v4267_v58  ;;  %v2917_v24 = vrot.slane %v5387_v46, %v3943_v10  ;;  %v2610_v1 = vrot.slane %v2609_v36, 4  ;;  %v2925_v31 = vrot.slane %v5387_v46, %v4380_v60 }
 0x812   : > { %v2603_v42 = vmul.f32 %v2578_v30, %v5625_v25  ;;  %v2593_v39 = vpop.permute.xlu1 %2592  ;;  %v2929_v30 = vrot.slane %v5387_v46, %v4279_v11 }
 0x813   : > { %v5402_v4 = vpop.eup %3885  ;;  %v2955_v43 = vmul.f32 %v5187_v16, %v2921_v7  ;;  %v2954_v40 = vmul.f32 %v5180_v62, %v2917_v24  ;;  %v1034_v16 = vrot.slane %v1033_v53, 1  ;;  %v2611_v51 = vadd.f32 %v2610_v1, %v2609_v36 }
 0x814   : > { %v2630_v14 = vsel %vm2608_vm14, %v2603_v42, 0.0  ;;  %v3319_v62 = vrot.slane %v5402_v4, %v3943_v10  ;;  %v2637_v36 = vsel %vm2608_vm14, %v2604_v37, 0.0  ;;  %v2606_v56 = vmul.f32 %v2593_v39, %v5625_v25 }
 0x815   : > { %v2588_v32 = vpop.permute.xlu0 %2587  ;;  %2969 = vperm.xlu0 %3722, %v2955_v43   ;;  %2964 = vperm.xlu1 %3721, %v2954_v40   ;;  %v2631_v59 = vrot.slane %v2630_v14, 4  ;;  %v2956_v23 = vmul.f32 %v5197_v61, %v2925_v31  ;;  %v2612_v26 = vrot.slane %v2611_v51, 2  ;;  %v5433_v7 = vadd.f32 %v1034_v16, %v1033_v53 }
 0x816   : > { %v2605_v5 = vmul.f32 %v2588_v32, %v5625_v25  ;;  %v3356_v6 = vmul.f32 %v5206_v48, %v3319_v62  ;;  %v2625_v48 = vadd.f32 %v2624_v17, %v2623_v13  ;;  %v3323_v18 = vrot.slane %v5402_v4, %v4267_v58 }
 0x817   : > { %v2632_v21 = vadd.f32 %v2631_v59, %v2630_v14  ;;  %v1045_v1 = vadd.f32 %v1044_v3, %v1043_v54  ;;  %v2638_v42 = vrot.slane %v2637_v36, 4  ;;  %v2957_v61 = vmul.f32 %v5218_v38, %v2929_v30 }
 0x818   : > { %v2644_v10 = vsel %vm2608_vm14, %v2605_v5, 0.0  ;;  %v1052_v13 = vadd.f32 %v1051_v9, %v1050_v19  ;;  %v2256_v43 = vsel %vm2206_vm11, %v2205_v35, 0.0  ;;  %v2619_v40 = vrot.slane %v2618_v20, 2 }
 0x819   : > { %v2598_v52 = vpop.permute.xlu0 %2597  ;;  %3366 = vperm.xlu0 %3722, %v3356_v6   ;;  %v2645_v24 = vrot.slane %v2644_v10, 4  ;;  %2974 = vperm.xlu1 %3721, %v2956_v23   ;;  %v2651_v55 = vsel %vm2608_vm14, %v2606_v56, 0.0  ;;  %v2626_v53 = vrot.slane %v2625_v48, 2  ;;  %v2613_v37 = vadd.f32 %v2612_v26, %v2611_v51 }
 0x81a   : > { %v2607_v8 = vmul.f32 %v2598_v52, %v5625_v25  ;;  %v3357_v14 = vmul.f32 %v5212_v49, %v3323_v18  ;;  %v2933_v58 = vrot.slane %v5387_v46, %v4306_v50  ;;  %v2633_v54 = vrot.slane %v2632_v21, 2 }
 0x81b   : > { %v2646_v32 = vadd.f32 %v2645_v24, %v2644_v10  ;;  %v3327_v38 = vrot.slane %v5402_v4, %v4380_v60  ;;  %v2639_v19 = vadd.f32 %v2638_v42, %v2637_v36  ;;  %v2652_v16 = vrot.slane %v2651_v55, 4 }
 0x81c   : > { %v2658_v45 = vsel %vm2608_vm14, %v2607_v8, 0.0  ;;  %v2958_v17 = vmul.f32 %v5230_v63, %v2933_v58  ;;  %v2937_v51 = vrot.slane %v5387_v46, %v4284_v27  ;;  %v1039_v39 = vrot.slane %v5419_v0, 2 }
 0x81d   : > { %2979 = vperm.xlu0 %3722, %v2957_v61   ;;  %v2659_v62 = vrot.slane %v2658_v45, 4  ;;  %3371 = vperm.xlu1 %3721, %v3357_v14   ;;  %v1046_v49 = vrot.slane %v1045_v1, 2  ;;  %v1053_v5 = vrot.slane %v1052_v13, 2  ;;  %v2620_v59 = vadd.f32 %v2619_v40, %v2618_v20 }
 0x81e   : > { %v2257_v6 = vrot.slane %v2256_v43, 4  ;;  %v2627_v31 = vadd.f32 %v2626_v53, %v2625_v48  ;;  %v3358_v3 = vmul.f32 %v5224_v57, %v3327_v38  ;;  %v3331_v60 = vrot.slane %v5402_v4, %v4279_v11 }
 0x81f   : > { %v2614_v9 = vrot.slane %v2613_v37, 1  ;;  %v2634_v35 = vadd.f32 %v2633_v54, %v2632_v21  ;;  %v2647_v10 = vrot.slane %v2646_v32, 2  ;;  %v2660_v63 = vadd.f32 %v2659_v62, %v2658_v45 }
 0x820   : > { %v2640_v36 = vrot.slane %v2639_v19, 2  ;;  %v2653_v56 = vadd.f32 %v2652_v16, %v2651_v55  ;;  %v2959_v52 = vmul.f32 %v5276_v12, %v2937_v51  ;;  %v2941_v20 = vrot.slane %v5387_v46, %v4312_v28 }
 0x821   : > { %2984 = vperm.xlu0 %3722, %v2958_v17   ;;  %3376 = vperm.xlu1 %3721, %v3358_v3   ;;  %v1040_v23 = vadd.f32 %v1039_v39, %v5419_v0  ;;  %v1047_v48 = vadd.f32 %v1046_v49, %v1045_v1  ;;  %v1054_v26 = vadd.f32 %v1053_v5, %v1052_v13  ;;  %v2621_v57 = vrot.slane %v2620_v59, 1  ;;  %v5655_v1 = vld [vmem:[#allocation3_spill] sm:$0xff] }
 0x822   : > { %v2258_v8 = vadd.f32 %v2257_v6, %v2256_v43  ;;  %v2628_v30 = vrot.slane %v2627_v31, 1  ;;  %v3359_v11 = vmul.f32 %v5234_v2, %v3331_v60  ;;  %v3335_v21 = vrot.slane %v5402_v4, %v4306_v50  ;;  %v5656_v50 = vld [vmem:[#allocation16_spill] sm:$0xff]  ;;  %v5658_v6 = vld [vmem:[#allocation18_spill] sm:$0xff] }
 0x823   : > { %v2615_v24 = vadd.f32 %v2614_v9, %v2613_v37  ;;  %v2635_v18 = vrot.slane %v2634_v35, 1  ;;  %v2648_v42 = vadd.f32 %v2647_v10, %v2646_v32  ;;  %v2661_v12 = vrot.slane %v2660_v63, 2 }
 0x824   : > { %v2641_v45 = vadd.f32 %v2640_v36, %v2639_v19  ;;  %v2654_v61 = vrot.slane %v2653_v56, 2  ;;  %v2960_v0 = vmul.f32 %v5240_v29, %v2941_v20  ;;  %v2945_v13 = vrot.slane %v5387_v46, %v5655_v1  ;;  %v5657_v46 = vld [vmem:[#allocation19_spill] sm:$0xff]  ;;  %v5659_v36 = vld [vmem:[#allocation20_spill] sm:$0xff] }
 0x825   : > { %2989 = vperm.xlu0 %3722, %v2959_v52   ;;  %3381 = vperm.xlu1 %3721, %v3359_v11   ;;  %v1041_v43 = vrot.slane %v1040_v23, 1  ;;  %v1048_v40 = vrot.slane %v1047_v48, 1  ;;  %v1055_v55 = vrot.slane %v1054_v26, 1  ;;  %v2622_v53 = vadd.f32 %v2621_v57, %v2620_v59 }
 0x826   : > { %v2259_v2 = vrot.slane %v2258_v8, 2  ;;  %v2629_v14 = vadd.f32 %v2628_v30, %v2627_v31  ;;  %v3360_v37 = vmul.f32 %v5656_v50, %v3335_v21  ;;  %v3339_v58 = vrot.slane %v5402_v4, %v4284_v27  ;;  %v5661_v21 = vld [vmem:[#allocation17_spill] sm:$0xff] }
 0x827   : > { %v3567_v54 = vsel %vm333_vm1, %v2622_v53, %v2615_v24  ;;  %v2636_v32 = vadd.f32 %v2635_v18, %v2634_v35  ;;  %v2649_v62 = vrot.slane %v2648_v42, 1  ;;  %v2662_v29 = vadd.f32 %v2661_v12, %v2660_v63  ;;  %v5662_v24 = vld [vmem:[#allocation2_spill] sm:$0xff] }
 0x828   : > { %v2642_v38 = vrot.slane %v2641_v45, 1  ;;  %v2655_v19 = vadd.f32 %v2654_v61, %v2653_v56  ;;  %v2961_v16 = vmul.f32 %v5657_v46, %v2945_v13  ;;  %v3347_v17 = vrot.slane %v5402_v4, %v5655_v1  ;;  %v5664_v61 = vld [vmem:[#allocation15_spill] sm:$0xff] }
 0x829   : > { %2994 = vperm.xlu0 %3722, %v2960_v0   ;;  %3386 = vperm.xlu1 %3721, %v3360_v37   ;;  %v645_v51 = vrot.slane %v5382_v34, 1  ;;  %v3497_v39 = vsel %vm337_vm3, %v5410_v33, %v5408_v44  ;;  %v1042_v27 = vadd.f32 %v1041_v43, %v1040_v23  ;;  %v1049_v49 = vadd.f32 %v1048_v40, %v1047_v48  ;;  %v5660_v23 = vld [vmem:[#allocation21_spill] sm:$0xff] }
 0x82a   : > { %v1056_v5 = vadd.f32 %v1055_v55, %v1054_v26  ;;  %v3568_v59 = vsel %vm335_vm2, %v2629_v14, %v3567_v54  ;;  %v3361_v31 = vmul.f32 %v5658_v6, %v3339_v58  ;;  %v3343_v3 = vrot.slane %v5402_v4, %v4312_v28 }
 0x82b   : > { %v2260_v60 = vadd.f32 %v2259_v2, %v2258_v8  ;;  %v3569_v9 = vsel %vm337_vm3, %v2636_v32, %v3568_v59  ;;  %v2650_v35 = vadd.f32 %v2649_v62, %v2648_v42  ;;  %v2663_v10 = vrot.slane %v2662_v29, 1 }
 0x82c   : > { %v3498_v63 = vsel %vm339_vm4, %v5433_v7, %v3497_v39  ;;  %v2643_v44 = vadd.f32 %v2642_v38, %v2641_v45  ;;  %v2656_v33 = vrot.slane %v2655_v19, 1  ;;  %v3363_v56 = vmul.f32 %v5659_v36, %v3347_v17 }
 0x82d   : > { %2999 = vperm.xlu0 %3722, %v2961_v16   ;;  %3391 = vperm.xlu1 %3721, %v3361_v31   ;;  %v3480_v52 = vsel %vm339_vm4, %v5376_v15, %v5372_v41  ;;  %v646_v20 = vadd.f32 %v645_v51, %v5382_v34  ;;  %v3499_v28 = vsel %vm341_vm5, %v1042_v27, %v3498_v63  ;;  %v2261_v57 = vrot.slane %v2260_v60, 1 }
 0x82e   : > { %v3570_v4 = vsel %vm339_vm4, %v2643_v44, %v3569_v9  ;;  %v3362_v48 = vmul.f32 %v5660_v23, %v3343_v3  ;;  %v3481_v7 = vsel %vm341_vm5, %v5378_v22, %v3480_v52  ;;  %v3500_v26 = vsel %vm343_vm6, %v1049_v49, %v3499_v28 }
 0x82f   : > { %v3571_v8 = vsel %vm341_vm5, %v2650_v35, %v3570_v4  ;;  %v2664_v30 = vadd.f32 %v2663_v10, %v2662_v29  ;;  %v3501_v41 = vsel %vm345_vm7, %v1056_v5, %v3500_v26  ;;  %v2657_v15 = vadd.f32 %v2656_v33, %v2655_v19 }
 0x830   : > { %v3482_v34 = vsel %vm343_vm6, %v5380_v47, %v3481_v7  ;;  %v5663_v22 = vpack.i.bf16 %v5661_v21, %v5662_v24  ;;  %v2262_v12 = vadd.f32 %v2261_v57, %v2260_v60 }
 0x831   : > { %3401 = vperm.xlu0 %3722, %v3363_v56   ;;  %3396 = vperm.xlu1 %3721, %v3362_v48   ;;  %v3483_v11 = vsel %vm345_vm7, %v646_v20, %v3482_v34  ;;  %v3572_v42 = vsel %vm343_vm6, %v2657_v15, %v3571_v8 }
 0x832   : > { %v3723_v18 = vpack.i.bf16 %v3501_v41, %v3483_v11  ;;  %v3573_v45 = vsel %vm345_vm7, %v2664_v30, %v3572_v42  ;;  %v3555_v0 = vsel %vm345_vm7, %v2262_v12, %v5664_v61 }
 0x833   : > { %v3733_v47 = vpack.i.bf16 %v3573_v45, %v3555_v0 }
 0x835   : > { %3729 = vrot.lane.b32.xlu0 %v5663_v22, %s3904_s25  ;;  %3724 = vrot.lane.b32.xlu1 %v3723_v18, %s3904_s25 }
 0x839   : > { %3734 = vrot.lane.b32.xlu1 %v3733_v47, %s3904_s25 }
 0x890   : > { %v2970_v1 = vpop.permute.xlu0 %2969  ;;  %v2965_v13 = vpop.permute.xlu1 %2964 }
 0x891   : > { %v3003_v43 = vmul.f32 %v2970_v1, %v5625_v25  ;;  %v3002_v40 = vmul.f32 %v2965_v13, %v5625_v25 }
 0x893   : > { %v3018_v55 = vsel %vm3010_vm15, %v3003_v43, 0.0  ;;  %v3011_v2 = vsel %vm3010_vm15, %v3002_v40, 0.0 }
 0x894   : > { %v3367_v53 = vpop.permute.xlu0 %3366  ;;  %v2975_v14 = vpop.permute.xlu1 %2974  ;;  %v3019_v50 = vrot.slane %v3018_v55, 4  ;;  %v3012_v58 = vrot.slane %v3011_v2, 4 }
 0x895   : > { %v3404_v37 = vmul.f32 %v3367_v53, %v5625_v25  ;;  %v3004_v29 = vmul.f32 %v2975_v14, %v5625_v25 }
 0x896   : > { %v3020_v32 = vadd.f32 %v3019_v50, %v3018_v55  ;;  %v3013_v19 = vadd.f32 %v3012_v58, %v3011_v2 }
 0x897   : > { %v3413_v62 = vsel %vm3412_vm9, %v3404_v37, 0.0  ;;  %v3025_v27 = vsel %vm3010_vm15, %v3004_v29, 0.0 }
 0x898   : > { %v2980_v54 = vpop.permute.xlu0 %2979  ;;  %v3372_v38 = vpop.permute.xlu1 %3371  ;;  %v3414_v51 = vrot.slane %v3413_v62, 4  ;;  %v3021_v39 = vrot.slane %v3020_v32, 2  ;;  %v3014_v5 = vrot.slane %v3013_v19, 2  ;;  %v3026_v35 = vrot.slane %v3025_v27, 4 }
 0x899   : > { %v3005_v46 = vmul.f32 %v2980_v54, %v5625_v25  ;;  %v3405_v16 = vmul.f32 %v3372_v38, %v5625_v25 }
 0x89a   : > { %v3415_v9 = vadd.f32 %v3414_v51, %v3413_v62  ;;  %v3022_v10 = vadd.f32 %v3021_v39, %v3020_v32  ;;  %v3015_v36 = vadd.f32 %v3014_v5, %v3013_v19  ;;  %v3027_v7 = vadd.f32 %v3026_v35, %v3025_v27 }
 0x89b   : > { %v3032_v6 = vsel %vm3010_vm15, %v3005_v46, 0.0  ;;  %v3420_v31 = vsel %vm3412_vm9, %v3405_v16, 0.0 }
 0x89c   : > { %v2985_v17 = vpop.permute.xlu0 %2984  ;;  %v3377_v49 = vpop.permute.xlu1 %3376  ;;  %v3033_v56 = vrot.slane %v3032_v6, 4  ;;  %v3421_v52 = vrot.slane %v3420_v31, 4  ;;  %v3416_v48 = vrot.slane %v3415_v9, 2  ;;  %v3023_v57 = vrot.slane %v3022_v10, 1 }
 0x89d   : > { %v3006_v59 = vmul.f32 %v2985_v17, %v5625_v25  ;;  %v3406_v3 = vmul.f32 %v3377_v49, %v5625_v25  ;;  %v3016_v34 = vrot.slane %v3015_v36, 1  ;;  %v3028_v0 = vrot.slane %v3027_v7, 2 }
 0x89e   : > { %v3034_v11 = vadd.f32 %v3033_v56, %v3032_v6  ;;  %v3422_v21 = vadd.f32 %v3421_v52, %v3420_v31  ;;  %v3417_v61 = vadd.f32 %v3416_v48, %v3415_v9  ;;  %v5531_v55 = vadd.f32 %v3023_v57, %v3022_v10 }
 0x89f   : > { %v3427_v63 = vsel %vm3412_vm9, %v3406_v3, 0.0  ;;  %v3039_v20 = vsel %vm3010_vm15, %v3006_v59, 0.0  ;;  %v5533_v53 = vadd.f32 %v3016_v34, %v3015_v36  ;;  %v3029_v62 = vadd.f32 %v3028_v0, %v3027_v7 }
 0x8a0   : > { %v2990_v60 = vpop.permute.xlu0 %2989  ;;  %v3382_v33 = vpop.permute.xlu1 %3381  ;;  %v3428_v28 = vrot.slane %v3427_v63, 4  ;;  %v3040_v8 = vrot.slane %v3039_v20, 4  ;;  %v3035_v2 = vrot.slane %v3034_v11, 2  ;;  %v3423_v14 = vrot.slane %v3422_v21, 2 }
 0x8a1   : > { %v3007_v44 = vmul.f32 %v2990_v60, %v5625_v25  ;;  %v3407_v4 = vmul.f32 %v3382_v33, %v5625_v25  ;;  %v3418_v32 = vrot.slane %v3417_v61, 1 }
 0x8a2   : > { %v3429_v22 = vadd.f32 %v3428_v28, %v3427_v63  ;;  %v3041_v47 = vadd.f32 %v3040_v8, %v3039_v20  ;;  %v3036_v27 = vadd.f32 %v3035_v2, %v3034_v11  ;;  %v3424_v49 = vadd.f32 %v3423_v14, %v3422_v21 }
 0x8a3   : > { %v3046_v26 = vsel %vm3010_vm15, %v3007_v44, 0.0  ;;  %v3434_v30 = vsel %vm3412_vm9, %v3407_v4, 0.0  ;;  %v3030_v44 = vrot.slane %v3029_v62, 1  ;;  %v3419_v21 = vadd.f32 %v3418_v32, %v3417_v61 }
 0x8a4   : > { %v2995_v23 = vpop.permute.xlu0 %2994  ;;  %v3387_v15 = vpop.permute.xlu1 %3386  ;;  %v3435_v24 = vrot.slane %v3434_v30, 4  ;;  %v3047_v18 = vrot.slane %v3046_v26, 4  ;;  %v3430_v50 = vrot.slane %v3429_v22, 2  ;;  %v3042_v19 = vrot.slane %v3041_v47, 2 }
 0x8a5   : > { %v3008_v41 = vmul.f32 %v2995_v23, %v5625_v25  ;;  %v3408_v12 = vmul.f32 %v3387_v15, %v5625_v25  ;;  %v3425_v23 = vrot.slane %v3424_v49, 1  ;;  %v3037_v57 = vrot.slane %v3036_v27, 1 }
 0x8a6   : > { %v3436_v1 = vadd.f32 %v3435_v24, %v3434_v30  ;;  %v3048_v37 = vadd.f32 %v3047_v18, %v3046_v26  ;;  %v3431_v6 = vadd.f32 %v3430_v50, %v3429_v22  ;;  %v3043_v33 = vadd.f32 %v3042_v19, %v3041_v47 }
 0x8a7   : > { %v3053_v42 = vsel %vm3010_vm15, %v3008_v41, 0.0  ;;  %v3441_v43 = vsel %vm3412_vm9, %v3408_v12, 0.0  ;;  %v3031_v47 = vadd.f32 %v3030_v44, %v3029_v62 }
 0x8a8   : > { %v3000_v45 = vpop.permute.xlu0 %2999  ;;  %v3054_v13 = vrot.slane %v3053_v42, 4  ;;  %v3392_v40 = vpop.permute.xlu1 %3391  ;;  %v3442_v58 = vrot.slane %v3441_v43, 4  ;;  %v3437_v46 = vrot.slane %v3436_v1, 2  ;;  %v3049_v31 = vrot.slane %v3048_v37, 2 }
 0x8a9   : > { %v3009_v54 = vmul.f32 %v3000_v45, %v5625_v25  ;;  %v3409_v38 = vmul.f32 %v3392_v40, %v5625_v25  ;;  %v3432_v8 = vrot.slane %v3431_v6, 1  ;;  %v3044_v24 = vrot.slane %v3043_v33, 1 }
 0x8aa   : > { %v3055_v29 = vadd.f32 %v3054_v13, %v3053_v42  ;;  %v3443_v16 = vadd.f32 %v3442_v58, %v3441_v43  ;;  %v3438_v36 = vadd.f32 %v3437_v46, %v3436_v1  ;;  %v3050_v48 = vadd.f32 %v3049_v31, %v3048_v37 }
 0x8ab   : > { %v3060_v17 = vsel %vm3010_vm15, %v3009_v54, 0.0  ;;  %v3448_v59 = vsel %vm3412_vm9, %v3409_v38, 0.0  ;;  %v3426_v42 = vadd.f32 %v3425_v23, %v3424_v49  ;;  %v3433_v1 = vadd.f32 %v3432_v8, %v3431_v6 }
 0x8ac   : > { %v3402_v51 = vpop.permute.xlu0 %3401  ;;  %v3397_v39 = vpop.permute.xlu1 %3396  ;;  %v3061_v5 = vrot.slane %v3060_v17, 4  ;;  %v3444_v3 = vrot.slane %v3443_v16, 2  ;;  %v3449_v60 = vrot.slane %v3448_v59, 4  ;;  %v3056_v9 = vrot.slane %v3055_v29, 2 }
 0x8ad   : > { %v3411_v10 = vmul.f32 %v3402_v51, %v5625_v25  ;;  %v3410_v63 = vmul.f32 %v3397_v39, %v5625_v25  ;;  %v3439_v15 = vrot.slane %v3438_v36, 1  ;;  %v3051_v12 = vrot.slane %v3050_v48, 1 }
 0x8ae   : > { %v3062_v35 = vadd.f32 %v3061_v5, %v3060_v17  ;;  %v3450_v56 = vadd.f32 %v3449_v60, %v3448_v59  ;;  %v3445_v52 = vadd.f32 %v3444_v3, %v3443_v16  ;;  %v3057_v30 = vadd.f32 %v3056_v9, %v3055_v29 }
 0x8af   : > { %v3462_v28 = vsel %vm3412_vm9, %v3411_v10, 0.0  ;;  %v3455_v4 = vsel %vm3412_vm9, %v3410_v63, 0.0  ;;  %v3038_v40 = vadd.f32 %v3037_v57, %v3036_v27  ;;  %v3440_v2 = vadd.f32 %v3439_v15, %v3438_v36 }
 0x8b0   : > { %v3063_v20 = vrot.slane %v3062_v35, 2  ;;  %v3451_v7 = vrot.slane %v3450_v56, 2  ;;  %v3463_v26 = vrot.slane %v3462_v28, 4  ;;  %v3456_v41 = vrot.slane %v3455_v4, 4  ;;  %v3725_v10 = vpop.permute.xlu1 %3724  ;;  %v3730_v63 = vpop.permute.xlu0 %3729 }
 0x8b1   : > { %v3446_v22 = vrot.slane %v3445_v52, 1  ;;  %v3058_v13 = vrot.slane %v3057_v30, 1  ;;  %v3585_v37 = vsel %vm333_vm1, %v5531_v55, %v5533_v53  ;;  %v3045_v61 = vadd.f32 %v3044_v24, %v3043_v33 }
 0x8b2   : > { %v3064_v25 = vadd.f32 %v3063_v20, %v3062_v35  ;;  %v3452_v34 = vadd.f32 %v3451_v7, %v3450_v56  ;;  %v3464_v11 = vadd.f32 %v3463_v26, %v3462_v28  ;;  %v3457_v18 = vadd.f32 %v3456_v41, %v3455_v4 }
 0x8b3   : > { %v3447_v58 = vadd.f32 %v3446_v22, %v3445_v52  ;;  %v3603_v32 = vsel %vm333_vm1, %v3426_v42, %v3419_v21  ;;  %v3052_v29 = vadd.f32 %v3051_v12, %v3050_v48  ;;  %v3586_v62 = vsel %vm335_vm2, %v3031_v47, %v3585_v37 }
 0x8b4   : > { %v3453_v45 = vrot.slane %v3452_v34, 1  ;;  %v3465_v0 = vrot.slane %v3464_v11, 2  ;;  %v3458_v43 = vrot.slane %v3457_v18, 2  ;;  %v3065_v14 = vrot.slane %v3064_v25, 1  ;;  %v3735_v52 = vpop.permute.xlu1 %3734 }
 0x8b5   : > { %v3604_v46 = vsel %vm335_vm2, %v3433_v1, %v3603_v32  ;;  %v3059_v16 = vadd.f32 %v3058_v13, %v3057_v30  ;;  %v3587_v51 = vsel %vm337_vm3, %v3038_v40, %v3586_v62  ;;  %v3727_v44 = vunpack.i.h.bf16 %v3725_v10 }
 0x8b6   : > { %v3466_v50 = vadd.f32 %v3465_v0, %v3464_v11  ;;  %v3459_v54 = vadd.f32 %v3458_v43, %v3457_v18  ;;  %v3454_v38 = vadd.f32 %v3453_v45, %v3452_v34  ;;  %v3605_v39 = vsel %vm337_vm3, %v3440_v2, %v3604_v46 }
 0x8b7   : > { %v3066_v27 = vadd.f32 %v3065_v14, %v3064_v25  ;;  %v3588_v53 = vsel %vm339_vm4, %v3045_v61, %v3587_v51  ;;  %v3606_v49 = vsel %vm339_vm4, %v3447_v58, %v3605_v39  ;;  %v3726_v33 = vunpack.i.l.bf16 %v3725_v10 }
 0x8b8   : > { %v3467_v19 = vrot.slane %v3466_v50, 1  ;;  %v3460_v17 = vrot.slane %v3459_v54, 1  ;;  %v3589_v59 = vsel %vm341_vm5, %v3052_v29, %v3588_v53  ;;  %v3607_v6 = vsel %vm341_vm5, %v3454_v38, %v3606_v49 }
 0x8b9   : > { %v3590_v31 = vsel %vm343_vm6, %v3059_v16, %v3589_v59  ;;  %v3731_v36 = vunpack.i.l.bf16 %v3730_v63  ;;  %v3613_v56 = vsel %vm258_vm0, %v3726_v33, %v3727_v44  ;;  %vm3615_vm1 = vcmask 97280  }
 0x8ba   : > { %v3468_v55 = vadd.f32 %v3467_v19, %v3466_v50  ;;  %v3461_v5 = vadd.f32 %v3460_v17, %v3459_v54  ;;  %v3591_v60 = vsel %vm345_vm7, %v3066_v27, %v3590_v31  ;;  %v3732_v28 = vunpack.i.h.bf16 %v3730_v63 }
 0x8bb   : > { %v3614_v20 = vsel %vm348_vm8, %v3613_v56, %v3731_v36  ;;  %v3736_v4 = vunpack.i.l.bf16 %v3735_v52  ;;  %vm3617_vm2 = vcmask 130048   ;;  %v3737_v48 = vunpack.i.h.bf16 %v3735_v52 }
 0x8bc   : > { %v3608_v3 = vsel %vm343_vm6, %v3461_v5, %v3607_v6  ;;  %v3616_v23 = vsel %vm3615_vm1, %v3614_v20, %v3732_v28  ;;  %vm3619_vm3 = vcmask 162816   ;;  %vm3621_vm4 = vcmask 195584  }
 0x8bd   : > { %v3609_v9 = vsel %vm345_vm7, %v3468_v55, %v3608_v3  ;;  %v3618_v7 = vsel %vm3617_vm2, %v3616_v23, %v3736_v4  ;;  %vm3623_vm5 = vcmask 228352   ;;  %vm3626_vm0 = vcmask 257024  }
 0x8be   : > { %v3738_v35 = vpack.i.bf16 %v3609_v9, %v3591_v60  ;;  %v3620_v30 = vsel %vm3619_vm3, %v3618_v7, %v3737_v48 }
 0x8c0   : > { %3739 = vrot.lane.b32.xlu0 %v3738_v35, %s3904_s25 }
 0x932   : > { %v3740_v26 = vpop.permute.xlu0 %3739 }
 0x933   : > { %v3742_v57 = vunpack.i.h.bf16 %v3740_v26  ;;  %v3741_v8 = vunpack.i.l.bf16 %v3740_v26 }
 0x935   : > { %v3622_v41 = vsel %vm3621_vm4, %v3620_v30, %v3741_v8 }
 0x936   : > { %v3624_v15 = vsel %vm3623_vm5, %v3622_v41, %v3742_v57 }
 0x937   : > { %v3625_v25 = vpack.c.bf16 %v3624_v15, %v3624_v15 }
 0x939   : > { %3627 = vst.msk [vmem:[%s155_s28] sm:$0xf] %vm3626_vm0, %v3625_v25 }
 0x93a PF: > { %s12_s9 = sadd.s32 1, %s3893_s9  }
 0x93b   : > { %p9_p4 = scmp.ge.s32.totalorder %s12_s9, 4  }
 0x93d   :  { %11 = sbr.rel (!%p9_p4) target bundleno = 1 (0x1), region = 61 }

</bundles_post_ra>
